<compile_context>
chip_gen: v5e
topology: v5e:2x2
jax: 0.10.0
libtpu: 0.0.40
codegen_flags: <defaults>
</compile_context>

<pallas_src>
import functools
import math

import jax
import jax.numpy as jnp
from jax.experimental import pallas as pl
from jax.experimental.pallas import tpu as pltpu

_BN_EPS = 1e-5


@functools.lru_cache(maxsize=None)
def _vmem_limit_bytes():
    """Generation-aware VMEM budget (3/4 of physical per-core VMEM)."""
    try:
        cap = getattr(pltpu.get_tpu_info(), "vmem_capacity_bytes", None)
        if cap:
            return int(cap) * 3 // 4
    except Exception:
        pass
    return 48 * 1024 * 1024        # safe fallback (fits v7x's 64 MiB)


def _largest_divisor_leq(n, cap):
    cap = max(1, min(n, cap))
    for t in range(cap, 0, -1):
        if n % t == 0:
            return t
    return 1


def _pick_channel_tile(c, cap=256):
    """Full C if small (or not 128-divisible); otherwise a 128-multiple divisor."""
    if c <= cap:
        return c
    for t in range(cap - cap % 128, 127, -128):
        if c % t == 0:
            return t
    return c


def _pick_batch_tile(N, H, W, tkc, tn, out_hw, out_bytes, budget):
    """Largest divisor of N whose per-step VMEM footprint fits the budget."""
    def est(nb):
        m = nb * H * W
        return (2 * nb * (H + 2) * (W + 2) * tkc * 2     # x blocks (2 buffers, bf16)
                + 2 * 9 * tkc * tn * 2                   # weight blocks (bf16)
                + 2 * nb * out_hw * tn * out_bytes       # output blocks
                + m * 9 * tkc * 2                        # im2col scratch (bf16)
                + m * tn * 4)                            # f32 accumulator
    best = 1
    for nb in range(1, N + 1):
        if N % nb == 0 and est(nb) <= budget:
            best = nb
    return best


# ----------------------------------------------------------------------------
# Pallas kernels
# ----------------------------------------------------------------------------
def _maxpool_pad_kernel(x_ref, o_ref):
    """MaxPool2d(2) with the zero-pad of the following conv fused into the write.

    x_ref: (nb, H2, 2, W2, 2, C)   o_ref: (nb, H2+2, W2+2, C)
    """
    x = x_ref[...]
    p = jnp.maximum(jnp.maximum(x[:, :, 0, :, 0, :], x[:, :, 0, :, 1, :]),
                    jnp.maximum(x[:, :, 1, :, 0, :], x[:, :, 1, :, 1, :]))
    h2, w2 = p.shape[1], p.shape[2]
    o_ref[...] = jnp.zeros(o_ref.shape, o_ref.dtype)            # zero halo
    o_ref[:, 1:h2 + 1, 1:w2 + 1, :] = p.astype(o_ref.dtype)


def _conv3x3_bn_act_kernel(x_ref, w_ref, shift_ref, o_ref, col_ref, acc_ref,
                           *, relu, padded_out):
    """Fused 3x3 conv (pad=1) + BN affine (+ReLU) for one grid point.

    x_ref:     (nb, H+2, W+2, tkc)  zero-padded bf16 input slab
    w_ref:     (1, 9*tkc, tn)       bf16 weights, BN scale folded in
    shift_ref: (1, tn)              f32 folded conv-bias + BN shift
    o_ref:     (nb, H+2, W+2, tn) if padded_out else (nb, H, W, tn)
    col_ref:   (nb*H*W, 9*tkc) bf16 im2col built in VMEM (never HBM)
    acc_ref:   (nb*H*W, tn)  f32    accumulator over the Cin grid axis
    """
    k = pl.program_id(2)
    nb, hp, wp, tkc = x_ref.shape
    H, W = hp - 2, wp - 2
    m = nb * H * W

    @pl.when(k == 0)
    def _():
        acc_ref[...] = jnp.zeros(acc_ref.shape, acc_ref.dtype)

    # Build im2col in VMEM: the 9 shifted windows laid side-by-side along K.
    for kh in range(3):
        for kw in range(3):
            t = kh * 3 + kw
            win = x_ref[:, kh:kh + H, kw:kw + W, :].reshape(m, tkc)
            col_ref[:, t * tkc:(t + 1) * tkc] = win

    # Single big-K matmul (K = 9*tkc) on the MXU; accumulate in f32.
    acc_ref[...] += jnp.dot(col_ref[...], w_ref[0],
                            preferred_element_type=jnp.float32)

    @pl.when(k == pl.num_programs(2) - 1)
    def _():
        y = acc_ref[...] + shift_ref[...]
        if relu:
            y = jnp.maximum(y, 0.0)
        y = y.reshape(nb, H, W, y.shape[-1]).astype(o_ref.dtype)
        if padded_out:
            # Emit a zero halo so the next conv reads an already-padded slab.
            o_ref[...] = jnp.zeros(o_ref.shape, o_ref.dtype)
            o_ref[:, 1:H + 1, 1:W + 1, :] = y
        else:
            o_ref[...] = y


# ----------------------------------------------------------------------------
# Kernel wrappers
# ----------------------------------------------------------------------------
def maxpool2_pad(x):
    """MaxPool2d(kernel=2, stride=2) on NHWC input; output has a zero halo."""
    N, H, W, C = x.shape
    H2, W2 = H // 2, W // 2
    x6 = x.reshape(N, H2, 2, W2, 2, C)                # free contiguous reshape
    blk_bytes = H * W * C * x.dtype.itemsize
    nb = _largest_divisor_leq(N, max(1, (8 << 20) // max(1, blk_bytes)))
    return pl.pallas_call(
        _maxpool_pad_kernel,
        out_shape=jax.ShapeDtypeStruct((N, H2 + 2, W2 + 2, C), x.dtype),
        grid_spec=pltpu.PrefetchScalarGridSpec(
            num_scalar_prefetch=0,
            grid=(N // nb,),
            in_specs=[pl.BlockSpec((nb, H2, 2, W2, 2, C),
                                   lambda i: (i, 0, 0, 0, 0, 0))],
            out_specs=pl.BlockSpec((nb, H2 + 2, W2 + 2, C),
                                   lambda i: (i, 0, 0, 0)),
        ),
        compiler_params=pltpu.CompilerParams(
            dimension_semantics=("parallel",),
            vmem_limit_bytes=_vmem_limit_bytes()),
    )(x6)


def conv3x3_bn_relu(x_padded, conv, bn, *, out_dtype=jnp.float32,
                    padded_out=False, relu=True):
    """Conv2d(3x3, pad=1) -> BatchNorm2d(eval) -> ReLU on an already-padded
    NHWC slab (N, H+2, W+2, Cin).  If padded_out, the (bf16) output carries a
    zero halo so it can feed the next conv without a separate pad pass."""
    N, Hp, Wp, Cin = x_padded.shape
    H, W = Hp - 2, Wp - 2
    Cout = conv["w"].shape[0]

    # Fold eval-mode BN into an affine; the scale goes into the weights (f32
    # math, then bf16 cast), leaving only `+ shift` in the kernel epilogue.
    scale = (bn["gamma"] / jnp.sqrt(bn["var"] + _BN_EPS)).astype(jnp.float32)
    shift = (bn["beta"] + scale * (conv["b"] - bn["mean"])
             ).astype(jnp.float32)[None, :]

    tn = _pick_channel_tile(Cout)                     # lane-dense output tile
    tkc = _pick_channel_tile(Cin)
    nkc = Cin // tkc

    w = jnp.transpose(conv["w"].astype(jnp.float32), (2, 3, 1, 0))  # (3,3,I,O)
    w = w * scale[None, None, None, :]
    # (3,3,Cin,Cout) -> (Cin//tkc, 9*tkc, Cout): per Cin tile, K is tap-major
    # and channel-minor, matching the im2col built inside the kernel.
    w = (w.reshape(3, 3, nkc, tkc, Cout)
          .transpose(2, 0, 1, 3, 4)
          .reshape(nkc, 9 * tkc, Cout)
          .astype(jnp.bfloat16))

    x_padded = x_padded.astype(jnp.bfloat16)          # no-op when already bf16

    out_hw = (Hp * Wp) if padded_out else (H * W)
    nb = _pick_batch_tile(N, H, W, tkc, tn, out_hw,
                          jnp.dtype(out_dtype).itemsize,
                          int(_vmem_limit_bytes() * 0.7))

    out_shape = (N, Hp, Wp, Cout) if padded_out else (N, H, W, Cout)
    out_block = (nb, Hp, Wp, tn) if padded_out else (nb, H, W, tn)

    kernel = functools.partial(_conv3x3_bn_act_kernel, relu=relu,
                               padded_out=padded_out)
    return pl.pallas_call(
        kernel,
        out_shape=jax.ShapeDtypeStruct(out_shape, out_dtype),
        grid_spec=pltpu.PrefetchScalarGridSpec(
            num_scalar_prefetch=0,
            grid=(N // nb, Cout // tn, nkc),
            in_specs=[
                pl.BlockSpec((nb, Hp, Wp, tkc), lambda b, j, k: (b, 0, 0, k)),
                pl.BlockSpec((1, 9 * tkc, tn), lambda b, j, k: (k, 0, j)),
                pl.BlockSpec((1, tn), lambda b, j, k: (0, j)),
            ],
            out_specs=pl.BlockSpec(out_block, lambda b, j, k: (b, 0, 0, j)),
            scratch_shapes=[
                pltpu.VMEM((nb * H * W, 9 * tkc), jnp.bfloat16),   # im2col
                pltpu.VMEM((nb * H * W, tn), jnp.float32),         # accumulator
            ],
        ),
        compiler_params=pltpu.CompilerParams(
            dimension_semantics=("parallel", "parallel", "arbitrary"),
            vmem_limit_bytes=_vmem_limit_bytes()),
    )(x_padded, w, shift)


# ----------------------------------------------------------------------------
# `down` forward (MaxPool2d(2) -> double_conv)
# ----------------------------------------------------------------------------
def down_forward(x_nchw, params):
    # NCHW -> NHWC and f32 -> bf16 in one fused XLA pass.
    x = jnp.transpose(x_nchw, (0, 2, 3, 1)).astype(jnp.bfloat16)
    xp = maxpool2_pad(x)                              # pooled + zero halo, bf16
    y1 = conv3x3_bn_relu(xp, params["c1"], params["bn1"],
                         out_dtype=jnp.bfloat16, padded_out=True)
    y2 = conv3x3_bn_relu(y1, params["c2"], params["bn2"],
                         out_dtype=jnp.float32, padded_out=False)
    return jnp.transpose(y2, (0, 3, 1, 2))            # NHWC -> NCHW


# ----------------------------------------------------------------------------
# Deterministic parameters (PyTorch shapes) and pure-XLA reference
# ----------------------------------------------------------------------------
def make_down_params(key, in_ch, out_ch):
    k1, k2 = jax.random.split(key)

    def conv_p(kk, ic, oc):
        std = 1.0 / math.sqrt(ic * 9)
        w = jax.random.uniform(kk, (oc, ic, 3, 3), jnp.float32, -std, std)
        b = jax.random.uniform(jax.random.fold_in(kk, 1), (oc,), jnp.float32,
                               -std, std)
        return {"w": w, "b": b}

    def bn_p(kk, ch):
        # Non-trivial eval-mode running stats so the BN fold is exercised.
        return {"gamma": 1.0 + 0.1 * jax.random.normal(kk, (ch,), jnp.float32),
                "beta": 0.1 * jax.random.normal(jax.random.fold_in(kk, 1),
                                                (ch,), jnp.float32),
                "mean": 0.05 * jax.random.normal(jax.random.fold_in(kk, 2),
                                                 (ch,), jnp.float32),
                "var": jnp.abs(1.0 + 0.1 * jax.random.normal(
                    jax.random.fold_in(kk, 3), (ch,), jnp.float32))}

    return {"c1": conv_p(k1, in_ch, out_ch),
            "bn1": bn_p(jax.random.fold_in(k1, 7), out_ch),
            "c2": conv_p(k2, out_ch, out_ch),
            "bn2": bn_p(jax.random.fold_in(k2, 7), out_ch)}


def down_reference(x_nchw, params):
    x = jax.lax.reduce_window(x_nchw, -jnp.inf, jax.lax.max,
                              (1, 1, 2, 2), (1, 1, 2, 2), "VALID")
    for c_key, bn_key in (("c1", "bn1"), ("c2", "bn2")):
        cp, bp = params[c_key], params[bn_key]
        x = jax.lax.conv_general_dilated(
            x, cp["w"], window_strides=(1, 1), padding=((1, 1), (1, 1)),
            dimension_numbers=("NCHW", "OIHW", "NCHW"))
        x = x + cp["b"][None, :, None, None]
        inv = (bp["gamma"] / jnp.sqrt(bp["var"] + _BN_EPS))
        x = (x - bp["mean"][None, :, None, None]) * inv[None, :, None, None] \
            + bp["beta"][None, :, None, None]
        x = jnp.maximum(x, 0.0)
    return x


# ----------------------------------------------------------------------------
if __name__ == "__main__":
    key = jax.random.PRNGKey(0)
    pkey, xkey = jax.random.split(key)

    batch, in_ch, out_ch, spatial = 2, 64, 128, 16    # down1 of the UNet
    params = make_down_params(pkey, in_ch, out_ch)
    x = jax.random.normal(xkey, (batch, in_ch, spatial, spatial), jnp.float32)

    fwd = jax.jit(functools.partial(down_forward, params=params))
    y = jax.block_until_ready(fwd(x))

    assert y.shape == (batch, out_ch, spatial // 2, spatial // 2), y.shape
    assert bool(jnp.all(jnp.isfinite(y)))

    # Numerical sanity check vs pure-XLA f32 reference (bf16 activations and
    # MXU operands, f32 accumulation -> small error).
    y_ref = jax.block_until_ready(
        jax.jit(functools.partial(down_reference, params=params))(x))
    err = float(jnp.max(jnp.abs(y - y_ref)))
    assert err < 0.2, f"max abs error vs reference: {err}"

    print("KERNEL_OK")
</pallas_src>

<mosaic_0001>
module attributes {stable_mosaic.version = 11 : i64} {
  func.func @_conv3x3_bn_act_kernel(%arg0: i32, %arg1: i32, %arg2: i32, %arg3: memref<2x10x10x128xbf16, #tpu.memory_space<vmem>>, %arg4: memref<1x1152x128xbf16, #tpu.memory_space<vmem>>, %arg5: memref<1x128xf32, #tpu.memory_space<vmem>>, %arg6: memref<2x8x8x128xf32, #tpu.memory_space<vmem>>, %arg7: memref<128x1152xbf16, #tpu.memory_space<vmem>>, %arg8: memref<128x128xf32, #tpu.memory_space<vmem>>) attributes {dimension_semantics = [#tpu.dimension_semantics<parallel>, #tpu.dimension_semantics<parallel>, #tpu.dimension_semantics<arbitrary>], iteration_bounds = array<i64: 1, 1, 1>, scalar_prefetch = 0 : i64, scratch_operands = 2 : i64, tpu.core_type = #tpu.core_type<tc>, window_params = [{transform_indices = @transform_0, window_bounds = array<i64: 2, 10, 10, 128>}, {transform_indices = @transform_1, window_bounds = array<i64: 1, 1152, 128>}, {transform_indices = @transform_2, window_bounds = array<i64: 1, 128>}, {transform_indices = @transform_3, window_bounds = array<i64: 2, 8, 8, 128>}]} {
    %c0_i32 = arith.constant 0 : i32
    %0 = arith.cmpi eq, %arg2, %c0_i32 : i32
    %1 = arith.extui %0 : i1 to i32
    %c0_i32_0 = arith.constant 0 : i32
    %2 = arith.cmpi ne, %1, %c0_i32_0 : i32
    scf.if %2 {
      %cst_55 = arith.constant 0.000000e+00 : f32
      %40 = vector.broadcast %cst_55 : f32 to vector<128x128xf32>
      %c0_56 = arith.constant 0 : index
      %c0_57 = arith.constant 0 : index
      %41 = vector.load %arg8[%c0_56, %c0_57] : memref<128x128xf32, #tpu.memory_space<vmem>>, vector<128x128xf32>
      tpu.vector_store %arg8[%c0_56, %c0_57], %40 {strides = array<i32>} : memref<128x128xf32, #tpu.memory_space<vmem>>, vector<128x128xf32>,
    } else {
    }
    %c0 = arith.constant 0 : index
    %c0_1 = arith.constant 0 : index
    %c0_2 = arith.constant 0 : index
    %c0_3 = arith.constant 0 : index
    %3 = vector.load %arg3[%c0, %c0_1, %c0_2, %c0_3] : memref<2x10x10x128xbf16, #tpu.memory_space<vmem>>, vector<2x8x8x128xbf16>
    %4 = vector.shape_cast %3 : vector<2x8x8x128xbf16> to vector<128x128xbf16>
    %c0_4 = arith.constant 0 : index
    %c0_5 = arith.constant 0 : index
    %5 = vector.load %arg7[%c0_4, %c0_5] : memref<128x1152xbf16, #tpu.memory_space<vmem>>, vector<128x128xbf16>
    tpu.vector_store %arg7[%c0_4, %c0_5], %4 {strides = array<i32>} : memref<128x1152xbf16, #tpu.memory_space<vmem>>, vector<128x128xbf16>,
    %c0_6 = arith.constant 0 : index
    %c0_7 = arith.constant 0 : index
    %c1 = arith.constant 1 : index
    %c0_8 = arith.constant 0 : index
    %6 = vector.load %arg3[%c0_6, %c0_7, %c1, %c0_8] : memref<2x10x10x128xbf16, #tpu.memory_space<vmem>>, vector<2x8x8x128xbf16>
    %7 = vector.shape_cast %6 : vector<2x8x8x128xbf16> to vector<128x128xbf16>
    %c0_9 = arith.constant 0 : index
    %c128 = arith.constant 128 : index
    %8 = vector.load %arg7[%c0_9, %c128] : memref<128x1152xbf16, #tpu.memory_space<vmem>>, vector<128x128xbf16>
    tpu.vector_store %arg7[%c0_9, %c128], %7 {strides = array<i32>} : memref<128x1152xbf16, #tpu.memory_space<vmem>>, vector<128x128xbf16>,
    %c0_10 = arith.constant 0 : index
    %c0_11 = arith.constant 0 : index
    %c2 = arith.constant 2 : index
    %c0_12 = arith.constant 0 : index
    %9 = vector.load %arg3[%c0_10, %c0_11, %c2, %c0_12] : memref<2x10x10x128xbf16, #tpu.memory_space<vmem>>, vector<2x8x8x128xbf16>
    %10 = vector.shape_cast %9 : vector<2x8x8x128xbf16> to vector<128x128xbf16>
    %c0_13 = arith.constant 0 : index
    %c256 = arith.constant 256 : index
    %11 = vector.load %arg7[%c0_13, %c256] : memref<128x1152xbf16, #tpu.memory_space<vmem>>, vector<128x128xbf16>
    tpu.vector_store %arg7[%c0_13, %c256], %10 {strides = array<i32>} : memref<128x1152xbf16, #tpu.memory_space<vmem>>, vector<128x128xbf16>,
    %c0_14 = arith.constant 0 : index
    %c1_15 = arith.constant 1 : index
    %c0_16 = arith.constant 0 : index
    %c0_17 = arith.constant 0 : index
    %12 = vector.load %arg3[%c0_14, %c1_15, %c0_16, %c0_17] : memref<2x10x10x128xbf16, #tpu.memory_space<vmem>>, vector<2x8x8x128xbf16>
    %13 = vector.shape_cast %12 : vector<2x8x8x128xbf16> to vector<128x128xbf16>
    %c0_18 = arith.constant 0 : index
    %c384 = arith.constant 384 : index
    %14 = vector.load %arg7[%c0_18, %c384] : memref<128x1152xbf16, #tpu.memory_space<vmem>>, vector<128x128xbf16>
    tpu.vector_store %arg7[%c0_18, %c384], %13 {strides = array<i32>} : memref<128x1152xbf16, #tpu.memory_space<vmem>>, vector<128x128xbf16>,
    %c0_19 = arith.constant 0 : index
    %c1_20 = arith.constant 1 : index
    %c1_21 = arith.constant 1 : index
    %c0_22 = arith.constant 0 : index
    %15 = vector.load %arg3[%c0_19, %c1_20, %c1_21, %c0_22] : memref<2x10x10x128xbf16, #tpu.memory_space<vmem>>, vector<2x8x8x128xbf16>
    %16 = vector.shape_cast %15 : vector<2x8x8x128xbf16> to vector<128x128xbf16>
    %c0_23 = arith.constant 0 : index
    %c512 = arith.constant 512 : index
    %17 = vector.load %arg7[%c0_23, %c512] : memref<128x1152xbf16, #tpu.memory_space<vmem>>, vector<128x128xbf16>
    tpu.vector_store %arg7[%c0_23, %c512], %16 {strides = array<i32>} : memref<128x1152xbf16, #tpu.memory_space<vmem>>, vector<128x128xbf16>,
    %c0_24 = arith.constant 0 : index
    %c1_25 = arith.constant 1 : index
    %c2_26 = arith.constant 2 : index
    %c0_27 = arith.constant 0 : index
    %18 = vector.load %arg3[%c0_24, %c1_25, %c2_26, %c0_27] : memref<2x10x10x128xbf16, #tpu.memory_space<vmem>>, vector<2x8x8x128xbf16>
    %19 = vector.shape_cast %18 : vector<2x8x8x128xbf16> to vector<128x128xbf16>
    %c0_28 = arith.constant 0 : index
    %c640 = arith.constant 640 : index
    %20 = vector.load %arg7[%c0_28, %c640] : memref<128x1152xbf16, #tpu.memory_space<vmem>>, vector<128x128xbf16>
    tpu.vector_store %arg7[%c0_28, %c640], %19 {strides = array<i32>} : memref<128x1152xbf16, #tpu.memory_space<vmem>>, vector<128x128xbf16>,
    %c0_29 = arith.constant 0 : index
    %c2_30 = arith.constant 2 : index
    %c0_31 = arith.constant 0 : index
    %c0_32 = arith.constant 0 : index
    %21 = vector.load %arg3[%c0_29, %c2_30, %c0_31, %c0_32] : memref<2x10x10x128xbf16, #tpu.memory_space<vmem>>, vector<2x8x8x128xbf16>
    %22 = vector.shape_cast %21 : vector<2x8x8x128xbf16> to vector<128x128xbf16>
    %c0_33 = arith.constant 0 : index
    %c768 = arith.constant 768 : index
    %23 = vector.load %arg7[%c0_33, %c768] : memref<128x1152xbf16, #tpu.memory_space<vmem>>, vector<128x128xbf16>
    tpu.vector_store %arg7[%c0_33, %c768], %22 {strides = array<i32>} : memref<128x1152xbf16, #tpu.memory_space<vmem>>, vector<128x128xbf16>,
    %c0_34 = arith.constant 0 : index
    %c2_35 = arith.constant 2 : index
    %c1_36 = arith.constant 1 : index
    %c0_37 = arith.constant 0 : index
    %24 = vector.load %arg3[%c0_34, %c2_35, %c1_36, %c0_37] : memref<2x10x10x128xbf16, #tpu.memory_space<vmem>>, vector<2x8x8x128xbf16>
    %25 = vector.shape_cast %24 : vector<2x8x8x128xbf16> to vector<128x128xbf16>
    %c0_38 = arith.constant 0 : index
    %c896 = arith.constant 896 : index
    %26 = vector.load %arg7[%c0_38, %c896] : memref<128x1152xbf16, #tpu.memory_space<vmem>>, vector<128x128xbf16>
    tpu.vector_store %arg7[%c0_38, %c896], %25 {strides = array<i32>} : memref<128x1152xbf16, #tpu.memory_space<vmem>>, vector<128x128xbf16>,
    %c0_39 = arith.constant 0 : index
    %c2_40 = arith.constant 2 : index
    %c2_41 = arith.constant 2 : index
    %c0_42 = arith.constant 0 : index
    %27 = vector.load %arg3[%c0_39, %c2_40, %c2_41, %c0_42] : memref<2x10x10x128xbf16, #tpu.memory_space<vmem>>, vector<2x8x8x128xbf16>
    %28 = vector.shape_cast %27 : vector<2x8x8x128xbf16> to vector<128x128xbf16>
    %c0_43 = arith.constant 0 : index
    %c1024 = arith.constant 1024 : index
    %29 = vector.load %arg7[%c0_43, %c1024] : memref<128x1152xbf16, #tpu.memory_space<vmem>>, vector<128x128xbf16>
    tpu.vector_store %arg7[%c0_43, %c1024], %28 {strides = array<i32>} : memref<128x1152xbf16, #tpu.memory_space<vmem>>, vector<128x128xbf16>,
    %c0_44 = arith.constant 0 : index
    %c0_45 = arith.constant 0 : index
    %30 = vector.load %arg8[%c0_44, %c0_45] : memref<128x128xf32, #tpu.memory_space<vmem>>, vector<128x128xf32>
    %c0_46 = arith.constant 0 : index
    %c0_47 = arith.constant 0 : index
    %31 = vector.load %arg7[%c0_46, %c0_47] : memref<128x1152xbf16, #tpu.memory_space<vmem>>, vector<128x1152xbf16>
    %c0_48 = arith.constant 0 : index
    %c0_49 = arith.constant 0 : index
    %c0_50 = arith.constant 0 : index
    %32 = vector.load %arg4[%c0_48, %c0_49, %c0_50] : memref<1x1152x128xbf16, #tpu.memory_space<vmem>>, vector<1x1152x128xbf16>
    %33 = vector.shape_cast %32 : vector<1x1152x128xbf16> to vector<1152x128xbf16>
    %cst = arith.constant dense<0.000000e+00> : vector<128x128xf32>
    %34 = tpu.matmul %31, %33, %cst {dimension_numbers = #tpu.dot_dimension_numbers<[1], [0], [0], [1], [0, 0, 1, 1], [], []>} : vector<128x1152xbf16>, vector<1152x128xbf16>, vector<128x128xf32> -> vector<128x128xf32>
    %35 = arith.addf %30, %34 : vector<128x128xf32>
    %c0_51 = arith.constant 0 : index
    %c0_52 = arith.constant 0 : index
    %36 = vector.load %arg8[%c0_51, %c0_52] : memref<128x128xf32, #tpu.memory_space<vmem>>, vector<128x128xf32>
    tpu.vector_store %arg8[%c0_51, %c0_52], %35 {strides = array<i32>} : memref<128x128xf32, #tpu.memory_space<vmem>>, vector<128x128xf32>,
    %c0_i32_53 = arith.constant 0 : i32
    %37 = arith.cmpi eq, %arg2, %c0_i32_53 : i32
    %38 = arith.extui %37 : i1 to i32
    %c0_i32_54 = arith.constant 0 : i32
    %39 = arith.cmpi ne, %38, %c0_i32_54 : i32
    scf.if %39 {
      %c0_55 = arith.constant 0 : index
      %c0_56 = arith.constant 0 : index
      %40 = vector.load %arg8[%c0_55, %c0_56] : memref<128x128xf32, #tpu.memory_space<vmem>>, vector<128x128xf32>
      %c0_57 = arith.constant 0 : index
      %c0_58 = arith.constant 0 : index
      %41 = vector.load %arg5[%c0_57, %c0_58] : memref<1x128xf32, #tpu.memory_space<vmem>>, vector<1x128xf32>
      %42 = vector.broadcast %41 : vector<1x128xf32> to vector<128x128xf32>
      %43 = arith.addf %40, %42 : vector<128x128xf32>
      %cst_59 = arith.constant 0.000000e+00 : f32
      %44 = vector.broadcast %cst_59 : f32 to vector<128x128xf32>
      %45 = arith.maximumf %43, %44 : vector<128x128xf32>
      %46 = vector.shape_cast %45 : vector<128x128xf32> to vector<2x8x8x128xf32>
      %c0_60 = arith.constant 0 : index
      %c0_61 = arith.constant 0 : index
      %c0_62 = arith.constant 0 : index
      %c0_63 = arith.constant 0 : index
      %47 = vector.load %arg6[%c0_60, %c0_61, %c0_62, %c0_63] : memref<2x8x8x128xf32, #tpu.memory_space<vmem>>, vector<2x8x8x128xf32>
      tpu.vector_store %arg6[%c0_60, %c0_61, %c0_62, %c0_63], %46 {strides = array<i32>} : memref<2x8x8x128xf32, #tpu.memory_space<vmem>>, vector<2x8x8x128xf32>,
    } else {
    }
    return
  }
  func.func @transform_0(%arg0: i32, %arg1: i32, %arg2: i32) -> (i32, i32, i32, i32) {
    %c0_i32 = arith.constant 0 : i32
    %c0_i32_0 = arith.constant 0 : i32
    %c0_i32_1 = arith.constant 0 : i32
    return %arg0, %c0_i32, %c0_i32_0, %arg2 : i32, i32, i32, i32
  }
  func.func @transform_1(%arg0: i32, %arg1: i32, %arg2: i32) -> (i32, i32, i32) {
    %c0_i32 = arith.constant 0 : i32
    %c0_i32_0 = arith.constant 0 : i32
    return %arg2, %c0_i32, %arg1 : i32, i32, i32
  }
  func.func @transform_2(%arg0: i32, %arg1: i32, %arg2: i32) -> (i32, i32) {
    %c0_i32 = arith.constant 0 : i32
    %c0_i32_0 = arith.constant 0 : i32
    return %c0_i32, %arg1 : i32, i32
  }
  func.func @transform_3(%arg0: i32, %arg1: i32, %arg2: i32) -> (i32, i32, i32, i32) {
    %c0_i32 = arith.constant 0 : i32
    %c0_i32_0 = arith.constant 0 : i32
    %c0_i32_1 = arith.constant 0 : i32
    return %arg0, %c0_i32, %c0_i32_0, %arg1 : i32, i32, i32, i32
  }
}

module attributes {stable_mosaic.version = 11 : i64} {
  func.func @_conv3x3_bn_act_kernel(%arg0: i32, %arg1: i32, %arg2: i32, %arg3: memref<2x10x10x64xbf16, #tpu.memory_space<vmem>>, %arg4: memref<1x576x128xbf16, #tpu.memory_space<vmem>>, %arg5: memref<1x128xf32, #tpu.memory_space<vmem>>, %arg6: memref<2x10x10x128xbf16, #tpu.memory_space<vmem>>, %arg7: memref<128x576xbf16, #tpu.memory_space<vmem>>, %arg8: memref<128x128xf32, #tpu.memory_space<vmem>>) attributes {dimension_semantics = [#tpu.dimension_semantics<parallel>, #tpu.dimension_semantics<parallel>, #tpu.dimension_semantics<arbitrary>], iteration_bounds = array<i64: 1, 1, 1>, scalar_prefetch = 0 : i64, scratch_operands = 2 : i64, tpu.core_type = #tpu.core_type<tc>, window_params = [{transform_indices = @transform_0, window_bounds = array<i64: 2, 10, 10, 64>}, {transform_indices = @transform_1, window_bounds = array<i64: 1, 576, 128>}, {transform_indices = @transform_2, window_bounds = array<i64: 1, 128>}, {transform_indices = @transform_3, window_bounds = array<i64: 2, 10, 10, 128>}]} {
    %c0_i32 = arith.constant 0 : i32
    %0 = arith.cmpi eq, %arg2, %c0_i32 : i32
    %1 = arith.extui %0 : i1 to i32
    %c0_i32_0 = arith.constant 0 : i32
    %2 = arith.cmpi ne, %1, %c0_i32_0 : i32
    scf.if %2 {
      %cst_55 = arith.constant 0.000000e+00 : f32
      %40 = vector.broadcast %cst_55 : f32 to vector<128x128xf32>
      %c0_56 = arith.constant 0 : index
      %c0_57 = arith.constant 0 : index
      %41 = vector.load %arg8[%c0_56, %c0_57] : memref<128x128xf32, #tpu.memory_space<vmem>>, vector<128x128xf32>
      tpu.vector_store %arg8[%c0_56, %c0_57], %40 {strides = array<i32>} : memref<128x128xf32, #tpu.memory_space<vmem>>, vector<128x128xf32>,
    } else {
    }
    %c0 = arith.constant 0 : index
    %c0_1 = arith.constant 0 : index
    %c0_2 = arith.constant 0 : index
    %c0_3 = arith.constant 0 : index
    %3 = vector.load %arg3[%c0, %c0_1, %c0_2, %c0_3] : memref<2x10x10x64xbf16, #tpu.memory_space<vmem>>, vector<2x8x8x64xbf16>
    %4 = vector.shape_cast %3 : vector<2x8x8x64xbf16> to vector<128x64xbf16>
    %c0_4 = arith.constant 0 : index
    %c0_5 = arith.constant 0 : index
    %5 = vector.load %arg7[%c0_4, %c0_5] : memref<128x576xbf16, #tpu.memory_space<vmem>>, vector<128x64xbf16>
    tpu.vector_store %arg7[%c0_4, %c0_5], %4 {strides = array<i32>} : memref<128x576xbf16, #tpu.memory_space<vmem>>, vector<128x64xbf16>,
    %c0_6 = arith.constant 0 : index
    %c0_7 = arith.constant 0 : index
    %c1 = arith.constant 1 : index
    %c0_8 = arith.constant 0 : index
    %6 = vector.load %arg3[%c0_6, %c0_7, %c1, %c0_8] : memref<2x10x10x64xbf16, #tpu.memory_space<vmem>>, vector<2x8x8x64xbf16>
    %7 = vector.shape_cast %6 : vector<2x8x8x64xbf16> to vector<128x64xbf16>
    %c0_9 = arith.constant 0 : index
    %c64 = arith.constant 64 : index
    %8 = vector.load %arg7[%c0_9, %c64] : memref<128x576xbf16, #tpu.memory_space<vmem>>, vector<128x64xbf16>
    tpu.vector_store %arg7[%c0_9, %c64], %7 {strides = array<i32>} : memref<128x576xbf16, #tpu.memory_space<vmem>>, vector<128x64xbf16>,
    %c0_10 = arith.constant 0 : index
    %c0_11 = arith.constant 0 : index
    %c2 = arith.constant 2 : index
    %c0_12 = arith.constant 0 : index
    %9 = vector.load %arg3[%c0_10, %c0_11, %c2, %c0_12] : memref<2x10x10x64xbf16, #tpu.memory_space<vmem>>, vector<2x8x8x64xbf16>
    %10 = vector.shape_cast %9 : vector<2x8x8x64xbf16> to vector<128x64xbf16>
    %c0_13 = arith.constant 0 : index
    %c128 = arith.constant 128 : index
    %11 = vector.load %arg7[%c0_13, %c128] : memref<128x576xbf16, #tpu.memory_space<vmem>>, vector<128x64xbf16>
    tpu.vector_store %arg7[%c0_13, %c128], %10 {strides = array<i32>} : memref<128x576xbf16, #tpu.memory_space<vmem>>, vector<128x64xbf16>,
    %c0_14 = arith.constant 0 : index
    %c1_15 = arith.constant 1 : index
    %c0_16 = arith.constant 0 : index
    %c0_17 = arith.constant 0 : index
    %12 = vector.load %arg3[%c0_14, %c1_15, %c0_16, %c0_17] : memref<2x10x10x64xbf16, #tpu.memory_space<vmem>>, vector<2x8x8x64xbf16>
    %13 = vector.shape_cast %12 : vector<2x8x8x64xbf16> to vector<128x64xbf16>
    %c0_18 = arith.constant 0 : index
    %c192 = arith.constant 192 : index
    %14 = vector.load %arg7[%c0_18, %c192] : memref<128x576xbf16, #tpu.memory_space<vmem>>, vector<128x64xbf16>
    tpu.vector_store %arg7[%c0_18, %c192], %13 {strides = array<i32>} : memref<128x576xbf16, #tpu.memory_space<vmem>>, vector<128x64xbf16>,
    %c0_19 = arith.constant 0 : index
    %c1_20 = arith.constant 1 : index
    %c1_21 = arith.constant 1 : index
    %c0_22 = arith.constant 0 : index
    %15 = vector.load %arg3[%c0_19, %c1_20, %c1_21, %c0_22] : memref<2x10x10x64xbf16, #tpu.memory_space<vmem>>, vector<2x8x8x64xbf16>
    %16 = vector.shape_cast %15 : vector<2x8x8x64xbf16> to vector<128x64xbf16>
    %c0_23 = arith.constant 0 : index
    %c256 = arith.constant 256 : index
    %17 = vector.load %arg7[%c0_23, %c256] : memref<128x576xbf16, #tpu.memory_space<vmem>>, vector<128x64xbf16>
    tpu.vector_store %arg7[%c0_23, %c256], %16 {strides = array<i32>} : memref<128x576xbf16, #tpu.memory_space<vmem>>, vector<128x64xbf16>,
    %c0_24 = arith.constant 0 : index
    %c1_25 = arith.constant 1 : index
    %c2_26 = arith.constant 2 : index
    %c0_27 = arith.constant 0 : index
    %18 = vector.load %arg3[%c0_24, %c1_25, %c2_26, %c0_27] : memref<2x10x10x64xbf16, #tpu.memory_space<vmem>>, vector<2x8x8x64xbf16>
    %19 = vector.shape_cast %18 : vector<2x8x8x64xbf16> to vector<128x64xbf16>
    %c0_28 = arith.constant 0 : index
    %c320 = arith.constant 320 : index
    %20 = vector.load %arg7[%c0_28, %c320] : memref<128x576xbf16, #tpu.memory_space<vmem>>, vector<128x64xbf16>
    tpu.vector_store %arg7[%c0_28, %c320], %19 {strides = array<i32>} : memref<128x576xbf16, #tpu.memory_space<vmem>>, vector<128x64xbf16>,
    %c0_29 = arith.constant 0 : index
    %c2_30 = arith.constant 2 : index
    %c0_31 = arith.constant 0 : index
    %c0_32 = arith.constant 0 : index
    %21 = vector.load %arg3[%c0_29, %c2_30, %c0_31, %c0_32] : memref<2x10x10x64xbf16, #tpu.memory_space<vmem>>, vector<2x8x8x64xbf16>
    %22 = vector.shape_cast %21 : vector<2x8x8x64xbf16> to vector<128x64xbf16>
    %c0_33 = arith.constant 0 : index
    %c384 = arith.constant 384 : index
    %23 = vector.load %arg7[%c0_33, %c384] : memref<128x576xbf16, #tpu.memory_space<vmem>>, vector<128x64xbf16>
    tpu.vector_store %arg7[%c0_33, %c384], %22 {strides = array<i32>} : memref<128x576xbf16, #tpu.memory_space<vmem>>, vector<128x64xbf16>,
    %c0_34 = arith.constant 0 : index
    %c2_35 = arith.constant 2 : index
    %c1_36 = arith.constant 1 : index
    %c0_37 = arith.constant 0 : index
    %24 = vector.load %arg3[%c0_34, %c2_35, %c1_36, %c0_37] : memref<2x10x10x64xbf16, #tpu.memory_space<vmem>>, vector<2x8x8x64xbf16>
    %25 = vector.shape_cast %24 : vector<2x8x8x64xbf16> to vector<128x64xbf16>
    %c0_38 = arith.constant 0 : index
    %c448 = arith.constant 448 : index
    %26 = vector.load %arg7[%c0_38, %c448] : memref<128x576xbf16, #tpu.memory_space<vmem>>, vector<128x64xbf16>
    tpu.vector_store %arg7[%c0_38, %c448], %25 {strides = array<i32>} : memref<128x576xbf16, #tpu.memory_space<vmem>>, vector<128x64xbf16>,
    %c0_39 = arith.constant 0 : index
    %c2_40 = arith.constant 2 : index
    %c2_41 = arith.constant 2 : index
    %c0_42 = arith.constant 0 : index
    %27 = vector.load %arg3[%c0_39, %c2_40, %c2_41, %c0_42] : memref<2x10x10x64xbf16, #tpu.memory_space<vmem>>, vector<2x8x8x64xbf16>
    %28 = vector.shape_cast %27 : vector<2x8x8x64xbf16> to vector<128x64xbf16>
    %c0_43 = arith.constant 0 : index
    %c512 = arith.constant 512 : index
    %29 = vector.load %arg7[%c0_43, %c512] : memref<128x576xbf16, #tpu.memory_space<vmem>>, vector<128x64xbf16>
    tpu.vector_store %arg7[%c0_43, %c512], %28 {strides = array<i32>} : memref<128x576xbf16, #tpu.memory_space<vmem>>, vector<128x64xbf16>,
    %c0_44 = arith.constant 0 : index
    %c0_45 = arith.constant 0 : index
    %30 = vector.load %arg8[%c0_44, %c0_45] : memref<128x128xf32, #tpu.memory_space<vmem>>, vector<128x128xf32>
    %c0_46 = arith.constant 0 : index
    %c0_47 = arith.constant 0 : index
    %31 = vector.load %arg7[%c0_46, %c0_47] : memref<128x576xbf16, #tpu.memory_space<vmem>>, vector<128x576xbf16>
    %c0_48 = arith.constant 0 : index
    %c0_49 = arith.constant 0 : index
    %c0_50 = arith.constant 0 : index
    %32 = vector.load %arg4[%c0_48, %c0_49, %c0_50] : memref<1x576x128xbf16, #tpu.memory_space<vmem>>, vector<1x576x128xbf16>
    %33 = vector.shape_cast %32 : vector<1x576x128xbf16> to vector<576x128xbf16>
    %cst = arith.constant dense<0.000000e+00> : vector<128x128xf32>
    %34 = tpu.matmul %31, %33, %cst {dimension_numbers = #tpu.dot_dimension_numbers<[1], [0], [0], [1], [0, 0, 1, 1], [], []>} : vector<128x576xbf16>, vector<576x128xbf16>, vector<128x128xf32> -> vector<128x128xf32>
    %35 = arith.addf %30, %34 : vector<128x128xf32>
    %c0_51 = arith.constant 0 : index
    %c0_52 = arith.constant 0 : index
    %36 = vector.load %arg8[%c0_51, %c0_52] : memref<128x128xf32, #tpu.memory_space<vmem>>, vector<128x128xf32>
    tpu.vector_store %arg8[%c0_51, %c0_52], %35 {strides = array<i32>} : memref<128x128xf32, #tpu.memory_space<vmem>>, vector<128x128xf32>,
    %c0_i32_53 = arith.constant 0 : i32
    %37 = arith.cmpi eq, %arg2, %c0_i32_53 : i32
    %38 = arith.extui %37 : i1 to i32
    %c0_i32_54 = arith.constant 0 : i32
    %39 = arith.cmpi ne, %38, %c0_i32_54 : i32
    scf.if %39 {
      %c0_55 = arith.constant 0 : index
      %c0_56 = arith.constant 0 : index
      %40 = vector.load %arg8[%c0_55, %c0_56] : memref<128x128xf32, #tpu.memory_space<vmem>>, vector<128x128xf32>
      %c0_57 = arith.constant 0 : index
      %c0_58 = arith.constant 0 : index
      %41 = vector.load %arg5[%c0_57, %c0_58] : memref<1x128xf32, #tpu.memory_space<vmem>>, vector<1x128xf32>
      %42 = vector.broadcast %41 : vector<1x128xf32> to vector<128x128xf32>
      %43 = arith.addf %40, %42 : vector<128x128xf32>
      %cst_59 = arith.constant 0.000000e+00 : f32
      %44 = vector.broadcast %cst_59 : f32 to vector<128x128xf32>
      %45 = arith.maximumf %43, %44 : vector<128x128xf32>
      %46 = vector.shape_cast %45 : vector<128x128xf32> to vector<2x8x8x128xf32>
      %47 = arith.truncf %46 : vector<2x8x8x128xf32> to vector<2x8x8x128xbf16>
      %cst_60 = arith.constant 0.000000e+00 : bf16
      %48 = vector.broadcast %cst_60 : bf16 to vector<2x10x10x128xbf16>
      %c0_61 = arith.constant 0 : index
      %c0_62 = arith.constant 0 : index
      %c0_63 = arith.constant 0 : index
      %c0_64 = arith.constant 0 : index
      %49 = vector.load %arg6[%c0_61, %c0_62, %c0_63, %c0_64] : memref<2x10x10x128xbf16, #tpu.memory_space<vmem>>, vector<2x10x10x128xbf16>
      tpu.vector_store %arg6[%c0_61, %c0_62, %c0_63, %c0_64], %48 {strides = array<i32>} : memref<2x10x10x128xbf16, #tpu.memory_space<vmem>>, vector<2x10x10x128xbf16>,
      %c0_65 = arith.constant 0 : index
      %c1_66 = arith.constant 1 : index
      %c1_67 = arith.constant 1 : index
      %c0_68 = arith.constant 0 : index
      %50 = vector.load %arg6[%c0_65, %c1_66, %c1_67, %c0_68] : memref<2x10x10x128xbf16, #tpu.memory_space<vmem>>, vector<2x8x8x128xbf16>
      tpu.vector_store %arg6[%c0_65, %c1_66, %c1_67, %c0_68], %47 {strides = array<i32>} : memref<2x10x10x128xbf16, #tpu.memory_space<vmem>>, vector<2x8x8x128xbf16>,
    } else {
    }
    return
  }
  func.func @transform_0(%arg0: i32, %arg1: i32, %arg2: i32) -> (i32, i32, i32, i32) {
    %c0_i32 = arith.constant 0 : i32
    %c0_i32_0 = arith.constant 0 : i32
    %c0_i32_1 = arith.constant 0 : i32
    return %arg0, %c0_i32, %c0_i32_0, %arg2 : i32, i32, i32, i32
  }
  func.func @transform_1(%arg0: i32, %arg1: i32, %arg2: i32) -> (i32, i32, i32) {
    %c0_i32 = arith.constant 0 : i32
    %c0_i32_0 = arith.constant 0 : i32
    return %arg2, %c0_i32, %arg1 : i32, i32, i32
  }
  func.func @transform_2(%arg0: i32, %arg1: i32, %arg2: i32) -> (i32, i32) {
    %c0_i32 = arith.constant 0 : i32
    %c0_i32_0 = arith.constant 0 : i32
    return %c0_i32, %arg1 : i32, i32
  }
  func.func @transform_3(%arg0: i32, %arg1: i32, %arg2: i32) -> (i32, i32, i32, i32) {
    %c0_i32 = arith.constant 0 : i32
    %c0_i32_0 = arith.constant 0 : i32
    %c0_i32_1 = arith.constant 0 : i32
    return %arg0, %c0_i32, %c0_i32_0, %arg1 : i32, i32, i32, i32
  }
}

module attributes {stable_mosaic.version = 11 : i64} {
  func.func @_maxpool_pad_kernel(%arg0: i32, %arg1: memref<2x8x2x8x2x64xbf16, #tpu.memory_space<vmem>>, %arg2: memref<2x10x10x64xbf16, #tpu.memory_space<vmem>>) attributes {dimension_semantics = [#tpu.dimension_semantics<parallel>], iteration_bounds = array<i64: 1>, scalar_prefetch = 0 : i64, scratch_operands = 0 : i64, tpu.core_type = #tpu.core_type<tc>, window_params = [{transform_indices = @transform_0, window_bounds = array<i64: 2, 8, 2, 8, 2, 64>}, {transform_indices = @transform_1, window_bounds = array<i64: 2, 10, 10, 64>}]} {
    %c0 = arith.constant 0 : index
    %c0_0 = arith.constant 0 : index
    %c0_1 = arith.constant 0 : index
    %c0_2 = arith.constant 0 : index
    %c0_3 = arith.constant 0 : index
    %c0_4 = arith.constant 0 : index
    %0 = vector.load %arg1[%c0, %c0_0, %c0_1, %c0_2, %c0_3, %c0_4] : memref<2x8x2x8x2x64xbf16, #tpu.memory_space<vmem>>, vector<2x8x2x8x2x64xbf16>
    %1 = vector.extract_strided_slice %0 {offsets = [0, 0, 0, 0, 0, 0], sizes = [2, 8, 1, 8, 1, 64], strides = [1, 1, 1, 1, 1, 1]} : vector<2x8x2x8x2x64xbf16> to vector<2x8x1x8x1x64xbf16>
    %2 = vector.shape_cast %1 : vector<2x8x1x8x1x64xbf16> to vector<2x8x8x64xbf16>
    %3 = vector.extract_strided_slice %0 {offsets = [0, 0, 0, 0, 1, 0], sizes = [2, 8, 1, 8, 1, 64], strides = [1, 1, 1, 1, 1, 1]} : vector<2x8x2x8x2x64xbf16> to vector<2x8x1x8x1x64xbf16>
    %4 = vector.shape_cast %3 : vector<2x8x1x8x1x64xbf16> to vector<2x8x8x64xbf16>
    %5 = arith.maximumf %2, %4 : vector<2x8x8x64xbf16>
    %6 = vector.extract_strided_slice %0 {offsets = [0, 0, 1, 0, 0, 0], sizes = [2, 8, 1, 8, 1, 64], strides = [1, 1, 1, 1, 1, 1]} : vector<2x8x2x8x2x64xbf16> to vector<2x8x1x8x1x64xbf16>
    %7 = vector.shape_cast %6 : vector<2x8x1x8x1x64xbf16> to vector<2x8x8x64xbf16>
    %8 = vector.extract_strided_slice %0 {offsets = [0, 0, 1, 0, 1, 0], sizes = [2, 8, 1, 8, 1, 64], strides = [1, 1, 1, 1, 1, 1]} : vector<2x8x2x8x2x64xbf16> to vector<2x8x1x8x1x64xbf16>
    %9 = vector.shape_cast %8 : vector<2x8x1x8x1x64xbf16> to vector<2x8x8x64xbf16>
    %10 = arith.maximumf %7, %9 : vector<2x8x8x64xbf16>
    %11 = arith.maximumf %5, %10 : vector<2x8x8x64xbf16>
    %cst = arith.constant 0.000000e+00 : bf16
    %12 = vector.broadcast %cst : bf16 to vector<2x10x10x64xbf16>
    %c0_5 = arith.constant 0 : index
    %c0_6 = arith.constant 0 : index
    %c0_7 = arith.constant 0 : index
    %c0_8 = arith.constant 0 : index
    %13 = vector.load %arg2[%c0_5, %c0_6, %c0_7, %c0_8] : memref<2x10x10x64xbf16, #tpu.memory_space<vmem>>, vector<2x10x10x64xbf16>
    tpu.vector_store %arg2[%c0_5, %c0_6, %c0_7, %c0_8], %12 {strides = array<i32>} : memref<2x10x10x64xbf16, #tpu.memory_space<vmem>>, vector<2x10x10x64xbf16>,
    %c0_9 = arith.constant 0 : index
    %c1 = arith.constant 1 : index
    %c1_10 = arith.constant 1 : index
    %c0_11 = arith.constant 0 : index
    %14 = vector.load %arg2[%c0_9, %c1, %c1_10, %c0_11] : memref<2x10x10x64xbf16, #tpu.memory_space<vmem>>, vector<2x8x8x64xbf16>
    tpu.vector_store %arg2[%c0_9, %c1, %c1_10, %c0_11], %11 {strides = array<i32>} : memref<2x10x10x64xbf16, #tpu.memory_space<vmem>>, vector<2x8x8x64xbf16>,
    return
  }
  func.func @transform_0(%arg0: i32) -> (i32, i32, i32, i32, i32, i32) {
    %c0_i32 = arith.constant 0 : i32
    %c0_i32_0 = arith.constant 0 : i32
    %c0_i32_1 = arith.constant 0 : i32
    %c0_i32_2 = arith.constant 0 : i32
    %c0_i32_3 = arith.constant 0 : i32
    %c0_i32_4 = arith.constant 0 : i32
    return %arg0, %c0_i32, %c0_i32_0, %c0_i32_1, %c0_i32_2, %c0_i32_3 : i32, i32, i32, i32, i32, i32
  }
  func.func @transform_1(%arg0: i32) -> (i32, i32, i32, i32) {
    %c0_i32 = arith.constant 0 : i32
    %c0_i32_0 = arith.constant 0 : i32
    %c0_i32_1 = arith.constant 0 : i32
    %c0_i32_2 = arith.constant 0 : i32
    return %arg0, %c0_i32, %c0_i32_0, %c0_i32_1 : i32, i32, i32, i32
  }
}

</mosaic_0001>

<bundles_post_ra>
// kernel: down_forward.4
= control target key start
LH: loop header
LB: loop body
LE: loop exit
PB: predicated region body
PF: predicated region fallthrough
CT: control target
= control target key end

     0   :  { %8 = vsyncpa [#allocation5], 0  ;;  %s3609_s15 = smov [#allocation4]   ;;  %s3610_s17 = smov 64   ;;  %s5353_s0 = inlined_call_operand.vmem [shape: bf16[2,10,10,64], index: 0, kind: input, shape index: {}]   ;;  %s5354_s1 = inlined_call_operand.hbm [shape: bf16[1,576,128], index: 1, kind: input, shape index: {}]   ;;  %s5355_s2 = inlined_call_operand.vmem [shape: f32[1,128], index: 2, kind: input, shape index: {}]   ;;  %s5356_s3 = inlined_call_operand.vmem [shape: bf16[2,10,10,128], index: 3, kind: output, shape index: {}]  }
   0x1   :  { %s15_s14 = sshll.u32 %s5354_s1, 4  ;;  %s17_s16 = sshll.u32 %s3609_s15, 4  ;;  %s16_s14 = int_to_ptr.hbm [resolvable:$true] %s15_s14  ;;  %s18_s16 = int_to_ptr.vmem [resolvable:$true] %s17_s16 }
   0x2   :  { %s3611_s18 = smov 4  }
   0x3   :  { %23 = dma.hbm_to_vmem [thread:$0]  %s16_s14, 4608, %s18_s16, [#allocation5], %s3610_s17, %s3610_s17, %s3611_s18  }
   0x4   :  { %3607 = dma.done.wait [#allocation5], 4608  }
   0x5   :  { %3608 = vsyncadd [#allocation5], 4294962688  ;;  %v3612_v0 = vmov 0   ;;  %vm116_vm0 = vsmask.f32 3328  ;;  %vm472_vm3 = vcmask 1042432  }
   0x6   :  { %2586 = vst [vmem:[%s5356_s3] sm:$0xf] %v3612_v0  ;;  %vm117_vm1 = vsmask.f32 7440  ;;  %v108_v1 = vld [vmem:[%s5353_s0 + $0x70] sm:$0xf]  ;;  %vm473_vm4 = vcmask 1046532  }
   0x7   :  { %2587 = vst [vmem:[%s5356_s3 + $0x4] sm:$0x1] %v3612_v0  ;;  %v109_v2 = vld [vmem:[%s5353_s0 + $0x74] sm:$0x1]  ;;  %v288_v3 = vshrl.u32 %v108_v1, 16  ;;  %v291_v4 = vshll.u32 %v108_v1, 16  ;;  %vm3710_vm2 = vmor %vm116_vm0, %vm117_vm1 }
   0x8   :  { %2604 = vst [vmem:[%s5356_s3 + $0x48] sm:$0xf] %v3612_v0  ;;  %v297_v5 = vshll.u32 %v109_v2, 16  ;;  %v100_v6 = vld [vmem:[%s5353_s0 + $0x50] sm:$0xf]  ;;  %vm3943_vm5 = vmor %vm472_vm3, %vm473_vm4  ;;  %vm67_vm6 = vcmask 519168  }
   0x9   :  { %2605 = vst [vmem:[%s5356_s3 + $0x4c] sm:$0x1] %v3612_v0  ;;  %v101_v7 = vld [vmem:[%s5353_s0 + $0x54] sm:$0x1]  ;;  %v290_v8 = vrot.slane %v288_v3, 4  ;;  %v293_v9 = vrot.slane %v291_v4, 5 }
   0xa   :  { %2606 = vst [vmem:[%s5356_s3 + $0x50] sm:$0xf] %v3612_v0  ;;  %v299_v10 = vrot.slane %v297_v5, 5  ;;  %v232_v11 = vshrl.u32 %v100_v6, 16  ;;  %v235_v12 = vshll.u32 %v100_v6, 16  ;;  %v241_v13 = vshll.u32 %v101_v7, 16 }
   0xb   :  { %2607 = vst [vmem:[%s5356_s3 + $0x54] sm:$0x1] %v3612_v0  ;;  %v110_v14 = vld [vmem:[%s5353_s0 + $0x78] sm:$0xf]  ;;  %v294_v15 = vor.u32 %v293_v9, %v290_v8  ;;  %v111_v17 = vld [vmem:[%s5353_s0 + $0x7c] sm:$0x1] }
   0xc   :  { %2624 = vst [vmem:[%s5356_s3 + $0x98] sm:$0xf] %v3612_v0  ;;  %v234_v16 = vrot.slane %v232_v11, 4  ;;  %v302_v18 = vshrl.u32 %v110_v14, 16  ;;  %v237_v20 = vrot.slane %v235_v12, 5  ;;  %v305_v21 = vshll.u32 %v110_v14, 16 }
   0xd   :  { %2625 = vst [vmem:[%s5356_s3 + $0x9c] sm:$0x1] %v3612_v0  ;;  %v311_v22 = vshll.u32 %v111_v17, 16  ;;  %v295_v23 = vrot.slane %v294_v15, 4  ;;  %v102_v25 = vld [vmem:[%s5353_s0 + $0x58] sm:$0xf] }
   0xe   :  { %2588 = vst [vmem:[%s5356_s3 + $0x8] sm:$0xf] %v3612_v0  ;;  %v304_v24 = vrot.slane %v302_v18, 4  ;;  %v238_v26 = vor.u32 %v237_v20, %v234_v16  ;;  %v243_v27 = vrot.slane %v241_v13, 5  ;;  %v307_v28 = vrot.slane %v305_v21, 5 }
   0xf   :  { %2589 = vst [vmem:[%s5356_s3 + $0xc] sm:$0x1] %v3612_v0  ;;  %v103_v29 = vld [vmem:[%s5353_s0 + $0x5c] sm:$0x1]  ;;  %v300_v30 = vsel %vm3710_vm2, %v295_v23, %v299_v10  ;;  %v246_v31 = vshrl.u32 %v102_v25, 16  ;;  %v249_v32 = vshll.u32 %v102_v25, 16 }
  0x10   :  { %2590 = vst [vmem:[%s5356_s3 + $0x10] sm:$0xf] %v3612_v0  ;;  %v255_v33 = vshll.u32 %v103_v29, 16  ;;  %367 = vrot.lane.b32.xlu1 %v300_v30, %s3610_s17  ;;  %v239_v34 = vrot.slane %v238_v26, 4  ;;  %v308_v35 = vor.u32 %v307_v28, %v304_v24  ;;  %v313_v36 = vrot.slane %v311_v22, 5 }
  0x11   :  { %2591 = vst [vmem:[%s5356_s3 + $0x14] sm:$0x1] %v3612_v0  ;;  %v92_v37 = vld [vmem:[%s5353_s0 + $0x20] sm:$0xf]  ;;  %v248_v38 = vrot.slane %v246_v31, 4  ;;  %v251_v39 = vrot.slane %v249_v32, 5 }
  0x12   :  { %2592 = vst [vmem:[%s5356_s3 + $0x18] sm:$0xf] %v3612_v0  ;;  %v257_v40 = vrot.slane %v255_v33, 5  ;;  %v176_v41 = vshrl.u32 %v92_v37, 16  ;;  %v244_v42 = vsel %vm3710_vm2, %v239_v34, %v243_v27  ;;  %v309_v43 = vrot.slane %v308_v35, 4 }
  0x13   :  { %2593 = vst [vmem:[%s5356_s3 + $0x1c] sm:$0x1] %v3612_v0  ;;  %v93_v44 = vld [vmem:[%s5353_s0 + $0x24] sm:$0x1]  ;;  %v179_v45 = vshll.u32 %v92_v37, 16  ;;  %359 = vrot.lane.b32.xlu0 %v244_v42, %s3610_s17  ;;  %v252_v46 = vor.u32 %v251_v39, %v248_v38  ;;  %vm391_vm7 = vcmask 1043968  }
  0x14   :  { %2594 = vst [vmem:[%s5356_s3 + $0x20] sm:$0xf] %v3612_v0  ;;  %v178_v47 = vrot.slane %v176_v41, 4  ;;  %v185_v48 = vshll.u32 %v93_v44, 16  ;;  %v86_v49 = vld [vmem:[%s5353_s0 + $0x8] sm:$0xf]  ;;  %v314_v53 = vsel %vm3710_vm2, %v309_v43, %v313_v36 }
  0x15   :  { %2595 = vst [vmem:[%s5356_s3 + $0x24] sm:$0x1] %v3612_v0  ;;  %v181_v50 = vrot.slane %v179_v45, 5  ;;  %v87_v51 = vld [vmem:[%s5353_s0 + $0xc] sm:$0x1]  ;;  %v134_v52 = vshrl.u32 %v86_v49, 16 }
  0x16   :  { %2596 = vst [vmem:[%s5356_s3 + $0x28] sm:$0xf] %v3612_v0  ;;  %v253_v54 = vrot.slane %v252_v46, 4  ;;  %v137_v55 = vshll.u32 %v86_v49, 16  ;;  %v143_v56 = vshll.u32 %v87_v51, 16  ;;  %v187_v58 = vrot.slane %v185_v48, 5 }
  0x17   :  { %2597 = vst [vmem:[%s5356_s3 + $0x2c] sm:$0x1] %v3612_v0  ;;  %v182_v57 = vor.u32 %v181_v50, %v178_v47  ;;  %v136_v59 = vrot.slane %v134_v52, 4  ;;  %v84_v60 = vld [vmem:[%s5353_s0] sm:$0xf]  ;;  %vm2213_vm8 = vcmask 523264  }
  0x18   :  { %2598 = vst [vmem:[%s5356_s3 + $0x30] sm:$0xf] %v3612_v0  ;;  %v258_v61 = vsel %vm3710_vm2, %v253_v54, %v257_v40  ;;  %v139_v62 = vrot.slane %v137_v55, 5  ;;  %v145_v63 = vrot.slane %v143_v56, 5  ;;  %v85_v1 = vld [vmem:[%s5353_s0 + $0x4] sm:$0x1]  ;;  %369 = vrot.lane.b32.xlu1 %v314_v53, %s3610_s17 }
  0x19   :  { %2599 = vst [vmem:[%s5356_s3 + $0x34] sm:$0x1] %v3612_v0  ;;  %v183_v2 = vrot.slane %v182_v57, 4  ;;  %v120_v3 = vshrl.u32 %v84_v60, 16  ;;  %v123_v4 = vshll.u32 %v84_v60, 16  ;;  %v129_v5 = vshll.u32 %v85_v1, 16 }
  0x1a   :  { %2600 = vst [vmem:[%s5356_s3 + $0x38] sm:$0xf] %v3612_v0  ;;  %v140_v6 = vor.u32 %v139_v62, %v136_v59  ;;  %v94_v7 = vld [vmem:[%s5353_s0 + $0x28] sm:$0xf]  ;;  %v95_v8 = vld [vmem:[%s5353_s0 + $0x2c] sm:$0x1] }
  0x1b   :  { %2601 = vst [vmem:[%s5356_s3 + $0x3c] sm:$0x1] %v3612_v0  ;;  %v188_v9 = vsel %vm3710_vm2, %v183_v2, %v187_v58  ;;  %v122_v10 = vrot.slane %v120_v3, 4  ;;  %v125_v11 = vrot.slane %v123_v4, 5  ;;  %v131_v12 = vrot.slane %v129_v5, 5  ;;  %361 = vrot.lane.b32.xlu0 %v258_v61, %s3610_s17 }
  0x1c   :  { %2602 = vst [vmem:[%s5356_s3 + $0x40] sm:$0xf] %v3612_v0  ;;  %351 = vrot.lane.b32.xlu2 %v188_v9, %s3610_s17  ;;  %v141_v13 = vrot.slane %v140_v6, 4  ;;  %v190_v14 = vshrl.u32 %v94_v7, 16  ;;  %v193_v15 = vshll.u32 %v94_v7, 16  ;;  %v199_v16 = vshll.u32 %v95_v8, 16 }
  0x1d   :  { %2603 = vst [vmem:[%s5356_s3 + $0x44] sm:$0x1] %v3612_v0  ;;  %v126_v17 = vor.u32 %v125_v11, %v122_v10  ;;  %v112_v18 = vld [vmem:[%s5353_s0 + $0x80] sm:$0xf]  ;;  %v113_v20 = vld [vmem:[%s5353_s0 + $0x84] sm:$0x1] }
  0x1e   :  { %2608 = vst [vmem:[%s5356_s3 + $0x58] sm:$0xf] %v3612_v0  ;;  %v146_v21 = vsel %vm3710_vm2, %v141_v13, %v145_v63  ;;  %v192_v22 = vrot.slane %v190_v14, 4  ;;  %v195_v23 = vrot.slane %v193_v15, 5  ;;  %v201_v24 = vrot.slane %v199_v16, 5 }
  0x1f   :  { %2609 = vst [vmem:[%s5356_s3 + $0x5c] sm:$0x1] %v3612_v0  ;;  %v127_v25 = vrot.slane %v126_v17, 4  ;;  %v316_v26 = vshrl.u32 %v112_v18, 16  ;;  %v319_v27 = vshll.u32 %v112_v18, 16  ;;  %v325_v28 = vshll.u32 %v113_v20, 16 }
  0x20   :  { %2610 = vst [vmem:[%s5356_s3 + $0x60] sm:$0xf] %v3612_v0  ;;  %v196_v29 = vor.u32 %v195_v23, %v192_v22  ;;  %v106_v30 = vld [vmem:[%s5353_s0 + $0x68] sm:$0xf]  ;;  %v107_v31 = vld [vmem:[%s5353_s0 + $0x6c] sm:$0x1]  ;;  %345 = vrot.lane.b32.xlu1 %v146_v21, %s3610_s17 }
  0x21   :  { %2611 = vst [vmem:[%s5356_s3 + $0x64] sm:$0x1] %v3612_v0  ;;  %v132_v32 = vsel %vm3710_vm2, %v127_v25, %v131_v12  ;;  %v318_v33 = vrot.slane %v316_v26, 4  ;;  %v321_v34 = vrot.slane %v319_v27, 5  ;;  %v327_v35 = vrot.slane %v325_v28, 5 }
  0x22   :  { %2612 = vst [vmem:[%s5356_s3 + $0x68] sm:$0xf] %v3612_v0  ;;  %v197_v36 = vrot.slane %v196_v29, 4  ;;  %v274_v37 = vshrl.u32 %v106_v30, 16  ;;  %v277_v38 = vshll.u32 %v106_v30, 16  ;;  %v283_v39 = vshll.u32 %v107_v31, 16 }
  0x23   :  { %2613 = vst [vmem:[%s5356_s3 + $0x6c] sm:$0x1] %v3612_v0  ;;  %v322_v40 = vor.u32 %v321_v34, %v318_v33  ;;  %v98_v41 = vld [vmem:[%s5353_s0 + $0x38] sm:$0xf]  ;;  %v99_v42 = vld [vmem:[%s5353_s0 + $0x3c] sm:$0x1]  ;;  %343 = vrot.lane.b32.xlu0 %v132_v32, %s3610_s17 }
  0x24   :  { %2614 = vst [vmem:[%s5356_s3 + $0x70] sm:$0xf] %v3612_v0  ;;  %v202_v43 = vsel %vm3710_vm2, %v197_v36, %v201_v24  ;;  %v276_v44 = vrot.slane %v274_v37, 4  ;;  %v279_v45 = vrot.slane %v277_v38, 5  ;;  %v285_v46 = vrot.slane %v283_v39, 5 }
  0x25   :  { %2615 = vst [vmem:[%s5356_s3 + $0x74] sm:$0x1] %v3612_v0  ;;  %353 = vrot.lane.b32.xlu2 %v202_v43, %s3610_s17  ;;  %v323_v47 = vrot.slane %v322_v40, 4  ;;  %v218_v48 = vshrl.u32 %v98_v41, 16  ;;  %v221_v49 = vshll.u32 %v98_v41, 16  ;;  %v227_v50 = vshll.u32 %v99_v42, 16 }
  0x26   :  { %2616 = vst [vmem:[%s5356_s3 + $0x78] sm:$0xf] %v3612_v0  ;;  %v280_v51 = vor.u32 %v279_v45, %v276_v44  ;;  %v96_v52 = vld [vmem:[%s5353_s0 + $0x30] sm:$0xf]  ;;  %v97_v53 = vld [vmem:[%s5353_s0 + $0x34] sm:$0x1] }
  0x27   :  { %2617 = vst [vmem:[%s5356_s3 + $0x7c] sm:$0x1] %v3612_v0  ;;  %v328_v54 = vsel %vm3710_vm2, %v323_v47, %v327_v35  ;;  %v220_v55 = vrot.slane %v218_v48, 4  ;;  %v223_v56 = vrot.slane %v221_v49, 5  ;;  %v204_v58 = vshrl.u32 %v96_v52, 16 }
  0x28   :  { %2618 = vst [vmem:[%s5356_s3 + $0x80] sm:$0xf] %v3612_v0  ;;  %v281_v57 = vrot.slane %v280_v51, 4  ;;  %v207_v59 = vshll.u32 %v96_v52, 16  ;;  %v213_v60 = vshll.u32 %v97_v53, 16  ;;  %371 = vrot.lane.b32.xlu1 %v328_v54, %s3610_s17  ;;  %v229_v62 = vrot.slane %v227_v50, 5 }
  0x29   :  { %2619 = vst [vmem:[%s5356_s3 + $0x84] sm:$0x1] %v3612_v0  ;;  %v224_v61 = vor.u32 %v223_v56, %v220_v55  ;;  %v104_v63 = vld [vmem:[%s5353_s0 + $0x60] sm:$0xf]  ;;  %v105_v1 = vld [vmem:[%s5353_s0 + $0x64] sm:$0x1] }
  0x2a   :  { %2620 = vst [vmem:[%s5356_s3 + $0x88] sm:$0xf] %v3612_v0  ;;  %v206_v2 = vrot.slane %v204_v58, 4  ;;  %v209_v3 = vrot.slane %v207_v59, 5  ;;  %v215_v4 = vrot.slane %v213_v60, 5  ;;  %v260_v7 = vshrl.u32 %v104_v63, 16 }
  0x2b   :  { %2621 = vst [vmem:[%s5356_s3 + $0x8c] sm:$0x1] %v3612_v0  ;;  %v2958_v5 = vld [vmem:[%s5353_s0 + $0x8] sm:$0xe]  ;;  %v225_v6 = vrot.slane %v224_v61, 4  ;;  %v263_v8 = vshll.u32 %v104_v63, 16 }
  0x2c   :  { %2622 = vst [vmem:[%s5356_s3 + $0x90] sm:$0xf] %v3612_v0  ;;  %v269_v9 = vshll.u32 %v105_v1, 16  ;;  %v210_v10 = vor.u32 %v209_v3, %v206_v2  ;;  %v2959_v11 = vld [vmem:[%s5353_s0 + $0xc] sm:$0x1]  ;;  %v262_v15 = vrot.slane %v260_v7, 4 }
  0x2d   :  { %2623 = vst [vmem:[%s5356_s3 + $0x94] sm:$0x1] %v3612_v0  ;;  %v286_v0 = vsel %vm3710_vm2, %v281_v57, %v285_v46  ;;  %v90_v12 = vld [vmem:[%s5353_s0 + $0x18] sm:$0xf]  ;;  %v91_v13 = vld [vmem:[%s5353_s0 + $0x1c] sm:$0x1]  ;;  %v230_v14 = vsel %vm3710_vm2, %v225_v6, %v229_v62 }
  0x2e   :  { %365 = vrot.lane.b32.xlu0 %v286_v0, %s3610_s17  ;;  %v265_v16 = vrot.slane %v263_v8, 5  ;;  %v2990_v17 = vrot.slane %v2958_v5, 9  ;;  %v114_v18 = vld [vmem:[%s5353_s0 + $0x88] sm:$0xf]  ;;  %v211_v20 = vrot.slane %v210_v10, 4  ;;  %v271_v21 = vrot.slane %v269_v9, 5 }
  0x2f   :  { %v162_v22 = vshrl.u32 %v90_v12, 16  ;;  %v165_v23 = vshll.u32 %v90_v12, 16  ;;  %v115_v24 = vld [vmem:[%s5353_s0 + $0x8c] sm:$0x1]  ;;  %v171_v26 = vshll.u32 %v91_v13, 16  ;;  %v330_v27 = vshrl.u32 %v114_v18, 16 }
  0x30   :  { %v266_v25 = vor.u32 %v265_v16, %v262_v15  ;;  %v333_v28 = vshll.u32 %v114_v18, 16  ;;  %v3024_v29 = vld [vmem:[%s5353_s0 + $0x18] sm:$0xf]  ;;  %v216_v30 = vsel %vm3710_vm2, %v211_v20, %v215_v4  ;;  %v1022_v31 = vrot.slane %v2959_v11, 5  ;;  %357 = vrot.lane.b32.xlu1 %v230_v14, %s3610_s17  ;;  %v3022_v38 = vld [vmem:[%s5353_s0 + $0x10] sm:$0xf] }
  0x31   :  { %v164_v32 = vrot.slane %v162_v22, 4  ;;  %v167_v33 = vrot.slane %v165_v23, 5  ;;  %v332_v35 = vrot.slane %v330_v27, 4  ;;  %v339_v37 = vshll.u32 %v115_v24, 16  ;;  %v3025_v46 = vld [vmem:[%s5353_s0 + $0x1c] sm:$0x1] }
  0x32   :  { %v267_v34 = vrot.slane %v266_v25, 4  ;;  %v335_v36 = vrot.slane %v333_v28, 5  ;;  %v1228_v41 = vshrl.u32 %v3024_v29, 16  ;;  %v1231_v42 = vshll.u32 %v3024_v29, 16  ;;  %v88_v48 = vld [vmem:[%s5353_s0 + $0x10] sm:$0xf] }
  0x33   :  { %v168_v40 = vor.u32 %v167_v33, %v164_v32  ;;  %v173_v44 = vrot.slane %v171_v26, 5  ;;  %v1214_v47 = vshrl.u32 %v3022_v38, 16  ;;  %v1217_v52 = vshll.u32 %v3022_v38, 16  ;;  %v3023_v56 = vld [vmem:[%s5353_s0 + $0x14] sm:$0x1] }
  0x34   :  { %v272_v43 = vsel %vm3710_vm2, %v267_v34, %v271_v21  ;;  %v336_v45 = vor.u32 %v335_v36, %v332_v35  ;;  %v1230_v50 = vrot.slane %v1228_v41, 4  ;;  %v1233_v51 = vrot.slane %v1231_v42, 5  ;;  %v89_v61 = vld [vmem:[%s5353_s0 + $0x14] sm:$0x1]  ;;  %v3028_v10 = vld [vmem:[%s5353_s0 + $0x28] sm:$0xf] }
  0x35   :  { %363 = vrot.lane.b32.xlu2 %v272_v43, %s3610_s17  ;;  %v169_v49 = vrot.slane %v168_v40, 4  ;;  %v1023_v53 = vsel %vm3943_vm5, %v2990_v17, %v1022_v31  ;;  %v341_v55 = vrot.slane %v339_v37, 5  ;;  %v1216_v57 = vrot.slane %v1214_v47, 4  ;;  %v3026_v18 = vld [vmem:[%s5353_s0 + $0x20] sm:$0xf] }
  0x36   :  { %355 = vrot.lane.b32.xlu0 %v216_v30, %s3610_s17  ;;  %v337_v54 = vrot.slane %v336_v45, 4  ;;  %v1234_v58 = vor.u32 %v1233_v51, %v1230_v50  ;;  %v1237_v59 = vshll.u32 %v3025_v46, 16  ;;  %v1219_v60 = vrot.slane %v1217_v52, 5  ;;  %v2962_v20 = vld [vmem:[%s5353_s0 + $0x18] sm:$0xe] }
  0x37   :  { %v148_v62 = vshrl.u32 %v88_v48, 16  ;;  %v151_v63 = vshll.u32 %v88_v48, 16  ;;  %v174_v1 = vsel %vm3710_vm2, %v169_v49, %v173_v44  ;;  %v1223_v0 = vshll.u32 %v3023_v56, 16  ;;  %v2963_v21 = vld [vmem:[%s5353_s0 + $0x1c] sm:$0x1] }
  0x38   :  { %1084 = vrot.lane.b32.xlu1 %v1023_v53, %s3610_s17  ;;  %v342_v3 = vsel %vm3710_vm2, %v337_v54, %v341_v55  ;;  %v1220_v4 = vor.u32 %v1219_v60, %v1216_v57  ;;  %v157_v6 = vshll.u32 %v89_v61, 16  ;;  %v1235_v7 = vrot.slane %v1234_v58, 4  ;;  %v2960_v24 = vld [vmem:[%s5353_s0 + $0x10] sm:$0xe]  ;;  %v2961_v29 = vld [vmem:[%s5353_s0 + $0x14] sm:$0x1] }
  0x39   :  { %v150_v2 = vrot.slane %v148_v62, 4  ;;  %v153_v5 = vrot.slane %v151_v63, 5  ;;  %v1239_v8 = vrot.slane %v1237_v59, 5  ;;  %v1225_v12 = vrot.slane %v1223_v0, 5  ;;  %v3029_v32 = vld [vmem:[%s5353_s0 + $0x2c] sm:$0x1] }
  0x3a   :  { %v1221_v11 = vrot.slane %v1220_v4, 4  ;;  %v159_v14 = vrot.slane %v157_v6, 5  ;;  %v1256_v16 = vshrl.u32 %v3028_v10, 16  ;;  %v1259_v17 = vshll.u32 %v3028_v10, 16  ;;  %v3027_v41 = vld [vmem:[%s5353_s0 + $0x24] sm:$0x1] }
  0x3b   :  { %v154_v9 = vor.u32 %v153_v5, %v150_v2  ;;  %v1240_v15 = vsel %vm3710_vm2, %v1235_v7, %v1239_v8  ;;  %v1242_v25 = vshrl.u32 %v3026_v18, 16  ;;  %v1245_v26 = vshll.u32 %v3026_v18, 16  ;;  %v2911_v42 = vld [vmem:[%s5353_s0 + $0x10] sm:$0xf]  ;;  %v3032_v48 = vld [vmem:[%s5353_s0 + $0x38] sm:$0xf] }
  0x3c   :  { %v1226_v22 = vsel %vm3710_vm2, %v1221_v11, %v1225_v12  ;;  %v2992_v27 = vrot.slane %v2962_v20, 9  ;;  %v1030_v28 = vrot.slane %v2963_v21, 5  ;;  %v1258_v30 = vrot.slane %v1256_v16, 4  ;;  %v3525_v49 = vld [vmem:[#allocation4 + $0x38] sm:$0xff]  ;;  %v2966_v52 = vld [vmem:[%s5353_s0 + $0x28] sm:$0xe] }
  0x3d   :  { %373 = vrot.lane.b32.xlu2 %v342_v3, %s3610_s17  ;;  %v155_v13 = vrot.slane %v154_v9, 4  ;;  %v1261_v31 = vrot.slane %v1259_v17, 5  ;;  %v2991_v33 = vrot.slane %v2960_v24, 9  ;;  %v1026_v34 = vrot.slane %v2961_v29, 5  ;;  %v2967_v54 = vld [vmem:[%s5353_s0 + $0x2c] sm:$0x1]  ;;  %3554 = vmatpush.bf16.msra.mxu1 %v3525_v49 }
  0x3e   :  { %349 = vrot.lane.b32.xlu0 %v174_v1, %s3610_s17  ;;  %v1244_v35 = vrot.slane %v1242_v25, 4  ;;  %v1247_v36 = vrot.slane %v1245_v26, 5  ;;  %v1031_v37 = vsel %vm3943_vm5, %v2992_v27, %v1030_v28  ;;  %v1265_v40 = vshll.u32 %v3029_v32, 16  ;;  %v3030_v57 = vld [vmem:[%s5353_s0 + $0x30] sm:$0xf]  ;;  %3555 = vmatpush.bf16.msra.mxu2 %v3525_v49 }
  0x3f   :  { %v160_v23 = vsel %vm3710_vm2, %v155_v13, %v159_v14  ;;  %v1262_v38 = vor.u32 %v1261_v31, %v1258_v30  ;;  %v1027_v43 = vsel %vm3943_vm5, %v2991_v33, %v1026_v34  ;;  %v1251_v45 = vshll.u32 %v3027_v41, 16  ;;  %3556 = vmatpush.bf16.msra.mxu3 %v3525_v49  ;;  %2238 = vmatpush.bf16.msra.mxu0 %v3525_v49  ;;  %v2910_v60 = vld [vmem:[%s5353_s0 + $0x8] sm:$0xf]  ;;  %v2964_v1 = vld [vmem:[%s5353_s0 + $0x20] sm:$0xe]  ;;  %v3524_v5 = vld [vmem:[#allocation4 + $0x30] sm:$0xff] }
  0x40   :  { %1439 = vrot.lane.b32.xlu1 %v1240_v15, %s3610_s17  ;;  %v1248_v44 = vor.u32 %v1247_v36, %v1244_v35  ;;  %v1267_v47 = vrot.slane %v1265_v40, 5  ;;  %v1284_v55 = vshrl.u32 %v3032_v48, 16  ;;  %v1287_v56 = vshll.u32 %v3032_v48, 16  ;;  %v2965_v0 = vld [vmem:[%s5353_s0 + $0x24] sm:$0x1]  ;;  %v3523_v14 = vld [vmem:[#allocation4 + $0x28] sm:$0xff] }
  0x41   :  { %v1263_v46 = vrot.slane %v1262_v38, 4  ;;  %v1253_v51 = vrot.slane %v1251_v45, 5  ;;  %v2994_v58 = vrot.slane %v2966_v52, 9  ;;  %v1038_v61 = vrot.slane %v2967_v54, 5  ;;  %v3033_v4 = vld [vmem:[%s5353_s0 + $0x3c] sm:$0x1]  ;;  %3557 = vmatpush.bf16.msra.mxu1 %v3524_v5 }
  0x42   :  { %v1249_v50 = vrot.slane %v1248_v44, 4  ;;  %v1270_v62 = vshrl.u32 %v3030_v57, 16  ;;  %v1273_v63 = vshll.u32 %v3030_v57, 16  ;;  %v1286_v2 = vrot.slane %v1284_v55, 4  ;;  %v3031_v13 = vld [vmem:[%s5353_s0 + $0x34] sm:$0x1]  ;;  %3558 = vmatpush.bf16.msra.mxu2 %v3524_v5 }
  0x43   :  { %v1268_v53 = vsel %vm3710_vm2, %v1263_v46, %v1267_v47  ;;  %v1289_v3 = vrot.slane %v1287_v56, 5  ;;  %v2993_v6 = vrot.slane %v2964_v1, 9  ;;  %v1034_v7 = vrot.slane %v2965_v0, 5  ;;  %3559 = vmatpush.bf16.msra.mxu3 %v3524_v5  ;;  %2239 = vmatpush.bf16.msra.mxu0 %v3524_v5  ;;  %v2913_v15 = vld [vmem:[%s5353_s0 + $0x20] sm:$0xf]  ;;  %v3521_v31 = vld [vmem:[#allocation4 + $0x18] sm:$0xff] }
  0x44   :  { %v1254_v59 = vsel %vm3710_vm2, %v1249_v50, %v1253_v51  ;;  %v1272_v8 = vrot.slane %v1270_v62, 4  ;;  %v1275_v9 = vrot.slane %v1273_v63, 5  ;;  %v1039_v10 = vsel %vm3943_vm5, %v2994_v58, %v1038_v61  ;;  %v55_v24 = vld [vmem:[%s5353_s0 + $0x20] sm:$0xf]  ;;  %v2970_v32 = vld [vmem:[%s5353_s0 + $0x38] sm:$0xe] }
  0x45   :  { %347 = vrot.lane.b32.xlu2 %v160_v23, %s3610_s17  ;;  %v1290_v11 = vor.u32 %v1289_v3, %v1286_v2  ;;  %v1293_v12 = vshll.u32 %v3033_v4, 16  ;;  %v1035_v16 = vsel %vm3943_vm5, %v2993_v6, %v1034_v7  ;;  %v1279_v18 = vshll.u32 %v3031_v13, 16  ;;  %3560 = vmatpush.bf16.msra.mxu1 %v3523_v14  ;;  %v3522_v23 = vld [vmem:[#allocation4 + $0x20] sm:$0xff]  ;;  %72 = vst.msk [vmem:[#allocation2 + $0x50] sm:$0xf] %vm67_vm6, %v55_v24  ;;  %v3520_v51 = vld [vmem:[#allocation4 + $0x10] sm:$0xff] }
  0x46   :  { %1437 = vrot.lane.b32.xlu0 %v1226_v22, %s3610_s17  ;;  %v1276_v17 = vor.u32 %v1275_v9, %v1272_v8  ;;  %3561 = vmatpush.bf16.msra.mxu2 %v3523_v14  ;;  %v3036_v22 = vld [vmem:[%s5353_s0 + $0x48] sm:$0xf]  ;;  %v3034_v27 = vld [vmem:[%s5353_s0 + $0x40] sm:$0xf]  ;;  %v2971_v33 = vld [vmem:[%s5353_s0 + $0x3c] sm:$0x1] }
  0x47   :  { %v1291_v20 = vrot.slane %v1290_v11, 4  ;;  %v1295_v21 = vrot.slane %v1293_v12, 5  ;;  %3562 = vmatpush.bf16.msra.mxu3 %v3523_v14  ;;  %2240 = vmatpush.bf16.msra.mxu0 %v3523_v14  ;;  %v1281_v26 = vrot.slane %v1279_v18, 5  ;;  %v1312_v29 = vshrl.u32 %v3036_v22, 16  ;;  %v2968_v34 = vld [vmem:[%s5353_s0 + $0x30] sm:$0xe] }
  0x48   :  { %1088 = vrot.lane.b32.xlu1 %v1031_v37, %s3610_s17  ;;  %v1277_v25 = vrot.slane %v1276_v17, 4  ;;  %v1315_v30 = vshll.u32 %v3036_v22, 16  ;;  %v1298_v35 = vshrl.u32 %v3034_v27, 16  ;;  %v1301_v36 = vshll.u32 %v3034_v27, 16  ;;  %v2912_v38 = vld [vmem:[%s5353_s0 + $0x18] sm:$0xf] }
  0x49   :  { %v1296_v28 = vsel %vm3710_vm2, %v1291_v20, %v1295_v21  ;;  %3563 = vmatpush.bf16.msra.mxu1 %v3522_v23  ;;  %v2969_v40 = vld [vmem:[%s5353_s0 + $0x34] sm:$0x1]  ;;  %v2996_v41 = vrot.slane %v2970_v32, 9  ;;  %v2995_v45 = vrot.slane %v2968_v34, 9  ;;  %v3037_v46 = vld [vmem:[%s5353_s0 + $0x4c] sm:$0x1] }
  0x4a   :  { %3564 = vmatpush.bf16.msra.mxu2 %v3522_v23  ;;  %v1282_v37 = vsel %vm3710_vm2, %v1277_v25, %v1281_v26  ;;  %v1317_v44 = vrot.slane %v1315_v30, 5  ;;  %v3035_v47 = vld [vmem:[%s5353_s0 + $0x44] sm:$0x1]  ;;  %v1042_v48 = vrot.slane %v2969_v40, 5  ;;  %v1300_v49 = vrot.slane %v1298_v35, 4 }
  0x4b   :  { %3565 = vmatpush.bf16.msra.mxu3 %v3522_v23  ;;  %2241 = vmatpush.bf16.msra.mxu0 %v3522_v23  ;;  %v1303_v50 = vrot.slane %v1301_v36, 5  ;;  %v63_v52 = vld [vmem:[%s5353_s0 + $0x70] sm:$0xf]  ;;  %v56_v54 = vld [vmem:[%s5353_s0 + $0x28] sm:$0xf]  ;;  %v1321_v57 = vshll.u32 %v3037_v46, 16 }
  0x4c   :  { %80 = vst.msk [vmem:[#allocation2 + $0xf0] sm:$0xf] %vm67_vm6, %v63_v52  ;;  %v1307_v58 = vshll.u32 %v3035_v47, 16  ;;  %v2915_v61 = vld [vmem:[%s5353_s0 + $0x30] sm:$0xf]  ;;  %v1043_v62 = vsel %vm3943_vm5, %v2995_v45, %v1042_v48  ;;  %v3518_v5 = vld [vmem:[#allocation4] sm:$0xff] }
  0x4d   :  { %1086 = vrot.lane.b32.xlu2 %v1027_v43, %s3610_s17  ;;  %v1314_v43 = vrot.slane %v1312_v29, 4  ;;  %3566 = vmatpush.bf16.msra.mxu1 %v3521_v31  ;;  %73 = vst.msk [vmem:[#allocation2 + $0x64] sm:$0xf] %vm67_vm6, %v56_v54  ;;  %v1323_v1 = vrot.slane %v1321_v57, 5  ;;  %v3040_v2 = vld [vmem:[%s5353_s0 + $0x68] sm:$0xf] }
  0x4e   :  { %606 = vrot.lane.b32.xlu0 %v2911_v42, %s3610_s17  ;;  %v1046_v42 = vrot.slane %v2971_v33, 5  ;;  %3567 = vmatpush.bf16.msra.mxu2 %v3521_v31  ;;  %v1309_v0 = vrot.slane %v1307_v58, 5  ;;  %v3038_v4 = vld [vmem:[%s5353_s0 + $0x60] sm:$0xf]  ;;  %v64_v6 = vld [vmem:[%s5353_s0 + $0x78] sm:$0xf] }
  0x4f   :  { %3568 = vmatpush.bf16.msra.mxu3 %v3521_v31  ;;  %2242 = vmatpush.bf16.msra.mxu0 %v3521_v31  ;;  %v1318_v56 = vor.u32 %v1317_v44, %v1314_v43  ;;  %v2974_v7 = vld [vmem:[%s5353_s0 + $0x58] sm:$0xe]  ;;  %81 = vst.msk [vmem:[#allocation2 + $0x104] sm:$0xf] %vm67_vm6, %v64_v6  ;;  %v1340_v11 = vshrl.u32 %v3040_v2, 16  ;;  %v1343_v12 = vshll.u32 %v3040_v2, 16 }
  0x50   :  { %1443 = vrot.lane.b32.xlu1 %v1268_v53, %s3610_s17  ;;  %v59_v53 = vld [vmem:[%s5353_s0 + $0x50] sm:$0xf]  ;;  %v1047_v55 = vsel %vm3943_vm5, %v2996_v41, %v1046_v42  ;;  %v60_v8 = vld [vmem:[%s5353_s0 + $0x58] sm:$0xf]  ;;  %v1326_v13 = vshrl.u32 %v3038_v4, 16  ;;  %v1329_v14 = vshll.u32 %v3038_v4, 16 }
  0x51   :  { %3569 = vmatpush.bf16.msra.mxu1 %v3520_v51  ;;  %76 = vst.msk [vmem:[#allocation2 + $0xa0] sm:$0xf] %vm67_vm6, %v59_v53  ;;  %v1319_v63 = vrot.slane %v1318_v56, 4  ;;  %v2998_v17 = vrot.slane %v2974_v7, 9  ;;  %v2972_v20 = vld [vmem:[%s5353_s0 + $0x40] sm:$0xe] }
  0x52   :  { %3570 = vmatpush.bf16.msra.mxu2 %v3520_v51  ;;  %77 = vst.msk [vmem:[#allocation2 + $0xb4] sm:$0xf] %vm67_vm6, %v60_v8  ;;  %v2973_v21 = vld [vmem:[%s5353_s0 + $0x44] sm:$0x1]  ;;  %v3041_v22 = vld [vmem:[%s5353_s0 + $0x6c] sm:$0x1] }
  0x53   :  { %3571 = vmatpush.bf16.msra.mxu3 %v3520_v51  ;;  %2243 = vmatpush.bf16.msra.mxu0 %v3520_v51  ;;  %v1324_v9 = vsel %vm3710_vm2, %v1319_v63, %v1323_v1  ;;  %v1342_v23 = vrot.slane %v1340_v11, 4  ;;  %v1345_v24 = vrot.slane %v1343_v12, 5  ;;  %v3039_v25 = vld [vmem:[%s5353_s0 + $0x64] sm:$0x1]  ;;  %v1328_v26 = vrot.slane %v1326_v13, 4  ;;  %v3541_v44 = vld [vmem:[#allocation4 + $0xb8] sm:$0xff] }
  0x54   :  { %v1331_v27 = vrot.slane %v1329_v14, 5  ;;  %v61_v29 = vld [vmem:[%s5353_s0 + $0x60] sm:$0xf]  ;;  %v52_v30 = vld [vmem:[%s5353_s0 + $0x8] sm:$0xf]  ;;  %v2997_v31 = vrot.slane %v2972_v20, 9 }
  0x55   :  { %604 = vrot.lane.b32.xlu2 %v2910_v60, %s3610_s17  ;;  %v1304_v60 = vor.u32 %v1303_v50, %v1300_v49  ;;  %v1050_v32 = vrot.slane %v2973_v21, 5  ;;  %78 = vst.msk [vmem:[#allocation2 + $0xc8] sm:$0xf] %vm67_vm6, %v61_v29  ;;  %v51_v33 = vld [vmem:[%s5353_s0] sm:$0xf]  ;;  %v1346_v36 = vor.u32 %v1345_v24, %v1342_v23  ;;  %v3549_v6 = vld [vmem:[#allocation4 + $0xf8] sm:$0xff] }
  0x56   :  { %1441 = vrot.lane.b32.xlu0 %v1254_v59, %s3610_s17  ;;  %v3519_v59 = vld [vmem:[#allocation4 + $0x8] sm:$0xff]  ;;  %69 = vst.msk [vmem:[#allocation2 + $0x14] sm:$0xf] %vm67_vm6, %v52_v30  ;;  %v1332_v40 = vor.u32 %v1331_v27, %v1328_v26  ;;  %v3042_v43 = vld [vmem:[%s5353_s0 + $0x70] sm:$0xf]  ;;  %v3538_v23 = vld [vmem:[#allocation4 + $0xa0] sm:$0xff] }
  0x57   :  { %3572 = vmatpush.bf16.msra.mxu1 %v3519_v59  ;;  %3573 = vmatpush.bf16.msra.mxu2 %v3519_v59  ;;  %v1305_v3 = vrot.slane %v1304_v60, 4  ;;  %68 = vst.msk [vmem:[#allocation2] sm:$0xf] %vm67_vm6, %v51_v33  ;;  %v2917_v45 = vld [vmem:[%s5353_s0 + $0x40] sm:$0xf]  ;;  %v1051_v46 = vsel %vm3943_vm5, %v2997_v31, %v1050_v32  ;;  %v1347_v47 = vrot.slane %v1346_v36, 4 }
  0x58   :  { %1092 = vrot.lane.b32.xlu1 %v1039_v10, %s3610_s17  ;;  %3574 = vmatpush.bf16.msra.mxu3 %v3519_v59  ;;  %v2975_v10 = vld [vmem:[%s5353_s0 + $0x5c] sm:$0x1]  ;;  %v1333_v50 = vrot.slane %v1332_v40, 4  ;;  %v1354_v53 = vshrl.u32 %v3042_v43, 16  ;;  %v1357_v54 = vshll.u32 %v3042_v43, 16  ;;  %v3548_v24 = vld [vmem:[#allocation4 + $0xf0] sm:$0xff] }
  0x59   :  { %2244 = vmatpush.bf16.msra.mxu0 %v3519_v59  ;;  %v1054_v18 = vrot.slane %v2975_v10, 5  ;;  %v66_v56 = vld [vmem:[%s5353_s0 + $0x88] sm:$0xf]  ;;  %v65_v57 = vld [vmem:[%s5353_s0 + $0x80] sm:$0xf]  ;;  %v3533_v40 = vld [vmem:[#allocation4 + $0x78] sm:$0xff] }
  0x5a   :  { %v2978_v58 = vld [vmem:[%s5353_s0 + $0x68] sm:$0xe]  ;;  %v3045_v59 = vld [vmem:[%s5353_s0 + $0x7c] sm:$0x1]  ;;  %83 = vst.msk [vmem:[#allocation2 + $0x12c] sm:$0xf] %vm67_vm6, %v66_v56 }
  0x5b   :  { %3575 = vmatpush.bf16.msra.mxu1 %v3518_v5  ;;  %3576 = vmatpush.bf16.msra.mxu2 %v3518_v5  ;;  %v1055_v34 = vsel %vm3943_vm5, %v2998_v17, %v1054_v18  ;;  %v62_v60 = vld [vmem:[%s5353_s0 + $0x68] sm:$0xf]  ;;  %v3043_v63 = vld [vmem:[%s5353_s0 + $0x74] sm:$0x1]  ;;  %82 = vst.msk [vmem:[#allocation2 + $0x118] sm:$0xf] %vm67_vm6, %v65_v57 }
  0x5c   :  { %3577 = vmatpush.bf16.msra.mxu3 %v3518_v5  ;;  %v2977_v2 = vld [vmem:[%s5353_s0 + $0x64] sm:$0x1]  ;;  %79 = vst.msk [vmem:[#allocation2 + $0xdc] sm:$0xf] %vm67_vm6, %v62_v60  ;;  %v1377_v4 = vshll.u32 %v3045_v59, 16  ;;  %v1359_v10 = vrot.slane %v1357_v54, 5 }
  0x5d   :  { %1090 = vrot.lane.b32.xlu2 %v1035_v16, %s3610_s17  ;;  %2245 = vmatpush.bf16.msra.mxu0 %v3518_v5  ;;  %v2914_v16 = vld [vmem:[%s5353_s0 + $0x28] sm:$0xf]  ;;  %v2916_v8 = vld [vmem:[%s5353_s0 + $0x38] sm:$0xf]  ;;  %v3000_v12 = vrot.slane %v2978_v58, 9  ;;  %v1363_v18 = vshll.u32 %v3043_v63, 16 }
  0x5e   :  { %610 = vrot.lane.b32.xlu0 %v2913_v15, %s3610_s17  ;;  %v1310_v15 = vsel %vm3710_vm2, %v1305_v3, %v1309_v0  ;;  %v2976_v0 = vld [vmem:[%s5353_s0 + $0x60] sm:$0xe]  ;;  %v3539_v5 = vld [vmem:[#allocation4 + $0xa8] sm:$0xff]  ;;  %v4237_v20 = vrot.slane %v1377_v4, 5  ;;  %v4242_v21 = vld [vmem:[%s5353_s0 + $0x78] sm:$0xe] }
  0x5f   :  { %2336 = vmatpush.bf16.msrb.mxu2 %v3541_v44  ;;  %v3048_v11 = vld [vmem:[%s5353_s0 + $0x88] sm:$0xf]  ;;  %v3046_v27 = vld [vmem:[%s5353_s0 + $0x80] sm:$0xf]  ;;  %v58_v29 = vld [vmem:[%s5353_s0 + $0x38] sm:$0xf]  ;;  %2287 = vmatpush.bf16.msrb.mxu1 %v3533_v40 }
  0x60   :  { %1447 = vrot.lane.b32.xlu1 %v1296_v28, %s3610_s17  ;;  %v3044_v28 = vld [vmem:[%s5353_s0 + $0x78] sm:$0xf]  ;;  %2385 = vmatpush.bf16.msrb.mxu3 %v3549_v6  ;;  %v57_v32 = vld [vmem:[%s5353_s0 + $0x30] sm:$0xf]  ;;  %v1399_v36 = vshll.u32 %v3048_v11, 16  ;;  %vm2787_vm9 = vcmask 1043456  }
  0x61   :  { %v1368_v41 = vshrl.u32 %v3044_v28, 16  ;;  %v1371_v42 = vshll.u32 %v3044_v28, 16  ;;  %v53_v28 = vld [vmem:[%s5353_s0 + $0x10] sm:$0xf]  ;;  %75 = vst.msk [vmem:[#allocation2 + $0x8c] sm:$0xf] %vm67_vm6, %v58_v29 }
  0x62   :  { %70 = vst.msk [vmem:[#allocation2 + $0x28] sm:$0xf] %vm67_vm6, %v53_v28  ;;  %v2928_v33 = vld [vmem:[%s5353_s0 + $0x10] sm:$0xf]  ;;  %v4284_v54 = vld [vmem:[%s5353_s0 + $0x8c] sm:$0x1] }
  0x63   :  { %v1370_v51 = vrot.slane %v1368_v41, 4  ;;  %v1373_v52 = vrot.slane %v1371_v42, 5  ;;  %v3537_v41 = vld [vmem:[#allocation4 + $0x98] sm:$0xff]  ;;  %v3547_v42 = vld [vmem:[#allocation4 + $0xe8] sm:$0xff]  ;;  %v718_v43 = vshll.u32 %v2928_v33, 16  ;;  %v3532_v59 = vld [vmem:[#allocation4 + $0x70] sm:$0xff] }
  0x64   :  { %2386 = vmatpush.bf16.msrb.mxu3 %v3548_v24  ;;  %74 = vst.msk [vmem:[#allocation2 + $0x78] sm:$0xf] %vm67_vm6, %v57_v32  ;;  %v2929_v56 = vld [vmem:[%s5353_s0 + $0x14] sm:$0x1]  ;;  %v4295_v58 = vld [vmem:[%s5353_s0 + $0x84] sm:$0x1]  ;;  %2288 = vmatpush.bf16.msrb.mxu1 %v3532_v59 }
  0x65   :  { %608 = vrot.lane.b32.xlu2 %v2912_v38, %s3610_s17  ;;  %v1335_v38 = vshll.u32 %v3039_v25, 16  ;;  %v1374_v3 = vor.u32 %v1373_v52, %v1370_v51  ;;  %v2926_v52 = vld [vmem:[%s5353_s0 + $0x8] sm:$0xf]  ;;  %v720_v57 = vrot.slane %v718_v43, 5  ;;  %v3536_v60 = vld [vmem:[#allocation4 + $0x90] sm:$0xff]  ;;  %v3545_v24 = vld [vmem:[#allocation4 + $0xd8] sm:$0xff] }
  0x66   :  { %1445 = vrot.lane.b32.xlu0 %v1282_v37, %s3610_s17  ;;  %v1349_v37 = vshll.u32 %v3041_v22, 16  ;;  %v1396_v22 = vshrl.u32 %v3048_v11, 16  ;;  %v701_v4 = vshrl.u32 %v2926_v52, 16  ;;  %v54_v6 = vld [vmem:[%s5353_s0 + $0x18] sm:$0xf]  ;;  %vm2793_vm11 = vcmask 1040384  }
  0x67   :  { %v1337_v49 = vrot.slane %v1335_v38, 5  ;;  %v4232_v17 = vrot.slane %v1374_v3, 4  ;;  %v2927_v3 = vld [vmem:[%s5353_s0 + $0xc] sm:$0x1]  ;;  %71 = vst.msk [vmem:[#allocation2 + $0x3c] sm:$0xf] %vm67_vm6, %v54_v6 }
  0x68   :  { %1096 = vrot.lane.b32.xlu1 %v1047_v55, %s3610_s17  ;;  %v1351_v48 = vrot.slane %v1349_v37, 5  ;;  %v3540_v55 = vld [vmem:[#allocation4 + $0xb0] sm:$0xff]  ;;  %v715_v37 = vshrl.u32 %v2928_v33, 16  ;;  %2387 = vmatpush.bf16.msrb.mxu3 %v3547_v42  ;;  %v4358_v43 = vld [vmem:[%s5353_s0 + $0x8c] sm:$0x1] }
  0x69   :  { %2337 = vmatpush.bf16.msrb.mxu2 %v3540_v55  ;;  %v1338_v7 = vsel %vm3710_vm2, %v1333_v50, %v1337_v49  ;;  %v1382_v49 = vshrl.u32 %v3046_v27, 16  ;;  %v1385_v50 = vshll.u32 %v3046_v27, 16  ;;  %v1401_v55 = vrot.slane %v1399_v36, 5  ;;  %v4385_v59 = vld [vmem:[%s5353_s0 + $0x84] sm:$0x1] }
  0x6a   :  { %v717_v51 = vrot.slane %v715_v37, 4  ;;  %v1380_v63 = vsel %vm3710_vm2, %v4232_v17, %v4237_v20  ;;  %v3553_v17 = vld [vmem:[#allocation4 + $0x118] sm:$0xff]  ;;  %v1405_v20 = vshll.u32 %v4284_v54, 16  ;;  %v3544_v54 = vld [vmem:[#allocation4 + $0xd0] sm:$0xff]  ;;  %v409_v6 = vld [vmem:[%s5353_s0 + $0x4] sm:$0x1] }
  0x6b   :  { %2438 = vmatpush.bf16.msrb.mxu0 %v3553_v17  ;;  %v3006_v17 = vld [vmem:[%s5353_s0 + $0x10] sm:$0xf]  ;;  %vm2788_vm10 = vsmask.f32 7938  ;;  %vm2794_vm12 = vsmask.f32 256 }
  0x6c   :  { %1165 = vst.msk [vmem:[#allocation2 + $0xc] sm:$0xf] %vm67_vm6, %v3006_v17  ;;  %vm5062_vm13 = vmand %vm2787_vm9, %vm2788_vm10 }
  0x6d   :  { %1094 = vrot.lane.b32.xlu2 %v1043_v62, %s3610_s17  ;;  %v2979_v62 = vld [vmem:[%s5353_s0 + $0x6c] sm:$0x1]  ;;  %2338 = vmatpush.bf16.msrb.mxu2 %v3539_v5  ;;  %v704_v5 = vshll.u32 %v2926_v52, 16  ;;  %v3530_v52 = vld [vmem:[#allocation4 + $0x60] sm:$0xff]  ;;  %vm5070_vm14 = vmand %vm2793_vm11, %vm2794_vm12 }
  0x6e   :  { %614 = vrot.lane.b32.xlu0 %v2915_v61, %s3610_s17  ;;  %v1352_v61 = vsel %vm3710_vm2, %v1347_v47, %v1351_v48  ;;  %v1062_v13 = vrot.slane %v2979_v62, 5  ;;  %v3002_v47 = vrot.slane %v4242_v21, 9  ;;  %v4276_v48 = vrot.slane %v1396_v22, 4  ;;  %v3531_v22 = vld [vmem:[#allocation4 + $0x68] sm:$0xff] }
  0x6f   :  { %v724_v62 = vshll.u32 %v2929_v56, 16  ;;  %2289 = vmatpush.bf16.msrb.mxu1 %v3531_v22 }
  0x70   :  { %1451 = vrot.lane.b32.xlu1 %v1324_v9, %s3610_s17  ;;  %v1356_v9 = vrot.slane %v1354_v53, 4  ;;  %v1063_v31 = vsel %vm3943_vm5, %v3000_v12, %v1062_v13  ;;  %v710_v12 = vshll.u32 %v2927_v3, 16  ;;  %v1402_v13 = vor.u32 %v1401_v55, %v4276_v48 }
  0x71   :  { %2339 = vmatpush.bf16.msrb.mxu2 %v3538_v23  ;;  %v726_v11 = vrot.slane %v724_v62, 5  ;;  %v3535_v23 = vld [vmem:[#allocation4 + $0x88] sm:$0xff]  ;;  %v4366_v48 = vrot.slane %v1405_v20, 5 }
  0x72   :  { %v1360_v26 = vor.u32 %v1359_v10, %v1356_v9  ;;  %v4317_v9 = vrot.slane %v1382_v49, 4  ;;  %v4319_v10 = vrot.slane %v1385_v50, 5  ;;  %v712_v29 = vrot.slane %v710_v12, 5  ;;  %v3007_v12 = vld [vmem:[%s5353_s0 + $0x18] sm:$0xf] }
  0x73   :  { %v4343_v36 = vrot.slane %v1402_v13, 4  ;;  %2290 = vmatpush.bf16.msrb.mxu1 %v3530_v52  ;;  %v3543_v13 = vld [vmem:[#allocation4 + $0xc8] sm:$0xff]  ;;  %1166 = vst.msk [vmem:[#allocation2 + $0x20] sm:$0xf] %vm67_vm6, %v3007_v12 }
  0x74   :  { %v1388_v37 = vor.u32 %v4319_v10, %v4317_v9  ;;  %v1074_v10 = vrot.slane %v4385_v59, 5  ;;  %v3055_v59 = vld [vmem:[%s5353_s0 + $0x14] sm:$0x1] }
  0x75   :  { %612 = vrot.lane.b32.xlu2 %v2914_v16, %s3610_s17  ;;  %v1058_v16 = vrot.slane %v2977_v2, 5  ;;  %2340 = vmatpush.bf16.msrb.mxu2 %v3537_v41  ;;  %v721_v2 = vor.u32 %v720_v57, %v717_v51  ;;  %v4375_v51 = vld [vmem:[%s5353_s0 + $0x80] sm:$0xe] }
  0x76   :  { %1449 = vrot.lane.b32.xlu0 %v1310_v15, %s3610_s17  ;;  %v352_v35 = vpop.permute.xlu2 %351  ;;  %v2999_v15 = vrot.slane %v2976_v0, 9  ;;  %v4309_v0 = vld [vmem:[%s5353_s0 + $0x70] sm:$0xe]  ;;  %v4391_v62 = vrot.slane %v1388_v37, 4  ;;  %v3003_v9 = vrot.slane %v4375_v51, 9 }
  0x77   :  { %396 = vst.msk [vmem:[#allocation2 + $0x50] sm:$0xf] %vm391_vm7, %v352_v35  ;;  %v3001_v32 = vrot.slane %v4309_v0, 9  ;;  %v3051_v37 = vld [vmem:[%s5353_s0 + $0x94] sm:$0x1] }
  0x78   :  { %1100 = vrot.lane.b32.xlu1 %v1055_v34, %s3610_s17  ;;  %v2919_v34 = vld [vmem:[%s5353_s0 + $0x60] sm:$0xf]  ;;  %v1059_v44 = vsel %vm3943_vm5, %v2999_v15, %v1058_v16  ;;  %v703_v15 = vrot.slane %v701_v4, 4  ;;  %v706_v16 = vrot.slane %v704_v5, 5  ;;  %v1078_v4 = vrot.slane %v4358_v43, 5 }
  0x79   :  { %2341 = vmatpush.bf16.msrb.mxu2 %v3536_v60  ;;  %v2923_v43 = vld [vmem:[%s5353_s0 + $0x80] sm:$0xf]  ;;  %v3054_v51 = vld [vmem:[%s5353_s0 + $0x10] sm:$0xe] }
  0x7a   :  { %v707_v28 = vor.u32 %v706_v16, %v703_v15 }
  0x7c   :  { %v708_v40 = vrot.slane %v707_v28, 4 }
  0x7d   :  { %1098 = vrot.lane.b32.xlu2 %v1051_v46, %s3610_s17  ;;  %v4272_v46 = vrot.slane %v1363_v18, 5  ;;  %2342 = vmatpush.bf16.msrb.mxu2 %v3535_v23  ;;  %v3528_v23 = vld [vmem:[#allocation4 + $0x50] sm:$0xff] }
  0x7e   :  { %618 = vrot.lane.b32.xlu0 %v2917_v45, %s3610_s17  ;;  %v3144_v25 = vld [vmem:[#allocation2 + $0x50] sm:$0xf]  ;;  %v4270_v45 = vrot.slane %v1360_v26, 4  ;;  %v1391_v26 = vshll.u32 %v4295_v58, 16  ;;  %v713_v50 = vsel %vm3710_vm2, %v708_v40, %v712_v29 }
  0x7f   :  { %v354_v1 = vpop.permute.xlu2 %353  ;;  %940 = vst.msk [vmem:[#allocation2 + $0x8] sm:$0xf] %vm67_vm6, %v713_v50  ;;  %v2931_v50 = vld [vmem:[%s5353_s0 + $0x1c] sm:$0x1] }
  0x80   :  { %397 = vst.msk [vmem:[#allocation2 + $0x64] sm:$0xf] %vm391_vm7, %v354_v1  ;;  %1455 = vrot.lane.b32.xlu1 %v1352_v61, %s3610_s17  ;;  %v3546_v61 = vld [vmem:[#allocation4 + $0xe0] sm:$0xff]  ;;  %v4304_v1 = vld [vmem:[%s5353_s0 + $0x7c] sm:$0x1]  ;;  %v1366_v18 = vsel %vm3710_vm2, %v4270_v45, %v4272_v46  ;;  %v4368_v49 = vrot.slane %v1391_v26, 5 }
  0x81   :  { %2388 = vmatpush.bf16.msrb.mxu3 %v3546_v61  ;;  %v3050_v45 = vld [vmem:[%s5353_s0 + $0x90] sm:$0xf]  ;;  %v3542_v26 = vld [vmem:[#allocation4 + $0xc0] sm:$0xff] }
  0x82   :  { %v368_v14 = vpop.permute.xlu1 %367  ;;  %v2921_v61 = vld [vmem:[%s5353_s0 + $0x70] sm:$0xf]  ;;  %v1410_v0 = vshrl.u32 %v3050_v45, 16  ;;  %v1413_v5 = vshll.u32 %v3050_v45, 16  ;;  %v3551_v45 = vld [vmem:[#allocation4 + $0x108] sm:$0xff] }
  0x83   :  { %404 = vst.msk [vmem:[#allocation2 + $0xf0] sm:$0xf] %vm391_vm7, %v368_v14  ;;  %v722_v14 = vrot.slane %v721_v2, 4  ;;  %v408_v2 = vld [vmem:[%s5353_s0] sm:$0xe] }
  0x84   :  { %v4421_v20 = vrot.slane %v1410_v0, 4  ;;  %v3527_v0 = vld [vmem:[#allocation4 + $0x48] sm:$0xff] }
  0x85   :  { %616 = vrot.lane.b32.xlu2 %v2916_v8, %s3610_s17  ;;  %v360_v30 = vpop.permute.xlu0 %359  ;;  %v727_v27 = vsel %vm3710_vm2, %v722_v14, %v726_v11  ;;  %2389 = vmatpush.bf16.msrb.mxu3 %v3545_v24  ;;  %v477_v11 = vrot.slane %v409_v6, 5  ;;  %v4428_v24 = vld [vmem:[%s5353_s0 + $0x9c] sm:$0x1] }
  0x86   :  { %1453 = vrot.lane.b32.xlu0 %v1338_v7, %s3610_s17  ;;  %400 = vst.msk [vmem:[#allocation2 + $0xa0] sm:$0xf] %vm391_vm7, %v360_v30  ;;  %v1070_v30 = vrot.slane %v4304_v1, 5 }
  0x87   :  { %v3490_v35 = vld [vmem:[#allocation2 + $0x60] sm:$0xf0]  ;;  %941 = vst.msk [vmem:[#allocation2 + $0x1c] sm:$0xf] %vm67_vm6, %v727_v27  ;;  %v2932_v27 = vld [vmem:[%s5353_s0 + $0x20] sm:$0xf] }
  0x88   :  { %v3145_v38 = vor.u32 %v3490_v35, %v3144_v25  ;;  %1104 = vrot.lane.b32.xlu1 %v1063_v31, %s3610_s17  ;;  %v2918_v25 = vld [vmem:[%s5353_s0 + $0x58] sm:$0xf]  ;;  %v2981_v31 = vld [vmem:[%s5353_s0 + $0x74] sm:$0x1]  ;;  %v1071_v57 = vsel %vm3943_vm5, %v3002_v47, %v1070_v30  ;;  %v1408_v30 = vsel %vm3710_vm2, %v4343_v36, %v4366_v48  ;;  %v743_v36 = vshrl.u32 %v2932_v27, 16 }
  0x89   :  { %v1066_v46 = vrot.slane %v2981_v31, 5  ;;  %v3552_v47 = vld [vmem:[#allocation4 + $0x110] sm:$0xff]  ;;  %2390 = vmatpush.bf16.msrb.mxu3 %v3544_v54  ;;  %v746_v40 = vshll.u32 %v2932_v27, 16 }
  0x8a   :  { %2256 = vmatmul.bf16.vlgmr.msra.gmra.mxu1 %v3145_v38  ;;  %v370_v53 = vpop.permute.xlu1 %369  ;;  %v4350_v38 = vld [vmem:[%s5353_s0 + $0x88] sm:$0xe]  ;;  %2439 = vmatpush.bf16.msrb.mxu0 %v3552_v47  ;;  %v413_v27 = vld [vmem:[%s5353_s0 + $0x14] sm:$0x1] }
  0x8b   :  { %405 = vst.msk [vmem:[#allocation2 + $0x104] sm:$0xf] %vm391_vm7, %v370_v53  ;;  %v3534_v53 = vld [vmem:[#allocation4 + $0x80] sm:$0xff]  ;;  %v3004_v1 = vrot.slane %v4350_v38, 9  ;;  %v1067_v3 = vsel %vm3943_vm5, %v3001_v32, %v1066_v46  ;;  %v745_v46 = vrot.slane %v743_v36, 4  ;;  %v748_v48 = vrot.slane %v746_v40, 5 }
  0x8c   :  { %2343 = vmatpush.bf16.msrb.mxu2 %v3534_v53  ;;  %v2933_v32 = vld [vmem:[%s5353_s0 + $0x24] sm:$0x1]  ;;  %v3057_v36 = vld [vmem:[%s5353_s0 + $0x1c] sm:$0x1]  ;;  %v3086_v40 = vrot.slane %v3054_v51, 9 }
  0x8d   :  { %1102 = vrot.lane.b32.xlu2 %v1059_v44, %s3610_s17  ;;  %v362_v7 = vpop.permute.xlu0 %361  ;;  %v3184_v41 = vld [vmem:[#allocation2 + $0xa0] sm:$0xf]  ;;  %v3052_v44 = vld [vmem:[%s5353_s0 + $0x98] sm:$0xf]  ;;  %2391 = vmatpush.bf16.msrb.mxu3 %v3543_v13 }
  0x8e   :  { %622 = vrot.lane.b32.xlu0 %v2919_v34, %s3610_s17  ;;  %401 = vst.msk [vmem:[#allocation2 + $0xb4] sm:$0xf] %vm391_vm7, %v362_v7  ;;  %v3224_v34 = vld [vmem:[#allocation2 + $0xf0] sm:$0xf]  ;;  %v1424_v21 = vshrl.u32 %v3052_v44, 16  ;;  %v2894_v7 = vrot.slane %v408_v2, 9  ;;  %2440 = vmatpush.bf16.msrb.mxu0 %v3551_v45 }
  0x8f   :  { %v364_v8 = vpop.permute.xlu2 %363  ;;  %v3550_v13 = vld [vmem:[#allocation4 + $0x100] sm:$0xff]  ;;  %v2936_v45 = vld [vmem:[%s5353_s0 + $0x30] sm:$0xf] }
  0x90   :  { %402 = vst.msk [vmem:[#allocation2 + $0xc8] sm:$0xf] %vm391_vm7, %v364_v8  ;;  %1459 = vrot.lane.b32.xlu1 %v1380_v63, %s3610_s17  ;;  %v1427_v63 = vshll.u32 %v3052_v44, 16  ;;  %v3529_v8 = vld [vmem:[#allocation4 + $0x58] sm:$0xff]  ;;  %v4410_v15 = vrot.slane %v1424_v21, 4  ;;  %v478_v22 = vsel %vm3943_vm5, %v2894_v7, %v477_v11 }
  0x91   :  { %2291 = vmatpush.bf16.msrb.mxu1 %v3529_v8  ;;  %555 = vst.msk [vmem:[#allocation2 + $0x4] sm:$0xf] %vm67_vm6, %v478_v22  ;;  %v2930_v44 = vld [vmem:[%s5353_s0 + $0x18] sm:$0xf]  ;;  %2392 = vmatpush.bf16.msrb.mxu3 %v3542_v26  ;;  %v3526_v22 = vld [vmem:[#allocation4 + $0x40] sm:$0xff] }
  0x92   :  { %v346_v33 = vpop.permute.xlu1 %345  ;;  %v3510_v35 = vld [vmem:[#allocation2 + $0x100] sm:$0xf0]  ;;  %v4412_v16 = vrot.slane %v1427_v63, 5  ;;  %v729_v52 = vshrl.u32 %v2930_v44, 16  ;;  %v732_v53 = vshll.u32 %v2930_v44, 16  ;;  %2441 = vmatpush.bf16.msrb.mxu0 %v3550_v13  ;;  %v1571_v44 = vrot.slane %v3057_v36, 5 }
  0x93   :  { %393 = vst.msk [vmem:[#allocation2 + $0x14] sm:$0xf] %vm391_vm7, %v346_v33  ;;  %v3225_v42 = vor.u32 %v3510_v35, %v3224_v34  ;;  %v2920_v35 = vld [vmem:[%s5353_s0 + $0x68] sm:$0xf] }
  0x94   :  { %v1430_v54 = vor.u32 %v4412_v16, %v4410_v15  ;;  %v731_v63 = vrot.slane %v729_v52, 4  ;;  %v734_v47 = vrot.slane %v732_v53, 5  ;;  %v1079_v16 = vsel %vm3943_vm5, %v3004_v1, %v1078_v4  ;;  %v2937_v53 = vld [vmem:[%s5353_s0 + $0x34] sm:$0x1] }
  0x95   :  { %620 = vrot.lane.b32.xlu2 %v2918_v25, %s3610_s17  ;;  %v344_v55 = vpop.permute.xlu0 %343  ;;  %v3500_v56 = vld [vmem:[#allocation2 + $0xb0] sm:$0xf0]  ;;  %2276 = vmatmul.bf16.vlgmr.msra.gmra.mxu3 %v3225_v42  ;;  %v4430_v25 = vrot.slane %v1413_v5, 5  ;;  %v752_v42 = vshll.u32 %v2933_v32, 16  ;;  %v3009_v32 = vld [vmem:[%s5353_s0 + $0x28] sm:$0xf] }
  0x96   :  { %1457 = vrot.lane.b32.xlu0 %v1366_v18, %s3610_s17  ;;  %392 = vst.msk [vmem:[#allocation2] sm:$0xf] %vm391_vm7, %v344_v55  ;;  %v3185_v60 = vor.u32 %v3500_v56, %v3184_v41  ;;  %2292 = vmatpush.bf16.msrb.mxu1 %v3528_v23  ;;  %v1394_v41 = vsel %vm3710_vm2, %v4391_v62, %v4368_v49  ;;  %v1433_v55 = vshll.u32 %v4428_v24, 16  ;;  %v738_v56 = vshll.u32 %v2931_v50, 16 }
  0x97   :  { %v374_v58 = vpop.permute.xlu2 %373  ;;  %v3204_v49 = vld [vmem:[#allocation2 + $0xc8] sm:$0xf]  ;;  %v749_v62 = vor.u32 %v748_v48, %v745_v46  ;;  %v754_v21 = vrot.slane %v752_v42, 5  ;;  %v1416_v7 = vor.u32 %v4430_v25, %v4421_v20  ;;  %v735_v11 = vor.u32 %v734_v47, %v731_v63  ;;  %v412_v20 = vld [vmem:[%s5353_s0 + $0x10] sm:$0xe] }
  0x98   :  { %407 = vst.msk [vmem:[#allocation2 + $0x12c] sm:$0xf] %vm391_vm7, %v374_v58  ;;  %2266 = vmatmul.bf16.vlgmr.msra.gmra.mxu2 %v3185_v60  ;;  %1108 = vrot.lane.b32.xlu1 %v1071_v57, %s3610_s17  ;;  %v410_v57 = vld [vmem:[%s5353_s0 + $0x8] sm:$0xe]  ;;  %v411_v58 = vld [vmem:[%s5353_s0 + $0xc] sm:$0x1] }
  0x99   :  { %v2895_v5 = vrot.slane %v410_v57, 9  ;;  %v481_v6 = vrot.slane %v411_v58, 5  ;;  %v750_v8 = vrot.slane %v749_v62, 4  ;;  %v740_v12 = vrot.slane %v738_v56, 5  ;;  %1168 = vst.msk [vmem:[#allocation2 + $0x48] sm:$0xf] %vm67_vm6, %v3009_v32 }
  0x9a   :  { %v372_v14 = vpop.permute.xlu1 %371  ;;  %v3480_v18 = vld [vmem:[#allocation2 + $0x10] sm:$0xf0]  ;;  %2293 = vmatpush.bf16.msrb.mxu1 %v3527_v0  ;;  %v736_v24 = vrot.slane %v735_v11, 4  ;;  %v2896_v1 = vrot.slane %v412_v20, 9  ;;  %v1431_v4 = vrot.slane %v1430_v54, 4  ;;  %v771_v56 = vshrl.u32 %v2936_v45, 16 }
  0x9b   :  { %406 = vst.msk [vmem:[#allocation2 + $0x118] sm:$0xf] %vm391_vm7, %v372_v14  ;;  %v755_v38 = vsel %vm3710_vm2, %v750_v8, %v754_v21  ;;  %v482_v26 = vsel %vm3943_vm5, %v2895_v5, %v481_v6  ;;  %v2922_v54 = vld [vmem:[%s5353_s0 + $0x78] sm:$0xf]  ;;  %v774_v57 = vshll.u32 %v2936_v45, 16  ;;  %v780_v21 = vshll.u32 %v2937_v53, 16 }
  0x9c   :  { %943 = vst.msk [vmem:[#allocation2 + $0x44] sm:$0xf] %vm67_vm6, %v755_v38  ;;  %v2934_v63 = vld [vmem:[%s5353_s0 + $0x28] sm:$0xf]  ;;  %v773_v0 = vrot.slane %v771_v56, 4 }
  0x9d   :  { %1106 = vrot.lane.b32.xlu2 %v1067_v3, %s3610_s17  ;;  %v3104_v29 = vld [vmem:[#allocation2] sm:$0xf]  ;;  %v1419_v3 = vshll.u32 %v3051_v37, 16  ;;  %556 = vst.msk [vmem:[#allocation2 + $0x18] sm:$0xf] %vm67_vm6, %v482_v26  ;;  %v782_v5 = vrot.slane %v780_v21, 5 }
  0x9e   :  { %626 = vrot.lane.b32.xlu0 %v2921_v61, %s3610_s17  ;;  %v3105_v33 = vor.u32 %v3480_v18, %v3104_v29  ;;  %v4483_v18 = vrot.slane %v1433_v55, 5  ;;  %v1417_v29 = vrot.slane %v1416_v7, 4  ;;  %2294 = vmatpush.bf16.msrb.mxu1 %v3526_v22  ;;  %v3008_v37 = vld [vmem:[%s5353_s0 + $0x20] sm:$0xf]  ;;  %v757_v6 = vshrl.u32 %v2934_v63, 16 }
  0x9f   :  { %v348_v31 = vpop.permute.xlu2 %347  ;;  %v3515_v34 = vld [vmem:[#allocation2 + $0x128] sm:$0xf0]  ;;  %v4495_v25 = vrot.slane %v1419_v3, 5  ;;  %1167 = vst.msk [vmem:[#allocation2 + $0x34] sm:$0xf] %vm67_vm6, %v3008_v37  ;;  %v760_v7 = vshll.u32 %v2934_v63, 16 }
  0xa0   :  { %v366_v28 = vpop.permute.xlu0 %365  ;;  %394 = vst.msk [vmem:[#allocation2 + $0x28] sm:$0xf] %vm391_vm7, %v348_v31  ;;  %2246 = vmatmul.bf16.vlgmr.msra.gmra.mxu0 %v3105_v33  ;;  %1463 = vrot.lane.b32.xlu1 %v1408_v30, %s3610_s17  ;;  %v741_v30 = vsel %vm3710_vm2, %v736_v24, %v740_v12  ;;  %v485_v31 = vrot.slane %v413_v27, 5  ;;  %v4526_v33 = vld [vmem:[%s5353_s0 + $0x90] sm:$0xe]  ;;  %v1436_v50 = vsel %vm3710_vm2, %v1431_v4, %v4483_v18 }
  0xa1   :  { %403 = vst.msk [vmem:[#allocation2 + $0xdc] sm:$0xf] %vm391_vm7, %v366_v28  ;;  %v1075_v28 = vsel %vm3943_vm5, %v3003_v9, %v1074_v10  ;;  %v1422_v47 = vsel %vm3710_vm2, %v1417_v29, %v4495_v25  ;;  %v2935_v3 = vld [vmem:[%s5353_s0 + $0x2c] sm:$0x1]  ;;  %v416_v27 = vld [vmem:[%s5353_s0 + $0x20] sm:$0xe] }
  0xa2   :  { %v358_v60 = vpop.permute.xlu1 %357  ;;  %v3244_v61 = vld [vmem:[#allocation2 + $0x118] sm:$0xf]  ;;  %942 = vst.msk [vmem:[#allocation2 + $0x30] sm:$0xf] %vm67_vm6, %v741_v30  ;;  %v766_v8 = vshll.u32 %v2935_v3, 16  ;;  %v2898_v51 = vrot.slane %v416_v27, 9 }
  0xa3   :  { %399 = vst.msk [vmem:[#allocation2 + $0x8c] sm:$0xf] %vm391_vm7, %v358_v60  ;;  %v3245_v2 = vor.u32 %v3515_v34, %v3244_v61  ;;  %v486_v34 = vsel %vm3943_vm5, %v2896_v1, %v485_v31  ;;  %v2989_v60 = vld [vmem:[%s5353_s0 + $0x94] sm:$0x1]  ;;  %v3005_v61 = vrot.slane %v4526_v33, 9 }
  0xa4   :  { %557 = vst.msk [vmem:[#allocation2 + $0x2c] sm:$0xf] %vm67_vm6, %v486_v34  ;;  %v1082_v22 = vrot.slane %v2989_v60, 5  ;;  %v768_v25 = vrot.slane %v766_v8, 5  ;;  %v417_v30 = vld [vmem:[%s5353_s0 + $0x24] sm:$0x1] }
  0xa5   :  { %624 = vrot.lane.b32.xlu2 %v2920_v35, %s3610_s17  ;;  %2281 = vmatmul.bf16.gmra.mxu3 %v3245_v2  ;;  %v3056_v35 = vld [vmem:[%s5353_s0 + $0x18] sm:$0xe]  ;;  %v776_v2 = vrot.slane %v774_v57, 5  ;;  %v3061_v45 = vld [vmem:[%s5353_s0 + $0x2c] sm:$0x1] }
  0xa6   :  { %1461 = vrot.lane.b32.xlu0 %v1394_v41, %s3610_s17  ;;  %v1567_v41 = vrot.slane %v3055_v59, 5  ;;  %v3087_v42 = vrot.slane %v3056_v35, 9  ;;  %v493_v59 = vrot.slane %v417_v30, 5  ;;  %v3011_v35 = vld [vmem:[%s5353_s0 + $0x38] sm:$0xf] }
  0xa7   :  { %v1087_v17 = vpop.permute.xlu2 %1086  ;;  %v777_v13 = vor.u32 %v776_v2, %v773_v0  ;;  %1170 = vst.msk [vmem:[#allocation2 + $0x70] sm:$0xf] %vm67_vm6, %v3011_v35  ;;  %v2924_v56 = vld [vmem:[%s5353_s0 + $0x88] sm:$0xf]  ;;  %v2938_v3 = vld [vmem:[%s5353_s0 + $0x38] sm:$0xf] }
  0xa8   :  { %v356_v14 = vpop.permute.xlu0 %355  ;;  %v3505_v15 = vld [vmem:[#allocation2 + $0xd8] sm:$0xf0]  ;;  %1133 = vst.msk [vmem:[#allocation2 + $0x1c] sm:$0xf] %vm391_vm7, %v1087_v17  ;;  %1112 = vrot.lane.b32.xlu1 %v1079_v16, %s3610_s17  ;;  %v1568_v55 = vsel %vm3943_vm5, %v3086_v40, %v1567_v41  ;;  %v1572_v62 = vsel %vm3943_vm5, %v3087_v42, %v1571_v44  ;;  %v759_v16 = vrot.slane %v757_v6, 4  ;;  %v762_v17 = vrot.slane %v760_v7, 5 }
  0xa9   :  { %398 = vst.msk [vmem:[#allocation2 + $0x78] sm:$0xf] %vm391_vm7, %v356_v14  ;;  %v3205_v23 = vor.u32 %v3505_v15, %v3204_v49  ;;  %v414_v14 = vld [vmem:[%s5353_s0 + $0x18] sm:$0xe]  ;;  %v3124_v15 = vld [vmem:[#allocation2 + $0x28] sm:$0xf]  ;;  %v494_v34 = vsel %vm3943_vm5, %v2898_v51, %v493_v59 }
  0xaa   :  { %v1085_v9 = vpop.permute.xlu1 %1084  ;;  %v3495_v10 = vld [vmem:[#allocation2 + $0x88] sm:$0xf0]  ;;  %1645 = vst.msk [vmem:[#allocation2 + $0x10] sm:$0xf] %vm67_vm6, %v1568_v55  ;;  %v778_v20 = vrot.slane %v777_v13, 4  ;;  %v763_v4 = vor.u32 %v762_v17, %v759_v16  ;;  %v788_v16 = vshll.u32 %v2938_v3, 16 }
  0xab   :  { %2271 = vmatmul.bf16.gmra.mxu2 %v3205_v23  ;;  %1132 = vst.msk [vmem:[#allocation2 + $0x8] sm:$0xf] %vm391_vm7, %v1085_v9  ;;  %v415_v23 = vld [vmem:[%s5353_s0 + $0x1c] sm:$0x1]  ;;  %v2925_v9 = vld [vmem:[%s5353_s0 + $0x90] sm:$0xf] }
  0xac   :  { %1646 = vst.msk [vmem:[#allocation2 + $0x24] sm:$0xf] %vm67_vm6, %v1572_v62  ;;  %v489_v26 = vrot.slane %v415_v23, 5  ;;  %v783_v29 = vsel %vm3710_vm2, %v778_v20, %v782_v5  ;;  %v764_v31 = vrot.slane %v763_v4, 4  ;;  %v3058_v40 = vld [vmem:[%s5353_s0 + $0x20] sm:$0xe] }
  0xad   :  { %1110 = vrot.lane.b32.xlu2 %v1075_v28, %s3610_s17  ;;  %945 = vst.msk [vmem:[#allocation2 + $0x6c] sm:$0xf] %vm67_vm6, %v783_v29  ;;  %v3010_v41 = vld [vmem:[%s5353_s0 + $0x30] sm:$0xf]  ;;  %v3059_v42 = vld [vmem:[%s5353_s0 + $0x24] sm:$0x1] }
  0xae   :  { %630 = vrot.lane.b32.xlu0 %v2923_v43, %s3610_s17  ;;  %v2897_v43 = vrot.slane %v414_v14, 9  ;;  %v769_v33 = vsel %vm3710_vm2, %v764_v31, %v768_v25  ;;  %v3060_v44 = vld [vmem:[%s5353_s0 + $0x28] sm:$0xe]  ;;  %559 = vst.msk [vmem:[#allocation2 + $0x54] sm:$0xf] %vm67_vm6, %v494_v34  ;;  %v785_v14 = vshrl.u32 %v2938_v3, 16 }
  0xaf   :  { %v605_v52 = vpop.permute.xlu2 %604  ;;  %v3481_v58 = vld [vmem:[#allocation2 + $0x18] sm:$0xf0]  ;;  %944 = vst.msk [vmem:[#allocation2 + $0x58] sm:$0xf] %vm67_vm6, %v769_v33  ;;  %v2941_v62 = vld [vmem:[%s5353_s0 + $0x44] sm:$0x1] }
  0xb0   :  { %v350_v46 = vpop.permute.xlu0 %349  ;;  %v3164_v48 = vld [vmem:[#allocation2 + $0x78] sm:$0xf]  ;;  %652 = vst.msk [vmem:[#allocation2 + $0x4] sm:$0xf] %vm391_vm7, %v605_v52  ;;  %1467 = vrot.lane.b32.xlu1 %v1436_v50, %s3610_s17  ;;  %v490_v32 = vsel %vm3943_vm5, %v2897_v43, %v489_v26  ;;  %v808_v2 = vshll.u32 %v2941_v62, 16  ;;  %v787_v20 = vrot.slane %v785_v14, 4 }
  0xb1   :  { %395 = vst.msk [vmem:[#allocation2 + $0x3c] sm:$0xf] %vm391_vm7, %v350_v46  ;;  %v3165_v49 = vor.u32 %v3495_v10, %v3164_v48  ;;  %v1083_v10 = vsel %vm3943_vm5, %v3005_v61, %v1082_v22  ;;  %v3088_v46 = vrot.slane %v3058_v40, 9  ;;  %v1575_v48 = vrot.slane %v3059_v42, 5  ;;  %v2939_v8 = vld [vmem:[%s5353_s0 + $0x3c] sm:$0x1] }
  0xb2   :  { %v1440_v11 = vpop.permute.xlu1 %1439  ;;  %v3112_v12 = vld [vmem:[#allocation2 + $0x8] sm:$0xf]  ;;  %558 = vst.msk [vmem:[#allocation2 + $0x40] sm:$0xf] %vm67_vm6, %v490_v32  ;;  %v810_v13 = vrot.slane %v808_v2, 5  ;;  %v794_v17 = vshll.u32 %v2939_v8, 16 }
  0xb3   :  { %2261 = vmatmul.bf16.gmra.mxu1 %v3165_v49  ;;  %1486 = vst.msk [vmem:[#allocation2 + $0x20] sm:$0xf] %vm391_vm7, %v1440_v11  ;;  %v3113_v18 = vor.u32 %v3481_v58, %v3112_v12  ;;  %v3089_v49 = vrot.slane %v3060_v44, 9  ;;  %v1576_v57 = vsel %vm3943_vm5, %v3088_v46, %v1575_v48  ;;  %v2940_v58 = vld [vmem:[%s5353_s0 + $0x40] sm:$0xf]  ;;  %v790_v27 = vrot.slane %v788_v16, 5 }
  0xb4   :  { %v799_v21 = vshrl.u32 %v2940_v58, 16  ;;  %v802_v63 = vshll.u32 %v2940_v58, 16  ;;  %v3482_v0 = vld [vmem:[#allocation2 + $0x20] sm:$0xf0]  ;;  %1169 = vst.msk [vmem:[#allocation2 + $0x5c] sm:$0xf] %vm67_vm6, %v3010_v41 }
  0xb5   :  { %628 = vrot.lane.b32.xlu2 %v2922_v54, %s3610_s17  ;;  %v1579_v54 = vrot.slane %v3061_v45, 5  ;;  %1647 = vst.msk [vmem:[#allocation2 + $0x38] sm:$0xf] %vm67_vm6, %v1576_v57  ;;  %v419_v23 = vld [vmem:[%s5353_s0 + $0x2c] sm:$0x1]  ;;  %v796_v30 = vrot.slane %v794_v17, 5  ;;  %v791_v51 = vor.u32 %v790_v27, %v787_v20 }
  0xb6   :  { %1465 = vrot.lane.b32.xlu0 %v1422_v47, %s3610_s17  ;;  %v3120_v47 = vld [vmem:[#allocation2 + $0x10] sm:$0xf]  ;;  %v801_v6 = vrot.slane %v799_v21, 4  ;;  %v804_v7 = vrot.slane %v802_v63, 5  ;;  %v421_v31 = vld [vmem:[%s5353_s0 + $0x34] sm:$0x1] }
  0xb7   :  { %v1091_v1 = vpop.permute.xlu2 %1090  ;;  %v1580_v61 = vsel %vm3943_vm5, %v3089_v49, %v1579_v54  ;;  %v3478_v5 = vld [vmem:[#allocation2 + $0x4] sm:$0xf]  ;;  %v3121_v4 = vor.u32 %v3482_v0, %v3120_v47  ;;  %v501_v33 = vrot.slane %v421_v31, 5  ;;  %v792_v34 = vrot.slane %v791_v51, 4  ;;  %v3012_v41 = vld [vmem:[%s5353_s0 + $0x40] sm:$0xf] }
  0xb8   :  { %v1438_v38 = vpop.permute.xlu0 %1437  ;;  %v3485_v24 = vld [vmem:[#allocation2 + $0x38] sm:$0xf0]  ;;  %1135 = vst.msk [vmem:[#allocation2 + $0x44] sm:$0xf] %vm391_vm7, %v1091_v1  ;;  %v3062_v42 = vld [vmem:[%s5353_s0 + $0x30] sm:$0xe] }
  0xb9   :  { %1485 = vst.msk [vmem:[#allocation2 + $0xc] sm:$0xf] %vm391_vm7, %v1438_v38  ;;  %v3125_v28 = vor.u32 %v3485_v24, %v3124_v15  ;;  %v805_v15 = vor.u32 %v804_v7, %v801_v6  ;;  %v420_v38 = vld [vmem:[%s5353_s0 + $0x30] sm:$0xe]  ;;  %v797_v40 = vsel %vm3710_vm2, %v792_v34, %v796_v30  ;;  %v3063_v44 = vld [vmem:[%s5353_s0 + $0x34] sm:$0x1] }
  0xba   :  { %v1089_v37 = vpop.permute.xlu1 %1088  ;;  %v3114_v36 = vld [vmem:[#allocation2 + $0x1c] sm:$0xf0]  ;;  %1648 = vst.msk [vmem:[#allocation2 + $0x4c] sm:$0xf] %vm67_vm6, %v1580_v61  ;;  %v3064_v45 = vld [vmem:[%s5353_s0 + $0x38] sm:$0xe] }
  0xbb   :  { %2251 = vmatmul.bf16.gmra.mxu0 %v3125_v28  ;;  %2344 = vmatmul.bf16.vlgmr.msrb.gmra.mxu2 %v3113_v18  ;;  %1134 = vst.msk [vmem:[#allocation2 + $0x30] sm:$0xf] %vm391_vm7, %v1089_v37  ;;  %v418_v18 = vld [vmem:[%s5353_s0 + $0x28] sm:$0xe]  ;;  %v806_v26 = vrot.slane %v805_v15, 4  ;;  %v497_v28 = vrot.slane %v419_v23, 5 }
  0xbc   :  { %v2899_v43 = vrot.slane %v418_v18, 9  ;;  %946 = vst.msk [vmem:[#allocation2 + $0x80] sm:$0xf] %vm67_vm6, %v797_v40  ;;  %v3065_v46 = vld [vmem:[%s5353_s0 + $0x3c] sm:$0x1]  ;;  %v1583_v49 = vrot.slane %v3063_v44, 5 }
  0xbd   :  { %1114 = vrot.lane.b32.xlu2 %v1083_v10, %s3610_s17  ;;  %v811_v32 = vsel %vm3710_vm2, %v806_v26, %v810_v13  ;;  %v3013_v10 = vld [vmem:[%s5353_s0 + $0x48] sm:$0xf]  ;;  %v3091_v57 = vrot.slane %v3064_v45, 9  ;;  %v1587_v58 = vrot.slane %v3065_v46, 5  ;;  %v2944_v62 = vld [vmem:[%s5353_s0 + $0x60] sm:$0xf] }
  0xbe   :  { %634 = vrot.lane.b32.xlu0 %v2925_v9, %s3610_s17  ;;  %v498_v59 = vsel %vm3943_vm5, %v2899_v43, %v497_v28  ;;  %v2900_v9 = vrot.slane %v420_v38, 9  ;;  %947 = vst.msk [vmem:[#allocation2 + $0x94] sm:$0xf] %vm67_vm6, %v811_v32  ;;  %v2945_v21 = vld [vmem:[%s5353_s0 + $0x64] sm:$0x1]  ;;  %v827_v47 = vshrl.u32 %v2944_v62, 16 }
  0xbf   :  { %v609_v53 = vpop.permute.xlu2 %608  ;;  %v3486_v60 = vld [vmem:[#allocation2 + $0x40] sm:$0xf0]  ;;  %560 = vst.msk [vmem:[#allocation2 + $0x68] sm:$0xf] %vm67_vm6, %v498_v59  ;;  %v1588_v63 = vsel %vm3943_vm5, %v3091_v57, %v1587_v58  ;;  %v830_v0 = vshll.u32 %v2944_v62, 16  ;;  %v836_v2 = vshll.u32 %v2945_v21, 16 }
  0xc0   :  { %v607_v50 = vpop.permute.xlu0 %606  ;;  %v3479_v52 = vld [vmem:[#allocation2 + $0xc] sm:$0xf]  ;;  %654 = vst.msk [vmem:[#allocation2 + $0x2c] sm:$0xf] %vm391_vm7, %v609_v53  ;;  %v3090_v53 = vrot.slane %v3062_v42, 9  ;;  %v829_v8 = vrot.slane %v827_v47, 4 }
  0xc1   :  { %653 = vst.msk [vmem:[#allocation2 + $0x18] sm:$0xf] %vm391_vm7, %v607_v50  ;;  %v3117_v55 = vor.u32 %v3479_v52, %v3114_v36  ;;  %v502_v36 = vsel %vm3943_vm5, %v2900_v9, %v501_v33  ;;  %v2942_v3 = vld [vmem:[%s5353_s0 + $0x58] sm:$0xf]  ;;  %v838_v18 = vrot.slane %v836_v2, 5 }
  0xc2   :  { %v1444_v11 = vpop.permute.xlu1 %1443  ;;  %v3132_v12 = vld [vmem:[#allocation2 + $0x30] sm:$0xf]  ;;  %1172 = vst.msk [vmem:[#allocation2 + $0x98] sm:$0xf] %vm67_vm6, %v3013_v10  ;;  %v1584_v61 = vsel %vm3943_vm5, %v3090_v53, %v1583_v49  ;;  %v813_v14 = vshrl.u32 %v2942_v3, 16  ;;  %v816_v15 = vshll.u32 %v2942_v3, 16 }
  0xc3   :  { %2393 = vmatmul.bf16.vlgmr.msrb.gmra.mxu3 %v3117_v55  ;;  %1488 = vst.msk [vmem:[#allocation2 + $0x48] sm:$0xf] %vm391_vm7, %v1444_v11  ;;  %v3133_v22 = vor.u32 %v3486_v60, %v3132_v12  ;;  %v3140_v55 = vld [vmem:[#allocation2 + $0x38] sm:$0xf]  ;;  %v832_v11 = vrot.slane %v830_v0, 5 }
  0xc4   :  { %561 = vst.msk [vmem:[#allocation2 + $0x7c] sm:$0xf] %vm67_vm6, %v502_v36  ;;  %v422_v20 = vld [vmem:[%s5353_s0 + $0x38] sm:$0xe]  ;;  %v423_v23 = vld [vmem:[%s5353_s0 + $0x3c] sm:$0x1] }
  0xc5   :  { %632 = vrot.lane.b32.xlu2 %v2924_v56, %s3610_s17  ;;  %v3487_v56 = vld [vmem:[#allocation2 + $0x48] sm:$0xf0]  ;;  %1171 = vst.msk [vmem:[#allocation2 + $0x84] sm:$0xf] %vm67_vm6, %v3012_v41  ;;  %v833_v17 = vor.u32 %v832_v11, %v829_v8  ;;  %v505_v26 = vrot.slane %v423_v23, 5 }
  0xc6   :  { %1649 = vst.msk [vmem:[#allocation2 + $0x60] sm:$0xf] %vm67_vm6, %v1584_v61  ;;  %v3141_v13 = vor.u32 %v3487_v56, %v3140_v55  ;;  %v424_v32 = vld [vmem:[%s5353_s0 + $0x50] sm:$0xe]  ;;  %v425_v51 = vld [vmem:[%s5353_s0 + $0x54] sm:$0x1] }
  0xc7   :  { %v1095_v25 = vpop.permute.xlu2 %1094  ;;  %1650 = vst.msk [vmem:[#allocation2 + $0x74] sm:$0xf] %vm67_vm6, %v1588_v63  ;;  %v3483_v12 = vld [vmem:[#allocation2 + $0x2c] sm:$0xf]  ;;  %v834_v28 = vrot.slane %v833_v17, 4  ;;  %v2902_v9 = vrot.slane %v424_v32, 9 }
  0xc8   :  { %v1442_v24 = vpop.permute.xlu0 %1441  ;;  %v3106_v1 = vld [vmem:[#allocation2 + $0x14] sm:$0xf0]  ;;  %1137 = vst.msk [vmem:[#allocation2 + $0x6c] sm:$0xf] %vm391_vm7, %v1095_v25  ;;  %v2901_v25 = vrot.slane %v422_v20, 9  ;;  %v509_v10 = vrot.slane %v425_v51, 5 }
  0xc9   :  { %1487 = vst.msk [vmem:[#allocation2 + $0x34] sm:$0xf] %vm391_vm7, %v1442_v24  ;;  %v3109_v29 = vor.u32 %v3478_v5, %v3106_v1  ;;  %v2943_v5 = vld [vmem:[%s5353_s0 + $0x5c] sm:$0x1]  ;;  %v815_v1 = vrot.slane %v813_v14, 4  ;;  %v839_v59 = vsel %vm3710_vm2, %v834_v28, %v838_v18 }
  0xca   :  { %v1093_v35 = vpop.permute.xlu1 %1092  ;;  %v3134_v37 = vld [vmem:[#allocation2 + $0x44] sm:$0xf0]  ;;  %v506_v31 = vsel %vm3943_vm5, %v2901_v25, %v505_v26  ;;  %949 = vst.msk [vmem:[#allocation2 + $0xbc] sm:$0xf] %vm67_vm6, %v839_v59  ;;  %v3066_v41 = vld [vmem:[%s5353_s0 + $0x40] sm:$0xe] }
  0xcb   :  { %2295 = vmatmul.bf16.vlgmr.msrb.gmra.mxu1 %v3109_v29  ;;  %2349 = vmatmul.bf16.gmra.mxu2 %v3133_v22  ;;  %1136 = vst.msk [vmem:[#allocation2 + $0x58] sm:$0xf] %vm391_vm7, %v1093_v35  ;;  %v822_v22 = vshll.u32 %v2943_v5, 16  ;;  %v3015_v40 = vld [vmem:[%s5353_s0 + $0x68] sm:$0xf] }
  0xcc   :  { %3406 = vmatmul.msk.bf16.vlgmr.msrb.gmra.mxu0 %vm2213_vm8, %v3121_v4  ;;  %v818_v4 = vrot.slane %v816_v15, 5  ;;  %562 = vst.msk [vmem:[#allocation2 + $0x90] sm:$0xf] %vm67_vm6, %v506_v31  ;;  %v3067_v42 = vld [vmem:[%s5353_s0 + $0x44] sm:$0x1] }
  0xcd   :  { %v824_v29 = vrot.slane %v822_v22, 5  ;;  %v3068_v44 = vld [vmem:[%s5353_s0 + $0x48] sm:$0xe]  ;;  %v3069_v45 = vld [vmem:[%s5353_s0 + $0x4c] sm:$0x1]  ;;  %v1591_v53 = vrot.slane %v3067_v42, 5 }
  0xce   :  { %v819_v30 = vor.u32 %v818_v4, %v815_v1  ;;  %v3093_v55 = vrot.slane %v3068_v44, 9  ;;  %v1595_v56 = vrot.slane %v3069_v45, 5  ;;  %v2949_v61 = vld [vmem:[%s5353_s0 + $0x74] sm:$0x1]  ;;  %v3160_v62 = vld [vmem:[#allocation2 + $0x60] sm:$0xf] }
  0xcf   :  { %v613_v52 = vpop.permute.xlu2 %612  ;;  %v3491_v60 = vld [vmem:[#allocation2 + $0x68] sm:$0xf0]  ;;  %v3492_v21 = vld [vmem:[#allocation2 + $0x70] sm:$0xf0]  ;;  %1174 = vst.msk [vmem:[#allocation2 + $0xc0] sm:$0xf] %vm67_vm6, %v3015_v40 }
  0xd0   :  { %v611_v48 = vpop.permute.xlu0 %610  ;;  %v3484_v50 = vld [vmem:[#allocation2 + $0x34] sm:$0xf]  ;;  %656 = vst.msk [vmem:[#allocation2 + $0x54] sm:$0xf] %vm391_vm7, %v613_v52  ;;  %v820_v33 = vrot.slane %v819_v30, 4  ;;  %v3092_v52 = vrot.slane %v3066_v41, 9  ;;  %v1596_v2 = vsel %vm3943_vm5, %v3093_v55, %v1595_v56 }
  0xd1   :  { %655 = vst.msk [vmem:[#allocation2 + $0x40] sm:$0xf] %vm391_vm7, %v611_v48  ;;  %v3137_v54 = vor.u32 %v3484_v50, %v3134_v37  ;;  %v510_v37 = vsel %vm3943_vm5, %v2902_v9, %v509_v10  ;;  %v864_v0 = vshll.u32 %v2949_v61, 16  ;;  %v2946_v3 = vld [vmem:[%s5353_s0 + $0x68] sm:$0xf] }
  0xd2   :  { %v1448_v6 = vpop.permute.xlu1 %1447  ;;  %v3152_v7 = vld [vmem:[#allocation2 + $0x58] sm:$0xf]  ;;  %v825_v36 = vsel %vm3710_vm2, %v820_v33, %v824_v29  ;;  %563 = vst.msk [vmem:[#allocation2 + $0xa4] sm:$0xf] %vm67_vm6, %v510_v37  ;;  %v1592_v58 = vsel %vm3943_vm5, %v3092_v52, %v1591_v53  ;;  %v2947_v5 = vld [vmem:[%s5353_s0 + $0x6c] sm:$0x1] }
  0xd3   :  { %2398 = vmatmul.bf16.gmra.mxu3 %v3137_v54  ;;  %1490 = vst.msk [vmem:[#allocation2 + $0x70] sm:$0xf] %vm391_vm7, %v1448_v6  ;;  %v3153_v16 = vor.u32 %v3491_v60, %v3152_v7  ;;  %v3014_v54 = vld [vmem:[%s5353_s0 + $0x60] sm:$0xf]  ;;  %v2948_v60 = vld [vmem:[%s5353_s0 + $0x70] sm:$0xf] }
  0xd4   :  { %948 = vst.msk [vmem:[#allocation2 + $0xa8] sm:$0xf] %vm67_vm6, %v825_v36  ;;  %v855_v63 = vshrl.u32 %v2948_v60, 16  ;;  %v858_v47 = vshll.u32 %v2948_v60, 16  ;;  %v844_v14 = vshll.u32 %v2946_v3, 16  ;;  %v866_v17 = vrot.slane %v864_v0, 5 }
  0xd5   :  { %1173 = vst.msk [vmem:[#allocation2 + $0xac] sm:$0xf] %vm67_vm6, %v3014_v54  ;;  %v850_v18 = vshll.u32 %v2947_v5, 16  ;;  %v426_v22 = vld [vmem:[%s5353_s0 + $0x58] sm:$0xe] }
  0xd6   :  { %1651 = vst.msk [vmem:[#allocation2 + $0x88] sm:$0xf] %vm67_vm6, %v1592_v58  ;;  %v857_v8 = vrot.slane %v855_v63, 4  ;;  %v860_v11 = vrot.slane %v858_v47, 5  ;;  %v846_v1 = vrot.slane %v844_v14, 5  ;;  %v2903_v29 = vrot.slane %v426_v22, 9 }
  0xd7   :  { %v1099_v24 = vpop.permute.xlu2 %1098  ;;  %1652 = vst.msk [vmem:[#allocation2 + $0x9c] sm:$0xf] %vm67_vm6, %v1596_v2  ;;  %v427_v4 = vld [vmem:[%s5353_s0 + $0x5c] sm:$0x1]  ;;  %v428_v31 = vld [vmem:[%s5353_s0 + $0x60] sm:$0xe] }
  0xd8   :  { %v1446_v43 = vpop.permute.xlu0 %1445  ;;  %v3126_v38 = vld [vmem:[#allocation2 + $0x3c] sm:$0xf0]  ;;  %1139 = vst.msk [vmem:[#allocation2 + $0x94] sm:$0xf] %vm391_vm7, %v1099_v24  ;;  %v513_v30 = vrot.slane %v427_v4, 5  ;;  %v2904_v59 = vrot.slane %v428_v31, 9 }
  0xd9   :  { %1489 = vst.msk [vmem:[#allocation2 + $0x5c] sm:$0xf] %vm391_vm7, %v1446_v43  ;;  %v3129_v27 = vor.u32 %v3483_v12, %v3126_v38  ;;  %v3488_v12 = vld [vmem:[#allocation2 + $0x54] sm:$0xf]  ;;  %v3161_v43 = vor.u32 %v3492_v21, %v3160_v62  ;;  %v429_v51 = vld [vmem:[%s5353_s0 + $0x64] sm:$0x1] }
  0xda   :  { %v1097_v34 = vpop.permute.xlu1 %1096  ;;  %v3154_v35 = vld [vmem:[#allocation2 + $0x6c] sm:$0xf0]  ;;  %v514_v10 = vsel %vm3943_vm5, %v2903_v29, %v513_v30  ;;  %v517_v33 = vrot.slane %v429_v51, 5  ;;  %v3017_v40 = vld [vmem:[%s5353_s0 + $0x78] sm:$0xf] }
  0xdb   :  { %2300 = vmatmul.bf16.gmra.mxu1 %v3129_v27  ;;  %2354 = vmatmul.bf16.gmra.mxu2 %v3153_v16  ;;  %1138 = vst.msk [vmem:[#allocation2 + $0x80] sm:$0xf] %vm391_vm7, %v1097_v34  ;;  %v861_v16 = vor.u32 %v860_v11, %v857_v8  ;;  %v852_v27 = vrot.slane %v850_v18, 5  ;;  %v3070_v41 = vld [vmem:[%s5353_s0 + $0x60] sm:$0xe] }
  0xdc   :  { %3407 = vmatmul.msk.bf16.gmra.mxu0 %vm2213_vm8, %v3141_v13  ;;  %v841_v13 = vshrl.u32 %v2946_v3, 16  ;;  %564 = vst.msk [vmem:[#allocation2 + $0xb8] sm:$0xf] %vm67_vm6, %v514_v10  ;;  %v518_v36 = vsel %vm3943_vm5, %v2904_v59, %v517_v33  ;;  %v3071_v42 = vld [vmem:[%s5353_s0 + $0x64] sm:$0x1] }
  0xdd   :  { %v862_v26 = vrot.slane %v861_v16, 4  ;;  %v3072_v44 = vld [vmem:[%s5353_s0 + $0x68] sm:$0xe]  ;;  %565 = vst.msk [vmem:[#allocation2 + $0xcc] sm:$0xf] %vm67_vm6, %v518_v36  ;;  %v1599_v54 = vrot.slane %v3071_v42, 5 }
  0xde   :  { %v843_v24 = vrot.slane %v841_v13, 4  ;;  %v3016_v53 = vld [vmem:[%s5353_s0 + $0x70] sm:$0xf]  ;;  %v3095_v56 = vrot.slane %v3072_v44, 9  ;;  %v2952_v58 = vld [vmem:[%s5353_s0 + $0x80] sm:$0xf] }
  0xdf   :  { %v617_v50 = vpop.permute.xlu2 %616  ;;  %v3496_v57 = vld [vmem:[#allocation2 + $0x90] sm:$0xf0]  ;;  %v867_v32 = vsel %vm3710_vm2, %v862_v26, %v866_v17  ;;  %v3180_v60 = vld [vmem:[#allocation2 + $0x88] sm:$0xf]  ;;  %v3497_v61 = vld [vmem:[#allocation2 + $0x98] sm:$0xf0] }
  0xe0   :  { %v615_v46 = vpop.permute.xlu0 %614  ;;  %v3489_v48 = vld [vmem:[#allocation2 + $0x5c] sm:$0xf]  ;;  %658 = vst.msk [vmem:[#allocation2 + $0x7c] sm:$0xf] %vm391_vm7, %v617_v50  ;;  %v847_v28 = vor.u32 %v846_v1, %v843_v24  ;;  %v3073_v50 = vld [vmem:[%s5353_s0 + $0x6c] sm:$0x1] }
  0xe1   :  { %657 = vst.msk [vmem:[#allocation2 + $0x68] sm:$0xf] %vm391_vm7, %v615_v46  ;;  %v3157_v49 = vor.u32 %v3489_v48, %v3154_v35  ;;  %v2953_v21 = vld [vmem:[%s5353_s0 + $0x84] sm:$0x1]  ;;  %v883_v63 = vshrl.u32 %v2952_v58, 16  ;;  %v886_v47 = vshll.u32 %v2952_v58, 16 }
  0xe2   :  { %v1452_v6 = vpop.permute.xlu1 %1451  ;;  %v3172_v7 = vld [vmem:[#allocation2 + $0x80] sm:$0xf]  ;;  %951 = vst.msk [vmem:[#allocation2 + $0xe4] sm:$0xf] %vm67_vm6, %v867_v32  ;;  %v848_v9 = vrot.slane %v847_v28, 4  ;;  %v892_v3 = vshll.u32 %v2953_v21, 16 }
  0xe3   :  { %2403 = vmatmul.bf16.gmra.mxu3 %v3157_v49  ;;  %1492 = vst.msk [vmem:[#allocation2 + $0x98] sm:$0xf] %vm391_vm7, %v1452_v6  ;;  %v3173_v15 = vor.u32 %v3496_v57, %v3172_v7  ;;  %v3094_v49 = vrot.slane %v3070_v41, 9  ;;  %v1603_v57 = vrot.slane %v3073_v50, 5  ;;  %v2950_v5 = vld [vmem:[%s5353_s0 + $0x78] sm:$0xf] }
  0xe4   :  { %v853_v37 = vsel %vm3710_vm2, %v848_v9, %v852_v27  ;;  %1176 = vst.msk [vmem:[#allocation2 + $0xe8] sm:$0xf] %vm67_vm6, %v3017_v40  ;;  %v885_v8 = vrot.slane %v883_v63, 4  ;;  %v888_v11 = vrot.slane %v886_v47, 5  ;;  %v2951_v13 = vld [vmem:[%s5353_s0 + $0x7c] sm:$0x1] }
  0xe5   :  { %950 = vst.msk [vmem:[#allocation2 + $0xd0] sm:$0xf] %vm67_vm6, %v853_v37  ;;  %v1600_v62 = vsel %vm3943_vm5, %v3094_v49, %v1599_v54  ;;  %v1604_v2 = vsel %vm3943_vm5, %v3095_v56, %v1603_v57  ;;  %v869_v14 = vshrl.u32 %v2950_v5, 16  ;;  %v872_v17 = vshll.u32 %v2950_v5, 16  ;;  %v430_v22 = vld [vmem:[%s5353_s0 + $0x68] sm:$0xe] }
  0xe6   :  { %1175 = vst.msk [vmem:[#allocation2 + $0xd4] sm:$0xf] %vm67_vm6, %v3016_v53  ;;  %v889_v16 = vor.u32 %v888_v11, %v885_v8  ;;  %v878_v18 = vshll.u32 %v2951_v13, 16  ;;  %v431_v1 = vld [vmem:[%s5353_s0 + $0x6c] sm:$0x1]  ;;  %v2905_v4 = vrot.slane %v430_v22, 9 }
  0xe7   :  { %v1103_v38 = vpop.permute.xlu2 %1102  ;;  %v3493_v0 = vld [vmem:[#allocation2 + $0x7c] sm:$0xf]  ;;  %1653 = vst.msk [vmem:[#allocation2 + $0xb0] sm:$0xf] %vm67_vm6, %v1600_v62  ;;  %v871_v24 = vrot.slane %v869_v14, 4  ;;  %v874_v27 = vrot.slane %v872_v17, 5 }
  0xe8   :  { %v1450_v20 = vpop.permute.xlu0 %1449  ;;  %v3146_v23 = vld [vmem:[#allocation2 + $0x64] sm:$0xf0]  ;;  %1141 = vst.msk [vmem:[#allocation2 + $0xbc] sm:$0xf] %vm391_vm7, %v1103_v38  ;;  %v890_v26 = vrot.slane %v889_v16, 4  ;;  %v521_v28 = vrot.slane %v431_v1, 5 }
  0xe9   :  { %1491 = vst.msk [vmem:[#allocation2 + $0x84] sm:$0xf] %vm391_vm7, %v1450_v20  ;;  %v3149_v25 = vor.u32 %v3488_v12, %v3146_v23  ;;  %v894_v12 = vrot.slane %v892_v3, 5  ;;  %v432_v29 = vld [vmem:[%s5353_s0 + $0x70] sm:$0xe]  ;;  %v875_v31 = vor.u32 %v874_v27, %v871_v24  ;;  %v880_v32 = vrot.slane %v878_v18, 5 }
  0xea   :  { %v1101_v34 = vpop.permute.xlu1 %1100  ;;  %v3174_v35 = vld [vmem:[#allocation2 + $0x94] sm:$0xf0]  ;;  %1654 = vst.msk [vmem:[#allocation2 + $0xc4] sm:$0xf] %vm67_vm6, %v1604_v2  ;;  %v433_v51 = vld [vmem:[%s5353_s0 + $0x74] sm:$0x1]  ;;  %v522_v9 = vsel %vm3943_vm5, %v2905_v4, %v521_v28 }
  0xeb   :  { %2305 = vmatmul.bf16.gmra.mxu1 %v3149_v25  ;;  %2359 = vmatmul.bf16.gmra.mxu2 %v3173_v15  ;;  %1140 = vst.msk [vmem:[#allocation2 + $0xa8] sm:$0xf] %vm391_vm7, %v1101_v34  ;;  %v895_v30 = vsel %vm3710_vm2, %v890_v26, %v894_v12  ;;  %v2906_v59 = vrot.slane %v432_v29, 9  ;;  %v525_v10 = vrot.slane %v433_v51, 5  ;;  %v876_v34 = vrot.slane %v875_v31, 4 }
  0xec   :  { %3408 = vmatmul.msk.bf16.gmra.mxu0 %vm2213_vm8, %v3161_v43  ;;  %v3181_v43 = vor.u32 %v3497_v61, %v3180_v60  ;;  %953 = vst.msk [vmem:[#allocation2 + $0x10c] sm:$0xf] %vm67_vm6, %v895_v30  ;;  %v3019_v36 = vld [vmem:[%s5353_s0 + $0x88] sm:$0xf]  ;;  %v3018_v41 = vld [vmem:[%s5353_s0 + $0x80] sm:$0xf] }
  0xed   :  { %566 = vst.msk [vmem:[#allocation2 + $0xe0] sm:$0xf] %vm67_vm6, %v522_v9  ;;  %v526_v37 = vsel %vm3943_vm5, %v2906_v59, %v525_v10  ;;  %v881_v40 = vsel %vm3710_vm2, %v876_v34, %v880_v32  ;;  %v3074_v42 = vld [vmem:[%s5353_s0 + $0x70] sm:$0xe]  ;;  %v3075_v44 = vld [vmem:[%s5353_s0 + $0x74] sm:$0x1] }
  0xee   :  { %567 = vst.msk [vmem:[#allocation2 + $0xf4] sm:$0xf] %vm67_vm6, %v526_v37  ;;  %v3076_v50 = vld [vmem:[%s5353_s0 + $0x78] sm:$0xe]  ;;  %v3077_v49 = vld [vmem:[%s5353_s0 + $0x7c] sm:$0x1] }
  0xef   :  { %v621_v48 = vpop.permute.xlu2 %620  ;;  %v3501_v55 = vld [vmem:[#allocation2 + $0xb8] sm:$0xf0]  ;;  %952 = vst.msk [vmem:[#allocation2 + $0xf8] sm:$0xf] %vm67_vm6, %v881_v40  ;;  %v3096_v54 = vrot.slane %v3074_v42, 9  ;;  %v3097_v56 = vrot.slane %v3076_v50, 9 }
  0xf0   :  { %v619_v45 = vpop.permute.xlu0 %618  ;;  %v3494_v46 = vld [vmem:[#allocation2 + $0x84] sm:$0xf]  ;;  %660 = vst.msk [vmem:[#allocation2 + $0xa4] sm:$0xf] %vm391_vm7, %v621_v48  ;;  %v1611_v57 = vrot.slane %v3077_v49, 5 }
  0xf1   :  { %659 = vst.msk [vmem:[#allocation2 + $0x90] sm:$0xf] %vm391_vm7, %v619_v45  ;;  %v3177_v52 = vor.u32 %v3494_v46, %v3174_v35  ;;  %v3200_v58 = vld [vmem:[#allocation2 + $0xb0] sm:$0xf]  ;;  %v3502_v60 = vld [vmem:[#allocation2 + $0xc0] sm:$0xf0] }
  0xf2   :  { %v1456_v6 = vpop.permute.xlu1 %1455  ;;  %v3192_v7 = vld [vmem:[#allocation2 + $0xa8] sm:$0xf]  ;;  %1178 = vst.msk [vmem:[#allocation2 + $0x110] sm:$0xf] %vm67_vm6, %v3019_v36  ;;  %v2956_v61 = vld [vmem:[%s5353_s0 + $0x90] sm:$0xf]  ;;  %v1612_v47 = vsel %vm3943_vm5, %v3097_v56, %v1611_v57 }
  0xf3   :  { %2408 = vmatmul.bf16.gmra.mxu3 %v3177_v52  ;;  %1494 = vst.msk [vmem:[#allocation2 + $0xc0] sm:$0xf] %vm391_vm7, %v1456_v6  ;;  %v3193_v15 = vor.u32 %v3501_v55, %v3192_v7  ;;  %v1607_v55 = vrot.slane %v3075_v44, 5  ;;  %v2957_v62 = vld [vmem:[%s5353_s0 + $0x94] sm:$0x1]  ;;  %v914_v2 = vshll.u32 %v2956_v61, 16 }
  0xf4   :  { %1177 = vst.msk [vmem:[#allocation2 + $0xfc] sm:$0xf] %vm67_vm6, %v3018_v41  ;;  %v2954_v3 = vld [vmem:[%s5353_s0 + $0x88] sm:$0xf]  ;;  %v920_v7 = vshll.u32 %v2957_v62, 16 }
  0xf5   :  { %v1608_v63 = vsel %vm3943_vm5, %v3096_v54, %v1607_v55  ;;  %v897_v8 = vshrl.u32 %v2954_v3, 16  ;;  %v916_v13 = vrot.slane %v914_v2, 5  ;;  %v2955_v14 = vld [vmem:[%s5353_s0 + $0x8c] sm:$0x1]  ;;  %1656 = vst.msk [vmem:[#allocation2 + $0xec] sm:$0xf] %vm67_vm6, %v1612_v47 }
  0xf6   :  { %1655 = vst.msk [vmem:[#allocation2 + $0xd8] sm:$0xf] %vm67_vm6, %v1608_v63  ;;  %v900_v17 = vshll.u32 %v2954_v3, 16  ;;  %v906_v18 = vshll.u32 %v2955_v14, 16  ;;  %v434_v24 = vld [vmem:[%s5353_s0 + $0x78] sm:$0xe] }
  0xf7   :  { %v1107_v38 = vpop.permute.xlu2 %1106  ;;  %v3498_v21 = vld [vmem:[#allocation2 + $0xa4] sm:$0xf]  ;;  %v899_v16 = vrot.slane %v897_v8, 4  ;;  %v435_v1 = vld [vmem:[%s5353_s0 + $0x7c] sm:$0x1]  ;;  %v2907_v27 = vrot.slane %v434_v24, 9 }
  0xf8   :  { %v1454_v20 = vpop.permute.xlu0 %1453  ;;  %v3166_v23 = vld [vmem:[#allocation2 + $0x8c] sm:$0xf0]  ;;  %1143 = vst.msk [vmem:[#allocation2 + $0xe4] sm:$0xf] %vm391_vm7, %v1107_v38  ;;  %v529_v28 = vrot.slane %v435_v1, 5  ;;  %v908_v30 = vrot.slane %v906_v18, 5 }
  0xf9   :  { %1493 = vst.msk [vmem:[#allocation2 + $0xac] sm:$0xf] %vm391_vm7, %v1454_v20  ;;  %v3169_v25 = vor.u32 %v3493_v0, %v3166_v23  ;;  %v911_v0 = vshrl.u32 %v2956_v61, 16  ;;  %v3201_v23 = vor.u32 %v3502_v60, %v3200_v58  ;;  %v3021_v31 = vld [vmem:[%s5353_s0 + $0x98] sm:$0xf] }
  0xfa   :  { %v1105_v33 = vpop.permute.xlu1 %1104  ;;  %v3194_v35 = vld [vmem:[#allocation2 + $0xbc] sm:$0xf0]  ;;  %v530_v59 = vsel %vm3943_vm5, %v2907_v27, %v529_v28  ;;  %1180 = vst.msk [vmem:[#allocation2 + $0x138] sm:$0xf] %vm67_vm6, %v3021_v31  ;;  %v3079_v9 = vld [vmem:[%s5353_s0 + $0x84] sm:$0x1] }
  0xfb   :  { %2310 = vmatmul.bf16.gmra.mxu1 %v3169_v25  ;;  %2364 = vmatmul.bf16.gmra.mxu2 %v3193_v15  ;;  %1142 = vst.msk [vmem:[#allocation2 + $0xd0] sm:$0xf] %vm391_vm7, %v1105_v33  ;;  %v913_v12 = vrot.slane %v911_v0, 4  ;;  %v922_v15 = vrot.slane %v920_v7, 5  ;;  %v902_v25 = vrot.slane %v900_v17, 5  ;;  %v1615_v42 = vrot.slane %v3079_v9, 5 }
  0xfc   :  { %3409 = vmatmul.msk.bf16.gmra.mxu0 %vm2213_vm8, %v3181_v43  ;;  %v3078_v32 = vld [vmem:[%s5353_s0 + $0x80] sm:$0xe]  ;;  %v3020_v37 = vld [vmem:[%s5353_s0 + $0x90] sm:$0xf]  ;;  %v3080_v36 = vld [vmem:[%s5353_s0 + $0x88] sm:$0xe] }
  0xfd   :  { %v917_v38 = vor.u32 %v916_v13, %v913_v12  ;;  %v903_v29 = vor.u32 %v902_v25, %v899_v16  ;;  %v3098_v34 = vrot.slane %v3078_v32, 9  ;;  %568 = vst.msk [vmem:[#allocation2 + $0x108] sm:$0xf] %vm67_vm6, %v530_v59  ;;  %v3081_v41 = vld [vmem:[%s5353_s0 + $0x8c] sm:$0x1]  ;;  %v3099_v44 = vrot.slane %v3080_v36, 9 }
  0xfe   :  { %v1619_v50 = vrot.slane %v3081_v41, 5  ;;  %v437_v55 = vld [vmem:[%s5353_s0 + $0x84] sm:$0x1]  ;;  %v3220_v57 = vld [vmem:[#allocation2 + $0xd8] sm:$0xf] }
  0xff   :  { %v625_v48 = vpop.permute.xlu2 %624  ;;  %v3506_v53 = vld [vmem:[#allocation2 + $0xe0] sm:$0xf0]  ;;  %v918_v26 = vrot.slane %v917_v38, 4  ;;  %v904_v33 = vrot.slane %v903_v29, 4  ;;  %v1616_v19 = vsel %vm3943_vm5, %v3098_v34, %v1615_v42  ;;  %v3507_v58 = vld [vmem:[#allocation2 + $0xe8] sm:$0xf0] }
 0x100   :  { %v623_v45 = vpop.permute.xlu0 %622  ;;  %v3499_v46 = vld [vmem:[#allocation2 + $0xac] sm:$0xf]  ;;  %662 = vst.msk [vmem:[#allocation2 + $0xcc] sm:$0xf] %vm391_vm7, %v625_v48  ;;  %v1620_v54 = vsel %vm3943_vm5, %v3099_v44, %v1619_v50  ;;  %v533_v60 = vrot.slane %v437_v55, 5 }
 0x101   :  { %661 = vst.msk [vmem:[#allocation2 + $0xb8] sm:$0xf] %vm391_vm7, %v623_v45  ;;  %v3197_v52 = vor.u32 %v3499_v46, %v3194_v35  ;;  %v923_v51 = vsel %vm3710_vm2, %v918_v26, %v922_v15  ;;  %v909_v40 = vsel %vm3710_vm2, %v904_v33, %v908_v30  ;;  %v438_v61 = vld [vmem:[%s5353_s0 + $0x88] sm:$0xe]  ;;  %v3085_v12 = vld [vmem:[%s5353_s0 + $0x9c] sm:$0x1]  ;;  %v3221_v15 = vor.u32 %v3507_v58, %v3220_v57 }
 0x102   :  { %v1460_v5 = vpop.permute.xlu1 %1459  ;;  %v3212_v6 = vld [vmem:[#allocation2 + $0xd0] sm:$0xf]  ;;  %955 = vst.msk [vmem:[#allocation2 + $0x134] sm:$0xf] %vm67_vm6, %v923_v51  ;;  %v2909_v63 = vrot.slane %v438_v61, 9 }
 0x103   :  { %2413 = vmatmul.bf16.gmra.mxu3 %v3197_v52  ;;  %1496 = vst.msk [vmem:[#allocation2 + $0xe8] sm:$0xf] %vm391_vm7, %v1460_v5  ;;  %v3213_v11 = vor.u32 %v3506_v53, %v3212_v6  ;;  %v436_v53 = vld [vmem:[%s5353_s0 + $0x80] sm:$0xe]  ;;  %v3082_v5 = vld [vmem:[%s5353_s0 + $0x90] sm:$0xe] }
 0x104   :  { %954 = vst.msk [vmem:[#allocation2 + $0x120] sm:$0xf] %vm67_vm6, %v909_v40  ;;  %v2908_v56 = vrot.slane %v436_v53, 9  ;;  %v3083_v6 = vld [vmem:[%s5353_s0 + $0x94] sm:$0x1]  ;;  %v3100_v17 = vrot.slane %v3082_v5, 9 }
 0x105   :  { %1179 = vst.msk [vmem:[#allocation2 + $0x124] sm:$0xf] %vm67_vm6, %v3020_v37  ;;  %v1623_v18 = vrot.slane %v3083_v6, 5 }
 0x106   :  { %1657 = vst.msk [vmem:[#allocation2 + $0x100] sm:$0xf] %vm67_vm6, %v1616_v19  ;;  %v534_v2 = vsel %vm3943_vm5, %v2908_v56, %v533_v60 }
 0x107   :  { %v1111_v43 = vpop.permute.xlu2 %1110  ;;  %v3503_v62 = vld [vmem:[#allocation2 + $0xcc] sm:$0xf]  ;;  %1658 = vst.msk [vmem:[#allocation2 + $0x114] sm:$0xf] %vm67_vm6, %v1620_v54  ;;  %v5031_v29 = vpop.f32.mrf.mxu1 }
 0x108   :  { %v1458_v22 = vpop.permute.xlu0 %1457  ;;  %v3186_v20 = vld [vmem:[#allocation2 + $0xb4] sm:$0xf0]  ;;  %1145 = vst.msk [vmem:[#allocation2 + $0x10c] sm:$0xf] %vm391_vm7, %v1111_v43  ;;  %v1624_v43 = vsel %vm3943_vm5, %v3100_v17, %v1623_v18 }
 0x109   :  { %1495 = vst.msk [vmem:[#allocation2 + $0xd4] sm:$0xf] %vm391_vm7, %v1458_v22  ;;  %v3189_v4 = vor.u32 %v3498_v21, %v3186_v20  ;;  %v439_v21 = vld [vmem:[%s5353_s0 + $0x8c] sm:$0x1] }
 0x10a   :  { %v1109_v10 = vpop.permute.xlu1 %1108  ;;  %v3214_v35 = vld [vmem:[#allocation2 + $0xe4] sm:$0xf0]  ;;  %v537_v3 = vrot.slane %v439_v21, 5  ;;  %569 = vst.msk [vmem:[#allocation2 + $0x11c] sm:$0xf] %vm67_vm6, %v534_v2 }
 0x10b   :  { %2315 = vmatmul.bf16.gmra.mxu1 %v3189_v4  ;;  %2369 = vmatmul.bf16.gmra.mxu2 %v3213_v11  ;;  %1144 = vst.msk [vmem:[#allocation2 + $0xf8] sm:$0xf] %vm391_vm7, %v1109_v10  ;;  %v3084_v11 = vld [vmem:[%s5353_s0 + $0x98] sm:$0xe] }
 0x10c   :  { %3410 = vmatmul.msk.bf16.gmra.mxu0 %vm2213_vm8, %v3201_v23  ;;  %v538_v8 = vsel %vm3943_vm5, %v2909_v63, %v537_v3  ;;  %v3101_v20 = vrot.slane %v3084_v11, 9  ;;  %v1627_v23 = vrot.slane %v3085_v12, 5  ;;  %1659 = vst.msk [vmem:[#allocation2 + $0x128] sm:$0xf] %vm67_vm6, %v1624_v43  ;;  %v5059_v11 = vld [vmem:[%s5355_s2] ss:$0 sm:$0xff] }
 0x10d   :  { %570 = vst.msk [vmem:[#allocation2 + $0x130] sm:$0xf] %vm67_vm6, %v538_v8  ;;  %v3240_v51 = vld [vmem:[#allocation2 + $0x100] sm:$0xf] }
 0x10e   :  { %v1628_v38 = vsel %vm3943_vm5, %v3101_v20, %v1627_v23  ;;  %v3512_v59 = vld [vmem:[#allocation2 + $0x110] sm:$0xf0] }
 0x10f   :  { %v629_v48 = vpop.permute.xlu2 %628  ;;  %v3511_v49 = vld [vmem:[#allocation2 + $0x108] sm:$0xf0]  ;;  %1660 = vst.msk [vmem:[#allocation2 + $0x13c] sm:$0xf] %vm67_vm6, %v1628_v38  ;;  %v3241_v36 = vor.u32 %v3512_v59, %v3240_v51  ;;  %v5040_v42 = vpop.f32.mrf.mxu1  ;;  %v3414_v59 = vld [vmem:[%s5356_s3 + $0x8] sm:$0xf] }
 0x110   :  { %v627_v45 = vpop.permute.xlu0 %626  ;;  %v3504_v46 = vld [vmem:[#allocation2 + $0xd4] sm:$0xf]  ;;  %664 = vst.msk [vmem:[#allocation2 + $0xf4] sm:$0xf] %vm391_vm7, %v629_v48 }
 0x111   :  { %663 = vst.msk [vmem:[#allocation2 + $0xe0] sm:$0xf] %vm391_vm7, %v627_v45  ;;  %v3217_v52 = vor.u32 %v3504_v46, %v3214_v35 }
 0x112   :  { %v1464_v47 = vpop.permute.xlu1 %1463  ;;  %v3232_v0 = vld [vmem:[#allocation2 + $0xf8] sm:$0xf] }
 0x113   :  { %2418 = vmatmul.bf16.gmra.mxu3 %v3217_v52  ;;  %1498 = vst.msk [vmem:[#allocation2 + $0x110] sm:$0xf] %vm391_vm7, %v1464_v47  ;;  %v3233_v7 = vor.u32 %v3511_v49, %v3232_v0  ;;  %v3260_v53 = vld [vmem:[#allocation2 + $0x128] sm:$0xf] }
 0x116   :  { %v3517_v49 = vld [vmem:[#allocation2 + $0x138] sm:$0xf0] }
 0x117   :  { %v1115_v16 = vpop.permute.xlu2 %1114  ;;  %v3508_v33 = vld [vmem:[#allocation2 + $0xf4] sm:$0xf]  ;;  %v3261_v60 = vor.u32 %v3517_v49, %v3260_v53 }
 0x118   :  { %v1462_v13 = vpop.permute.xlu0 %1461  ;;  %v3206_v14 = vld [vmem:[#allocation2 + $0xdc] sm:$0xf0]  ;;  %1147 = vst.msk [vmem:[#allocation2 + $0x134] sm:$0xf] %vm391_vm7, %v1115_v16  ;;  %v5027_v25 = vpop.f32.mrf.mxu3 }
 0x119   :  { %1497 = vst.msk [vmem:[#allocation2 + $0xfc] sm:$0xf] %vm391_vm7, %v1462_v13  ;;  %v3209_v22 = vor.u32 %v3503_v62, %v3206_v14 }
 0x11a   :  { %v1113_v24 = vpop.permute.xlu1 %1112  ;;  %v3234_v4 = vld [vmem:[#allocation2 + $0x10c] sm:$0xf0] }
 0x11b   :  { %2320 = vmatmul.bf16.gmra.mxu1 %v3209_v22  ;;  %2374 = vmatmul.bf16.gmra.mxu2 %v3233_v7  ;;  %v5024_v1 = vpop.f32.mrf.mxu2  ;;  %1146 = vst.msk [vmem:[#allocation2 + $0x120] sm:$0xf] %vm391_vm7, %v1113_v24 }
 0x11c   :  { %3411 = vmatmul.msk.bf16.gmra.mxu0 %vm2213_vm8, %v3221_v15 }
 0x11d   :  { %v2247_v9 = vpop.f32.mrf.mxu0 }
 0x11f   :  { %v633_v28 = vpop.permute.xlu2 %632  ;;  %v3516_v30 = vld [vmem:[#allocation2 + $0x130] sm:$0xf0] }
 0x120   :  { %v631_v26 = vpop.permute.xlu0 %630  ;;  %v3509_v27 = vld [vmem:[#allocation2 + $0xfc] sm:$0xf]  ;;  %666 = vst.msk [vmem:[#allocation2 + $0x11c] sm:$0xf] %vm391_vm7, %v633_v28  ;;  %v5037_v41 = vpop.f32.mrf.mxu3 }
 0x121   :  { %665 = vst.msk [vmem:[#allocation2 + $0x108] sm:$0xf] %vm391_vm7, %v631_v26  ;;  %v3237_v39 = vor.u32 %v3509_v27, %v3234_v4 }
 0x122   :  { %v1468_v31 = vpop.permute.xlu1 %1467  ;;  %v3252_v32 = vld [vmem:[#allocation2 + $0x120] sm:$0xf] }
 0x123   :  { %2423 = vmatmul.bf16.gmra.mxu3 %v3237_v39  ;;  %v5033_v10 = vpop.f32.mrf.mxu2  ;;  %1500 = vst.msk [vmem:[#allocation2 + $0x138] sm:$0xf] %vm391_vm7, %v1468_v31  ;;  %v3253_v34 = vor.u32 %v3516_v30, %v3252_v32 }
 0x125   :  { %v2249_v46 = vpop.f32.mrf.mxu0 }
 0x127   :  { %v3513_v56 = vld [vmem:[#allocation2 + $0x11c] sm:$0xf] }
 0x128   :  { %v1466_v35 = vpop.permute.xlu0 %1465  ;;  %v3226_v37 = vld [vmem:[#allocation2 + $0x104] sm:$0xf0]  ;;  %v5045_v19 = vpop.f32.mrf.mxu3 }
 0x129   :  { %1499 = vst.msk [vmem:[#allocation2 + $0x124] sm:$0xf] %vm391_vm7, %v1466_v35  ;;  %v3229_v40 = vor.u32 %v3508_v33, %v3226_v37  ;;  %v3416_v33 = vld [vmem:[%s5356_s3 + $0xc] sm:$0x1] }
 0x12a   :  { %v3254_v45 = vld [vmem:[#allocation2 + $0x134] sm:$0xf0] }
 0x12b   :  { %2325 = vmatmul.bf16.gmra.mxu1 %v3229_v40  ;;  %2379 = vmatmul.bf16.gmra.mxu2 %v3253_v34 }
 0x12c   :  { %3412 = vmatmul.msk.bf16.gmra.mxu0 %vm2213_vm8, %v3241_v36 }
 0x12e   :  { %v5042_v44 = vpop.f32.mrf.mxu2 }
 0x130   :  { %v635_v48 = vpop.permute.xlu0 %634  ;;  %v3514_v50 = vld [vmem:[#allocation2 + $0x124] sm:$0xf]  ;;  %v5047_v54 = vpop.f32.mrf.mxu1 }
 0x131   :  { %667 = vst.msk [vmem:[#allocation2 + $0x130] sm:$0xf] %vm391_vm7, %v635_v48  ;;  %v3257_v52 = vor.u32 %v3514_v50, %v3254_v45  ;;  %v5052_v62 = vpop.f32.mrf.mxu3 }
 0x133   :  { %2428 = vmatmul.bf16.gmra.mxu3 %v3257_v52 }
 0x136   :  { %v5049_v55 = vpop.f32.mrf.mxu2 }
 0x138   :  { %v2252_v57 = vpop.f32.mrf.mxu0  ;;  %v3246_v58 = vld [vmem:[#allocation2 + $0x12c] sm:$0xf0]  ;;  %v5054_v63 = vpop.f32.mrf.mxu1 }
 0x139   :  { %v3249_v61 = vor.u32 %v3513_v56, %v3246_v58 }
 0x13b   :  { %2330 = vmatmul.bf16.gmra.mxu1 %v3249_v61 }
 0x13c   :  { %3413 = vmatmul.msk.bf16.gmra.mxu0 %vm2213_vm8, %v3261_v60 }
 0x13e   :  { %v2345_v21 = vpop.f32.mrf.mxu2 }
 0x140   :  { %v2254_v47 = vpop.f32.mrf.mxu0 }
 0x146   :  { %v2347_v0 = vpop.f32.mrf.mxu2  ;;  %v2394_v2 = vpop.f32.mrf.mxu3 }
 0x148   :  { %v2296_v3 = vpop.f32.mrf.mxu1 }
 0x149   :  { %v2297_v5 = vadd.f32 %v2296_v3, %v2247_v9  ;;  %v2443_v6 = vpop.f32.mrf.mxu0 }
 0x14b   :  { %v2346_v7 = vadd.f32 %v2345_v21, %v2297_v5 }
 0x14d   :  { %v2395_v8 = vadd.f32 %v2394_v2, %v2346_v7  ;;  %v3420_v2 = vld [vmem:[%s5356_s3 + $0x14] sm:$0x1] }
 0x14e   :  { %v2350_v12 = vpop.f32.mrf.mxu2  ;;  %v2396_v13 = vpop.f32.mrf.mxu3 }
 0x14f   :  { %v2444_v14 = vadd.f32 %v2443_v6, %v2395_v8 }
 0x150   :  { %v2298_v15 = vpop.f32.mrf.mxu1 }
 0x151   :  { %v2538_v16 = vadd.f32 %v5059_v11, %v2444_v14  ;;  %v2299_v17 = vadd.f32 %v2298_v15, %v2249_v46  ;;  %v2445_v18 = vpop.f32.mrf.mxu0 }
 0x153   :  { %v2554_v22 = vmax.f32 %v2538_v16, 0.0  ;;  %v2348_v20 = vadd.f32 %v2347_v0, %v2299_v17  ;;  %v3418_v0 = vld [vmem:[%s5356_s3 + $0x10] sm:$0xf] }
 0x155   :  { %v2570_v23 = vpack.c.bf16 %v2554_v22, %v2554_v22  ;;  %v2397_v43 = vadd.f32 %v2396_v13, %v2348_v20 }
 0x156   :  { %v2352_v38 = vpop.f32.mrf.mxu2  ;;  %v2399_v24 = vpop.f32.mrf.mxu3 }
 0x157   :  { %v2627_v4 = vshrl.u32 %v2570_v23, 16  ;;  %v2446_v26 = vadd.f32 %v2445_v18, %v2397_v43  ;;  %v2630_v28 = vshll.u32 %v2570_v23, 16 }
 0x158   :  { %v2301_v27 = vpop.f32.mrf.mxu1 }
 0x159   :  { %v2629_v39 = vrot.slane %v2627_v4, 7  ;;  %v2539_v31 = vadd.f32 %v5059_v11, %v2446_v26  ;;  %v2302_v32 = vadd.f32 %v2301_v27, %v2252_v57  ;;  %v2448_v51 = vpop.f32.mrf.mxu0  ;;  %v3424_v4 = vld [vmem:[%s5356_s3 + $0x1c] sm:$0x1] }
 0x15b   :  { %v2632_v34 = vor.u32 %v2630_v28, %v2629_v39  ;;  %v2633_v35 = vrot.slane %v2629_v39, 4  ;;  %v2555_v37 = vmax.f32 %v2539_v31, 0.0  ;;  %v2351_v36 = vadd.f32 %v2350_v12, %v2302_v32 }
 0x15d   :  { %v2791_v40 = vsel %vm5062_vm13, %v2632_v34, %v3414_v59  ;;  %v2797_v45 = vsel %vm5070_vm14, %v2633_v35, %v3416_v33  ;;  %v2571_v46 = vpack.c.bf16 %v2555_v37, %v2555_v37  ;;  %v2400_v48 = vadd.f32 %v2399_v24, %v2351_v36  ;;  %v3422_v24 = vld [vmem:[%s5356_s3 + $0x18] sm:$0xf] }
 0x15e   :  { %3415 = vst [vmem:[%s5356_s3 + $0x8] sm:$0xf] %v2791_v40  ;;  %v2355_v50 = vpop.f32.mrf.mxu2  ;;  %v2401_v52 = vpop.f32.mrf.mxu3 }
 0x15f   :  { %3417 = vst [vmem:[%s5356_s3 + $0xc] sm:$0x1] %v2797_v45  ;;  %v2635_v53 = vshrl.u32 %v2571_v46, 16  ;;  %v2449_v49 = vadd.f32 %v2448_v51, %v2400_v48  ;;  %v2638_v58 = vshll.u32 %v2571_v46, 16 }
 0x160   :  { %v2303_v56 = vpop.f32.mrf.mxu1 }
 0x161   :  { %v2637_v57 = vrot.slane %v2635_v53, 7  ;;  %v2540_v60 = vadd.f32 %v5059_v11, %v2449_v49  ;;  %v2304_v61 = vadd.f32 %v2303_v56, %v2254_v47  ;;  %v2450_v21 = vpop.f32.mrf.mxu0 }
 0x163   :  { %v2640_v3 = vor.u32 %v2638_v58, %v2637_v57  ;;  %v2641_v5 = vrot.slane %v2637_v57, 4  ;;  %v2556_v6 = vmax.f32 %v2540_v60, 0.0  ;;  %v2353_v7 = vadd.f32 %v2352_v38, %v2304_v61 }
 0x165   :  { %v2800_v8 = vsel %vm5062_vm13, %v2640_v3, %v3418_v0  ;;  %v2803_v12 = vsel %vm5070_vm14, %v2641_v5, %v3420_v2  ;;  %v2572_v47 = vpack.c.bf16 %v2556_v6, %v2556_v6  ;;  %v2402_v13 = vadd.f32 %v2401_v52, %v2353_v7  ;;  %v3428_v52 = vld [vmem:[%s5356_s3 + $0x24] sm:$0x1] }
 0x166   :  { %3419 = vst [vmem:[%s5356_s3 + $0x10] sm:$0xf] %v2800_v8  ;;  %v2357_v14 = vpop.f32.mrf.mxu2  ;;  %v2404_v15 = vpop.f32.mrf.mxu3 }
 0x167   :  { %3421 = vst [vmem:[%s5356_s3 + $0x14] sm:$0x1] %v2803_v12  ;;  %v2643_v16 = vshrl.u32 %v2572_v47, 16  ;;  %v2451_v17 = vadd.f32 %v2450_v21, %v2402_v13  ;;  %v2646_v20 = vshll.u32 %v2572_v47, 16  ;;  %v3430_v13 = vld [vmem:[%s5356_s3 + $0x28] sm:$0xf] }
 0x168   :  { %v2306_v18 = vpop.f32.mrf.mxu1 }
 0x169   :  { %v2645_v22 = vrot.slane %v2643_v16, 7  ;;  %v2541_v23 = vadd.f32 %v5059_v11, %v2451_v17  ;;  %v2307_v43 = vadd.f32 %v2306_v18, %v5031_v29  ;;  %v2453_v38 = vpop.f32.mrf.mxu0 }
 0x16b   :  { %v2648_v26 = vor.u32 %v2646_v20, %v2645_v22  ;;  %v2649_v27 = vrot.slane %v2645_v22, 4  ;;  %v2557_v39 = vmax.f32 %v2541_v23, 0.0  ;;  %v2356_v28 = vadd.f32 %v2355_v50, %v2307_v43  ;;  %v3426_v50 = vld [vmem:[%s5356_s3 + $0x20] sm:$0xf] }
 0x16d   :  { %v2806_v31 = vsel %vm5062_vm13, %v2648_v26, %v3422_v24  ;;  %v2809_v32 = vsel %vm5070_vm14, %v2649_v27, %v3424_v4  ;;  %v2573_v29 = vpack.c.bf16 %v2557_v39, %v2557_v39  ;;  %v2405_v51 = vadd.f32 %v2404_v15, %v2356_v28 }
 0x16e   :  { %3423 = vst [vmem:[%s5356_s3 + $0x18] sm:$0xf] %v2806_v31  ;;  %v2360_v59 = vpop.f32.mrf.mxu2  ;;  %v2406_v33 = vpop.f32.mrf.mxu3 }
 0x16f   :  { %3425 = vst [vmem:[%s5356_s3 + $0x1c] sm:$0x1] %v2809_v32  ;;  %v2651_v34 = vshrl.u32 %v2573_v29, 16  ;;  %v2454_v35 = vadd.f32 %v2453_v38, %v2405_v51  ;;  %v2654_v40 = vshll.u32 %v2573_v29, 16  ;;  %v3434_v29 = vld [vmem:[%s5356_s3 + $0x30] sm:$0xf] }
 0x170   :  { %v2308_v37 = vpop.f32.mrf.mxu1  ;;  %v3436_v51 = vld [vmem:[%s5356_s3 + $0x34] sm:$0x1] }
 0x171   :  { %v2653_v36 = vrot.slane %v2651_v34, 7  ;;  %v2542_v45 = vadd.f32 %v5059_v11, %v2454_v35  ;;  %v2309_v46 = vadd.f32 %v2308_v37, %v5040_v42  ;;  %v2455_v48 = vpop.f32.mrf.mxu0 }
 0x173   :  { %v2656_v53 = vor.u32 %v2654_v40, %v2653_v36  ;;  %v2657_v49 = vrot.slane %v2653_v36, 4  ;;  %v2558_v56 = vmax.f32 %v2542_v45, 0.0  ;;  %v2358_v57 = vadd.f32 %v2357_v14, %v2309_v46  ;;  %v3432_v14 = vld [vmem:[%s5356_s3 + $0x2c] sm:$0x1] }
 0x175   :  { %v2812_v58 = vsel %vm5062_vm13, %v2656_v53, %v3426_v50  ;;  %v2815_v60 = vsel %vm5070_vm14, %v2657_v49, %v3428_v52  ;;  %v2574_v42 = vpack.c.bf16 %v2558_v56, %v2558_v56  ;;  %v2407_v61 = vadd.f32 %v2406_v33, %v2358_v57 }
 0x176   :  { %3427 = vst [vmem:[%s5356_s3 + $0x20] sm:$0xf] %v2812_v58  ;;  %v2362_v21 = vpop.f32.mrf.mxu2  ;;  %v2409_v0 = vpop.f32.mrf.mxu3 }
 0x177   :  { %3429 = vst [vmem:[%s5356_s3 + $0x24] sm:$0x1] %v2815_v60  ;;  %v2659_v2 = vshrl.u32 %v2574_v42, 16  ;;  %v2456_v3 = vadd.f32 %v2455_v48, %v2407_v61  ;;  %v2662_v7 = vshll.u32 %v2574_v42, 16  ;;  %v3438_v60 = vld [vmem:[%s5356_s3 + $0x38] sm:$0xf] }
 0x178   :  { %v2311_v5 = vpop.f32.mrf.mxu1  ;;  %v3440_v42 = vld [vmem:[%s5356_s3 + $0x3c] sm:$0x1] }
 0x179   :  { %v2661_v6 = vrot.slane %v2659_v2, 7  ;;  %v2543_v8 = vadd.f32 %v5059_v11, %v2456_v3  ;;  %v2312_v12 = vadd.f32 %v2311_v5, %v5047_v54  ;;  %v2458_v47 = vpop.f32.mrf.mxu0 }
 0x17b   :  { %v2664_v15 = vor.u32 %v2662_v7, %v2661_v6  ;;  %v2665_v16 = vrot.slane %v2661_v6, 4  ;;  %v2559_v17 = vmax.f32 %v2543_v8, 0.0  ;;  %v2361_v18 = vadd.f32 %v2360_v59, %v2312_v12 }
 0x17d   :  { %v2818_v22 = vsel %vm5062_vm13, %v2664_v15, %v3430_v13  ;;  %v2821_v20 = vsel %vm5070_vm14, %v2665_v16, %v3432_v14  ;;  %v2575_v54 = vpack.c.bf16 %v2559_v17, %v2559_v17  ;;  %v2410_v23 = vadd.f32 %v2409_v0, %v2361_v18 }
 0x17e   :  { %3431 = vst [vmem:[%s5356_s3 + $0x28] sm:$0xf] %v2818_v22  ;;  %v2365_v43 = vpop.f32.mrf.mxu2  ;;  %v2411_v38 = vpop.f32.mrf.mxu3  ;;  %v3442_v22 = vld [vmem:[%s5356_s3 + $0x40] sm:$0xf] }
 0x17f   :  { %3433 = vst [vmem:[%s5356_s3 + $0x2c] sm:$0x1] %v2821_v20  ;;  %v2667_v24 = vshrl.u32 %v2575_v54, 16  ;;  %v2459_v4 = vadd.f32 %v2458_v47, %v2410_v23  ;;  %v2670_v39 = vshll.u32 %v2575_v54, 16  ;;  %v3444_v20 = vld [vmem:[%s5356_s3 + $0x44] sm:$0x1] }
 0x180   :  { %v2313_v26 = vpop.f32.mrf.mxu1 }
 0x181   :  { %v2669_v27 = vrot.slane %v2667_v24, 7  ;;  %v2544_v28 = vadd.f32 %v5059_v11, %v2459_v4  ;;  %v2314_v31 = vadd.f32 %v2313_v26, %v5054_v63  ;;  %v2460_v32 = vpop.f32.mrf.mxu0 }
 0x183   :  { %v2672_v59 = vor.u32 %v2670_v39, %v2669_v27  ;;  %v2673_v33 = vrot.slane %v2669_v27, 4  ;;  %v2560_v34 = vmax.f32 %v2544_v28, 0.0  ;;  %v2363_v35 = vadd.f32 %v2362_v21, %v2314_v31 }
 0x185   :  { %v2824_v37 = vsel %vm5062_vm13, %v2672_v59, %v3434_v29  ;;  %v2827_v36 = vsel %vm5070_vm14, %v2673_v33, %v3436_v51  ;;  %v2576_v63 = vpack.c.bf16 %v2560_v34, %v2560_v34  ;;  %v2412_v40 = vadd.f32 %v2411_v38, %v2363_v35  ;;  %v3446_v34 = vld [vmem:[%s5356_s3 + $0x58] sm:$0xf]  ;;  %v3448_v35 = vld [vmem:[%s5356_s3 + $0x5c] sm:$0x1] }
 0x186   :  { %3435 = vst [vmem:[%s5356_s3 + $0x30] sm:$0xf] %v2824_v37  ;;  %v2367_v45 = vpop.f32.mrf.mxu2  ;;  %v2414_v46 = vpop.f32.mrf.mxu3 }
 0x187   :  { %3437 = vst [vmem:[%s5356_s3 + $0x34] sm:$0x1] %v2827_v36  ;;  %v2675_v48 = vshrl.u32 %v2576_v63, 16  ;;  %v2461_v50 = vadd.f32 %v2460_v32, %v2412_v40  ;;  %v2678_v49 = vshll.u32 %v2576_v63, 16 }
 0x188   :  { %v2316_v52 = vpop.f32.mrf.mxu1 }
 0x189   :  { %v2677_v53 = vrot.slane %v2675_v48, 7  ;;  %v2545_v56 = vadd.f32 %v5059_v11, %v2461_v50  ;;  %v2317_v57 = vadd.f32 %v2316_v52, %v5024_v1  ;;  %v2463_v58 = vpop.f32.mrf.mxu0 }
 0x18b   :  { %v2680_v61 = vor.u32 %v2678_v49, %v2677_v53  ;;  %v2681_v21 = vrot.slane %v2677_v53, 4  ;;  %v2561_v0 = vmax.f32 %v2545_v56, 0.0  ;;  %v2366_v2 = vadd.f32 %v2365_v43, %v2317_v57 }
 0x18d   :  { %v2830_v3 = vsel %vm5062_vm13, %v2680_v61, %v3438_v60  ;;  %v2833_v5 = vsel %vm5070_vm14, %v2681_v21, %v3440_v42  ;;  %v2577_v1 = vpack.c.bf16 %v2561_v0, %v2561_v0  ;;  %v2415_v6 = vadd.f32 %v2414_v46, %v2366_v2  ;;  %v3450_v21 = vld [vmem:[%s5356_s3 + $0x60] sm:$0xf]  ;;  %v3452_v0 = vld [vmem:[%s5356_s3 + $0x64] sm:$0x1] }
 0x18e   :  { %3439 = vst [vmem:[%s5356_s3 + $0x38] sm:$0xf] %v2830_v3  ;;  %v2416_v7 = vpop.f32.mrf.mxu3  ;;  %v2370_v47 = vpop.f32.mrf.mxu2 }
 0x18f   :  { %3441 = vst [vmem:[%s5356_s3 + $0x3c] sm:$0x1] %v2833_v5  ;;  %v2683_v8 = vshrl.u32 %v2577_v1, 16  ;;  %v2464_v12 = vadd.f32 %v2463_v58, %v2415_v6  ;;  %v2686_v15 = vshll.u32 %v2577_v1, 16 }
 0x190   :  { %v2318_v13 = vpop.f32.mrf.mxu1 }
 0x191   :  { %v2685_v14 = vrot.slane %v2683_v8, 7  ;;  %v2546_v16 = vadd.f32 %v5059_v11, %v2464_v12  ;;  %v2319_v17 = vadd.f32 %v2318_v13, %v5033_v10  ;;  %v2465_v18 = vpop.f32.mrf.mxu0 }
 0x193   :  { %v2688_v54 = vor.u32 %v2686_v15, %v2685_v14  ;;  %v2689_v23 = vrot.slane %v2685_v14, 4  ;;  %v2562_v43 = vmax.f32 %v2546_v16, 0.0  ;;  %v2368_v38 = vadd.f32 %v2367_v45, %v2319_v17 }
 0x195   :  { %v2836_v24 = vsel %vm5062_vm13, %v2688_v54, %v3442_v22  ;;  %v2839_v4 = vsel %vm5070_vm14, %v2689_v23, %v3444_v20  ;;  %v2578_v10 = vpack.c.bf16 %v2562_v43, %v2562_v43  ;;  %v2417_v26 = vadd.f32 %v2416_v7, %v2368_v38  ;;  %v3454_v54 = vld [vmem:[%s5356_s3 + $0x68] sm:$0xf]  ;;  %v3456_v23 = vld [vmem:[%s5356_s3 + $0x6c] sm:$0x1] }
 0x196   :  { %3443 = vst [vmem:[%s5356_s3 + $0x40] sm:$0xf] %v2836_v24  ;;  %v2419_v27 = vpop.f32.mrf.mxu3  ;;  %v2372_v37 = vpop.f32.mrf.mxu2 }
 0x197   :  { %3445 = vst [vmem:[%s5356_s3 + $0x44] sm:$0x1] %v2839_v4  ;;  %v2691_v39 = vshrl.u32 %v2578_v10, 16  ;;  %v2466_v28 = vadd.f32 %v2465_v18, %v2417_v26  ;;  %v2694_v29 = vshll.u32 %v2578_v10, 16 }
 0x198   :  { %v2321_v31 = vpop.f32.mrf.mxu1 }
 0x199   :  { %v2693_v32 = vrot.slane %v2691_v39, 7  ;;  %v2547_v51 = vadd.f32 %v5059_v11, %v2466_v28  ;;  %v2322_v59 = vadd.f32 %v2321_v31, %v5042_v44  ;;  %v2468_v33 = vpop.f32.mrf.mxu0 }
 0x19b   :  { %v2696_v36 = vor.u32 %v2694_v29, %v2693_v32  ;;  %v2697_v63 = vrot.slane %v2693_v32, 4  ;;  %v2563_v40 = vmax.f32 %v2547_v51, 0.0  ;;  %v2371_v45 = vadd.f32 %v2370_v47, %v2322_v59 }
 0x19d   :  { %v2842_v46 = vsel %vm5062_vm13, %v2696_v36, %v3446_v34  ;;  %v2845_v44 = vsel %vm5070_vm14, %v2697_v63, %v3448_v35  ;;  %v2579_v48 = vpack.c.bf16 %v2563_v40, %v2563_v40  ;;  %v2420_v50 = vadd.f32 %v2419_v27, %v2371_v45  ;;  %v3458_v35 = vld [vmem:[%s5356_s3 + $0x70] sm:$0xf] }
 0x19e   :  { %3447 = vst [vmem:[%s5356_s3 + $0x58] sm:$0xf] %v2842_v46  ;;  %v2421_v52 = vpop.f32.mrf.mxu3  ;;  %v2375_v6 = vpop.f32.mrf.mxu2 }
 0x19f   :  { %3449 = vst [vmem:[%s5356_s3 + $0x5c] sm:$0x1] %v2845_v44  ;;  %v2699_v53 = vshrl.u32 %v2579_v48, 16  ;;  %v2469_v49 = vadd.f32 %v2468_v33, %v2420_v50  ;;  %v2702_v58 = vshll.u32 %v2579_v48, 16 }
 0x1a0   :  { %v2323_v56 = vpop.f32.mrf.mxu1 }
 0x1a1   :  { %v2701_v57 = vrot.slane %v2699_v53, 7  ;;  %v2548_v60 = vadd.f32 %v5059_v11, %v2469_v49  ;;  %v2324_v42 = vadd.f32 %v2323_v56, %v5049_v55  ;;  %v2470_v61 = vpop.f32.mrf.mxu0 }
 0x1a3   :  { %v2704_v2 = vor.u32 %v2702_v58, %v2701_v57  ;;  %v2705_v3 = vrot.slane %v2701_v57, 4  ;;  %v2564_v5 = vmax.f32 %v2548_v60, 0.0  ;;  %v2373_v1 = vadd.f32 %v2372_v37, %v2324_v42  ;;  %v3460_v37 = vld [vmem:[%s5356_s3 + $0x74] sm:$0x1] }
 0x1a5   :  { %v2848_v7 = vsel %vm5062_vm13, %v2704_v2, %v3450_v21  ;;  %v2851_v55 = vsel %vm5070_vm14, %v2705_v3, %v3452_v0  ;;  %v2580_v8 = vpack.c.bf16 %v2564_v5, %v2564_v5  ;;  %v2422_v12 = vadd.f32 %v2421_v52, %v2373_v1  ;;  %v3464_v21 = vld [vmem:[%s5356_s3 + $0x7c] sm:$0x1] }
 0x1a6   :  { %3451 = vst [vmem:[%s5356_s3 + $0x60] sm:$0xf] %v2848_v7  ;;  %v2424_v47 = vpop.f32.mrf.mxu3  ;;  %v2377_v39 = vpop.f32.mrf.mxu2 }
 0x1a7   :  { %3453 = vst [vmem:[%s5356_s3 + $0x64] sm:$0x1] %v2851_v55  ;;  %v2707_v13 = vshrl.u32 %v2580_v8, 16  ;;  %v2471_v14 = vadd.f32 %v2470_v61, %v2422_v12  ;;  %v2710_v17 = vshll.u32 %v2580_v8, 16  ;;  %v3462_v61 = vld [vmem:[%s5356_s3 + $0x78] sm:$0xf] }
 0x1a8   :  { %v2326_v15 = vpop.f32.mrf.mxu1 }
 0x1a9   :  { %v2709_v16 = vrot.slane %v2707_v13, 7  ;;  %v2549_v18 = vadd.f32 %v5059_v11, %v2471_v14  ;;  %v2327_v22 = vadd.f32 %v2326_v15, %v5027_v25  ;;  %v2473_v20 = vpop.f32.mrf.mxu0 }
 0x1ab   :  { %v2712_v43 = vor.u32 %v2710_v17, %v2709_v16  ;;  %v2713_v38 = vrot.slane %v2709_v16, 4  ;;  %v2565_v24 = vmax.f32 %v2549_v18, 0.0  ;;  %v2376_v4 = vadd.f32 %v2375_v6, %v2327_v22  ;;  %v3466_v18 = vld [vmem:[%s5356_s3 + $0x80] sm:$0xf]  ;;  %v3468_v22 = vld [vmem:[%s5356_s3 + $0x84] sm:$0x1] }
 0x1ad   :  { %v2854_v10 = vsel %vm5062_vm13, %v2712_v43, %v3454_v54  ;;  %v2857_v26 = vsel %vm5070_vm14, %v2713_v38, %v3456_v23  ;;  %v2581_v25 = vpack.c.bf16 %v2565_v24, %v2565_v24  ;;  %v2425_v27 = vadd.f32 %v2424_v47, %v2376_v4 }
 0x1ae   :  { %3455 = vst [vmem:[%s5356_s3 + $0x68] sm:$0xf] %v2854_v10  ;;  %v2426_v32 = vpop.f32.mrf.mxu3  ;;  %v2380_v49 = vpop.f32.mrf.mxu2 }
 0x1af   :  { %3457 = vst [vmem:[%s5356_s3 + $0x6c] sm:$0x1] %v2857_v26  ;;  %v2715_v28 = vshrl.u32 %v2581_v25, 16  ;;  %v2474_v31 = vadd.f32 %v2473_v20, %v2425_v27  ;;  %v2718_v59 = vshll.u32 %v2581_v25, 16 }
 0x1b0   :  { %v2328_v29 = vpop.f32.mrf.mxu1 }
 0x1b1   :  { %v2717_v51 = vrot.slane %v2715_v28, 7  ;;  %v2550_v33 = vadd.f32 %v5059_v11, %v2474_v31  ;;  %v2329_v34 = vadd.f32 %v2328_v29, %v5037_v41  ;;  %v2475_v36 = vpop.f32.mrf.mxu0  ;;  %v3470_v29 = vld [vmem:[%s5356_s3 + $0x88] sm:$0xf] }
 0x1b3   :  { %v2720_v63 = vor.u32 %v2718_v59, %v2717_v51  ;;  %v2721_v40 = vrot.slane %v2717_v51, 4  ;;  %v2566_v45 = vmax.f32 %v2550_v33, 0.0  ;;  %v2378_v46 = vadd.f32 %v2377_v39, %v2329_v34  ;;  %v3472_v51 = vld [vmem:[%s5356_s3 + $0x8c] sm:$0x1] }
 0x1b5   :  { %v2860_v44 = vsel %vm5062_vm13, %v2720_v63, %v3458_v35  ;;  %v2863_v48 = vsel %vm5070_vm14, %v2721_v40, %v3460_v37  ;;  %v2582_v41 = vpack.c.bf16 %v2566_v45, %v2566_v45  ;;  %v2427_v50 = vadd.f32 %v2426_v32, %v2378_v46  ;;  %v3474_v45 = vld [vmem:[%s5356_s3 + $0x90] sm:$0xf]  ;;  %v3476_v46 = vld [vmem:[%s5356_s3 + $0x94] sm:$0x1] }
 0x1b6   :  { %3459 = vst [vmem:[%s5356_s3 + $0x70] sm:$0xf] %v2860_v44  ;;  %v2429_v0 = vpop.f32.mrf.mxu3  ;;  %v2382_v20 = vpop.f32.mrf.mxu2 }
 0x1b7   :  { %3461 = vst [vmem:[%s5356_s3 + $0x74] sm:$0x1] %v2863_v48  ;;  %v2723_v52 = vshrl.u32 %v2582_v41, 16  ;;  %v2476_v53 = vadd.f32 %v2475_v36, %v2427_v50  ;;  %v2726_v58 = vshll.u32 %v2582_v41, 16 }
 0x1b8   :  { %v2331_v56 = vpop.f32.mrf.mxu1 }
 0x1b9   :  { %v2725_v57 = vrot.slane %v2723_v52, 7  ;;  %v2551_v60 = vadd.f32 %v5059_v11, %v2476_v53  ;;  %v2332_v42 = vadd.f32 %v2331_v56, %v5045_v19  ;;  %v2478_v6 = vpop.f32.mrf.mxu0 }
 0x1bb   :  { %v2728_v2 = vor.u32 %v2726_v58, %v2725_v57  ;;  %v2729_v3 = vrot.slane %v2725_v57, 4  ;;  %v2567_v5 = vmax.f32 %v2551_v60, 0.0  ;;  %v2381_v1 = vadd.f32 %v2380_v49, %v2332_v42 }
 0x1bd   :  { %v2866_v7 = vsel %vm5062_vm13, %v2728_v2, %v3462_v61  ;;  %v2869_v19 = vsel %vm5070_vm14, %v2729_v3, %v3464_v21  ;;  %v2583_v55 = vpack.c.bf16 %v2567_v5, %v2567_v5  ;;  %v2430_v8 = vadd.f32 %v2429_v0, %v2381_v1 }
 0x1be   :  { %3463 = vst [vmem:[%s5356_s3 + $0x78] sm:$0xf] %v2866_v7  ;;  %v2431_v24 = vpop.f32.mrf.mxu3 }
 0x1bf   :  { %3465 = vst [vmem:[%s5356_s3 + $0x7c] sm:$0x1] %v2869_v19  ;;  %v2731_v12 = vshrl.u32 %v2583_v55, 16  ;;  %v2479_v47 = vadd.f32 %v2478_v6, %v2430_v8  ;;  %v2734_v15 = vshll.u32 %v2583_v55, 16 }
 0x1c0   :  { %v2333_v13 = vpop.f32.mrf.mxu1 }
 0x1c1   :  { %v2733_v14 = vrot.slane %v2731_v12, 7  ;;  %v2552_v16 = vadd.f32 %v5059_v11, %v2479_v47  ;;  %v2334_v17 = vadd.f32 %v2333_v13, %v5052_v62  ;;  %v2480_v25 = vpop.f32.mrf.mxu0 }
 0x1c3   :  { %v2736_v54 = vor.u32 %v2734_v15, %v2733_v14  ;;  %v2737_v23 = vrot.slane %v2733_v14, 4  ;;  %v2568_v43 = vmax.f32 %v2552_v16, 0.0  ;;  %v2383_v38 = vadd.f32 %v2382_v20, %v2334_v17 }
 0x1c5   :  { %v2872_v4 = vsel %vm5062_vm13, %v2736_v54, %v3466_v18  ;;  %v2875_v62 = vsel %vm5070_vm14, %v2737_v23, %v3468_v22  ;;  %v2584_v10 = vpack.c.bf16 %v2568_v43, %v2568_v43  ;;  %v2432_v26 = vadd.f32 %v2431_v24, %v2383_v38 }
 0x1c6   :  { %3467 = vst [vmem:[%s5356_s3 + $0x80] sm:$0xf] %v2872_v4 }
 0x1c7   :  { %3469 = vst [vmem:[%s5356_s3 + $0x84] sm:$0x1] %v2875_v62  ;;  %v2739_v27 = vshrl.u32 %v2584_v10, 16  ;;  %v2481_v39 = vadd.f32 %v2480_v25, %v2432_v26  ;;  %v2742_v31 = vshll.u32 %v2584_v10, 16 }
 0x1c9   :  { %v2741_v28 = vrot.slane %v2739_v27, 7  ;;  %v2553_v32 = vadd.f32 %v5059_v11, %v2481_v39 }
 0x1cb   :  { %v2744_v59 = vor.u32 %v2742_v31, %v2741_v28  ;;  %v2745_v33 = vrot.slane %v2741_v28, 4  ;;  %v2569_v34 = vmax.f32 %v2553_v32, 0.0 }
 0x1cd   :  { %v2878_v35 = vsel %vm5062_vm13, %v2744_v59, %v3470_v29  ;;  %v2881_v37 = vsel %vm5070_vm14, %v2745_v33, %v3472_v51  ;;  %v2585_v36 = vpack.c.bf16 %v2569_v34, %v2569_v34 }
 0x1ce   :  { %3471 = vst [vmem:[%s5356_s3 + $0x88] sm:$0xf] %v2878_v35 }
 0x1cf   :  { %3473 = vst [vmem:[%s5356_s3 + $0x8c] sm:$0x1] %v2881_v37  ;;  %v2747_v11 = vshrl.u32 %v2585_v36, 16  ;;  %v2750_v40 = vshll.u32 %v2585_v36, 16 }
 0x1d1   :  { %v2749_v63 = vrot.slane %v2747_v11, 7 }
 0x1d3   :  { %v2752_v44 = vor.u32 %v2750_v40, %v2749_v63  ;;  %v2753_v48 = vrot.slane %v2749_v63, 4 }
 0x1d5   :  { %v2884_v41 = vsel %vm5062_vm13, %v2752_v44, %v3474_v45  ;;  %v2887_v50 = vsel %vm5070_vm14, %v2753_v48, %v3476_v46 }
 0x1d6   :  { %3475 = vst [vmem:[%s5356_s3 + $0x90] sm:$0xf] %v2884_v41 }
 0x1d7   :  { %3477 = vst [vmem:[%s5356_s3 + $0x94] sm:$0x1] %v2887_v50 }
 0x1d8   :  { %2893 = vsyncpa [#allocation5], 1 }

// kernel: down_forward.3
= control target key start
LH: loop header
LB: loop body
LE: loop exit
PB: predicated region body
PF: predicated region fallthrough
CT: control target
= control target key end

     0   :  { %vm2569_vm0 = vcmask 519168   ;;  %v3573_v0 = vmov 0   ;;  %vm2571_vm1 = vcmask 516096   ;;  %vm2869_vm2 = vcmask 1042434   ;;  %s4931_s1 = inlined_call_operand.vmem [shape: bf16[2,10,10,64], index: 1, kind: output, shape index: {}]   ;;  %s4932_s0 = inlined_call_operand.vmem [shape: bf16[2,8,2,8,2,64], index: 0, kind: input, shape index: {}]  }
   0x1   :  { %2573 = vst.msk [vmem:[%s4931_s1 + $0x8] sm:$0xf] %vm2569_vm0, %v3573_v0  ;;  %v9_v1 = vld [vmem:[%s4932_s0] sm:$0x1]  ;;  %v10_v2 = vld [vmem:[%s4932_s0 + $0x1] sm:$0x1] }
   0x2   :  { %2570 = vst.msk [vmem:[%s4931_s1] sm:$0xf] %vm2569_vm0, %v3573_v0  ;;  %v11_v3 = vld [vmem:[%s4932_s0 + $0x2] sm:$0x1]  ;;  %v12_v4 = vld [vmem:[%s4932_s0 + $0x3] sm:$0x1]  ;;  %v265_v9 = vunpack.c.l.bf16 %v9_v1  ;;  %v266_v10 = vunpack.c.l.bf16 %v10_v2 }
   0x3   :  { %2575 = vst.msk [vmem:[%s4931_s1 + $0x10] sm:$0xf] %vm2569_vm0, %v3573_v0  ;;  %v13_v5 = vld [vmem:[%s4932_s0 + $0x4] sm:$0x1]  ;;  %v14_v6 = vld [vmem:[%s4932_s0 + $0x5] sm:$0x1]  ;;  %v267_v11 = vunpack.c.l.bf16 %v11_v3  ;;  %v268_v12 = vunpack.c.l.bf16 %v12_v4 }
   0x4   :  { %2577 = vst.msk [vmem:[%s4931_s1 + $0x18] sm:$0xf] %vm2569_vm0, %v3573_v0  ;;  %v15_v7 = vld [vmem:[%s4932_s0 + $0x6] sm:$0x1]  ;;  %v17_v8 = vld [vmem:[%s4932_s0 + $0x8] sm:$0x1]  ;;  %v269_v15 = vunpack.c.l.bf16 %v13_v5  ;;  %v270_v16 = vunpack.c.l.bf16 %v14_v6 }
   0x5   :  { %2579 = vst.msk [vmem:[%s4931_s1 + $0x20] sm:$0xf] %vm2569_vm0, %v3573_v0  ;;  %v18_v13 = vld [vmem:[%s4932_s0 + $0x9] sm:$0x1]  ;;  %v19_v14 = vld [vmem:[%s4932_s0 + $0xa] sm:$0x1]  ;;  %v271_v17 = vunpack.c.l.bf16 %v15_v7  ;;  %v1161_v20 = vunpack.c.l.bf16 %v17_v8 }
   0x6   :  { %2581 = vst.msk [vmem:[%s4931_s1 + $0x28] sm:$0xf] %vm2569_vm0, %v3573_v0  ;;  %v20_v18 = vld [vmem:[%s4932_s0 + $0xb] sm:$0x1]  ;;  %v21_v19 = vld [vmem:[%s4932_s0 + $0xc] sm:$0x1]  ;;  %v1162_v23 = vunpack.c.l.bf16 %v18_v13  ;;  %v1163_v24 = vunpack.c.l.bf16 %v19_v14 }
   0x7   :  { %2583 = vst.msk [vmem:[%s4931_s1 + $0x30] sm:$0xf] %vm2569_vm0, %v3573_v0  ;;  %v22_v21 = vld [vmem:[%s4932_s0 + $0xd] sm:$0x1]  ;;  %v23_v22 = vld [vmem:[%s4932_s0 + $0xe] sm:$0x1]  ;;  %v1164_v25 = vunpack.c.l.bf16 %v20_v18  ;;  %v1165_v26 = vunpack.c.l.bf16 %v21_v19 }
   0x8   :  { %2585 = vst.msk [vmem:[%s4931_s1 + $0x38] sm:$0xf] %vm2569_vm0, %v3573_v0  ;;  %v3252_v27 = vrot.slane %v265_v9, 9  ;;  %v3253_v28 = vrot.slane %v266_v10, 9  ;;  %v3254_v29 = vrot.slane %v267_v11, 9  ;;  %v3255_v30 = vrot.slane %v268_v12, 9 }
   0x9   :  { %2587 = vst.msk [vmem:[%s4931_s1 + $0x40] sm:$0xf] %vm2569_vm0, %v3573_v0  ;;  %v3256_v31 = vrot.slane %v269_v15, 9  ;;  %v3257_v32 = vrot.slane %v270_v16, 9  ;;  %v3258_v33 = vrot.slane %v271_v17, 9  ;;  %v1166_v34 = vunpack.c.l.bf16 %v22_v21 }
   0xa   :  { %2589 = vst.msk [vmem:[%s4931_s1 + $0x48] sm:$0xf] %vm2569_vm0, %v3573_v0  ;;  %v905_v35 = vmax.f32 %v265_v9, %v3252_v27  ;;  %v906_v36 = vmax.f32 %v266_v10, %v3253_v28  ;;  %v907_v37 = vmax.f32 %v267_v11, %v3254_v29  ;;  %v908_v38 = vmax.f32 %v268_v12, %v3255_v30  ;;  %v16_v8 = vld [vmem:[%s4932_s0 + $0x7] sm:$0x1]  ;;  %v24_v9 = vld [vmem:[%s4932_s0 + $0xf] sm:$0x1] }
   0xb   :  { %2591 = vst.msk [vmem:[%s4931_s1 + $0x50] sm:$0xf] %vm2569_vm0, %v3573_v0  ;;  %v909_v39 = vmax.f32 %v269_v15, %v3256_v31  ;;  %v910_v40 = vmax.f32 %v270_v16, %v3257_v32  ;;  %v911_v41 = vmax.f32 %v271_v17, %v3258_v33  ;;  %v1167_v42 = vunpack.c.l.bf16 %v23_v22  ;;  %v3735_v14 = vld [vmem:[%s4932_s0 + $0x10] sm:$0x1]  ;;  %v3740_v15 = vld [vmem:[%s4932_s0 + $0x11] sm:$0x1] }
   0xc   :  { %2593 = vst.msk [vmem:[%s4931_s1 + $0x58] sm:$0xf] %vm2569_vm0, %v3573_v0  ;;  %v3380_v43 = vrot.slane %v1161_v20, 9  ;;  %v3381_v44 = vrot.slane %v1162_v23, 9  ;;  %v3382_v45 = vrot.slane %v1163_v24, 9  ;;  %v3383_v46 = vrot.slane %v1164_v25, 9 }
   0xd   :  { %2595 = vst.msk [vmem:[%s4931_s1 + $0x60] sm:$0xf] %vm2569_vm0, %v3573_v0  ;;  %v3384_v47 = vrot.slane %v1165_v26, 9  ;;  %v3385_v48 = vrot.slane %v1166_v34, 9  ;;  %v3386_v49 = vrot.slane %v1167_v42, 9  ;;  %vm2872_vm3 = vcmask 1043459  }
   0xe   :  { %2597 = vst.msk [vmem:[%s4931_s1 + $0x68] sm:$0xf] %vm2569_vm0, %v3573_v0  ;;  %v1801_v50 = vmax.f32 %v1161_v20, %v3380_v43  ;;  %v1802_v51 = vmax.f32 %v1162_v23, %v3381_v44  ;;  %v1803_v52 = vmax.f32 %v1163_v24, %v3382_v45  ;;  %v1804_v53 = vmax.f32 %v1164_v25, %v3383_v46  ;;  %v3750_v19 = vld [vmem:[%s4932_s0 + $0x12] sm:$0x1]  ;;  %v3760_v24 = vld [vmem:[%s4932_s0 + $0x13] sm:$0x1] }
   0xf   :  { %2599 = vst.msk [vmem:[%s4931_s1 + $0x70] sm:$0xf] %vm2569_vm0, %v3573_v0  ;;  %v1805_v54 = vmax.f32 %v1165_v26, %v3384_v47  ;;  %v1806_v55 = vmax.f32 %v1166_v34, %v3385_v48  ;;  %v1807_v56 = vmax.f32 %v1167_v42, %v3386_v49  ;;  %vm2875_vm4 = vcmask 1044484   ;;  %v3765_v25 = vld [vmem:[%s4932_s0 + $0x14] sm:$0x1] }
  0x10   :  { %2601 = vst.msk [vmem:[%s4931_s1 + $0x78] sm:$0xf] %vm2569_vm0, %v3573_v0  ;;  %v2313_v57 = vmax.f32 %v905_v35, %v1801_v50  ;;  %v2314_v58 = vmax.f32 %v906_v36, %v1802_v51  ;;  %v2315_v59 = vmax.f32 %v907_v37, %v1803_v52  ;;  %v2316_v60 = vmax.f32 %v908_v38, %v1804_v53  ;;  %v30_v32 = vld [vmem:[%s4932_s0 + $0x15] sm:$0x1]  ;;  %v31_v34 = vld [vmem:[%s4932_s0 + $0x16] sm:$0x1] }
  0x11   :  { %2603 = vst.msk [vmem:[%s4931_s1 + $0x80] sm:$0xf] %vm2569_vm0, %v3573_v0  ;;  %v2317_v61 = vmax.f32 %v909_v39, %v1805_v54  ;;  %v2318_v62 = vmax.f32 %v910_v40, %v1806_v55  ;;  %v2319_v63 = vmax.f32 %v911_v41, %v1807_v56  ;;  %vm2878_vm5 = vcmask 1045509   ;;  %v3508_v46 = vld [vmem:[%s4931_s1 + $0x8] sm:$0xf] }
  0x12   :  { %2605 = vst.msk [vmem:[%s4931_s1 + $0x88] sm:$0xf] %vm2569_vm0, %v3573_v0  ;;  %v2441_v1 = vpack.c.bf16 %v2313_v57, %v2313_v57  ;;  %v2442_v2 = vpack.c.bf16 %v2314_v58, %v2314_v58  ;;  %v2443_v3 = vpack.c.bf16 %v2315_v59, %v2315_v59  ;;  %v2444_v4 = vpack.c.bf16 %v2316_v60, %v2316_v60  ;;  %v33_v49 = vld [vmem:[%s4932_s0 + $0x18] sm:$0x1]  ;;  %v34_v53 = vld [vmem:[%s4932_s0 + $0x19] sm:$0x1] }
  0x13   :  { %2607 = vst.msk [vmem:[%s4931_s1 + $0x90] sm:$0xf] %vm2569_vm0, %v3573_v0  ;;  %v2445_v5 = vpack.c.bf16 %v2317_v61, %v2317_v61  ;;  %v2446_v6 = vpack.c.bf16 %v2318_v62, %v2318_v62  ;;  %v2447_v7 = vpack.c.bf16 %v2319_v63, %v2319_v63  ;;  %vm2881_vm6 = vcmask 1046534   ;;  %v35_v54 = vld [vmem:[%s4932_s0 + $0x1a] sm:$0x1] }
  0x14   :  { %2609 = vst.msk [vmem:[%s4931_s1 + $0x98] sm:$0xf] %vm2569_vm0, %v3573_v0  ;;  %v2739_v10 = vunpack.c.l.b16 %v2441_v1  ;;  %v2740_v11 = vunpack.c.l.b16 %v2442_v2  ;;  %v2741_v12 = vunpack.c.l.b16 %v2443_v3  ;;  %v2742_v13 = vunpack.c.l.b16 %v2444_v4  ;;  %v36_v60 = vld [vmem:[%s4932_s0 + $0x1b] sm:$0x1]  ;;  %v37_v63 = vld [vmem:[%s4932_s0 + $0x1c] sm:$0x1] }
  0x15   :  { %2574 = vst.msk [vmem:[%s4931_s1 + $0xc] sm:$0x1] %vm2571_vm1, %v3573_v0  ;;  %v2743_v16 = vunpack.c.l.b16 %v2445_v5  ;;  %v2744_v17 = vunpack.c.l.b16 %v2446_v6  ;;  %v2745_v18 = vunpack.c.l.b16 %v2447_v7  ;;  %vm2884_vm7 = vcmask 1047559   ;;  %v38_v7 = vld [vmem:[%s4932_s0 + $0x1d] sm:$0x1] }
  0x16   :  { %2572 = vst.msk [vmem:[%s4931_s1 + $0x4] sm:$0x1] %vm2571_vm1, %v3573_v0  ;;  %v2867_v20 = vrot.slane %v2739_v10, 7  ;;  %v2868_v21 = vrot.slane %v2740_v11, 6  ;;  %v2871_v22 = vrot.slane %v2741_v12, 5  ;;  %v2874_v23 = vrot.slane %v2742_v13, 4 }
  0x17   :  { %2576 = vst.msk [vmem:[%s4931_s1 + $0x14] sm:$0x1] %vm2571_vm1, %v3573_v0  ;;  %v2877_v26 = vrot.slane %v2743_v16, 3  ;;  %v2880_v27 = vrot.slane %v2744_v17, 2  ;;  %v2883_v28 = vrot.slane %v2745_v18, 1  ;;  %v272_v30 = vunpack.c.l.bf16 %v16_v8 }
  0x18   :  { %2578 = vst.msk [vmem:[%s4931_s1 + $0x1c] sm:$0x1] %vm2571_vm1, %v3573_v0  ;;  %v2870_v29 = vsel %vm2869_vm2, %v2868_v21, %v2867_v20  ;;  %vm3147_vm8 = vsmask.f32 7938  ;;  %v1168_v31 = vunpack.c.l.bf16 %v24_v9  ;;  %vm3153_vm9 = vsmask.f32 256 }
  0x19   :  { %2580 = vst.msk [vmem:[%s4931_s1 + $0x24] sm:$0x1] %vm2571_vm1, %v3573_v0  ;;  %v2873_v33 = vsel %vm2872_vm3, %v2871_v22, %v2870_v29  ;;  %v273_v35 = vunpack.c.l.bf16 %v3735_v14  ;;  %v274_v36 = vunpack.c.l.bf16 %v3740_v15  ;;  %v3259_v38 = vrot.slane %v272_v30, 9  ;;  %vm3827_vm10 = vmand %vm2569_vm0, %vm3147_vm8  ;;  %v39_v8 = vld [vmem:[%s4932_s0 + $0x1e] sm:$0x1] }
  0x1a   :  { %2582 = vst.msk [vmem:[%s4931_s1 + $0x2c] sm:$0x1] %vm2571_vm1, %v3573_v0  ;;  %v2876_v37 = vsel %vm2875_vm4, %v2874_v23, %v2873_v33  ;;  %v3387_v39 = vrot.slane %v1168_v31, 9  ;;  %v275_v40 = vunpack.c.l.bf16 %v3750_v19  ;;  %v276_v42 = vunpack.c.l.bf16 %v3760_v24  ;;  %vm3883_vm11 = vmand %vm2571_vm1, %vm3153_vm9 }
  0x1b   :  { %2584 = vst.msk [vmem:[%s4931_s1 + $0x34] sm:$0x1] %vm2571_vm1, %v3573_v0  ;;  %v2879_v41 = vsel %vm2878_vm5, %v2877_v26, %v2876_v37  ;;  %v277_v43 = vunpack.c.l.bf16 %v3765_v25  ;;  %v278_v44 = vunpack.c.l.bf16 %v30_v32  ;;  %v912_v47 = vmax.f32 %v272_v30, %v3259_v38  ;;  %v32_v25 = vld [vmem:[%s4932_s0 + $0x17] sm:$0x1] }
  0x1c   :  { %2586 = vst.msk [vmem:[%s4931_s1 + $0x3c] sm:$0x1] %vm2571_vm1, %v3573_v0  ;;  %v2882_v45 = vsel %vm2881_vm6, %v2880_v27, %v2879_v41  ;;  %v1808_v48 = vmax.f32 %v1168_v31, %v3387_v39  ;;  %v279_v50 = vunpack.c.l.bf16 %v31_v34  ;;  %v3260_v55 = vrot.slane %v273_v35, 9  ;;  %v3510_v20 = vld [vmem:[%s4931_s1 + $0xc] sm:$0x1] }
  0x1d   :  { %2588 = vst.msk [vmem:[%s4931_s1 + $0x44] sm:$0x1] %vm2571_vm1, %v3573_v0  ;;  %v2885_v51 = vsel %vm2884_vm7, %v2883_v28, %v2882_v45  ;;  %v3261_v56 = vrot.slane %v274_v36, 9  ;;  %v3262_v57 = vrot.slane %v275_v40, 9  ;;  %v3263_v61 = vrot.slane %v276_v42, 9 }
  0x1e   :  { %2590 = vst.msk [vmem:[%s4931_s1 + $0x4c] sm:$0x1] %vm2571_vm1, %v3573_v0  ;;  %v3081_v58 = vpack.c.b16 %v2885_v51, %v2885_v51  ;;  %v2320_v59 = vmax.f32 %v912_v47, %v1808_v48  ;;  %v3264_v62 = vrot.slane %v277_v43, 9  ;;  %v3265_v1 = vrot.slane %v278_v44, 9 }
  0x1f   :  { %2592 = vst.msk [vmem:[%s4931_s1 + $0x54] sm:$0x1] %vm2571_vm1, %v3573_v0  ;;  %v3266_v2 = vrot.slane %v279_v50, 9  ;;  %v913_v3 = vmax.f32 %v273_v35, %v3260_v55  ;;  %v914_v4 = vmax.f32 %v274_v36, %v3261_v56  ;;  %v915_v9 = vmax.f32 %v275_v40, %v3262_v57 }
  0x20   :  { %2594 = vst.msk [vmem:[%s4931_s1 + $0x5c] sm:$0x1] %vm2571_vm1, %v3573_v0  ;;  %v3150_v5 = vsel %vm3827_vm10, %v3081_v58, %v3508_v46  ;;  %v2448_v6 = vpack.c.bf16 %v2320_v59, %v2320_v59  ;;  %v916_v10 = vmax.f32 %v276_v42, %v3263_v61  ;;  %v917_v11 = vmax.f32 %v277_v43, %v3264_v62  ;;  %v40_v58 = vld [vmem:[%s4932_s0 + $0x1f] sm:$0x1] }
  0x21   :  { %2596 = vst.msk [vmem:[%s4931_s1 + $0x64] sm:$0x1] %vm2571_vm1, %v3573_v0  ;;  %v918_v12 = vmax.f32 %v278_v44, %v3265_v1  ;;  %v919_v13 = vmax.f32 %v279_v50, %v3266_v2  ;;  %v1169_v14 = vunpack.c.l.bf16 %v33_v49  ;;  %v1170_v16 = vunpack.c.l.bf16 %v34_v53  ;;  %v42_v1 = vld [vmem:[%s4932_s0 + $0x21] sm:$0x1]  ;;  %v43_v2 = vld [vmem:[%s4932_s0 + $0x22] sm:$0x1] }
  0x22   :  { %2598 = vst.msk [vmem:[%s4931_s1 + $0x6c] sm:$0x1] %vm2571_vm1, %v3573_v0  ;;  %v2746_v15 = vunpack.c.l.b16 %v2448_v6  ;;  %v1171_v17 = vunpack.c.l.bf16 %v35_v54  ;;  %v1172_v18 = vunpack.c.l.bf16 %v36_v60  ;;  %v1173_v21 = vunpack.c.l.bf16 %v37_v63  ;;  %v41_v63 = vld [vmem:[%s4932_s0 + $0x20] sm:$0x1] }
  0x23   :  { %2600 = vst.msk [vmem:[%s4931_s1 + $0x74] sm:$0x1] %vm2571_vm1, %v3573_v0  ;;  %v1174_v22 = vunpack.c.l.bf16 %v38_v7  ;;  %v1175_v23 = vunpack.c.l.bf16 %v39_v8  ;;  %v3388_v24 = vrot.slane %v1169_v14, 9  ;;  %v3389_v27 = vrot.slane %v1170_v16, 9  ;;  %v44_v7 = vld [vmem:[%s4932_s0 + $0x23] sm:$0x1] }
  0x24   :  { %2602 = vst.msk [vmem:[%s4931_s1 + $0x7c] sm:$0x1] %vm2571_vm1, %v3573_v0  ;;  %v3082_v26 = vpack.c.b16 %v2746_v15, %v2746_v15  ;;  %v3390_v28 = vrot.slane %v1171_v17, 9  ;;  %v3391_v29 = vrot.slane %v1172_v18, 9  ;;  %v3392_v30 = vrot.slane %v1173_v21, 9 }
  0x25   :  { %2604 = vst.msk [vmem:[%s4931_s1 + $0x84] sm:$0x1] %vm2571_vm1, %v3573_v0  ;;  %v3393_v31 = vrot.slane %v1174_v22, 9  ;;  %v3394_v32 = vrot.slane %v1175_v23, 9  ;;  %v1809_v33 = vmax.f32 %v1169_v14, %v3388_v24  ;;  %v1810_v35 = vmax.f32 %v1170_v16, %v3389_v27  ;;  %v45_v8 = vld [vmem:[%s4932_s0 + $0x24] sm:$0x1] }
  0x26   :  { %2606 = vst.msk [vmem:[%s4931_s1 + $0x8c] sm:$0x1] %vm2571_vm1, %v3573_v0  ;;  %v3156_v34 = vsel %vm3883_vm11, %v3082_v26, %v3510_v20  ;;  %v1811_v36 = vmax.f32 %v1171_v17, %v3390_v28  ;;  %v1812_v37 = vmax.f32 %v1172_v18, %v3391_v29  ;;  %v1813_v38 = vmax.f32 %v1173_v21, %v3392_v30  ;;  %v47_v17 = vld [vmem:[%s4932_s0 + $0x26] sm:$0x1] }
  0x27   :  { %2608 = vst.msk [vmem:[%s4931_s1 + $0x94] sm:$0x1] %vm2571_vm1, %v3573_v0  ;;  %v1814_v39 = vmax.f32 %v1174_v22, %v3393_v31  ;;  %v1815_v40 = vmax.f32 %v1175_v23, %v3394_v32  ;;  %v2321_v41 = vmax.f32 %v913_v3, %v1809_v33  ;;  %v2322_v42 = vmax.f32 %v914_v4, %v1810_v35  ;;  %v3512_v33 = vld [vmem:[%s4931_s1 + $0x10] sm:$0xf] }
  0x28   :  { %2610 = vst.msk [vmem:[%s4931_s1 + $0x9c] sm:$0x1] %vm2571_vm1, %v3573_v0  ;;  %v2323_v43 = vmax.f32 %v915_v9, %v1811_v36  ;;  %v2324_v44 = vmax.f32 %v916_v10, %v1812_v37  ;;  %v280_v45 = vunpack.c.l.bf16 %v32_v25  ;;  %v2325_v46 = vmax.f32 %v917_v11, %v1813_v38 }
  0x29   :  { %3509 = vst [vmem:[%s4931_s1 + $0x8] sm:$0xf] %v3150_v5  ;;  %v2326_v47 = vmax.f32 %v918_v12, %v1814_v39  ;;  %v2327_v48 = vmax.f32 %v919_v13, %v1815_v40  ;;  %v2449_v49 = vpack.c.bf16 %v2321_v41, %v2321_v41  ;;  %v2450_v50 = vpack.c.bf16 %v2322_v42, %v2322_v42  ;;  %v46_v13 = vld [vmem:[%s4932_s0 + $0x25] sm:$0x1]  ;;  %v49_v39 = vld [vmem:[%s4932_s0 + $0x28] sm:$0x1] }
  0x2a   :  { %3511 = vst [vmem:[%s4931_s1 + $0xc] sm:$0x1] %v3156_v34  ;;  %v2451_v51 = vpack.c.bf16 %v2323_v43, %v2323_v43  ;;  %v2452_v53 = vpack.c.bf16 %v2324_v44, %v2324_v44  ;;  %v3267_v0 = vrot.slane %v280_v45, 9  ;;  %v2453_v54 = vpack.c.bf16 %v2325_v46, %v2325_v46  ;;  %v50_v40 = vld [vmem:[%s4932_s0 + $0x29] sm:$0x1] }
  0x2b   :  { %v2454_v55 = vpack.c.bf16 %v2326_v47, %v2326_v47  ;;  %v2455_v56 = vpack.c.bf16 %v2327_v48, %v2327_v48  ;;  %v2747_v57 = vunpack.c.l.b16 %v2449_v49  ;;  %v2748_v59 = vunpack.c.l.b16 %v2450_v50  ;;  %v51_v44 = vld [vmem:[%s4932_s0 + $0x2a] sm:$0x1] }
  0x2c   :  { %v2749_v60 = vunpack.c.l.b16 %v2451_v51  ;;  %v2750_v61 = vunpack.c.l.b16 %v2452_v53  ;;  %v920_v62 = vmax.f32 %v280_v45, %v3267_v0  ;;  %v2751_v3 = vunpack.c.l.b16 %v2453_v54  ;;  %v52_v45 = vld [vmem:[%s4932_s0 + $0x2b] sm:$0x1]  ;;  %v53_v51 = vld [vmem:[%s4932_s0 + $0x2c] sm:$0x1]  ;;  %v54_v53 = vld [vmem:[%s4932_s0 + $0x2d] sm:$0x1] }
  0x2d   :  { %v2752_v4 = vunpack.c.l.b16 %v2454_v55  ;;  %v2753_v5 = vunpack.c.l.b16 %v2455_v56  ;;  %v2886_v6 = vrot.slane %v2747_v57, 7  ;;  %v2887_v9 = vrot.slane %v2748_v59, 6  ;;  %v55_v0 = vld [vmem:[%s4932_s0 + $0x2e] sm:$0x1] }
  0x2e   :  { %v2889_v10 = vrot.slane %v2749_v60, 5  ;;  %v2891_v11 = vrot.slane %v2750_v61, 4  ;;  %v1176_v12 = vunpack.c.l.bf16 %v40_v58  ;;  %v2893_v14 = vrot.slane %v2751_v3, 3 }
  0x2f   :  { %v2895_v15 = vrot.slane %v2752_v4, 2  ;;  %v2897_v16 = vrot.slane %v2753_v5, 1  ;;  %v281_v18 = vunpack.c.l.bf16 %v41_v63  ;;  %v2888_v20 = vsel %vm2869_vm2, %v2887_v9, %v2886_v6 }
  0x30   :  { %v3395_v21 = vrot.slane %v1176_v12, 9  ;;  %v282_v22 = vunpack.c.l.bf16 %v42_v1  ;;  %v283_v23 = vunpack.c.l.bf16 %v43_v2  ;;  %v2890_v24 = vsel %vm2872_vm3, %v2889_v10, %v2888_v20  ;;  %v3514_v1 = vld [vmem:[%s4931_s1 + $0x14] sm:$0x1] }
  0x31   :  { %v284_v25 = vunpack.c.l.bf16 %v44_v7  ;;  %v285_v26 = vunpack.c.l.bf16 %v45_v8  ;;  %v286_v27 = vunpack.c.l.bf16 %v46_v13  ;;  %v2892_v28 = vsel %vm2875_vm4, %v2891_v11, %v2890_v24 }
  0x32   :  { %v1816_v29 = vmax.f32 %v1176_v12, %v3395_v21  ;;  %v287_v30 = vunpack.c.l.bf16 %v47_v17  ;;  %v3268_v31 = vrot.slane %v281_v18, 9  ;;  %v2894_v32 = vsel %vm2878_vm5, %v2893_v14, %v2892_v28  ;;  %v48_v14 = vld [vmem:[%s4932_s0 + $0x27] sm:$0x1] }
  0x33   :  { %v3269_v34 = vrot.slane %v282_v22, 9  ;;  %v3270_v35 = vrot.slane %v283_v23, 9  ;;  %v3271_v36 = vrot.slane %v284_v25, 9  ;;  %v2896_v37 = vsel %vm2881_vm6, %v2895_v15, %v2894_v32 }
  0x34   :  { %v2328_v38 = vmax.f32 %v920_v62, %v1816_v29  ;;  %v3272_v41 = vrot.slane %v285_v26, 9  ;;  %v3273_v42 = vrot.slane %v286_v27, 9  ;;  %v2898_v43 = vsel %vm2884_vm7, %v2897_v16, %v2896_v37 }
  0x35   :  { %v3274_v46 = vrot.slane %v287_v30, 9  ;;  %v921_v47 = vmax.f32 %v281_v18, %v3268_v31  ;;  %v922_v48 = vmax.f32 %v282_v22, %v3269_v34  ;;  %v3083_v49 = vpack.c.b16 %v2898_v43, %v2898_v43 }
  0x36   :  { %v2456_v50 = vpack.c.bf16 %v2328_v38, %v2328_v38  ;;  %v923_v54 = vmax.f32 %v283_v23, %v3270_v35  ;;  %v924_v55 = vmax.f32 %v284_v25, %v3271_v36  ;;  %v925_v56 = vmax.f32 %v285_v26, %v3272_v41 }
  0x37   :  { %v926_v57 = vmax.f32 %v286_v27, %v3273_v42  ;;  %v927_v58 = vmax.f32 %v287_v30, %v3274_v46  ;;  %v1177_v59 = vunpack.c.l.bf16 %v49_v39  ;;  %v3159_v60 = vsel %vm3827_vm10, %v3083_v49, %v3512_v33  ;;  %v58_v46 = vld [vmem:[%s4932_s0 + $0x31] sm:$0x1] }
  0x38   :  { %v2754_v61 = vunpack.c.l.b16 %v2456_v50  ;;  %v1178_v62 = vunpack.c.l.bf16 %v50_v40  ;;  %v1179_v63 = vunpack.c.l.bf16 %v51_v44  ;;  %3513 = vst [vmem:[%s4931_s1 + $0x10] sm:$0xf] %v3159_v60  ;;  %v1180_v2 = vunpack.c.l.bf16 %v52_v45  ;;  %v56_v40 = vld [vmem:[%s4932_s0 + $0x2f] sm:$0x1]  ;;  %v57_v45 = vld [vmem:[%s4932_s0 + $0x30] sm:$0x1] }
  0x39   :  { %v1181_v3 = vunpack.c.l.bf16 %v53_v51  ;;  %v1182_v4 = vunpack.c.l.bf16 %v54_v53  ;;  %v1183_v5 = vunpack.c.l.bf16 %v55_v0  ;;  %v3396_v7 = vrot.slane %v1177_v59, 9  ;;  %v59_v51 = vld [vmem:[%s4932_s0 + $0x32] sm:$0x1]  ;;  %v60_v53 = vld [vmem:[%s4932_s0 + $0x33] sm:$0x1] }
  0x3a   :  { %v3084_v6 = vpack.c.b16 %v2754_v61, %v2754_v61  ;;  %v3397_v8 = vrot.slane %v1178_v62, 9  ;;  %v3398_v9 = vrot.slane %v1179_v63, 9  ;;  %v3399_v10 = vrot.slane %v1180_v2, 9  ;;  %v61_v0 = vld [vmem:[%s4932_s0 + $0x34] sm:$0x1] }
  0x3b   :  { %v3400_v11 = vrot.slane %v1181_v3, 9  ;;  %v3401_v12 = vrot.slane %v1182_v4, 9  ;;  %v3402_v13 = vrot.slane %v1183_v5, 9  ;;  %v1817_v16 = vmax.f32 %v1177_v59, %v3396_v7 }
  0x3c   :  { %v3162_v15 = vsel %vm3883_vm11, %v3084_v6, %v3514_v1  ;;  %v1818_v17 = vmax.f32 %v1178_v62, %v3397_v8  ;;  %v1819_v18 = vmax.f32 %v1179_v63, %v3398_v9  ;;  %v1820_v20 = vmax.f32 %v1180_v2, %v3399_v10  ;;  %v63_v63 = vld [vmem:[%s4932_s0 + $0x36] sm:$0x1] }
  0x3d   :  { %3515 = vst [vmem:[%s4931_s1 + $0x14] sm:$0x1] %v3162_v15  ;;  %v1821_v21 = vmax.f32 %v1181_v3, %v3400_v11  ;;  %v1822_v22 = vmax.f32 %v1182_v4, %v3401_v12  ;;  %v1823_v23 = vmax.f32 %v1183_v5, %v3402_v13  ;;  %v2329_v24 = vmax.f32 %v921_v47, %v1817_v16 }
  0x3e   :  { %v2330_v25 = vmax.f32 %v922_v48, %v1818_v17  ;;  %v2331_v26 = vmax.f32 %v923_v54, %v1819_v18  ;;  %v288_v27 = vunpack.c.l.bf16 %v48_v14  ;;  %v2332_v28 = vmax.f32 %v924_v55, %v1820_v20  ;;  %v3516_v18 = vld [vmem:[%s4931_s1 + $0x18] sm:$0xf] }
  0x3f   :  { %v2333_v29 = vmax.f32 %v925_v56, %v1821_v21  ;;  %v2334_v30 = vmax.f32 %v926_v57, %v1822_v22  ;;  %v2335_v31 = vmax.f32 %v927_v58, %v1823_v23  ;;  %v2457_v32 = vpack.c.bf16 %v2329_v24, %v2329_v24  ;;  %v62_v58 = vld [vmem:[%s4932_s0 + $0x35] sm:$0x1]  ;;  %v65_v21 = vld [vmem:[%s4932_s0 + $0x38] sm:$0x1] }
  0x40   :  { %v2458_v33 = vpack.c.bf16 %v2330_v25, %v2330_v25  ;;  %v2459_v34 = vpack.c.bf16 %v2331_v26, %v2331_v26  ;;  %v3275_v35 = vrot.slane %v288_v27, 9  ;;  %v2460_v36 = vpack.c.bf16 %v2332_v28, %v2332_v28  ;;  %v66_v25 = vld [vmem:[%s4932_s0 + $0x39] sm:$0x1]  ;;  %v67_v26 = vld [vmem:[%s4932_s0 + $0x3a] sm:$0x1] }
  0x41   :  { %v2461_v37 = vpack.c.bf16 %v2333_v29, %v2333_v29  ;;  %v2462_v38 = vpack.c.bf16 %v2334_v30, %v2334_v30  ;;  %v2463_v39 = vpack.c.bf16 %v2335_v31, %v2335_v31  ;;  %v2755_v41 = vunpack.c.l.b16 %v2457_v32  ;;  %v68_v32 = vld [vmem:[%s4932_s0 + $0x3b] sm:$0x1] }
  0x42   :  { %v2756_v42 = vunpack.c.l.b16 %v2458_v33  ;;  %v2757_v43 = vunpack.c.l.b16 %v2459_v34  ;;  %v928_v44 = vmax.f32 %v288_v27, %v3275_v35  ;;  %v2758_v47 = vunpack.c.l.b16 %v2460_v36  ;;  %v69_v33 = vld [vmem:[%s4932_s0 + $0x3c] sm:$0x1]  ;;  %v70_v34 = vld [vmem:[%s4932_s0 + $0x3d] sm:$0x1] }
  0x43   :  { %v2759_v48 = vunpack.c.l.b16 %v2461_v37  ;;  %v2760_v49 = vunpack.c.l.b16 %v2462_v38  ;;  %v2761_v50 = vunpack.c.l.b16 %v2463_v39  ;;  %v2899_v54 = vrot.slane %v2755_v41, 7  ;;  %v71_v37 = vld [vmem:[%s4932_s0 + $0x3e] sm:$0x1] }
  0x44   :  { %v2900_v55 = vrot.slane %v2756_v42, 6  ;;  %v2902_v56 = vrot.slane %v2757_v43, 5  ;;  %v1184_v57 = vunpack.c.l.bf16 %v56_v40  ;;  %v2904_v59 = vrot.slane %v2758_v47, 4 }
  0x45   :  { %v2906_v60 = vrot.slane %v2759_v48, 3  ;;  %v2908_v61 = vrot.slane %v2760_v49, 2  ;;  %v2910_v62 = vrot.slane %v2761_v50, 1  ;;  %v289_v3 = vunpack.c.l.bf16 %v57_v45 }
  0x46   :  { %v2901_v1 = vsel %vm2869_vm2, %v2900_v55, %v2899_v54  ;;  %v3403_v2 = vrot.slane %v1184_v57, 9  ;;  %v290_v4 = vunpack.c.l.bf16 %v58_v46  ;;  %v291_v6 = vunpack.c.l.bf16 %v59_v51  ;;  %v3518_v46 = vld [vmem:[%s4931_s1 + $0x1c] sm:$0x1] }
  0x47   :  { %v2903_v5 = vsel %vm2872_vm3, %v2902_v56, %v2901_v1  ;;  %v292_v7 = vunpack.c.l.bf16 %v60_v53  ;;  %v293_v8 = vunpack.c.l.bf16 %v61_v0  ;;  %v294_v11 = vunpack.c.l.bf16 %v62_v58 }
  0x48   :  { %v2905_v9 = vsel %vm2875_vm4, %v2904_v59, %v2903_v5  ;;  %v1824_v10 = vmax.f32 %v1184_v57, %v3403_v2  ;;  %v295_v12 = vunpack.c.l.bf16 %v63_v63  ;;  %v3276_v14 = vrot.slane %v289_v3, 9  ;;  %v64_v59 = vld [vmem:[%s4932_s0 + $0x37] sm:$0x1] }
  0x49   :  { %v2907_v13 = vsel %vm2878_vm5, %v2906_v60, %v2905_v9  ;;  %v3277_v15 = vrot.slane %v290_v4, 9  ;;  %v3278_v16 = vrot.slane %v291_v6, 9  ;;  %v3279_v22 = vrot.slane %v292_v7, 9 }
  0x4a   :  { %v2909_v17 = vsel %vm2881_vm6, %v2908_v61, %v2907_v13  ;;  %v2336_v20 = vmax.f32 %v928_v44, %v1824_v10  ;;  %v3280_v23 = vrot.slane %v293_v8, 9  ;;  %v3281_v27 = vrot.slane %v294_v11, 9 }
  0x4b   :  { %v2911_v24 = vsel %vm2884_vm7, %v2910_v62, %v2909_v17  ;;  %v3282_v28 = vrot.slane %v295_v12, 9  ;;  %v929_v29 = vmax.f32 %v289_v3, %v3276_v14  ;;  %v930_v35 = vmax.f32 %v290_v4, %v3277_v15 }
  0x4c   :  { %v3085_v30 = vpack.c.b16 %v2911_v24, %v2911_v24  ;;  %v2464_v31 = vpack.c.bf16 %v2336_v20, %v2336_v20  ;;  %v931_v36 = vmax.f32 %v291_v6, %v3278_v16  ;;  %v932_v38 = vmax.f32 %v292_v7, %v3279_v22  ;;  %v72_v22 = vld [vmem:[%s4932_s0 + $0x3f] sm:$0x1] }
  0x4d   :  { %v933_v39 = vmax.f32 %v293_v8, %v3280_v23  ;;  %v934_v40 = vmax.f32 %v294_v11, %v3281_v27  ;;  %v935_v41 = vmax.f32 %v295_v12, %v3282_v28  ;;  %v1185_v44 = vunpack.c.l.bf16 %v65_v21 }
  0x4e   :  { %v3165_v42 = vsel %vm3827_vm10, %v3085_v30, %v3516_v18  ;;  %v2762_v43 = vunpack.c.l.b16 %v2464_v31  ;;  %v1186_v45 = vunpack.c.l.bf16 %v66_v25  ;;  %v1187_v47 = vunpack.c.l.bf16 %v67_v26  ;;  %v73_v31 = vld [vmem:[%s4932_s0 + $0x40] sm:$0x1] }
  0x4f   :  { %3517 = vst [vmem:[%s4931_s1 + $0x18] sm:$0xf] %v3165_v42  ;;  %v1188_v48 = vunpack.c.l.bf16 %v68_v32  ;;  %v1189_v49 = vunpack.c.l.bf16 %v69_v33  ;;  %v1190_v50 = vunpack.c.l.bf16 %v70_v34  ;;  %v1191_v53 = vunpack.c.l.bf16 %v71_v37  ;;  %v74_v32 = vld [vmem:[%s4932_s0 + $0x41] sm:$0x1]  ;;  %v75_v33 = vld [vmem:[%s4932_s0 + $0x42] sm:$0x1] }
  0x50   :  { %v3086_v51 = vpack.c.b16 %v2762_v43, %v2762_v43  ;;  %v3404_v0 = vrot.slane %v1185_v44, 9  ;;  %v3405_v54 = vrot.slane %v1186_v45, 9  ;;  %v3406_v55 = vrot.slane %v1187_v47, 9 }
  0x51   :  { %v3407_v56 = vrot.slane %v1188_v48, 9  ;;  %v3408_v57 = vrot.slane %v1189_v49, 9  ;;  %v3409_v58 = vrot.slane %v1190_v50, 9  ;;  %v3410_v61 = vrot.slane %v1191_v53, 9 }
  0x52   :  { %v3168_v60 = vsel %vm3883_vm11, %v3086_v51, %v3518_v46  ;;  %v1825_v62 = vmax.f32 %v1185_v44, %v3404_v0  ;;  %v1826_v63 = vmax.f32 %v1186_v45, %v3405_v54  ;;  %v1827_v1 = vmax.f32 %v1187_v47, %v3406_v55  ;;  %v78_v44 = vld [vmem:[%s4932_s0 + $0x45] sm:$0x1] }
  0x53   :  { %3519 = vst [vmem:[%s4931_s1 + $0x1c] sm:$0x1] %v3168_v60  ;;  %v1828_v2 = vmax.f32 %v1188_v48, %v3407_v56  ;;  %v1829_v3 = vmax.f32 %v1189_v49, %v3408_v57  ;;  %v1830_v4 = vmax.f32 %v1190_v50, %v3409_v58  ;;  %v1831_v5 = vmax.f32 %v1191_v53, %v3410_v61  ;;  %v79_v48 = vld [vmem:[%s4932_s0 + $0x46] sm:$0x1] }
  0x54   :  { %v2337_v6 = vmax.f32 %v929_v29, %v1825_v62  ;;  %v2338_v7 = vmax.f32 %v930_v35, %v1826_v63  ;;  %v296_v8 = vunpack.c.l.bf16 %v64_v59  ;;  %v2339_v9 = vmax.f32 %v931_v36, %v1827_v1  ;;  %v81_v1 = vld [vmem:[%s4932_s0 + $0x48] sm:$0x1] }
  0x55   :  { %v2340_v10 = vmax.f32 %v932_v38, %v1828_v2  ;;  %v2341_v11 = vmax.f32 %v933_v39, %v1829_v3  ;;  %v2342_v12 = vmax.f32 %v934_v40, %v1830_v4  ;;  %v2343_v13 = vmax.f32 %v935_v41, %v1831_v5  ;;  %v76_v38 = vld [vmem:[%s4932_s0 + $0x43] sm:$0x1]  ;;  %v77_v39 = vld [vmem:[%s4932_s0 + $0x44] sm:$0x1]  ;;  %v82_v2 = vld [vmem:[%s4932_s0 + $0x49] sm:$0x1] }
  0x56   :  { %v2465_v14 = vpack.c.bf16 %v2337_v6, %v2337_v6  ;;  %v2466_v15 = vpack.c.bf16 %v2338_v7, %v2338_v7  ;;  %v3283_v16 = vrot.slane %v296_v8, 9  ;;  %v2467_v17 = vpack.c.bf16 %v2339_v9, %v2339_v9  ;;  %v3520_v6 = vld [vmem:[%s4931_s1 + $0x20] sm:$0xf] }
  0x57   :  { %v2468_v18 = vpack.c.bf16 %v2340_v10, %v2340_v10  ;;  %v2469_v20 = vpack.c.bf16 %v2341_v11, %v2341_v11  ;;  %v2470_v21 = vpack.c.bf16 %v2342_v12, %v2342_v12  ;;  %v2471_v23 = vpack.c.bf16 %v2343_v13, %v2343_v13  ;;  %v83_v12 = vld [vmem:[%s4932_s0 + $0x4a] sm:$0x1]  ;;  %v84_v13 = vld [vmem:[%s4932_s0 + $0x4b] sm:$0x1] }
  0x58   :  { %v2763_v24 = vunpack.c.l.b16 %v2465_v14  ;;  %v2764_v25 = vunpack.c.l.b16 %v2466_v15  ;;  %v936_v26 = vmax.f32 %v296_v8, %v3283_v16  ;;  %v2765_v27 = vunpack.c.l.b16 %v2467_v17  ;;  %v85_v14 = vld [vmem:[%s4932_s0 + $0x4c] sm:$0x1]  ;;  %v86_v17 = vld [vmem:[%s4932_s0 + $0x4d] sm:$0x1] }
  0x59   :  { %v2766_v28 = vunpack.c.l.b16 %v2468_v18  ;;  %v2767_v29 = vunpack.c.l.b16 %v2469_v20  ;;  %v2768_v30 = vunpack.c.l.b16 %v2470_v21  ;;  %v2769_v34 = vunpack.c.l.b16 %v2471_v23  ;;  %v87_v18 = vld [vmem:[%s4932_s0 + $0x4e] sm:$0x1] }
  0x5a   :  { %v2912_v35 = vrot.slane %v2763_v24, 7  ;;  %v2913_v36 = vrot.slane %v2764_v25, 6  ;;  %v1192_v37 = vunpack.c.l.bf16 %v72_v22  ;;  %v2915_v40 = vrot.slane %v2765_v27, 5 }
  0x5b   :  { %v2917_v41 = vrot.slane %v2766_v28, 4  ;;  %v2919_v42 = vrot.slane %v2767_v29, 3  ;;  %v2921_v43 = vrot.slane %v2768_v30, 2  ;;  %v2923_v46 = vrot.slane %v2769_v34, 1  ;;  %v3522_v28 = vld [vmem:[%s4931_s1 + $0x24] sm:$0x1] }
  0x5c   :  { %v2914_v45 = vsel %vm2869_vm2, %v2913_v36, %v2912_v35  ;;  %v3411_v47 = vrot.slane %v1192_v37, 9  ;;  %v297_v49 = vunpack.c.l.bf16 %v73_v31  ;;  %v298_v51 = vunpack.c.l.bf16 %v74_v32 }
  0x5d   :  { %v2916_v50 = vsel %vm2872_vm3, %v2915_v40, %v2914_v45  ;;  %v299_v53 = vunpack.c.l.bf16 %v75_v33  ;;  %v300_v0 = vunpack.c.l.bf16 %v76_v38  ;;  %v301_v56 = vunpack.c.l.bf16 %v77_v39 }
  0x5e   :  { %v2918_v54 = vsel %vm2875_vm4, %v2917_v41, %v2916_v50  ;;  %v1832_v55 = vmax.f32 %v1192_v37, %v3411_v47  ;;  %v302_v57 = vunpack.c.l.bf16 %v78_v44  ;;  %v303_v59 = vunpack.c.l.bf16 %v79_v48  ;;  %v80_v41 = vld [vmem:[%s4932_s0 + $0x47] sm:$0x1] }
  0x5f   :  { %v2920_v58 = vsel %vm2878_vm5, %v2919_v42, %v2918_v54  ;;  %v3284_v60 = vrot.slane %v297_v49, 9  ;;  %v3285_v61 = vrot.slane %v298_v51, 9  ;;  %v3286_v3 = vrot.slane %v299_v53, 9 }
  0x60   :  { %v2922_v62 = vsel %vm2881_vm6, %v2921_v43, %v2920_v58  ;;  %v2344_v63 = vmax.f32 %v936_v26, %v1832_v55  ;;  %v3287_v4 = vrot.slane %v300_v0, 9  ;;  %v3288_v7 = vrot.slane %v301_v56, 9 }
  0x61   :  { %v2924_v5 = vsel %vm2884_vm7, %v2923_v46, %v2922_v62  ;;  %v3289_v8 = vrot.slane %v302_v57, 9  ;;  %v3290_v9 = vrot.slane %v303_v59, 9  ;;  %v937_v15 = vmax.f32 %v297_v49, %v3284_v60 }
  0x62   :  { %v3087_v10 = vpack.c.b16 %v2924_v5, %v2924_v5  ;;  %v2472_v11 = vpack.c.bf16 %v2344_v63, %v2344_v63  ;;  %v938_v16 = vmax.f32 %v298_v51, %v3285_v61  ;;  %v939_v20 = vmax.f32 %v299_v53, %v3286_v3  ;;  %v88_v3 = vld [vmem:[%s4932_s0 + $0x4f] sm:$0x1] }
  0x63   :  { %v940_v21 = vmax.f32 %v300_v0, %v3287_v4  ;;  %v941_v22 = vmax.f32 %v301_v56, %v3288_v7  ;;  %v942_v23 = vmax.f32 %v302_v57, %v3289_v8  ;;  %v943_v26 = vmax.f32 %v303_v59, %v3290_v9 }
  0x64   :  { %v3171_v24 = vsel %vm3827_vm10, %v3087_v10, %v3520_v6  ;;  %v2770_v25 = vunpack.c.l.b16 %v2472_v11  ;;  %v1193_v27 = vunpack.c.l.bf16 %v81_v1  ;;  %v1194_v29 = vunpack.c.l.bf16 %v82_v2 }
  0x65   :  { %3521 = vst [vmem:[%s4931_s1 + $0x20] sm:$0xf] %v3171_v24  ;;  %v1195_v30 = vunpack.c.l.bf16 %v83_v12  ;;  %v1196_v31 = vunpack.c.l.bf16 %v84_v13  ;;  %v1197_v32 = vunpack.c.l.bf16 %v85_v14  ;;  %v1198_v34 = vunpack.c.l.bf16 %v86_v17  ;;  %v89_v12 = vld [vmem:[%s4932_s0 + $0x50] sm:$0x1]  ;;  %v90_v13 = vld [vmem:[%s4932_s0 + $0x51] sm:$0x1] }
  0x66   :  { %v3088_v33 = vpack.c.b16 %v2770_v25, %v2770_v25  ;;  %v1199_v35 = vunpack.c.l.bf16 %v87_v18  ;;  %v3412_v36 = vrot.slane %v1193_v27, 9  ;;  %v3413_v37 = vrot.slane %v1194_v29, 9  ;;  %v91_v14 = vld [vmem:[%s4932_s0 + $0x52] sm:$0x1] }
  0x67   :  { %v3414_v38 = vrot.slane %v1195_v30, 9  ;;  %v3415_v39 = vrot.slane %v1196_v31, 9  ;;  %v3416_v40 = vrot.slane %v1197_v32, 9  ;;  %v3417_v43 = vrot.slane %v1198_v34, 9 }
  0x68   :  { %v3174_v42 = vsel %vm3883_vm11, %v3088_v33, %v3522_v28  ;;  %v3418_v44 = vrot.slane %v1199_v35, 9  ;;  %v1833_v45 = vmax.f32 %v1193_v27, %v3412_v36  ;;  %v1834_v46 = vmax.f32 %v1194_v29, %v3413_v37 }
  0x69   :  { %3523 = vst [vmem:[%s4931_s1 + $0x24] sm:$0x1] %v3174_v42  ;;  %v1835_v47 = vmax.f32 %v1195_v30, %v3414_v38  ;;  %v1836_v48 = vmax.f32 %v1196_v31, %v3415_v39  ;;  %v1837_v49 = vmax.f32 %v1197_v32, %v3416_v40  ;;  %v1838_v50 = vmax.f32 %v1198_v34, %v3417_v43  ;;  %v95_v30 = vld [vmem:[%s4932_s0 + $0x56] sm:$0x1] }
  0x6a   :  { %v1839_v51 = vmax.f32 %v1199_v35, %v3418_v44  ;;  %v2345_v53 = vmax.f32 %v937_v15, %v1833_v45  ;;  %v304_v0 = vunpack.c.l.bf16 %v80_v41  ;;  %v2346_v54 = vmax.f32 %v938_v16, %v1834_v46  ;;  %v97_v46 = vld [vmem:[%s4932_s0 + $0x58] sm:$0x1] }
  0x6b   :  { %v2347_v55 = vmax.f32 %v939_v20, %v1835_v47  ;;  %v2348_v56 = vmax.f32 %v940_v21, %v1836_v48  ;;  %v2349_v57 = vmax.f32 %v941_v22, %v1837_v49  ;;  %v2350_v58 = vmax.f32 %v942_v23, %v1838_v50  ;;  %v92_v20 = vld [vmem:[%s4932_s0 + $0x53] sm:$0x1]  ;;  %v93_v21 = vld [vmem:[%s4932_s0 + $0x54] sm:$0x1]  ;;  %v98_v50 = vld [vmem:[%s4932_s0 + $0x59] sm:$0x1] }
  0x6c   :  { %v2351_v59 = vmax.f32 %v943_v26, %v1839_v51  ;;  %v2473_v60 = vpack.c.bf16 %v2345_v53, %v2345_v53  ;;  %v3291_v61 = vrot.slane %v304_v0, 9  ;;  %v2474_v62 = vpack.c.bf16 %v2346_v54, %v2346_v54  ;;  %v94_v26 = vld [vmem:[%s4932_s0 + $0x55] sm:$0x1] }
  0x6d   :  { %v2475_v63 = vpack.c.bf16 %v2347_v55, %v2347_v55  ;;  %v2476_v1 = vpack.c.bf16 %v2348_v56, %v2348_v56  ;;  %v2477_v2 = vpack.c.bf16 %v2349_v57, %v2349_v57  ;;  %v2478_v4 = vpack.c.bf16 %v2350_v58, %v2350_v58  ;;  %v3524_v55 = vld [vmem:[%s4931_s1 + $0x28] sm:$0xf]  ;;  %v99_v57 = vld [vmem:[%s4932_s0 + $0x5a] sm:$0x1]  ;;  %v100_v58 = vld [vmem:[%s4932_s0 + $0x5b] sm:$0x1] }
  0x6e   :  { %v2479_v5 = vpack.c.bf16 %v2351_v59, %v2351_v59  ;;  %v2771_v6 = vunpack.c.l.b16 %v2473_v60  ;;  %v944_v7 = vmax.f32 %v304_v0, %v3291_v61  ;;  %v2772_v8 = vunpack.c.l.b16 %v2474_v62  ;;  %v101_v62 = vld [vmem:[%s4932_s0 + $0x5c] sm:$0x1] }
  0x6f   :  { %v2773_v9 = vunpack.c.l.b16 %v2475_v63  ;;  %v2774_v10 = vunpack.c.l.b16 %v2476_v1  ;;  %v2775_v11 = vunpack.c.l.b16 %v2477_v2  ;;  %v2776_v15 = vunpack.c.l.b16 %v2478_v4  ;;  %v102_v63 = vld [vmem:[%s4932_s0 + $0x5d] sm:$0x1]  ;;  %v103_v1 = vld [vmem:[%s4932_s0 + $0x5e] sm:$0x1] }
  0x70   :  { %v2777_v16 = vunpack.c.l.b16 %v2479_v5  ;;  %v2925_v17 = vrot.slane %v2771_v6, 7  ;;  %v1200_v18 = vunpack.c.l.bf16 %v88_v3  ;;  %v2926_v22 = vrot.slane %v2772_v8, 6 }
  0x71   :  { %v2928_v23 = vrot.slane %v2773_v9, 5  ;;  %v2930_v24 = vrot.slane %v2774_v10, 4  ;;  %v2932_v25 = vrot.slane %v2775_v11, 3  ;;  %v2934_v27 = vrot.slane %v2776_v15, 2  ;;  %v3526_v10 = vld [vmem:[%s4931_s1 + $0x2c] sm:$0x1] }
  0x72   :  { %v2936_v28 = vrot.slane %v2777_v16, 1  ;;  %v3419_v29 = vrot.slane %v1200_v18, 9  ;;  %v305_v31 = vunpack.c.l.bf16 %v89_v12  ;;  %v2927_v32 = vsel %vm2869_vm2, %v2926_v22, %v2925_v17 }
  0x73   :  { %v306_v33 = vunpack.c.l.bf16 %v90_v13  ;;  %v307_v34 = vunpack.c.l.bf16 %v91_v14  ;;  %v308_v35 = vunpack.c.l.bf16 %v92_v20  ;;  %v2929_v36 = vsel %vm2872_vm3, %v2928_v23, %v2927_v32  ;;  %v96_v23 = vld [vmem:[%s4932_s0 + $0x57] sm:$0x1] }
  0x74   :  { %v1840_v37 = vmax.f32 %v1200_v18, %v3419_v29  ;;  %v309_v38 = vunpack.c.l.bf16 %v93_v21  ;;  %v310_v39 = vunpack.c.l.bf16 %v94_v26  ;;  %v2931_v40 = vsel %vm2875_vm4, %v2930_v24, %v2929_v36 }
  0x75   :  { %v311_v41 = vunpack.c.l.bf16 %v95_v30  ;;  %v3292_v42 = vrot.slane %v305_v31, 9  ;;  %v3293_v43 = vrot.slane %v306_v33, 9  ;;  %v2933_v44 = vsel %vm2878_vm5, %v2932_v25, %v2931_v40 }
  0x76   :  { %v2352_v45 = vmax.f32 %v944_v7, %v1840_v37  ;;  %v3294_v47 = vrot.slane %v307_v34, 9  ;;  %v3295_v48 = vrot.slane %v308_v35, 9  ;;  %v2935_v49 = vsel %vm2881_vm6, %v2934_v27, %v2933_v44 }
  0x77   :  { %v3296_v51 = vrot.slane %v309_v38, 9  ;;  %v3297_v53 = vrot.slane %v310_v39, 9  ;;  %v3298_v0 = vrot.slane %v311_v41, 9  ;;  %v2937_v54 = vsel %vm2884_vm7, %v2936_v28, %v2935_v49 }
  0x78   :  { %v2480_v56 = vpack.c.bf16 %v2352_v45, %v2352_v45  ;;  %v945_v59 = vmax.f32 %v305_v31, %v3292_v42  ;;  %v946_v60 = vmax.f32 %v306_v33, %v3293_v43  ;;  %v3089_v61 = vpack.c.b16 %v2937_v54, %v2937_v54 }
  0x79   :  { %v947_v2 = vmax.f32 %v307_v34, %v3294_v47  ;;  %v948_v3 = vmax.f32 %v308_v35, %v3295_v48  ;;  %v949_v4 = vmax.f32 %v309_v38, %v3296_v51  ;;  %v950_v6 = vmax.f32 %v310_v39, %v3297_v53  ;;  %v104_v48 = vld [vmem:[%s4932_s0 + $0x5f] sm:$0x1] }
  0x7a   :  { %v2778_v5 = vunpack.c.l.b16 %v2480_v56  ;;  %v951_v7 = vmax.f32 %v311_v41, %v3298_v0  ;;  %v1201_v8 = vunpack.c.l.bf16 %v97_v46  ;;  %v3177_v9 = vsel %vm3827_vm10, %v3089_v61, %v3524_v55 }
  0x7b   :  { %v1202_v11 = vunpack.c.l.bf16 %v98_v50  ;;  %v1203_v12 = vunpack.c.l.bf16 %v99_v57  ;;  %v1204_v13 = vunpack.c.l.bf16 %v100_v58  ;;  %3525 = vst [vmem:[%s4931_s1 + $0x28] sm:$0xf] %v3177_v9  ;;  %v1205_v15 = vunpack.c.l.bf16 %v101_v62  ;;  %v105_v57 = vld [vmem:[%s4932_s0 + $0x60] sm:$0x1]  ;;  %v106_v58 = vld [vmem:[%s4932_s0 + $0x61] sm:$0x1] }
  0x7c   :  { %v3090_v14 = vpack.c.b16 %v2778_v5, %v2778_v5  ;;  %v1206_v16 = vunpack.c.l.bf16 %v102_v63  ;;  %v1207_v17 = vunpack.c.l.bf16 %v103_v1  ;;  %v3420_v18 = vrot.slane %v1201_v8, 9  ;;  %v107_v63 = vld [vmem:[%s4932_s0 + $0x62] sm:$0x1]  ;;  %v108_v1 = vld [vmem:[%s4932_s0 + $0x63] sm:$0x1] }
  0x7d   :  { %v3421_v20 = vrot.slane %v1202_v11, 9  ;;  %v3422_v21 = vrot.slane %v1203_v12, 9  ;;  %v3423_v22 = vrot.slane %v1204_v13, 9  ;;  %v3424_v25 = vrot.slane %v1205_v15, 9 }
  0x7e   :  { %v3180_v24 = vsel %vm3883_vm11, %v3090_v14, %v3526_v10  ;;  %v3425_v26 = vrot.slane %v1206_v16, 9  ;;  %v3426_v27 = vrot.slane %v1207_v17, 9  ;;  %v1841_v28 = vmax.f32 %v1201_v8, %v3420_v18 }
  0x7f   :  { %3527 = vst [vmem:[%s4931_s1 + $0x2c] sm:$0x1] %v3180_v24  ;;  %v1842_v29 = vmax.f32 %v1202_v11, %v3421_v20  ;;  %v1843_v30 = vmax.f32 %v1203_v12, %v3422_v21  ;;  %v1844_v31 = vmax.f32 %v1204_v13, %v3423_v22  ;;  %v1845_v32 = vmax.f32 %v1205_v15, %v3424_v25  ;;  %v111_v12 = vld [vmem:[%s4932_s0 + $0x66] sm:$0x1] }
  0x80   :  { %v1846_v33 = vmax.f32 %v1206_v16, %v3425_v26  ;;  %v1847_v34 = vmax.f32 %v1207_v17, %v3426_v27  ;;  %v312_v35 = vunpack.c.l.bf16 %v96_v23  ;;  %v2353_v36 = vmax.f32 %v945_v59, %v1841_v28  ;;  %v113_v28 = vld [vmem:[%s4932_s0 + $0x68] sm:$0x1] }
  0x81   :  { %v2354_v37 = vmax.f32 %v946_v60, %v1842_v29  ;;  %v2355_v38 = vmax.f32 %v947_v2, %v1843_v30  ;;  %v2356_v39 = vmax.f32 %v948_v3, %v1844_v31  ;;  %v2357_v40 = vmax.f32 %v949_v4, %v1845_v32  ;;  %v109_v2 = vld [vmem:[%s4932_s0 + $0x64] sm:$0x1]  ;;  %v114_v32 = vld [vmem:[%s4932_s0 + $0x69] sm:$0x1] }
  0x82   :  { %v2358_v41 = vmax.f32 %v950_v6, %v1846_v33  ;;  %v2359_v42 = vmax.f32 %v951_v7, %v1847_v34  ;;  %v3299_v43 = vrot.slane %v312_v35, 9  ;;  %v2481_v44 = vpack.c.bf16 %v2353_v36, %v2353_v36  ;;  %v110_v7 = vld [vmem:[%s4932_s0 + $0x65] sm:$0x1] }
  0x83   :  { %v2482_v45 = vpack.c.bf16 %v2354_v37, %v2354_v37  ;;  %v2483_v46 = vpack.c.bf16 %v2355_v38, %v2355_v38  ;;  %v2484_v47 = vpack.c.bf16 %v2356_v39, %v2356_v39  ;;  %v2485_v49 = vpack.c.bf16 %v2357_v40, %v2357_v40  ;;  %v3528_v37 = vld [vmem:[%s4931_s1 + $0x30] sm:$0xf]  ;;  %v115_v39 = vld [vmem:[%s4932_s0 + $0x6a] sm:$0x1] }
  0x84   :  { %v2486_v50 = vpack.c.bf16 %v2358_v41, %v2358_v41  ;;  %v2487_v51 = vpack.c.bf16 %v2359_v42, %v2359_v42  ;;  %v952_v53 = vmax.f32 %v312_v35, %v3299_v43  ;;  %v2779_v0 = vunpack.c.l.b16 %v2481_v44  ;;  %v116_v43 = vld [vmem:[%s4932_s0 + $0x6b] sm:$0x1]  ;;  %v117_v44 = vld [vmem:[%s4932_s0 + $0x6c] sm:$0x1] }
  0x85   :  { %v2780_v54 = vunpack.c.l.b16 %v2482_v45  ;;  %v2781_v55 = vunpack.c.l.b16 %v2483_v46  ;;  %v2782_v56 = vunpack.c.l.b16 %v2484_v47  ;;  %v2783_v59 = vunpack.c.l.b16 %v2485_v49  ;;  %v118_v45 = vld [vmem:[%s4932_s0 + $0x6d] sm:$0x1] }
  0x86   :  { %v2784_v60 = vunpack.c.l.b16 %v2486_v50  ;;  %v2785_v61 = vunpack.c.l.b16 %v2487_v51  ;;  %v1208_v62 = vunpack.c.l.bf16 %v104_v48  ;;  %v2938_v3 = vrot.slane %v2779_v0, 7  ;;  %v119_v50 = vld [vmem:[%s4932_s0 + $0x6e] sm:$0x1] }
  0x87   :  { %v2939_v4 = vrot.slane %v2780_v54, 6  ;;  %v2941_v5 = vrot.slane %v2781_v55, 5  ;;  %v2943_v6 = vrot.slane %v2782_v56, 4  ;;  %v2945_v8 = vrot.slane %v2783_v59, 3  ;;  %v3530_v55 = vld [vmem:[%s4931_s1 + $0x34] sm:$0x1] }
  0x88   :  { %v2947_v9 = vrot.slane %v2784_v60, 2  ;;  %v2949_v10 = vrot.slane %v2785_v61, 1  ;;  %v3427_v11 = vrot.slane %v1208_v62, 9  ;;  %v313_v14 = vunpack.c.l.bf16 %v105_v57 }
  0x89   :  { %v2940_v13 = vsel %vm2869_vm2, %v2939_v4, %v2938_v3  ;;  %v314_v15 = vunpack.c.l.bf16 %v106_v58  ;;  %v315_v16 = vunpack.c.l.bf16 %v107_v63  ;;  %v316_v20 = vunpack.c.l.bf16 %v108_v1  ;;  %v112_v4 = vld [vmem:[%s4932_s0 + $0x67] sm:$0x1] }
  0x8a   :  { %v2942_v17 = vsel %vm2872_vm3, %v2941_v5, %v2940_v13  ;;  %v1848_v18 = vmax.f32 %v1208_v62, %v3427_v11  ;;  %v317_v21 = vunpack.c.l.bf16 %v109_v2  ;;  %v318_v23 = vunpack.c.l.bf16 %v110_v7 }
  0x8b   :  { %v2944_v22 = vsel %vm2875_vm4, %v2943_v6, %v2942_v17  ;;  %v319_v24 = vunpack.c.l.bf16 %v111_v12  ;;  %v3300_v25 = vrot.slane %v313_v14, 9  ;;  %v3301_v29 = vrot.slane %v314_v15, 9 }
  0x8c   :  { %v2946_v26 = vsel %vm2878_vm5, %v2945_v8, %v2944_v22  ;;  %v2360_v27 = vmax.f32 %v952_v53, %v1848_v18  ;;  %v3302_v30 = vrot.slane %v315_v16, 9  ;;  %v3303_v33 = vrot.slane %v316_v20, 9 }
  0x8d   :  { %v2948_v31 = vsel %vm2881_vm6, %v2947_v9, %v2946_v26  ;;  %v3304_v34 = vrot.slane %v317_v21, 9  ;;  %v3305_v35 = vrot.slane %v318_v23, 9  ;;  %v3306_v40 = vrot.slane %v319_v24, 9 }
  0x8e   :  { %v2950_v36 = vsel %vm2884_vm7, %v2949_v10, %v2948_v31  ;;  %v2488_v38 = vpack.c.bf16 %v2360_v27, %v2360_v27  ;;  %v953_v41 = vmax.f32 %v313_v14, %v3300_v25  ;;  %v954_v46 = vmax.f32 %v314_v15, %v3301_v29 }
  0x8f   :  { %v3091_v42 = vpack.c.b16 %v2950_v36, %v2950_v36  ;;  %v955_v47 = vmax.f32 %v315_v16, %v3302_v30  ;;  %v956_v48 = vmax.f32 %v316_v20, %v3303_v33  ;;  %v957_v51 = vmax.f32 %v317_v21, %v3304_v34  ;;  %v120_v30 = vld [vmem:[%s4932_s0 + $0x6f] sm:$0x1] }
  0x90   :  { %v2786_v49 = vunpack.c.l.b16 %v2488_v38  ;;  %v958_v53 = vmax.f32 %v318_v23, %v3305_v35  ;;  %v959_v0 = vmax.f32 %v319_v24, %v3306_v40  ;;  %v1209_v56 = vunpack.c.l.bf16 %v113_v28  ;;  %v122_v40 = vld [vmem:[%s4932_s0 + $0x71] sm:$0x1] }
  0x91   :  { %v3183_v54 = vsel %vm3827_vm10, %v3091_v42, %v3528_v37  ;;  %v1210_v57 = vunpack.c.l.bf16 %v114_v32  ;;  %v1211_v58 = vunpack.c.l.bf16 %v115_v39  ;;  %v1212_v60 = vunpack.c.l.bf16 %v116_v43  ;;  %v121_v39 = vld [vmem:[%s4932_s0 + $0x70] sm:$0x1] }
  0x92   :  { %3529 = vst [vmem:[%s4931_s1 + $0x30] sm:$0xf] %v3183_v54  ;;  %v3092_v59 = vpack.c.b16 %v2786_v49, %v2786_v49  ;;  %v1213_v61 = vunpack.c.l.bf16 %v117_v44  ;;  %v1214_v62 = vunpack.c.l.bf16 %v118_v45  ;;  %v1215_v63 = vunpack.c.l.bf16 %v119_v50  ;;  %v123_v45 = vld [vmem:[%s4932_s0 + $0x72] sm:$0x1] }
  0x93   :  { %v3428_v1 = vrot.slane %v1209_v56, 9  ;;  %v3429_v2 = vrot.slane %v1210_v57, 9  ;;  %v3430_v3 = vrot.slane %v1211_v58, 9  ;;  %v3431_v6 = vrot.slane %v1212_v60, 9 }
  0x94   :  { %v3186_v5 = vsel %vm3883_vm11, %v3092_v59, %v3530_v55  ;;  %v3432_v7 = vrot.slane %v1213_v61, 9  ;;  %v3433_v8 = vrot.slane %v1214_v62, 9  ;;  %v3434_v9 = vrot.slane %v1215_v63, 9 }
  0x95   :  { %3531 = vst [vmem:[%s4931_s1 + $0x34] sm:$0x1] %v3186_v5  ;;  %v1849_v10 = vmax.f32 %v1209_v56, %v3428_v1  ;;  %v1850_v11 = vmax.f32 %v1210_v57, %v3429_v2  ;;  %v1851_v12 = vmax.f32 %v1211_v58, %v3430_v3  ;;  %v1852_v13 = vmax.f32 %v1212_v60, %v3431_v6  ;;  %v127_v57 = vld [vmem:[%s4932_s0 + $0x76] sm:$0x1] }
  0x96   :  { %v1853_v14 = vmax.f32 %v1213_v61, %v3432_v7  ;;  %v1854_v15 = vmax.f32 %v1214_v62, %v3433_v8  ;;  %v320_v16 = vunpack.c.l.bf16 %v112_v4  ;;  %v1855_v17 = vmax.f32 %v1215_v63, %v3434_v9 }
  0x97   :  { %v2361_v18 = vmax.f32 %v953_v41, %v1849_v10  ;;  %v2362_v20 = vmax.f32 %v954_v46, %v1850_v11  ;;  %v2363_v21 = vmax.f32 %v955_v47, %v1851_v12  ;;  %v2364_v22 = vmax.f32 %v956_v48, %v1852_v13  ;;  %v124_v46 = vld [vmem:[%s4932_s0 + $0x73] sm:$0x1]  ;;  %v125_v47 = vld [vmem:[%s4932_s0 + $0x74] sm:$0x1]  ;;  %v129_v12 = vld [vmem:[%s4932_s0 + $0x78] sm:$0x1] }
  0x98   :  { %v2365_v23 = vmax.f32 %v957_v51, %v1853_v14  ;;  %v2366_v24 = vmax.f32 %v958_v53, %v1854_v15  ;;  %v3307_v25 = vrot.slane %v320_v16, 9  ;;  %v2367_v26 = vmax.f32 %v959_v0, %v1855_v17  ;;  %v126_v53 = vld [vmem:[%s4932_s0 + $0x75] sm:$0x1]  ;;  %v3532_v17 = vld [vmem:[%s4931_s1 + $0x38] sm:$0xf] }
  0x99   :  { %v2489_v27 = vpack.c.bf16 %v2361_v18, %v2361_v18  ;;  %v2490_v28 = vpack.c.bf16 %v2362_v20, %v2362_v20  ;;  %v2491_v29 = vpack.c.bf16 %v2363_v21, %v2363_v21  ;;  %v2492_v31 = vpack.c.bf16 %v2364_v22, %v2364_v22  ;;  %v130_v20 = vld [vmem:[%s4932_s0 + $0x79] sm:$0x1] }
  0x9a   :  { %v2493_v32 = vpack.c.bf16 %v2365_v23, %v2365_v23  ;;  %v2494_v33 = vpack.c.bf16 %v2366_v24, %v2366_v24  ;;  %v960_v34 = vmax.f32 %v320_v16, %v3307_v25  ;;  %v2495_v35 = vpack.c.bf16 %v2367_v26, %v2367_v26  ;;  %v131_v24 = vld [vmem:[%s4932_s0 + $0x7a] sm:$0x1]  ;;  %v132_v25 = vld [vmem:[%s4932_s0 + $0x7b] sm:$0x1]  ;;  %v133_v26 = vld [vmem:[%s4932_s0 + $0x7c] sm:$0x1] }
  0x9b   :  { %v2787_v36 = vunpack.c.l.b16 %v2489_v27  ;;  %v2788_v37 = vunpack.c.l.b16 %v2490_v28  ;;  %v2789_v38 = vunpack.c.l.b16 %v2491_v29  ;;  %v2790_v41 = vunpack.c.l.b16 %v2492_v31  ;;  %v134_v31 = vld [vmem:[%s4932_s0 + $0x7d] sm:$0x1] }
  0x9c   :  { %v2791_v42 = vunpack.c.l.b16 %v2493_v32  ;;  %v2792_v43 = vunpack.c.l.b16 %v2494_v33  ;;  %v1216_v44 = vunpack.c.l.bf16 %v120_v30  ;;  %v2793_v48 = vunpack.c.l.b16 %v2495_v35  ;;  %v135_v32 = vld [vmem:[%s4932_s0 + $0x7e] sm:$0x1] }
  0x9d   :  { %v2951_v49 = vrot.slane %v2787_v36, 7  ;;  %v2952_v50 = vrot.slane %v2788_v37, 6  ;;  %v2954_v51 = vrot.slane %v2789_v38, 5  ;;  %v2956_v0 = vrot.slane %v2790_v41, 4  ;;  %v3534_v37 = vld [vmem:[%s4931_s1 + $0x3c] sm:$0x1] }
  0x9e   :  { %v2958_v54 = vrot.slane %v2791_v42, 3  ;;  %v2960_v55 = vrot.slane %v2792_v43, 2  ;;  %v3435_v56 = vrot.slane %v1216_v44, 9  ;;  %v2962_v59 = vrot.slane %v2793_v48, 1 }
  0x9f   :  { %v2953_v58 = vsel %vm2869_vm2, %v2952_v50, %v2951_v49  ;;  %v321_v60 = vunpack.c.l.bf16 %v121_v39  ;;  %v322_v61 = vunpack.c.l.bf16 %v122_v40  ;;  %v323_v1 = vunpack.c.l.bf16 %v123_v45  ;;  %v128_v49 = vld [vmem:[%s4932_s0 + $0x77] sm:$0x1] }
  0xa0   :  { %v2955_v62 = vsel %vm2872_vm3, %v2954_v51, %v2953_v58  ;;  %v1856_v63 = vmax.f32 %v1216_v44, %v3435_v56  ;;  %v324_v2 = vunpack.c.l.bf16 %v124_v46  ;;  %v325_v4 = vunpack.c.l.bf16 %v125_v47 }
  0xa1   :  { %v2957_v3 = vsel %vm2875_vm4, %v2956_v0, %v2955_v62  ;;  %v326_v5 = vunpack.c.l.bf16 %v126_v53  ;;  %v327_v6 = vunpack.c.l.bf16 %v127_v57  ;;  %v3308_v9 = vrot.slane %v321_v60, 9 }
  0xa2   :  { %v2959_v7 = vsel %vm2878_vm5, %v2958_v54, %v2957_v3  ;;  %v2368_v8 = vmax.f32 %v960_v34, %v1856_v63  ;;  %v3309_v10 = vrot.slane %v322_v61, 9  ;;  %v3310_v13 = vrot.slane %v323_v1, 9 }
  0xa3   :  { %v2961_v11 = vsel %vm2881_vm6, %v2960_v55, %v2959_v7  ;;  %v3311_v14 = vrot.slane %v324_v2, 9  ;;  %v3312_v15 = vrot.slane %v325_v4, 9  ;;  %v3313_v21 = vrot.slane %v326_v5, 9 }
  0xa4   :  { %v2963_v16 = vsel %vm2884_vm7, %v2962_v59, %v2961_v11  ;;  %v2496_v18 = vpack.c.bf16 %v2368_v8, %v2368_v8  ;;  %v3314_v22 = vrot.slane %v327_v6, 9  ;;  %v961_v27 = vmax.f32 %v321_v60, %v3308_v9  ;;  %v136_v11 = vld [vmem:[%s4932_s0 + $0x7f] sm:$0x1] }
  0xa5   :  { %v3093_v23 = vpack.c.b16 %v2963_v16, %v2963_v16  ;;  %v962_v28 = vmax.f32 %v322_v61, %v3309_v10  ;;  %v963_v29 = vmax.f32 %v323_v1, %v3310_v13  ;;  %v964_v33 = vmax.f32 %v324_v2, %v3311_v14 }
  0xa6   :  { %v2794_v30 = vunpack.c.l.b16 %v2496_v18  ;;  %v965_v34 = vmax.f32 %v325_v4, %v3312_v15  ;;  %v966_v35 = vmax.f32 %v326_v5, %v3313_v21  ;;  %v967_v38 = vmax.f32 %v327_v6, %v3314_v22 }
  0xa7   :  { %v3189_v36 = vsel %vm3827_vm10, %v3093_v23, %v3532_v17  ;;  %v1217_v39 = vunpack.c.l.bf16 %v129_v12  ;;  %v1218_v40 = vunpack.c.l.bf16 %v130_v20  ;;  %v1219_v42 = vunpack.c.l.bf16 %v131_v24 }
  0xa8   :  { %3533 = vst [vmem:[%s4931_s1 + $0x38] sm:$0xf] %v3189_v36  ;;  %v3094_v41 = vpack.c.b16 %v2794_v30, %v2794_v30  ;;  %v1220_v43 = vunpack.c.l.bf16 %v132_v25  ;;  %v1221_v44 = vunpack.c.l.bf16 %v133_v26  ;;  %v1222_v45 = vunpack.c.l.bf16 %v134_v31  ;;  %v137_v25 = vld [vmem:[%s4932_s0 + $0x80] sm:$0x1]  ;;  %v138_v26 = vld [vmem:[%s4932_s0 + $0x81] sm:$0x1] }
  0xa9   :  { %v1223_v46 = vunpack.c.l.bf16 %v135_v32  ;;  %v3436_v47 = vrot.slane %v1217_v39, 9  ;;  %v3437_v48 = vrot.slane %v1218_v40, 9  ;;  %v3438_v51 = vrot.slane %v1219_v42, 9  ;;  %v140_v32 = vld [vmem:[%s4932_s0 + $0x83] sm:$0x1] }
  0xaa   :  { %v3192_v50 = vsel %vm3883_vm11, %v3094_v41, %v3534_v37  ;;  %v3439_v53 = vrot.slane %v1220_v43, 9  ;;  %v3440_v0 = vrot.slane %v1221_v44, 9  ;;  %v3441_v54 = vrot.slane %v1222_v45, 9 }
  0xab   :  { %3535 = vst [vmem:[%s4931_s1 + $0x3c] sm:$0x1] %v3192_v50  ;;  %v3442_v55 = vrot.slane %v1223_v46, 9  ;;  %v1857_v56 = vmax.f32 %v1217_v39, %v3436_v47  ;;  %v1858_v57 = vmax.f32 %v1218_v40, %v3437_v48  ;;  %v1859_v58 = vmax.f32 %v1219_v42, %v3438_v51  ;;  %v143_v42 = vld [vmem:[%s4932_s0 + $0x86] sm:$0x1] }
  0xac   :  { %v1860_v59 = vmax.f32 %v1220_v43, %v3439_v53  ;;  %v1861_v60 = vmax.f32 %v1221_v44, %v3440_v0  ;;  %v328_v61 = vunpack.c.l.bf16 %v128_v49  ;;  %v1862_v62 = vmax.f32 %v1222_v45, %v3441_v54 }
  0xad   :  { %v1863_v63 = vmax.f32 %v1223_v46, %v3442_v55  ;;  %v2369_v1 = vmax.f32 %v961_v27, %v1857_v56  ;;  %v2370_v2 = vmax.f32 %v962_v28, %v1858_v57  ;;  %v2371_v3 = vmax.f32 %v963_v29, %v1859_v58  ;;  %v139_v27 = vld [vmem:[%s4932_s0 + $0x82] sm:$0x1]  ;;  %v145_v57 = vld [vmem:[%s4932_s0 + $0x88] sm:$0x1] }
  0xae   :  { %v2372_v4 = vmax.f32 %v964_v33, %v1860_v59  ;;  %v2373_v5 = vmax.f32 %v965_v34, %v1861_v60  ;;  %v3315_v6 = vrot.slane %v328_v61, 9  ;;  %v2374_v7 = vmax.f32 %v966_v35, %v1862_v62  ;;  %v141_v33 = vld [vmem:[%s4932_s0 + $0x84] sm:$0x1]  ;;  %v3536_v62 = vld [vmem:[%s4931_s1 + $0x40] sm:$0xf] }
  0xaf   :  { %v2375_v8 = vmax.f32 %v967_v38, %v1863_v63  ;;  %v2497_v9 = vpack.c.bf16 %v2369_v1, %v2369_v1  ;;  %v2498_v10 = vpack.c.bf16 %v2370_v2, %v2370_v2  ;;  %v2499_v12 = vpack.c.bf16 %v2371_v3, %v2371_v3  ;;  %v142_v38 = vld [vmem:[%s4932_s0 + $0x85] sm:$0x1]  ;;  %v146_v1 = vld [vmem:[%s4932_s0 + $0x89] sm:$0x1] }
  0xb0   :  { %v2500_v13 = vpack.c.bf16 %v2372_v4, %v2372_v4  ;;  %v2501_v14 = vpack.c.bf16 %v2373_v5, %v2373_v5  ;;  %v968_v15 = vmax.f32 %v328_v61, %v3315_v6  ;;  %v2502_v16 = vpack.c.bf16 %v2374_v7, %v2374_v7  ;;  %v147_v5 = vld [vmem:[%s4932_s0 + $0x8a] sm:$0x1]  ;;  %v148_v6 = vld [vmem:[%s4932_s0 + $0x8b] sm:$0x1] }
  0xb1   :  { %v2503_v17 = vpack.c.bf16 %v2375_v8, %v2375_v8  ;;  %v2795_v18 = vunpack.c.l.b16 %v2497_v9  ;;  %v2796_v20 = vunpack.c.l.b16 %v2498_v10  ;;  %v2797_v21 = vunpack.c.l.b16 %v2499_v12  ;;  %v150_v12 = vld [vmem:[%s4932_s0 + $0x8d] sm:$0x1] }
  0xb2   :  { %v2798_v22 = vunpack.c.l.b16 %v2500_v13  ;;  %v2799_v23 = vunpack.c.l.b16 %v2501_v14  ;;  %v1224_v24 = vunpack.c.l.bf16 %v136_v11  ;;  %v2800_v28 = vunpack.c.l.b16 %v2502_v16  ;;  %v149_v11 = vld [vmem:[%s4932_s0 + $0x8c] sm:$0x1]  ;;  %v151_v13 = vld [vmem:[%s4932_s0 + $0x8e] sm:$0x1] }
  0xb3   :  { %v2801_v29 = vunpack.c.l.b16 %v2503_v17  ;;  %v2964_v30 = vrot.slane %v2795_v18, 7  ;;  %v2965_v31 = vrot.slane %v2796_v20, 6  ;;  %v2967_v34 = vrot.slane %v2797_v21, 5  ;;  %v3538_v18 = vld [vmem:[%s4931_s1 + $0x44] sm:$0x1] }
  0xb4   :  { %v2969_v35 = vrot.slane %v2798_v22, 4  ;;  %v2971_v36 = vrot.slane %v2799_v23, 3  ;;  %v3443_v37 = vrot.slane %v1224_v24, 9  ;;  %v2973_v40 = vrot.slane %v2800_v28, 2 }
  0xb5   :  { %v2966_v39 = vsel %vm2869_vm2, %v2965_v31, %v2964_v30  ;;  %v2975_v41 = vrot.slane %v2801_v29, 1  ;;  %v329_v43 = vunpack.c.l.bf16 %v137_v25  ;;  %v330_v46 = vunpack.c.l.bf16 %v138_v26  ;;  %v144_v31 = vld [vmem:[%s4932_s0 + $0x87] sm:$0x1] }
  0xb6   :  { %v2968_v44 = vsel %vm2872_vm3, %v2967_v34, %v2966_v39  ;;  %v1864_v45 = vmax.f32 %v1224_v24, %v3443_v37  ;;  %v331_v47 = vunpack.c.l.bf16 %v139_v27  ;;  %v332_v49 = vunpack.c.l.bf16 %v140_v32 }
  0xb7   :  { %v2970_v48 = vsel %vm2875_vm4, %v2969_v35, %v2968_v44  ;;  %v333_v50 = vunpack.c.l.bf16 %v141_v33  ;;  %v334_v51 = vunpack.c.l.bf16 %v142_v38  ;;  %v335_v54 = vunpack.c.l.bf16 %v143_v42 }
  0xb8   :  { %v2972_v53 = vsel %vm2878_vm5, %v2971_v36, %v2970_v48  ;;  %v2376_v0 = vmax.f32 %v968_v15, %v1864_v45  ;;  %v3316_v55 = vrot.slane %v329_v43, 9  ;;  %v3317_v58 = vrot.slane %v330_v46, 9 }
  0xb9   :  { %v2974_v56 = vsel %vm2881_vm6, %v2973_v40, %v2972_v53  ;;  %v3318_v59 = vrot.slane %v331_v47, 9  ;;  %v3319_v60 = vrot.slane %v332_v49, 9  ;;  %v3320_v2 = vrot.slane %v333_v50, 9 }
  0xba   :  { %v2976_v61 = vsel %vm2884_vm7, %v2975_v41, %v2974_v56  ;;  %v2504_v63 = vpack.c.bf16 %v2376_v0, %v2376_v0  ;;  %v3321_v3 = vrot.slane %v334_v51, 9  ;;  %v3322_v7 = vrot.slane %v335_v54, 9  ;;  %v152_v56 = vld [vmem:[%s4932_s0 + $0x8f] sm:$0x1] }
  0xbb   :  { %v3095_v4 = vpack.c.b16 %v2976_v61, %v2976_v61  ;;  %v969_v8 = vmax.f32 %v329_v43, %v3316_v55  ;;  %v970_v9 = vmax.f32 %v330_v46, %v3317_v58  ;;  %v971_v14 = vmax.f32 %v331_v47, %v3318_v59 }
  0xbc   :  { %v2802_v10 = vunpack.c.l.b16 %v2504_v63  ;;  %v972_v15 = vmax.f32 %v332_v49, %v3319_v60  ;;  %v973_v16 = vmax.f32 %v333_v50, %v3320_v2  ;;  %v974_v20 = vmax.f32 %v334_v51, %v3321_v3 }
  0xbd   :  { %v3195_v17 = vsel %vm3827_vm10, %v3095_v4, %v3536_v62  ;;  %v975_v21 = vmax.f32 %v335_v54, %v3322_v7  ;;  %v1225_v22 = vunpack.c.l.bf16 %v145_v57  ;;  %v1226_v24 = vunpack.c.l.bf16 %v146_v1  ;;  %v154_v7 = vld [vmem:[%s4932_s0 + $0x91] sm:$0x1] }
  0xbe   :  { %3537 = vst [vmem:[%s4931_s1 + $0x40] sm:$0xf] %v3195_v17  ;;  %v3096_v23 = vpack.c.b16 %v2802_v10, %v2802_v10  ;;  %v1227_v25 = vunpack.c.l.bf16 %v147_v5  ;;  %v1228_v26 = vunpack.c.l.bf16 %v148_v6  ;;  %v1229_v27 = vunpack.c.l.bf16 %v149_v11  ;;  %v153_v6 = vld [vmem:[%s4932_s0 + $0x90] sm:$0x1] }
  0xbf   :  { %v1230_v28 = vunpack.c.l.bf16 %v150_v12  ;;  %v1231_v29 = vunpack.c.l.bf16 %v151_v13  ;;  %v3444_v30 = vrot.slane %v1225_v22, 9  ;;  %v3445_v33 = vrot.slane %v1226_v24, 9  ;;  %v156_v13 = vld [vmem:[%s4932_s0 + $0x93] sm:$0x1] }
  0xc0   :  { %v3198_v32 = vsel %vm3883_vm11, %v3096_v23, %v3538_v18  ;;  %v3446_v34 = vrot.slane %v1227_v25, 9  ;;  %v3447_v35 = vrot.slane %v1228_v26, 9  ;;  %v3448_v36 = vrot.slane %v1229_v27, 9 }
  0xc1   :  { %3539 = vst [vmem:[%s4931_s1 + $0x44] sm:$0x1] %v3198_v32  ;;  %v3449_v37 = vrot.slane %v1230_v28, 9  ;;  %v3450_v38 = vrot.slane %v1231_v29, 9  ;;  %v1865_v39 = vmax.f32 %v1225_v22, %v3444_v30  ;;  %v1866_v40 = vmax.f32 %v1226_v24, %v3445_v33  ;;  %v159_v24 = vld [vmem:[%s4932_s0 + $0x96] sm:$0x1] }
  0xc2   :  { %v1867_v41 = vmax.f32 %v1227_v25, %v3446_v34  ;;  %v1868_v42 = vmax.f32 %v1228_v26, %v3447_v35  ;;  %v336_v43 = vunpack.c.l.bf16 %v144_v31  ;;  %v1869_v44 = vmax.f32 %v1229_v27, %v3448_v36 }
  0xc3   :  { %v1870_v45 = vmax.f32 %v1230_v28, %v3449_v37  ;;  %v1871_v46 = vmax.f32 %v1231_v29, %v3450_v38  ;;  %v2377_v47 = vmax.f32 %v969_v8, %v1865_v39  ;;  %v2378_v48 = vmax.f32 %v970_v9, %v1866_v40  ;;  %v155_v8 = vld [vmem:[%s4932_s0 + $0x92] sm:$0x1]  ;;  %v161_v39 = vld [vmem:[%s4932_s0 + $0x98] sm:$0x1] }
  0xc4   :  { %v2379_v49 = vmax.f32 %v971_v14, %v1867_v41  ;;  %v2380_v50 = vmax.f32 %v972_v15, %v1868_v42  ;;  %v3323_v51 = vrot.slane %v336_v43, 9  ;;  %v2381_v53 = vmax.f32 %v973_v16, %v1869_v44  ;;  %v157_v14 = vld [vmem:[%s4932_s0 + $0x94] sm:$0x1] }
  0xc5   :  { %v2382_v0 = vmax.f32 %v974_v20, %v1870_v45  ;;  %v2383_v54 = vmax.f32 %v975_v21, %v1871_v46  ;;  %v2505_v55 = vpack.c.bf16 %v2377_v47, %v2377_v47  ;;  %v2506_v57 = vpack.c.bf16 %v2378_v48, %v2378_v48  ;;  %v158_v20 = vld [vmem:[%s4932_s0 + $0x95] sm:$0x1]  ;;  %v162_v45 = vld [vmem:[%s4932_s0 + $0x99] sm:$0x1]  ;;  %v163_v46 = vld [vmem:[%s4932_s0 + $0x9a] sm:$0x1] }
  0xc6   :  { %v2507_v58 = vpack.c.bf16 %v2379_v49, %v2379_v49  ;;  %v2508_v59 = vpack.c.bf16 %v2380_v50, %v2380_v50  ;;  %v976_v60 = vmax.f32 %v336_v43, %v3323_v51  ;;  %v2509_v61 = vpack.c.bf16 %v2381_v53, %v2381_v53  ;;  %v3540_v50 = vld [vmem:[%s4931_s1 + $0x58] sm:$0xf] }
  0xc7   :  { %v2510_v62 = vpack.c.bf16 %v2382_v0, %v2382_v0  ;;  %v2511_v63 = vpack.c.bf16 %v2383_v54, %v2383_v54  ;;  %v2803_v1 = vunpack.c.l.b16 %v2505_v55  ;;  %v2804_v2 = vunpack.c.l.b16 %v2506_v57  ;;  %v164_v51 = vld [vmem:[%s4932_s0 + $0x9b] sm:$0x1]  ;;  %v165_v57 = vld [vmem:[%s4932_s0 + $0x9c] sm:$0x1] }
  0xc8   :  { %v2805_v3 = vunpack.c.l.b16 %v2507_v58  ;;  %v2806_v4 = vunpack.c.l.b16 %v2508_v59  ;;  %v1232_v5 = vunpack.c.l.bf16 %v152_v56  ;;  %v2807_v9 = vunpack.c.l.b16 %v2509_v61  ;;  %v166_v58 = vld [vmem:[%s4932_s0 + $0x9d] sm:$0x1]  ;;  %v167_v59 = vld [vmem:[%s4932_s0 + $0x9e] sm:$0x1] }
  0xc9   :  { %v2808_v10 = vunpack.c.l.b16 %v2510_v62  ;;  %v2809_v11 = vunpack.c.l.b16 %v2511_v63  ;;  %v2977_v12 = vrot.slane %v2803_v1, 7  ;;  %v2978_v15 = vrot.slane %v2804_v2, 6  ;;  %v3542_v62 = vld [vmem:[%s4931_s1 + $0x5c] sm:$0x1] }
  0xca   :  { %v2980_v16 = vrot.slane %v2805_v3, 5  ;;  %v2982_v17 = vrot.slane %v2806_v4, 4  ;;  %v3451_v18 = vrot.slane %v1232_v5, 9  ;;  %v2984_v21 = vrot.slane %v2807_v9, 3 }
  0xcb   :  { %v2986_v22 = vrot.slane %v2808_v10, 2  ;;  %v2988_v23 = vrot.slane %v2809_v11, 1  ;;  %v337_v25 = vunpack.c.l.bf16 %v153_v6  ;;  %v2979_v26 = vsel %vm2869_vm2, %v2978_v15, %v2977_v12  ;;  %v160_v12 = vld [vmem:[%s4932_s0 + $0x97] sm:$0x1] }
  0xcc   :  { %v1872_v27 = vmax.f32 %v1232_v5, %v3451_v18  ;;  %v338_v28 = vunpack.c.l.bf16 %v154_v7  ;;  %v339_v29 = vunpack.c.l.bf16 %v155_v8  ;;  %v2981_v30 = vsel %vm2872_vm3, %v2980_v16, %v2979_v26 }
  0xcd   :  { %v340_v31 = vunpack.c.l.bf16 %v156_v13  ;;  %v341_v32 = vunpack.c.l.bf16 %v157_v14  ;;  %v342_v33 = vunpack.c.l.bf16 %v158_v20  ;;  %v2983_v34 = vsel %vm2875_vm4, %v2982_v17, %v2981_v30 }
  0xce   :  { %v2384_v35 = vmax.f32 %v976_v60, %v1872_v27  ;;  %v343_v36 = vunpack.c.l.bf16 %v159_v24  ;;  %v3324_v37 = vrot.slane %v337_v25, 9  ;;  %v2985_v38 = vsel %vm2878_vm5, %v2984_v21, %v2983_v34 }
  0xcf   :  { %v3325_v40 = vrot.slane %v338_v28, 9  ;;  %v3326_v41 = vrot.slane %v339_v29, 9  ;;  %v3327_v42 = vrot.slane %v340_v31, 9  ;;  %v2987_v43 = vsel %vm2881_vm6, %v2986_v22, %v2985_v38  ;;  %v168_v38 = vld [vmem:[%s4932_s0 + $0x9f] sm:$0x1] }
  0xd0   :  { %v2512_v44 = vpack.c.bf16 %v2384_v35, %v2384_v35  ;;  %v3328_v47 = vrot.slane %v341_v32, 9  ;;  %v3329_v48 = vrot.slane %v342_v33, 9  ;;  %v2989_v49 = vsel %vm2884_vm7, %v2988_v23, %v2987_v43 }
  0xd1   :  { %v3330_v53 = vrot.slane %v343_v36, 9  ;;  %v977_v0 = vmax.f32 %v337_v25, %v3324_v37  ;;  %v978_v54 = vmax.f32 %v338_v28, %v3325_v40  ;;  %v3097_v55 = vpack.c.b16 %v2989_v49, %v2989_v49 }
  0xd2   :  { %v2810_v56 = vunpack.c.l.b16 %v2512_v44  ;;  %v979_v60 = vmax.f32 %v339_v29, %v3326_v41  ;;  %v980_v61 = vmax.f32 %v340_v31, %v3327_v42  ;;  %v981_v63 = vmax.f32 %v341_v32, %v3328_v47 }
  0xd3   :  { %v982_v1 = vmax.f32 %v342_v33, %v3329_v48  ;;  %v983_v2 = vmax.f32 %v343_v36, %v3330_v53  ;;  %v1233_v3 = vunpack.c.l.bf16 %v161_v39  ;;  %v3201_v4 = vsel %vm3827_vm10, %v3097_v55, %v3540_v50  ;;  %v170_v53 = vld [vmem:[%s4932_s0 + $0xa1] sm:$0x1] }
  0xd4   :  { %v3098_v5 = vpack.c.b16 %v2810_v56, %v2810_v56  ;;  %v1234_v6 = vunpack.c.l.bf16 %v162_v45  ;;  %v1235_v7 = vunpack.c.l.bf16 %v163_v46  ;;  %3541 = vst [vmem:[%s4931_s1 + $0x58] sm:$0xf] %v3201_v4  ;;  %v1236_v8 = vunpack.c.l.bf16 %v164_v51  ;;  %v169_v51 = vld [vmem:[%s4932_s0 + $0xa0] sm:$0x1] }
  0xd5   :  { %v1237_v9 = vunpack.c.l.bf16 %v165_v57  ;;  %v1238_v10 = vunpack.c.l.bf16 %v166_v58  ;;  %v1239_v11 = vunpack.c.l.bf16 %v167_v59  ;;  %v3452_v14 = vrot.slane %v1233_v3, 9  ;;  %v171_v57 = vld [vmem:[%s4932_s0 + $0xa2] sm:$0x1]  ;;  %v172_v58 = vld [vmem:[%s4932_s0 + $0xa3] sm:$0x1] }
  0xd6   :  { %v3204_v13 = vsel %vm3883_vm11, %v3098_v5, %v3542_v62  ;;  %v3453_v15 = vrot.slane %v1234_v6, 9  ;;  %v3454_v16 = vrot.slane %v1235_v7, 9  ;;  %v3455_v17 = vrot.slane %v1236_v8, 9  ;;  %v173_v59 = vld [vmem:[%s4932_s0 + $0xa4] sm:$0x1] }
  0xd7   :  { %3543 = vst [vmem:[%s4931_s1 + $0x5c] sm:$0x1] %v3204_v13  ;;  %v3456_v18 = vrot.slane %v1237_v9, 9  ;;  %v3457_v20 = vrot.slane %v1238_v10, 9  ;;  %v3458_v21 = vrot.slane %v1239_v11, 9  ;;  %v1873_v22 = vmax.f32 %v1233_v3, %v3452_v14 }
  0xd8   :  { %v1874_v23 = vmax.f32 %v1234_v6, %v3453_v15  ;;  %v1875_v24 = vmax.f32 %v1235_v7, %v3454_v16  ;;  %v344_v25 = vunpack.c.l.bf16 %v160_v12  ;;  %v1876_v26 = vmax.f32 %v1236_v8, %v3455_v17  ;;  %v175_v6 = vld [vmem:[%s4932_s0 + $0xa6] sm:$0x1] }
  0xd9   :  { %v1877_v27 = vmax.f32 %v1237_v9, %v3456_v18  ;;  %v1878_v28 = vmax.f32 %v1238_v10, %v3457_v20  ;;  %v1879_v29 = vmax.f32 %v1239_v11, %v3458_v21  ;;  %v2385_v30 = vmax.f32 %v977_v0, %v1873_v22 }
  0xda   :  { %v2386_v31 = vmax.f32 %v978_v54, %v1874_v23  ;;  %v2387_v32 = vmax.f32 %v979_v60, %v1875_v24  ;;  %v3331_v33 = vrot.slane %v344_v25, 9  ;;  %v2388_v34 = vmax.f32 %v980_v61, %v1876_v26  ;;  %v177_v26 = vld [vmem:[%s4932_s0 + $0xa8] sm:$0x1] }
  0xdb   :  { %v2389_v35 = vmax.f32 %v981_v63, %v1877_v27  ;;  %v2390_v36 = vmax.f32 %v982_v1, %v1878_v28  ;;  %v2391_v37 = vmax.f32 %v983_v2, %v1879_v29  ;;  %v2513_v39 = vpack.c.bf16 %v2385_v30, %v2385_v30  ;;  %v174_v1 = vld [vmem:[%s4932_s0 + $0xa5] sm:$0x1]  ;;  %v178_v27 = vld [vmem:[%s4932_s0 + $0xa9] sm:$0x1] }
  0xdc   :  { %v2514_v40 = vpack.c.bf16 %v2386_v31, %v2386_v31  ;;  %v2515_v41 = vpack.c.bf16 %v2387_v32, %v2387_v32  ;;  %v984_v42 = vmax.f32 %v344_v25, %v3331_v33  ;;  %v2516_v43 = vpack.c.bf16 %v2388_v34, %v2388_v34  ;;  %v3544_v31 = vld [vmem:[%s4931_s1 + $0x60] sm:$0xf]  ;;  %v179_v32 = vld [vmem:[%s4932_s0 + $0xaa] sm:$0x1] }
  0xdd   :  { %v2517_v44 = vpack.c.bf16 %v2389_v35, %v2389_v35  ;;  %v2518_v45 = vpack.c.bf16 %v2390_v36, %v2390_v36  ;;  %v2519_v46 = vpack.c.bf16 %v2391_v37, %v2391_v37  ;;  %v2811_v47 = vunpack.c.l.b16 %v2513_v39  ;;  %v181_v39 = vld [vmem:[%s4932_s0 + $0xac] sm:$0x1] }
  0xde   :  { %v2812_v48 = vunpack.c.l.b16 %v2514_v40  ;;  %v2813_v49 = vunpack.c.l.b16 %v2515_v41  ;;  %v1240_v50 = vunpack.c.l.bf16 %v168_v38  ;;  %v2814_v0 = vunpack.c.l.b16 %v2516_v43  ;;  %v180_v38 = vld [vmem:[%s4932_s0 + $0xab] sm:$0x1]  ;;  %v182_v40 = vld [vmem:[%s4932_s0 + $0xad] sm:$0x1]  ;;  %v3546_v43 = vld [vmem:[%s4931_s1 + $0x64] sm:$0x1] }
  0xdf   :  { %v2815_v54 = vunpack.c.l.b16 %v2517_v44  ;;  %v2816_v55 = vunpack.c.l.b16 %v2518_v45  ;;  %v2817_v56 = vunpack.c.l.b16 %v2519_v46  ;;  %v2990_v60 = vrot.slane %v2811_v47, 7  ;;  %v183_v44 = vld [vmem:[%s4932_s0 + $0xae] sm:$0x1] }
  0xe0   :  { %v2991_v61 = vrot.slane %v2812_v48, 6  ;;  %v2993_v62 = vrot.slane %v2813_v49, 5  ;;  %v3459_v63 = vrot.slane %v1240_v50, 9  ;;  %v2995_v2 = vrot.slane %v2814_v0, 4 }
  0xe1   :  { %v2997_v3 = vrot.slane %v2815_v54, 3  ;;  %v2999_v4 = vrot.slane %v2816_v55, 2  ;;  %v3001_v5 = vrot.slane %v2817_v56, 1  ;;  %v345_v9 = vunpack.c.l.bf16 %v169_v51 }
  0xe2   :  { %v2992_v7 = vsel %vm2869_vm2, %v2991_v61, %v2990_v60  ;;  %v1880_v8 = vmax.f32 %v1240_v50, %v3459_v63  ;;  %v346_v10 = vunpack.c.l.bf16 %v170_v53  ;;  %v347_v12 = vunpack.c.l.bf16 %v171_v57  ;;  %v176_v57 = vld [vmem:[%s4932_s0 + $0xa7] sm:$0x1] }
  0xe3   :  { %v2994_v11 = vsel %vm2872_vm3, %v2993_v62, %v2992_v7  ;;  %v348_v13 = vunpack.c.l.bf16 %v172_v58  ;;  %v349_v14 = vunpack.c.l.bf16 %v173_v59  ;;  %v350_v17 = vunpack.c.l.bf16 %v174_v1 }
  0xe4   :  { %v2996_v15 = vsel %vm2875_vm4, %v2995_v2, %v2994_v11  ;;  %v2392_v16 = vmax.f32 %v984_v42, %v1880_v8  ;;  %v351_v18 = vunpack.c.l.bf16 %v175_v6  ;;  %v3332_v21 = vrot.slane %v345_v9, 9 }
  0xe5   :  { %v2998_v20 = vsel %vm2878_vm5, %v2997_v3, %v2996_v15  ;;  %v3333_v22 = vrot.slane %v346_v10, 9  ;;  %v3334_v23 = vrot.slane %v347_v12, 9  ;;  %v3335_v28 = vrot.slane %v348_v13, 9 }
  0xe6   :  { %v3000_v24 = vsel %vm2881_vm6, %v2999_v4, %v2998_v20  ;;  %v2520_v25 = vpack.c.bf16 %v2392_v16, %v2392_v16  ;;  %v3336_v29 = vrot.slane %v349_v14, 9  ;;  %v3337_v33 = vrot.slane %v350_v17, 9  ;;  %v184_v20 = vld [vmem:[%s4932_s0 + $0xaf] sm:$0x1] }
  0xe7   :  { %v3002_v30 = vsel %vm2884_vm7, %v3001_v5, %v3000_v24  ;;  %v3338_v34 = vrot.slane %v351_v18, 9  ;;  %v985_v35 = vmax.f32 %v345_v9, %v3332_v21  ;;  %v986_v41 = vmax.f32 %v346_v10, %v3333_v22 }
  0xe8   :  { %v3099_v36 = vpack.c.b16 %v3002_v30, %v3002_v30  ;;  %v2818_v37 = vunpack.c.l.b16 %v2520_v25  ;;  %v987_v42 = vmax.f32 %v347_v12, %v3334_v23  ;;  %v988_v45 = vmax.f32 %v348_v13, %v3335_v28 }
  0xe9   :  { %v989_v46 = vmax.f32 %v349_v14, %v3336_v29  ;;  %v990_v47 = vmax.f32 %v350_v17, %v3337_v33  ;;  %v991_v48 = vmax.f32 %v351_v18, %v3338_v34  ;;  %v1241_v51 = vunpack.c.l.bf16 %v177_v26  ;;  %v185_v33 = vld [vmem:[%s4932_s0 + $0xb0] sm:$0x1] }
  0xea   :  { %v3207_v49 = vsel %vm3827_vm10, %v3099_v36, %v3544_v31  ;;  %v3100_v50 = vpack.c.b16 %v2818_v37, %v2818_v37  ;;  %v1242_v53 = vunpack.c.l.bf16 %v178_v27  ;;  %v1243_v0 = vunpack.c.l.bf16 %v179_v32 }
  0xeb   :  { %3545 = vst [vmem:[%s4931_s1 + $0x60] sm:$0xf] %v3207_v49  ;;  %v1244_v54 = vunpack.c.l.bf16 %v180_v38  ;;  %v1245_v55 = vunpack.c.l.bf16 %v181_v39  ;;  %v1246_v56 = vunpack.c.l.bf16 %v182_v40  ;;  %v1247_v59 = vunpack.c.l.bf16 %v183_v44  ;;  %v186_v38 = vld [vmem:[%s4932_s0 + $0xb1] sm:$0x1]  ;;  %v187_v39 = vld [vmem:[%s4932_s0 + $0xb2] sm:$0x1] }
  0xec   :  { %v3210_v58 = vsel %vm3883_vm11, %v3100_v50, %v3546_v43  ;;  %v3460_v60 = vrot.slane %v1241_v51, 9  ;;  %v3461_v61 = vrot.slane %v1242_v53, 9  ;;  %v3462_v62 = vrot.slane %v1243_v0, 9  ;;  %v188_v40 = vld [vmem:[%s4932_s0 + $0xb3] sm:$0x1] }
  0xed   :  { %3547 = vst [vmem:[%s4931_s1 + $0x64] sm:$0x1] %v3210_v58  ;;  %v3463_v63 = vrot.slane %v1244_v54, 9  ;;  %v3464_v1 = vrot.slane %v1245_v55, 9  ;;  %v3465_v2 = vrot.slane %v1246_v56, 9  ;;  %v3466_v3 = vrot.slane %v1247_v59, 9 }
  0xee   :  { %v1881_v4 = vmax.f32 %v1241_v51, %v3460_v60  ;;  %v1882_v5 = vmax.f32 %v1242_v53, %v3461_v61  ;;  %v352_v6 = vunpack.c.l.bf16 %v176_v57  ;;  %v1883_v7 = vmax.f32 %v1243_v0, %v3462_v62  ;;  %v190_v50 = vld [vmem:[%s4932_s0 + $0xb5] sm:$0x1] }
  0xef   :  { %v1884_v8 = vmax.f32 %v1244_v54, %v3463_v63  ;;  %v1885_v9 = vmax.f32 %v1245_v55, %v3464_v1  ;;  %v1886_v10 = vmax.f32 %v1246_v56, %v3465_v2  ;;  %v1887_v11 = vmax.f32 %v1247_v59, %v3466_v3  ;;  %v191_v54 = vld [vmem:[%s4932_s0 + $0xb6] sm:$0x1] }
  0xf0   :  { %v2393_v12 = vmax.f32 %v985_v35, %v1881_v4  ;;  %v2394_v13 = vmax.f32 %v986_v41, %v1882_v5  ;;  %v3339_v14 = vrot.slane %v352_v6, 9  ;;  %v2395_v15 = vmax.f32 %v987_v42, %v1883_v7  ;;  %v193_v7 = vld [vmem:[%s4932_s0 + $0xb8] sm:$0x1] }
  0xf1   :  { %v2396_v16 = vmax.f32 %v988_v45, %v1884_v8  ;;  %v2397_v17 = vmax.f32 %v989_v46, %v1885_v9  ;;  %v2398_v18 = vmax.f32 %v990_v47, %v1886_v10  ;;  %v2399_v21 = vmax.f32 %v991_v48, %v1887_v11  ;;  %v189_v45 = vld [vmem:[%s4932_s0 + $0xb4] sm:$0x1]  ;;  %v194_v8 = vld [vmem:[%s4932_s0 + $0xb9] sm:$0x1] }
  0xf2   :  { %v2521_v22 = vpack.c.bf16 %v2393_v12, %v2393_v12  ;;  %v2522_v23 = vpack.c.bf16 %v2394_v13, %v2394_v13  ;;  %v992_v24 = vmax.f32 %v352_v6, %v3339_v14  ;;  %v2523_v25 = vpack.c.bf16 %v2395_v15, %v2395_v15  ;;  %v3548_v12 = vld [vmem:[%s4931_s1 + $0x68] sm:$0xf] }
  0xf3   :  { %v2524_v26 = vpack.c.bf16 %v2396_v16, %v2396_v16  ;;  %v2525_v27 = vpack.c.bf16 %v2397_v17, %v2397_v17  ;;  %v2526_v28 = vpack.c.bf16 %v2398_v18, %v2398_v18  ;;  %v2527_v29 = vpack.c.bf16 %v2399_v21, %v2399_v21  ;;  %v195_v18 = vld [vmem:[%s4932_s0 + $0xba] sm:$0x1]  ;;  %v197_v21 = vld [vmem:[%s4932_s0 + $0xbc] sm:$0x1] }
  0xf4   :  { %v2819_v30 = vunpack.c.l.b16 %v2521_v22  ;;  %v2820_v31 = vunpack.c.l.b16 %v2522_v23  ;;  %v1248_v32 = vunpack.c.l.bf16 %v184_v20  ;;  %v2821_v34 = vunpack.c.l.b16 %v2523_v25  ;;  %v196_v20 = vld [vmem:[%s4932_s0 + $0xbb] sm:$0x1]  ;;  %v198_v25 = vld [vmem:[%s4932_s0 + $0xbd] sm:$0x1] }
  0xf5   :  { %v2822_v35 = vunpack.c.l.b16 %v2524_v26  ;;  %v2823_v36 = vunpack.c.l.b16 %v2525_v27  ;;  %v2824_v37 = vunpack.c.l.b16 %v2526_v28  ;;  %v2825_v41 = vunpack.c.l.b16 %v2527_v29  ;;  %v199_v26 = vld [vmem:[%s4932_s0 + $0xbe] sm:$0x1] }
  0xf6   :  { %v3003_v42 = vrot.slane %v2819_v30, 7  ;;  %v3004_v43 = vrot.slane %v2820_v31, 6  ;;  %v3467_v44 = vrot.slane %v1248_v32, 9  ;;  %v3006_v46 = vrot.slane %v2821_v34, 5 }
  0xf7   :  { %v3008_v47 = vrot.slane %v2822_v35, 4  ;;  %v3010_v48 = vrot.slane %v2823_v36, 3  ;;  %v3012_v49 = vrot.slane %v2824_v37, 2  ;;  %v3014_v53 = vrot.slane %v2825_v41, 1 }
  0xf8   :  { %v3005_v51 = vsel %vm2869_vm2, %v3004_v43, %v3003_v42  ;;  %v1888_v0 = vmax.f32 %v1248_v32, %v3467_v44  ;;  %v353_v55 = vunpack.c.l.bf16 %v185_v33  ;;  %v354_v57 = vunpack.c.l.bf16 %v186_v38 }
  0xf9   :  { %v3007_v56 = vsel %vm2872_vm3, %v3006_v46, %v3005_v51  ;;  %v355_v58 = vunpack.c.l.bf16 %v187_v39  ;;  %v356_v59 = vunpack.c.l.bf16 %v188_v40  ;;  %v357_v62 = vunpack.c.l.bf16 %v189_v45  ;;  %v192_v39 = vld [vmem:[%s4932_s0 + $0xb7] sm:$0x1] }
  0xfa   :  { %v3009_v60 = vsel %vm2875_vm4, %v3008_v47, %v3007_v56  ;;  %v2400_v61 = vmax.f32 %v992_v24, %v1888_v0  ;;  %v358_v63 = vunpack.c.l.bf16 %v190_v50  ;;  %v359_v2 = vunpack.c.l.bf16 %v191_v54  ;;  %v3550_v24 = vld [vmem:[%s4931_s1 + $0x6c] sm:$0x1] }
  0xfb   :  { %v3011_v1 = vsel %vm2878_vm5, %v3010_v48, %v3009_v60  ;;  %v3340_v3 = vrot.slane %v353_v55, 9  ;;  %v3341_v4 = vrot.slane %v354_v57, 9  ;;  %v3342_v9 = vrot.slane %v355_v58, 9 }
  0xfc   :  { %v3013_v5 = vsel %vm2881_vm6, %v3012_v49, %v3011_v1  ;;  %v2528_v6 = vpack.c.bf16 %v2400_v61, %v2400_v61  ;;  %v3343_v10 = vrot.slane %v356_v59, 9  ;;  %v3344_v13 = vrot.slane %v357_v62, 9  ;;  %v200_v1 = vld [vmem:[%s4932_s0 + $0xbf] sm:$0x1] }
  0xfd   :  { %v3015_v11 = vsel %vm2884_vm7, %v3014_v53, %v3013_v5  ;;  %v3345_v14 = vrot.slane %v358_v63, 9  ;;  %v3346_v15 = vrot.slane %v359_v2, 9  ;;  %v993_v22 = vmax.f32 %v353_v55, %v3340_v3 }
  0xfe   :  { %v3101_v16 = vpack.c.b16 %v3015_v11, %v3015_v11  ;;  %v2826_v17 = vunpack.c.l.b16 %v2528_v6  ;;  %v994_v23 = vmax.f32 %v354_v57, %v3341_v4  ;;  %v995_v27 = vmax.f32 %v355_v58, %v3342_v9 }
  0xff   :  { %v996_v28 = vmax.f32 %v356_v59, %v3343_v10  ;;  %v997_v29 = vmax.f32 %v357_v62, %v3344_v13  ;;  %v998_v30 = vmax.f32 %v358_v63, %v3345_v14  ;;  %v999_v33 = vmax.f32 %v359_v2, %v3346_v15 }
 0x100   :  { %v3213_v31 = vsel %vm3827_vm10, %v3101_v16, %v3548_v12  ;;  %v3102_v32 = vpack.c.b16 %v2826_v17, %v2826_v17  ;;  %v1249_v34 = vunpack.c.l.bf16 %v193_v7  ;;  %v1250_v35 = vunpack.c.l.bf16 %v194_v8 }
 0x101   :  { %3549 = vst [vmem:[%s4931_s1 + $0x68] sm:$0xf] %v3213_v31  ;;  %v1251_v36 = vunpack.c.l.bf16 %v195_v18  ;;  %v1252_v37 = vunpack.c.l.bf16 %v196_v20  ;;  %v1253_v38 = vunpack.c.l.bf16 %v197_v21  ;;  %v1254_v41 = vunpack.c.l.bf16 %v198_v25  ;;  %v201_v18 = vld [vmem:[%s4932_s0 + $0xc0] sm:$0x1]  ;;  %v202_v20 = vld [vmem:[%s4932_s0 + $0xc1] sm:$0x1] }
 0x102   :  { %v3216_v40 = vsel %vm3883_vm11, %v3102_v32, %v3550_v24  ;;  %v1255_v42 = vunpack.c.l.bf16 %v199_v26  ;;  %v3468_v43 = vrot.slane %v1249_v34, 9  ;;  %v3469_v44 = vrot.slane %v1250_v35, 9  ;;  %v203_v21 = vld [vmem:[%s4932_s0 + $0xc2] sm:$0x1]  ;;  %v204_v26 = vld [vmem:[%s4932_s0 + $0xc3] sm:$0x1] }
 0x103   :  { %3551 = vst [vmem:[%s4931_s1 + $0x6c] sm:$0x1] %v3216_v40  ;;  %v3470_v45 = vrot.slane %v1251_v36, 9  ;;  %v3471_v46 = vrot.slane %v1252_v37, 9  ;;  %v3472_v47 = vrot.slane %v1253_v38, 9  ;;  %v3473_v48 = vrot.slane %v1254_v41, 9 }
 0x104   :  { %v3474_v49 = vrot.slane %v1255_v42, 9  ;;  %v1889_v50 = vmax.f32 %v1249_v34, %v3468_v43  ;;  %v360_v51 = vunpack.c.l.bf16 %v192_v39  ;;  %v1890_v53 = vmax.f32 %v1250_v35, %v3469_v44  ;;  %v206_v32 = vld [vmem:[%s4932_s0 + $0xc5] sm:$0x1] }
 0x105   :  { %v1891_v0 = vmax.f32 %v1251_v36, %v3470_v45  ;;  %v1892_v54 = vmax.f32 %v1252_v37, %v3471_v46  ;;  %v1893_v55 = vmax.f32 %v1253_v38, %v3472_v47  ;;  %v1894_v56 = vmax.f32 %v1254_v41, %v3473_v48  ;;  %v207_v36 = vld [vmem:[%s4932_s0 + $0xc6] sm:$0x1] }
 0x106   :  { %v1895_v57 = vmax.f32 %v1255_v42, %v3474_v49  ;;  %v2401_v58 = vmax.f32 %v993_v22, %v1889_v50  ;;  %v3347_v59 = vrot.slane %v360_v51, 9  ;;  %v2402_v60 = vmax.f32 %v994_v23, %v1890_v53  ;;  %v209_v53 = vld [vmem:[%s4932_s0 + $0xc8] sm:$0x1] }
 0x107   :  { %v2403_v61 = vmax.f32 %v995_v27, %v1891_v0  ;;  %v2404_v62 = vmax.f32 %v996_v28, %v1892_v54  ;;  %v2405_v63 = vmax.f32 %v997_v29, %v1893_v55  ;;  %v2406_v2 = vmax.f32 %v998_v30, %v1894_v56  ;;  %v205_v27 = vld [vmem:[%s4932_s0 + $0xc4] sm:$0x1]  ;;  %v210_v0 = vld [vmem:[%s4932_s0 + $0xc9] sm:$0x1] }
 0x108   :  { %v2407_v3 = vmax.f32 %v999_v33, %v1895_v57  ;;  %v2529_v4 = vpack.c.bf16 %v2401_v58, %v2401_v58  ;;  %v1000_v5 = vmax.f32 %v360_v51, %v3347_v59  ;;  %v2530_v6 = vpack.c.bf16 %v2402_v60, %v2402_v60  ;;  %v211_v57 = vld [vmem:[%s4932_s0 + $0xca] sm:$0x1] }
 0x109   :  { %v2531_v7 = vpack.c.bf16 %v2403_v61, %v2403_v61  ;;  %v2532_v8 = vpack.c.bf16 %v2404_v62, %v2404_v62  ;;  %v2533_v9 = vpack.c.bf16 %v2405_v63, %v2405_v63  ;;  %v2534_v10 = vpack.c.bf16 %v2406_v2, %v2406_v2  ;;  %v3552_v62 = vld [vmem:[%s4931_s1 + $0x70] sm:$0xf]  ;;  %v213_v2 = vld [vmem:[%s4932_s0 + $0xcc] sm:$0x1] }
 0x10a   :  { %v2535_v11 = vpack.c.bf16 %v2407_v3, %v2407_v3  ;;  %v2827_v12 = vunpack.c.l.b16 %v2529_v4  ;;  %v1256_v13 = vunpack.c.l.bf16 %v200_v1  ;;  %v2828_v14 = vunpack.c.l.b16 %v2530_v6  ;;  %v212_v1 = vld [vmem:[%s4932_s0 + $0xcb] sm:$0x1]  ;;  %v3554_v6 = vld [vmem:[%s4931_s1 + $0x74] sm:$0x1] }
 0x10b   :  { %v2829_v15 = vunpack.c.l.b16 %v2531_v7  ;;  %v2830_v16 = vunpack.c.l.b16 %v2532_v8  ;;  %v2831_v17 = vunpack.c.l.b16 %v2533_v9  ;;  %v2832_v22 = vunpack.c.l.b16 %v2534_v10  ;;  %v214_v7 = vld [vmem:[%s4932_s0 + $0xcd] sm:$0x1]  ;;  %v215_v8 = vld [vmem:[%s4932_s0 + $0xce] sm:$0x1] }
 0x10c   :  { %v2833_v23 = vunpack.c.l.b16 %v2535_v11  ;;  %v3016_v24 = vrot.slane %v2827_v12, 7  ;;  %v3475_v25 = vrot.slane %v1256_v13, 9  ;;  %v3017_v28 = vrot.slane %v2828_v14, 6 }
 0x10d   :  { %v3019_v29 = vrot.slane %v2829_v15, 5  ;;  %v3021_v30 = vrot.slane %v2830_v16, 4  ;;  %v3023_v31 = vrot.slane %v2831_v17, 3  ;;  %v3025_v33 = vrot.slane %v2832_v22, 2 }
 0x10e   :  { %v3027_v34 = vrot.slane %v2833_v23, 1  ;;  %v1896_v35 = vmax.f32 %v1256_v13, %v3475_v25  ;;  %v361_v37 = vunpack.c.l.bf16 %v201_v18  ;;  %v3018_v38 = vsel %vm2869_vm2, %v3017_v28, %v3016_v24 }
 0x10f   :  { %v362_v39 = vunpack.c.l.bf16 %v202_v20  ;;  %v363_v40 = vunpack.c.l.bf16 %v203_v21  ;;  %v364_v41 = vunpack.c.l.bf16 %v204_v26  ;;  %v3020_v42 = vsel %vm2872_vm3, %v3019_v29, %v3018_v38  ;;  %v208_v21 = vld [vmem:[%s4932_s0 + $0xc7] sm:$0x1] }
 0x110   :  { %v2408_v43 = vmax.f32 %v1000_v5, %v1896_v35  ;;  %v365_v44 = vunpack.c.l.bf16 %v205_v27  ;;  %v366_v45 = vunpack.c.l.bf16 %v206_v32  ;;  %v3022_v46 = vsel %vm2875_vm4, %v3021_v30, %v3020_v42 }
 0x111   :  { %v367_v47 = vunpack.c.l.bf16 %v207_v36  ;;  %v3348_v48 = vrot.slane %v361_v37, 9  ;;  %v3349_v49 = vrot.slane %v362_v39, 9  ;;  %v3024_v50 = vsel %vm2878_vm5, %v3023_v31, %v3022_v46  ;;  %v216_v46 = vld [vmem:[%s4932_s0 + $0xcf] sm:$0x1] }
 0x112   :  { %v2536_v51 = vpack.c.bf16 %v2408_v43, %v2408_v43  ;;  %v3350_v54 = vrot.slane %v363_v40, 9  ;;  %v3351_v55 = vrot.slane %v364_v41, 9  ;;  %v3026_v56 = vsel %vm2881_vm6, %v3025_v33, %v3024_v50 }
 0x113   :  { %v3352_v58 = vrot.slane %v365_v44, 9  ;;  %v3353_v59 = vrot.slane %v366_v45, 9  ;;  %v3354_v60 = vrot.slane %v367_v47, 9  ;;  %v3028_v61 = vsel %vm2884_vm7, %v3027_v34, %v3026_v56 }
 0x114   :  { %v2834_v63 = vunpack.c.l.b16 %v2536_v51  ;;  %v1001_v3 = vmax.f32 %v361_v37, %v3348_v48  ;;  %v1002_v4 = vmax.f32 %v362_v39, %v3349_v49  ;;  %v3103_v5 = vpack.c.b16 %v3028_v61, %v3028_v61 }
 0x115   :  { %v1003_v9 = vmax.f32 %v363_v40, %v3350_v54  ;;  %v1004_v10 = vmax.f32 %v364_v41, %v3351_v55  ;;  %v1005_v11 = vmax.f32 %v365_v44, %v3352_v58  ;;  %v1006_v13 = vmax.f32 %v366_v45, %v3353_v59 }
 0x116   :  { %v3104_v12 = vpack.c.b16 %v2834_v63, %v2834_v63  ;;  %v1007_v14 = vmax.f32 %v367_v47, %v3354_v60  ;;  %v1257_v15 = vunpack.c.l.bf16 %v209_v53  ;;  %v3219_v16 = vsel %vm3827_vm10, %v3103_v5, %v3552_v62  ;;  %v217_v63 = vld [vmem:[%s4932_s0 + $0xd0] sm:$0x1] }
 0x117   :  { %v1258_v17 = vunpack.c.l.bf16 %v210_v0  ;;  %v1259_v18 = vunpack.c.l.bf16 %v211_v57  ;;  %v1260_v20 = vunpack.c.l.bf16 %v212_v1  ;;  %3553 = vst [vmem:[%s4931_s1 + $0x70] sm:$0xf] %v3219_v16  ;;  %v1261_v23 = vunpack.c.l.bf16 %v213_v2  ;;  %v218_v1 = vld [vmem:[%s4932_s0 + $0xd1] sm:$0x1]  ;;  %v219_v2 = vld [vmem:[%s4932_s0 + $0xd2] sm:$0x1] }
 0x118   :  { %v3222_v22 = vsel %vm3883_vm11, %v3104_v12, %v3554_v6  ;;  %v1262_v24 = vunpack.c.l.bf16 %v214_v7  ;;  %v1263_v25 = vunpack.c.l.bf16 %v215_v8  ;;  %v3476_v26 = vrot.slane %v1257_v15, 9  ;;  %v220_v7 = vld [vmem:[%s4932_s0 + $0xd3] sm:$0x1]  ;;  %v221_v8 = vld [vmem:[%s4932_s0 + $0xd4] sm:$0x1] }
 0x119   :  { %3555 = vst [vmem:[%s4931_s1 + $0x74] sm:$0x1] %v3222_v22  ;;  %v3477_v27 = vrot.slane %v1258_v17, 9  ;;  %v3478_v28 = vrot.slane %v1259_v18, 9  ;;  %v3479_v29 = vrot.slane %v1260_v20, 9  ;;  %v3480_v30 = vrot.slane %v1261_v23, 9 }
 0x11a   :  { %v3481_v31 = vrot.slane %v1262_v24, 9  ;;  %v3482_v32 = vrot.slane %v1263_v25, 9  ;;  %v368_v33 = vunpack.c.l.bf16 %v208_v21  ;;  %v1897_v34 = vmax.f32 %v1257_v15, %v3476_v26 }
 0x11b   :  { %v1898_v35 = vmax.f32 %v1258_v17, %v3477_v27  ;;  %v1899_v36 = vmax.f32 %v1259_v18, %v3478_v28  ;;  %v1900_v37 = vmax.f32 %v1260_v20, %v3479_v29  ;;  %v1901_v38 = vmax.f32 %v1261_v23, %v3480_v30  ;;  %v223_v18 = vld [vmem:[%s4932_s0 + $0xd6] sm:$0x1] }
 0x11c   :  { %v1902_v39 = vmax.f32 %v1262_v24, %v3481_v31  ;;  %v1903_v40 = vmax.f32 %v1263_v25, %v3482_v32  ;;  %v3355_v41 = vrot.slane %v368_v33, 9  ;;  %v2409_v42 = vmax.f32 %v1001_v3, %v1897_v34  ;;  %v225_v34 = vld [vmem:[%s4932_s0 + $0xd8] sm:$0x1] }
 0x11d   :  { %v2410_v43 = vmax.f32 %v1002_v4, %v1898_v35  ;;  %v2411_v44 = vmax.f32 %v1003_v9, %v1899_v36  ;;  %v2412_v45 = vmax.f32 %v1004_v10, %v1900_v37  ;;  %v2413_v47 = vmax.f32 %v1005_v11, %v1901_v38  ;;  %v226_v35 = vld [vmem:[%s4932_s0 + $0xd9] sm:$0x1] }
 0x11e   :  { %v2414_v48 = vmax.f32 %v1006_v13, %v1902_v39  ;;  %v2415_v49 = vmax.f32 %v1007_v14, %v1903_v40  ;;  %v1008_v50 = vmax.f32 %v368_v33, %v3355_v41  ;;  %v2537_v51 = vpack.c.bf16 %v2409_v42, %v2409_v42  ;;  %v222_v13 = vld [vmem:[%s4932_s0 + $0xd5] sm:$0x1]  ;;  %v227_v39 = vld [vmem:[%s4932_s0 + $0xda] sm:$0x1] }
 0x11f   :  { %v2538_v53 = vpack.c.bf16 %v2410_v43, %v2410_v43  ;;  %v2539_v0 = vpack.c.bf16 %v2411_v44, %v2411_v44  ;;  %v2540_v54 = vpack.c.bf16 %v2412_v45, %v2412_v45  ;;  %v2541_v55 = vpack.c.bf16 %v2413_v47, %v2413_v47  ;;  %v3556_v44 = vld [vmem:[%s4931_s1 + $0x78] sm:$0xf] }
 0x120   :  { %v2542_v56 = vpack.c.bf16 %v2414_v48, %v2414_v48  ;;  %v2543_v57 = vpack.c.bf16 %v2415_v49, %v2415_v49  ;;  %v1264_v58 = vunpack.c.l.bf16 %v216_v46  ;;  %v2835_v59 = vunpack.c.l.b16 %v2537_v51  ;;  %v228_v46 = vld [vmem:[%s4932_s0 + $0xdb] sm:$0x1]  ;;  %v229_v51 = vld [vmem:[%s4932_s0 + $0xdc] sm:$0x1] }
 0x121   :  { %v2836_v60 = vunpack.c.l.b16 %v2538_v53  ;;  %v2837_v61 = vunpack.c.l.b16 %v2539_v0  ;;  %v2838_v62 = vunpack.c.l.b16 %v2540_v54  ;;  %v2839_v3 = vunpack.c.l.b16 %v2541_v55  ;;  %v230_v53 = vld [vmem:[%s4932_s0 + $0xdd] sm:$0x1] }
 0x122   :  { %v2840_v4 = vunpack.c.l.b16 %v2542_v56  ;;  %v2841_v5 = vunpack.c.l.b16 %v2543_v57  ;;  %v3483_v6 = vrot.slane %v1264_v58, 9  ;;  %v3029_v9 = vrot.slane %v2835_v59, 7  ;;  %v231_v57 = vld [vmem:[%s4932_s0 + $0xde] sm:$0x1] }
 0x123   :  { %v3030_v10 = vrot.slane %v2836_v60, 6  ;;  %v3032_v11 = vrot.slane %v2837_v61, 5  ;;  %v3034_v12 = vrot.slane %v2838_v62, 4  ;;  %v3036_v14 = vrot.slane %v2839_v3, 3 }
 0x124   :  { %v3038_v15 = vrot.slane %v2840_v4, 2  ;;  %v3040_v16 = vrot.slane %v2841_v5, 1  ;;  %v1904_v17 = vmax.f32 %v1264_v58, %v3483_v6  ;;  %v369_v21 = vunpack.c.l.bf16 %v217_v63 }
 0x125   :  { %v3031_v20 = vsel %vm2869_vm2, %v3030_v10, %v3029_v9  ;;  %v370_v22 = vunpack.c.l.bf16 %v218_v1  ;;  %v371_v23 = vunpack.c.l.bf16 %v219_v2  ;;  %v372_v26 = vunpack.c.l.bf16 %v220_v7  ;;  %v224_v2 = vld [vmem:[%s4932_s0 + $0xd7] sm:$0x1] }
 0x126   :  { %v3033_v24 = vsel %vm2872_vm3, %v3032_v11, %v3031_v20  ;;  %v2416_v25 = vmax.f32 %v1008_v50, %v1904_v17  ;;  %v373_v27 = vunpack.c.l.bf16 %v221_v8  ;;  %v374_v29 = vunpack.c.l.bf16 %v222_v13  ;;  %v3558_v50 = vld [vmem:[%s4931_s1 + $0x7c] sm:$0x1] }
 0x127   :  { %v3035_v28 = vsel %vm2875_vm4, %v3034_v12, %v3033_v24  ;;  %v375_v30 = vunpack.c.l.bf16 %v223_v18  ;;  %v3356_v31 = vrot.slane %v369_v21, 9  ;;  %v3357_v36 = vrot.slane %v370_v22, 9 }
 0x128   :  { %v3037_v32 = vsel %vm2878_vm5, %v3036_v14, %v3035_v28  ;;  %v2544_v33 = vpack.c.bf16 %v2416_v25, %v2416_v25  ;;  %v3358_v37 = vrot.slane %v371_v23, 9  ;;  %v3359_v40 = vrot.slane %v372_v26, 9  ;;  %v232_v28 = vld [vmem:[%s4932_s0 + $0xdf] sm:$0x1] }
 0x129   :  { %v3039_v38 = vsel %vm2881_vm6, %v3038_v15, %v3037_v32  ;;  %v3360_v41 = vrot.slane %v373_v27, 9  ;;  %v3361_v42 = vrot.slane %v374_v29, 9  ;;  %v3362_v47 = vrot.slane %v375_v30, 9 }
 0x12a   :  { %v3041_v43 = vsel %vm2884_vm7, %v3040_v16, %v3039_v38  ;;  %v2842_v45 = vunpack.c.l.b16 %v2544_v33  ;;  %v1009_v48 = vmax.f32 %v369_v21, %v3356_v31  ;;  %v1010_v0 = vmax.f32 %v370_v22, %v3357_v36 }
 0x12b   :  { %v3105_v49 = vpack.c.b16 %v3041_v43, %v3041_v43  ;;  %v1011_v54 = vmax.f32 %v371_v23, %v3358_v37  ;;  %v1012_v55 = vmax.f32 %v372_v26, %v3359_v40  ;;  %v1013_v58 = vmax.f32 %v373_v27, %v3360_v41 }
 0x12c   :  { %v3106_v56 = vpack.c.b16 %v2842_v45, %v2842_v45  ;;  %v1014_v59 = vmax.f32 %v374_v29, %v3361_v42  ;;  %v1015_v60 = vmax.f32 %v375_v30, %v3362_v47  ;;  %v1265_v62 = vunpack.c.l.bf16 %v225_v34  ;;  %v233_v45 = vld [vmem:[%s4932_s0 + $0xe0] sm:$0x1]  ;;  %v235_v47 = vld [vmem:[%s4932_s0 + $0xe2] sm:$0x1] }
 0x12d   :  { %v3225_v61 = vsel %vm3827_vm10, %v3105_v49, %v3556_v44  ;;  %v1266_v63 = vunpack.c.l.bf16 %v226_v35  ;;  %v1267_v1 = vunpack.c.l.bf16 %v227_v39  ;;  %v1268_v4 = vunpack.c.l.bf16 %v228_v46  ;;  %v234_v46 = vld [vmem:[%s4932_s0 + $0xe1] sm:$0x1] }
 0x12e   :  { %3557 = vst [vmem:[%s4931_s1 + $0x78] sm:$0xf] %v3225_v61  ;;  %v3228_v3 = vsel %vm3883_vm11, %v3106_v56, %v3558_v50  ;;  %v1269_v5 = vunpack.c.l.bf16 %v229_v51  ;;  %v1270_v6 = vunpack.c.l.bf16 %v230_v53  ;;  %v1271_v7 = vunpack.c.l.bf16 %v231_v57  ;;  %v236_v53 = vld [vmem:[%s4932_s0 + $0xe3] sm:$0x1] }
 0x12f   :  { %3559 = vst [vmem:[%s4931_s1 + $0x7c] sm:$0x1] %v3228_v3  ;;  %v3484_v8 = vrot.slane %v1265_v62, 9  ;;  %v3485_v9 = vrot.slane %v1266_v63, 9  ;;  %v3486_v10 = vrot.slane %v1267_v1, 9  ;;  %v3487_v11 = vrot.slane %v1268_v4, 9 }
 0x130   :  { %v3488_v12 = vrot.slane %v1269_v5, 9  ;;  %v3489_v13 = vrot.slane %v1270_v6, 9  ;;  %v376_v14 = vunpack.c.l.bf16 %v224_v2  ;;  %v3490_v15 = vrot.slane %v1271_v7, 9 }
 0x131   :  { %v1905_v16 = vmax.f32 %v1265_v62, %v3484_v8  ;;  %v1906_v17 = vmax.f32 %v1266_v63, %v3485_v9  ;;  %v1907_v18 = vmax.f32 %v1267_v1, %v3486_v10  ;;  %v1908_v20 = vmax.f32 %v1268_v4, %v3487_v11  ;;  %v239_v63 = vld [vmem:[%s4932_s0 + $0xe6] sm:$0x1] }
 0x132   :  { %v1909_v21 = vmax.f32 %v1269_v5, %v3488_v12  ;;  %v1910_v22 = vmax.f32 %v1270_v6, %v3489_v13  ;;  %v3363_v23 = vrot.slane %v376_v14, 9  ;;  %v1911_v24 = vmax.f32 %v1271_v7, %v3490_v15  ;;  %v241_v15 = vld [vmem:[%s4932_s0 + $0xe8] sm:$0x1] }
 0x133   :  { %v2417_v25 = vmax.f32 %v1009_v48, %v1905_v16  ;;  %v2418_v26 = vmax.f32 %v1010_v0, %v1906_v17  ;;  %v2419_v27 = vmax.f32 %v1011_v54, %v1907_v18  ;;  %v2420_v29 = vmax.f32 %v1012_v55, %v1908_v20  ;;  %v237_v0 = vld [vmem:[%s4932_s0 + $0xe4] sm:$0x1]  ;;  %v242_v20 = vld [vmem:[%s4932_s0 + $0xe9] sm:$0x1] }
 0x134   :  { %v2421_v30 = vmax.f32 %v1013_v58, %v1909_v21  ;;  %v2422_v31 = vmax.f32 %v1014_v59, %v1910_v22  ;;  %v1016_v32 = vmax.f32 %v376_v14, %v3363_v23  ;;  %v2423_v33 = vmax.f32 %v1015_v60, %v1911_v24  ;;  %v238_v58 = vld [vmem:[%s4932_s0 + $0xe5] sm:$0x1] }
 0x135   :  { %v2545_v34 = vpack.c.bf16 %v2417_v25, %v2417_v25  ;;  %v2546_v35 = vpack.c.bf16 %v2418_v26, %v2418_v26  ;;  %v2547_v36 = vpack.c.bf16 %v2419_v27, %v2419_v27  ;;  %v2548_v37 = vpack.c.bf16 %v2420_v29, %v2420_v29  ;;  %v3560_v25 = vld [vmem:[%s4931_s1 + $0x80] sm:$0xf]  ;;  %v243_v27 = vld [vmem:[%s4932_s0 + $0xea] sm:$0x1] }
 0x136   :  { %v2549_v38 = vpack.c.bf16 %v2421_v30, %v2421_v30  ;;  %v2550_v39 = vpack.c.bf16 %v2422_v31, %v2422_v31  ;;  %v1272_v40 = vunpack.c.l.bf16 %v232_v28  ;;  %v2551_v41 = vpack.c.bf16 %v2423_v33, %v2423_v33  ;;  %v3562_v31 = vld [vmem:[%s4931_s1 + $0x84] sm:$0x1]  ;;  %v245_v33 = vld [vmem:[%s4932_s0 + $0xec] sm:$0x1] }
 0x137   :  { %v2843_v42 = vunpack.c.l.b16 %v2545_v34  ;;  %v2844_v43 = vunpack.c.l.b16 %v2546_v35  ;;  %v2845_v44 = vunpack.c.l.b16 %v2547_v36  ;;  %v2846_v48 = vunpack.c.l.b16 %v2548_v37 }
 0x138   :  { %v2847_v49 = vunpack.c.l.b16 %v2549_v38  ;;  %v2848_v50 = vunpack.c.l.b16 %v2550_v39  ;;  %v3491_v51 = vrot.slane %v1272_v40, 9  ;;  %v2849_v54 = vunpack.c.l.b16 %v2551_v41  ;;  %v246_v38 = vld [vmem:[%s4932_s0 + $0xed] sm:$0x1]  ;;  %v247_v39 = vld [vmem:[%s4932_s0 + $0xee] sm:$0x1] }
 0x139   :  { %v3042_v55 = vrot.slane %v2843_v42, 7  ;;  %v3043_v56 = vrot.slane %v2844_v43, 6  ;;  %v3045_v57 = vrot.slane %v2845_v44, 5  ;;  %v3047_v59 = vrot.slane %v2846_v48, 4 }
 0x13a   :  { %v3049_v60 = vrot.slane %v2847_v49, 3  ;;  %v3051_v61 = vrot.slane %v2848_v50, 2  ;;  %v1912_v62 = vmax.f32 %v1272_v40, %v3491_v51  ;;  %v3053_v2 = vrot.slane %v2849_v54, 1 }
 0x13b   :  { %v3044_v1 = vsel %vm2869_vm2, %v3043_v56, %v3042_v55  ;;  %v377_v3 = vunpack.c.l.bf16 %v233_v45  ;;  %v378_v4 = vunpack.c.l.bf16 %v234_v46  ;;  %v379_v7 = vunpack.c.l.bf16 %v235_v47  ;;  %v240_v47 = vld [vmem:[%s4932_s0 + $0xe7] sm:$0x1] }
 0x13c   :  { %v3046_v5 = vsel %vm2872_vm3, %v3045_v57, %v3044_v1  ;;  %v2424_v6 = vmax.f32 %v1016_v32, %v1912_v62  ;;  %v380_v8 = vunpack.c.l.bf16 %v236_v53  ;;  %v381_v10 = vunpack.c.l.bf16 %v237_v0  ;;  %v244_v32 = vld [vmem:[%s4932_s0 + $0xeb] sm:$0x1] }
 0x13d   :  { %v3048_v9 = vsel %vm2875_vm4, %v3047_v59, %v3046_v5  ;;  %v382_v11 = vunpack.c.l.bf16 %v238_v58  ;;  %v383_v12 = vunpack.c.l.bf16 %v239_v63  ;;  %v3364_v16 = vrot.slane %v377_v3, 9 }
 0x13e   :  { %v3050_v13 = vsel %vm2878_vm5, %v3049_v60, %v3048_v9  ;;  %v2552_v14 = vpack.c.bf16 %v2424_v6, %v2424_v6  ;;  %v3365_v17 = vrot.slane %v378_v4, 9  ;;  %v3366_v21 = vrot.slane %v379_v7, 9  ;;  %v248_v9 = vld [vmem:[%s4932_s0 + $0xef] sm:$0x1] }
 0x13f   :  { %v3052_v18 = vsel %vm2881_vm6, %v3051_v61, %v3050_v13  ;;  %v3367_v22 = vrot.slane %v380_v8, 9  ;;  %v3368_v23 = vrot.slane %v381_v10, 9  ;;  %v3369_v28 = vrot.slane %v382_v11, 9 }
 0x140   :  { %v3054_v24 = vsel %vm2884_vm7, %v3053_v2, %v3052_v18  ;;  %v2850_v26 = vunpack.c.l.b16 %v2552_v14  ;;  %v3370_v29 = vrot.slane %v383_v12, 9  ;;  %v1017_v34 = vmax.f32 %v377_v3, %v3364_v16 }
 0x141   :  { %v3107_v30 = vpack.c.b16 %v3054_v24, %v3054_v24  ;;  %v1018_v35 = vmax.f32 %v378_v4, %v3365_v17  ;;  %v1019_v36 = vmax.f32 %v379_v7, %v3366_v21  ;;  %v1020_v40 = vmax.f32 %v380_v8, %v3367_v22 }
 0x142   :  { %v3108_v37 = vpack.c.b16 %v2850_v26, %v2850_v26  ;;  %v1021_v41 = vmax.f32 %v381_v10, %v3368_v23  ;;  %v1022_v42 = vmax.f32 %v382_v11, %v3369_v28  ;;  %v1023_v44 = vmax.f32 %v383_v12, %v3370_v29 }
 0x143   :  { %v3231_v43 = vsel %vm3827_vm10, %v3107_v30, %v3560_v25  ;;  %v1273_v45 = vunpack.c.l.bf16 %v241_v15  ;;  %v1274_v46 = vunpack.c.l.bf16 %v242_v20  ;;  %v1275_v49 = vunpack.c.l.bf16 %v243_v27  ;;  %v249_v27 = vld [vmem:[%s4932_s0 + $0xf0] sm:$0x1] }
 0x144   :  { %3561 = vst [vmem:[%s4931_s1 + $0x80] sm:$0xf] %v3231_v43  ;;  %v3234_v48 = vsel %vm3883_vm11, %v3108_v37, %v3562_v31  ;;  %v1276_v50 = vunpack.c.l.bf16 %v244_v32  ;;  %v1277_v51 = vunpack.c.l.bf16 %v245_v33  ;;  %v1278_v53 = vunpack.c.l.bf16 %v246_v38  ;;  %v250_v32 = vld [vmem:[%s4932_s0 + $0xf1] sm:$0x1]  ;;  %v251_v33 = vld [vmem:[%s4932_s0 + $0xf2] sm:$0x1] }
 0x145   :  { %3563 = vst [vmem:[%s4931_s1 + $0x84] sm:$0x1] %v3234_v48  ;;  %v1279_v0 = vunpack.c.l.bf16 %v247_v39  ;;  %v3492_v54 = vrot.slane %v1273_v45, 9  ;;  %v3493_v55 = vrot.slane %v1274_v46, 9  ;;  %v3494_v56 = vrot.slane %v1275_v49, 9 }
 0x146   :  { %v3495_v57 = vrot.slane %v1276_v50, 9  ;;  %v3496_v58 = vrot.slane %v1277_v51, 9  ;;  %v384_v59 = vunpack.c.l.bf16 %v240_v47  ;;  %v3497_v60 = vrot.slane %v1278_v53, 9  ;;  %v252_v38 = vld [vmem:[%s4932_s0 + $0xf3] sm:$0x1] }
 0x147   :  { %v3498_v61 = vrot.slane %v1279_v0, 9  ;;  %v1913_v62 = vmax.f32 %v1273_v45, %v3492_v54  ;;  %v1914_v63 = vmax.f32 %v1274_v46, %v3493_v55  ;;  %v1915_v1 = vmax.f32 %v1275_v49, %v3494_v56  ;;  %v253_v39 = vld [vmem:[%s4932_s0 + $0xf4] sm:$0x1]  ;;  %v255_v48 = vld [vmem:[%s4932_s0 + $0xf6] sm:$0x1] }
 0x148   :  { %v1916_v2 = vmax.f32 %v1276_v50, %v3495_v57  ;;  %v1917_v3 = vmax.f32 %v1277_v51, %v3496_v58  ;;  %v3371_v4 = vrot.slane %v384_v59, 9  ;;  %v1918_v5 = vmax.f32 %v1278_v53, %v3497_v60  ;;  %v257_v60 = vld [vmem:[%s4932_s0 + $0xf8] sm:$0x1] }
 0x149   :  { %v1919_v6 = vmax.f32 %v1279_v0, %v3498_v61  ;;  %v2425_v7 = vmax.f32 %v1017_v34, %v1913_v62  ;;  %v2426_v8 = vmax.f32 %v1018_v35, %v1914_v63  ;;  %v2427_v10 = vmax.f32 %v1019_v36, %v1915_v1  ;;  %v258_v1 = vld [vmem:[%s4932_s0 + $0xf9] sm:$0x1] }
 0x14a   :  { %v2428_v11 = vmax.f32 %v1020_v40, %v1916_v2  ;;  %v2429_v12 = vmax.f32 %v1021_v41, %v1917_v3  ;;  %v1024_v13 = vmax.f32 %v384_v59, %v3371_v4  ;;  %v2430_v14 = vmax.f32 %v1022_v42, %v1918_v5 }
 0x14b   :  { %v2431_v15 = vmax.f32 %v1023_v44, %v1919_v6  ;;  %v2553_v16 = vpack.c.bf16 %v2425_v7, %v2425_v7  ;;  %v2554_v17 = vpack.c.bf16 %v2426_v8, %v2426_v8  ;;  %v2555_v18 = vpack.c.bf16 %v2427_v10, %v2427_v10  ;;  %v254_v44 = vld [vmem:[%s4932_s0 + $0xf5] sm:$0x1]  ;;  %v3564_v6 = vld [vmem:[%s4931_s1 + $0x88] sm:$0xf]  ;;  %v259_v8 = vld [vmem:[%s4932_s0 + $0xfa] sm:$0x1] }
 0x14c   :  { %v2556_v20 = vpack.c.bf16 %v2428_v11, %v2428_v11  ;;  %v2557_v21 = vpack.c.bf16 %v2429_v12, %v2429_v12  ;;  %v1280_v22 = vunpack.c.l.bf16 %v248_v9  ;;  %v2558_v23 = vpack.c.bf16 %v2430_v14, %v2430_v14  ;;  %v3566_v12 = vld [vmem:[%s4931_s1 + $0x8c] sm:$0x1] }
 0x14d   :  { %v2559_v24 = vpack.c.bf16 %v2431_v15, %v2431_v15  ;;  %v2851_v25 = vunpack.c.l.b16 %v2553_v16  ;;  %v2852_v26 = vunpack.c.l.b16 %v2554_v17  ;;  %v2853_v28 = vunpack.c.l.b16 %v2555_v18  ;;  %v261_v18 = vld [vmem:[%s4932_s0 + $0xfc] sm:$0x1] }
 0x14e   :  { %v2854_v29 = vunpack.c.l.b16 %v2556_v20  ;;  %v2855_v30 = vunpack.c.l.b16 %v2557_v21  ;;  %v3499_v31 = vrot.slane %v1280_v22, 9  ;;  %v2856_v34 = vunpack.c.l.b16 %v2558_v23  ;;  %v262_v20 = vld [vmem:[%s4932_s0 + $0xfd] sm:$0x1]  ;;  %v263_v21 = vld [vmem:[%s4932_s0 + $0xfe] sm:$0x1] }
 0x14f   :  { %v2857_v35 = vunpack.c.l.b16 %v2559_v24  ;;  %v3055_v36 = vrot.slane %v2851_v25, 7  ;;  %v3056_v37 = vrot.slane %v2852_v26, 6  ;;  %v3058_v40 = vrot.slane %v2853_v28, 5 }
 0x150   :  { %v3060_v41 = vrot.slane %v2854_v29, 4  ;;  %v3062_v42 = vrot.slane %v2855_v30, 3  ;;  %v1920_v43 = vmax.f32 %v1280_v22, %v3499_v31  ;;  %v3064_v46 = vrot.slane %v2856_v34, 2  ;;  %v256_v29 = vld [vmem:[%s4932_s0 + $0xf7] sm:$0x1] }
 0x151   :  { %v3057_v45 = vsel %vm2869_vm2, %v3056_v37, %v3055_v36  ;;  %v3066_v47 = vrot.slane %v2857_v35, 1  ;;  %v385_v49 = vunpack.c.l.bf16 %v249_v27  ;;  %v386_v53 = vunpack.c.l.bf16 %v250_v32 }
 0x152   :  { %v3059_v50 = vsel %vm2872_vm3, %v3058_v40, %v3057_v45  ;;  %v2432_v51 = vmax.f32 %v1024_v13, %v1920_v43  ;;  %v387_v0 = vunpack.c.l.bf16 %v251_v33  ;;  %v388_v55 = vunpack.c.l.bf16 %v252_v38  ;;  %v260_v13 = vld [vmem:[%s4932_s0 + $0xfb] sm:$0x1] }
 0x153   :  { %v3061_v54 = vsel %vm2875_vm4, %v3060_v41, %v3059_v50  ;;  %v389_v56 = vunpack.c.l.bf16 %v253_v39  ;;  %v390_v57 = vunpack.c.l.bf16 %v254_v44  ;;  %v391_v61 = vunpack.c.l.bf16 %v255_v48 }
 0x154   :  { %v3063_v58 = vsel %vm2878_vm5, %v3062_v42, %v3061_v54  ;;  %v2560_v59 = vpack.c.bf16 %v2432_v51, %v2432_v51  ;;  %v3372_v62 = vrot.slane %v385_v49, 9  ;;  %v3373_v2 = vrot.slane %v386_v53, 9  ;;  %v264_v54 = vld [vmem:[%s4932_s0 + $0xff] sm:$0x1] }
 0x155   :  { %v3065_v63 = vsel %vm2881_vm6, %v3064_v46, %v3063_v58  ;;  %v3374_v3 = vrot.slane %v387_v0, 9  ;;  %v3375_v4 = vrot.slane %v388_v55, 9  ;;  %v3376_v9 = vrot.slane %v389_v56, 9 }
 0x156   :  { %v3067_v5 = vsel %vm2884_vm7, %v3066_v47, %v3065_v63  ;;  %v2858_v7 = vunpack.c.l.b16 %v2560_v59  ;;  %v3377_v10 = vrot.slane %v390_v57, 9  ;;  %v3378_v14 = vrot.slane %v391_v61, 9 }
 0x157   :  { %v3109_v11 = vpack.c.b16 %v3067_v5, %v3067_v5  ;;  %v1025_v15 = vmax.f32 %v385_v49, %v3372_v62  ;;  %v1026_v16 = vmax.f32 %v386_v53, %v3373_v2  ;;  %v1027_v22 = vmax.f32 %v387_v0, %v3374_v3 }
 0x158   :  { %v3110_v17 = vpack.c.b16 %v2858_v7, %v2858_v7  ;;  %v1028_v23 = vmax.f32 %v388_v55, %v3375_v4  ;;  %v1029_v24 = vmax.f32 %v389_v56, %v3376_v9  ;;  %v1030_v26 = vmax.f32 %v390_v57, %v3377_v10 }
 0x159   :  { %v3237_v25 = vsel %vm3827_vm10, %v3109_v11, %v3564_v6  ;;  %v1031_v27 = vmax.f32 %v391_v61, %v3378_v14  ;;  %v1281_v28 = vunpack.c.l.bf16 %v257_v60  ;;  %v1282_v31 = vunpack.c.l.bf16 %v258_v1 }
 0x15a   :  { %3565 = vst [vmem:[%s4931_s1 + $0x88] sm:$0xf] %v3237_v25  ;;  %v3240_v30 = vsel %vm3883_vm11, %v3110_v17, %v3566_v12  ;;  %v1283_v32 = vunpack.c.l.bf16 %v259_v8  ;;  %v1284_v33 = vunpack.c.l.bf16 %v260_v13  ;;  %v1285_v34 = vunpack.c.l.bf16 %v261_v18 }
 0x15b   :  { %3567 = vst [vmem:[%s4931_s1 + $0x8c] sm:$0x1] %v3240_v30  ;;  %v1286_v35 = vunpack.c.l.bf16 %v262_v20  ;;  %v1287_v36 = vunpack.c.l.bf16 %v263_v21  ;;  %v3500_v37 = vrot.slane %v1281_v28, 9  ;;  %v3501_v38 = vrot.slane %v1282_v31, 9 }
 0x15c   :  { %v3502_v39 = vrot.slane %v1283_v32, 9  ;;  %v3503_v40 = vrot.slane %v1284_v33, 9  ;;  %v392_v41 = vunpack.c.l.bf16 %v256_v29  ;;  %v3504_v42 = vrot.slane %v1285_v34, 9 }
 0x15d   :  { %v3505_v43 = vrot.slane %v1286_v35, 9  ;;  %v3506_v44 = vrot.slane %v1287_v36, 9  ;;  %v1921_v45 = vmax.f32 %v1281_v28, %v3500_v37  ;;  %v1922_v46 = vmax.f32 %v1282_v31, %v3501_v38 }
 0x15e   :  { %v1923_v47 = vmax.f32 %v1283_v32, %v3502_v39  ;;  %v1924_v48 = vmax.f32 %v1284_v33, %v3503_v40  ;;  %v3379_v49 = vrot.slane %v392_v41, 9  ;;  %v1925_v50 = vmax.f32 %v1285_v34, %v3504_v42  ;;  %v3568_v33 = vld [vmem:[%s4931_s1 + $0x90] sm:$0xf]  ;;  %v3570_v34 = vld [vmem:[%s4931_s1 + $0x94] sm:$0x1] }
 0x15f   :  { %v1926_v51 = vmax.f32 %v1286_v35, %v3505_v43  ;;  %v1927_v53 = vmax.f32 %v1287_v36, %v3506_v44  ;;  %v2433_v0 = vmax.f32 %v1025_v15, %v1921_v45  ;;  %v2434_v55 = vmax.f32 %v1026_v16, %v1922_v46 }
 0x160   :  { %v2435_v56 = vmax.f32 %v1027_v22, %v1923_v47  ;;  %v2436_v57 = vmax.f32 %v1028_v23, %v1924_v48  ;;  %v1032_v58 = vmax.f32 %v392_v41, %v3379_v49  ;;  %v2437_v59 = vmax.f32 %v1029_v24, %v1925_v50 }
 0x161   :  { %v2438_v60 = vmax.f32 %v1030_v26, %v1926_v51  ;;  %v2439_v61 = vmax.f32 %v1031_v27, %v1927_v53  ;;  %v2561_v62 = vpack.c.bf16 %v2433_v0, %v2433_v0  ;;  %v2562_v63 = vpack.c.bf16 %v2434_v55, %v2434_v55 }
 0x162   :  { %v2563_v1 = vpack.c.bf16 %v2435_v56, %v2435_v56  ;;  %v2564_v2 = vpack.c.bf16 %v2436_v57, %v2436_v57  ;;  %v1288_v3 = vunpack.c.l.bf16 %v264_v54  ;;  %v2565_v4 = vpack.c.bf16 %v2437_v59, %v2437_v59 }
 0x163   :  { %v2566_v5 = vpack.c.bf16 %v2438_v60, %v2438_v60  ;;  %v2567_v6 = vpack.c.bf16 %v2439_v61, %v2439_v61  ;;  %v2859_v7 = vunpack.c.l.b16 %v2561_v62  ;;  %v2860_v8 = vunpack.c.l.b16 %v2562_v63 }
 0x164   :  { %v2861_v9 = vunpack.c.l.b16 %v2563_v1  ;;  %v2862_v10 = vunpack.c.l.b16 %v2564_v2  ;;  %v3507_v11 = vrot.slane %v1288_v3, 9  ;;  %v2863_v12 = vunpack.c.l.b16 %v2565_v4 }
 0x165   :  { %v2864_v13 = vunpack.c.l.b16 %v2566_v5  ;;  %v2865_v14 = vunpack.c.l.b16 %v2567_v6  ;;  %v3068_v15 = vrot.slane %v2859_v7, 7  ;;  %v3069_v16 = vrot.slane %v2860_v8, 6 }
 0x166   :  { %v3071_v17 = vrot.slane %v2861_v9, 5  ;;  %v3073_v18 = vrot.slane %v2862_v10, 4  ;;  %v1928_v20 = vmax.f32 %v1288_v3, %v3507_v11  ;;  %v3075_v21 = vrot.slane %v2863_v12, 3 }
 0x167   :  { %v3070_v22 = vsel %vm2869_vm2, %v3069_v16, %v3068_v15  ;;  %v3077_v23 = vrot.slane %v2864_v13, 2  ;;  %v3079_v26 = vrot.slane %v2865_v14, 1 }
 0x168   :  { %v2440_v24 = vmax.f32 %v1032_v58, %v1928_v20  ;;  %v3072_v25 = vsel %vm2872_vm3, %v3071_v17, %v3070_v22 }
 0x169   :  { %v3074_v27 = vsel %vm2875_vm4, %v3073_v18, %v3072_v25 }
 0x16a   :  { %v2568_v28 = vpack.c.bf16 %v2440_v24, %v2440_v24  ;;  %v3076_v29 = vsel %vm2878_vm5, %v3075_v21, %v3074_v27 }
 0x16b   :  { %v3078_v30 = vsel %vm2881_vm6, %v3077_v23, %v3076_v29 }
 0x16c   :  { %v2866_v31 = vunpack.c.l.b16 %v2568_v28  ;;  %v3080_v32 = vsel %vm2884_vm7, %v3079_v26, %v3078_v30 }
 0x16d   :  { %v3111_v35 = vpack.c.b16 %v3080_v32, %v3080_v32 }
 0x16e   :  { %v3112_v36 = vpack.c.b16 %v2866_v31, %v2866_v31 }
 0x16f   :  { %v3243_v37 = vsel %vm3827_vm10, %v3111_v35, %v3568_v33 }
 0x170   :  { %v3246_v38 = vsel %vm3883_vm11, %v3112_v36, %v3570_v34  ;;  %3569 = vst [vmem:[%s4931_s1 + $0x90] sm:$0xf] %v3243_v37 }
 0x171   :  { %3571 = vst [vmem:[%s4931_s1 + $0x94] sm:$0x1] %v3246_v38 }

// kernel: down_forward.5
= control target key start
LH: loop header
LB: loop body
LE: loop exit
PB: predicated region body
PF: predicated region fallthrough
CT: control target
= control target key end

     0   :  { %vm422_vm0 = vcmask 1042432   ;;  %vm423_vm1 = vcmask 1046532   ;;  %vm99_vm2 = vsmask.f32 3328  ;;  %vm100_vm3 = vsmask.f32 7440  ;;  %s5422_s0 = inlined_call_operand.vmem [shape: bf16[2,10,10,128], index: 0, kind: input, shape index: {}]   ;;  %s5423_s1 = inlined_call_operand.vmem [shape: bf16[1,1152,128], index: 1, kind: input, shape index: {}]   ;;  %s5424_s2 = inlined_call_operand.vmem [shape: f32[1,128], index: 2, kind: input, shape index: {}]   ;;  %s5425_s3 = inlined_call_operand.hbm [shape: f32[2,8,8,128], index: 3, kind: output, shape index: {}]  }
   0x1   :  { %v3948_v0 = vld [vmem:[%s5423_s1 + $0x38] sm:$0xff]  ;;  %v3947_v1 = vld [vmem:[%s5423_s1 + $0x30] sm:$0xff]  ;;  %v39_v2 = vld [vmem:[%s5422_s0 + $0x20] sm:$0xf] }
   0x2   :  { %4013 = vmatpush.bf16.msra.mxu1 %v3948_v0  ;;  %4014 = vmatpush.bf16.msra.mxu2 %v3948_v0  ;;  %v40_v3 = vld [vmem:[%s5422_s0 + $0x28] sm:$0xf]  ;;  %55 = vst [vmem:[#allocation2 + $0x90] sm:$0xf] %v39_v2  ;;  %v43_v4 = vld [vmem:[%s5422_s0 + $0x50] sm:$0xf]  ;;  %vm4211_vm4 = vmor %vm422_vm0, %vm423_vm1 }
   0x3   :  { %4015 = vmatpush.bf16.msra.mxu3 %v3948_v0  ;;  %2523 = vmatpush.bf16.msra.mxu0 %v3948_v0  ;;  %56 = vst [vmem:[#allocation2 + $0xb4] sm:$0xf] %v40_v3  ;;  %v44_v5 = vld [vmem:[%s5422_s0 + $0x58] sm:$0xf]  ;;  %v47_v6 = vld [vmem:[%s5422_s0 + $0x70] sm:$0xf]  ;;  %vm4218_vm5 = vmor %vm99_vm2, %vm100_vm3 }
   0x4   :  { %59 = vst [vmem:[#allocation2 + $0x120] sm:$0xf] %v43_v4  ;;  %v48_v7 = vld [vmem:[%s5422_s0 + $0x78] sm:$0xf]  ;;  %v3946_v8 = vld [vmem:[%s5423_s1 + $0x28] sm:$0xff]  ;;  %v3945_v12 = vld [vmem:[%s5423_s1 + $0x20] sm:$0xff] }
   0x5   :  { %60 = vst [vmem:[#allocation2 + $0x144] sm:$0xf] %v44_v5  ;;  %v35_v9 = vld [vmem:[%s5422_s0] sm:$0xf]  ;;  %v36_v10 = vld [vmem:[%s5422_s0 + $0x8] sm:$0xf] }
   0x6   :  { %4016 = vmatpush.bf16.msra.mxu1 %v3947_v1  ;;  %4017 = vmatpush.bf16.msra.mxu2 %v3947_v1  ;;  %63 = vst [vmem:[#allocation2 + $0x1b0] sm:$0xf] %v47_v6  ;;  %v41_v11 = vld [vmem:[%s5422_s0 + $0x30] sm:$0xf]  ;;  %v42_v13 = vld [vmem:[%s5422_s0 + $0x38] sm:$0xf] }
   0x7   :  { %4018 = vmatpush.bf16.msra.mxu3 %v3947_v1  ;;  %2524 = vmatpush.bf16.msra.mxu0 %v3947_v1  ;;  %64 = vst [vmem:[#allocation2 + $0x1d4] sm:$0xf] %v48_v7  ;;  %v45_v14 = vld [vmem:[%s5422_s0 + $0x60] sm:$0xf]  ;;  %v46_v15 = vld [vmem:[%s5422_s0 + $0x68] sm:$0xf] }
   0x8   :  { %51 = vst [vmem:[#allocation2] sm:$0xf] %v35_v9  ;;  %v3944_v16 = vld [vmem:[%s5423_s1 + $0x18] sm:$0xff]  ;;  %v49_v17 = vld [vmem:[%s5422_s0 + $0x80] sm:$0xf]  ;;  %v3943_v19 = vld [vmem:[%s5423_s1 + $0x10] sm:$0xff] }
   0x9   :  { %52 = vst [vmem:[#allocation2 + $0x24] sm:$0xf] %v36_v10  ;;  %v50_v18 = vld [vmem:[%s5422_s0 + $0x88] sm:$0xf]  ;;  %v37_v20 = vld [vmem:[%s5422_s0 + $0x10] sm:$0xf] }
   0xa   :  { %4019 = vmatpush.bf16.msra.mxu1 %v3946_v8  ;;  %4020 = vmatpush.bf16.msra.mxu2 %v3946_v8  ;;  %57 = vst [vmem:[#allocation2 + $0xd8] sm:$0xf] %v41_v11  ;;  %v38_v21 = vld [vmem:[%s5422_s0 + $0x18] sm:$0xf]  ;;  %v3942_v22 = vld [vmem:[%s5423_s1 + $0x8] sm:$0xff]  ;;  %v3941_v29 = vld [vmem:[%s5423_s1] sm:$0xff] }
   0xb   :  { %4021 = vmatpush.bf16.msra.mxu3 %v3946_v8  ;;  %2525 = vmatpush.bf16.msra.mxu0 %v3946_v8  ;;  %58 = vst [vmem:[#allocation2 + $0xfc] sm:$0xf] %v42_v13  ;;  %v67_v23 = vld [vmem:[%s5422_s0] sm:$0xf]  ;;  %v68_v24 = vld [vmem:[%s5422_s0 + $0x4] sm:$0x1] }
   0xc   :  { %61 = vst [vmem:[#allocation2 + $0x168] sm:$0xf] %v45_v14  ;;  %v4165_v25 = vld [vmem:[#allocation2 + $0x90] sm:$0xf]  ;;  %v4167_v26 = vld [vmem:[#allocation2 + $0xb0] sm:$0xf0] }
   0xd   :  { %62 = vst [vmem:[#allocation2 + $0x18c] sm:$0xf] %v46_v15  ;;  %v4169_v27 = vld [vmem:[#allocation2 + $0x120] sm:$0xf]  ;;  %v69_v28 = vld [vmem:[%s5422_s0 + $0x8] sm:$0xf]  ;;  %v3368_v44 = vor.u32 %v4167_v26, %v4165_v25 }
   0xe   :  { %4022 = vmatpush.bf16.msra.mxu1 %v3945_v12  ;;  %4023 = vmatpush.bf16.msra.mxu2 %v3945_v12  ;;  %65 = vst [vmem:[#allocation2 + $0x1f8] sm:$0xf] %v49_v17  ;;  %v3909_v30 = vld [vmem:[#allocation2 + $0x140] sm:$0xf0]  ;;  %v4177_v31 = vld [vmem:[#allocation2 + $0x1b0] sm:$0xf] }
   0xf   :  { %4024 = vmatpush.bf16.msra.mxu3 %v3945_v12  ;;  %2526 = vmatpush.bf16.msra.mxu0 %v3945_v12  ;;  %66 = vst [vmem:[#allocation2 + $0x21c] sm:$0xf] %v50_v18  ;;  %v4179_v32 = vld [vmem:[#allocation2 + $0x1d0] sm:$0xf0]  ;;  %v4181_v33 = vld [vmem:[#allocation2] sm:$0xf]  ;;  %v3440_v45 = vor.u32 %v3909_v30, %v4169_v27 }
  0x10   :  { %53 = vst [vmem:[#allocation2 + $0x48] sm:$0xf] %v37_v20  ;;  %v70_v34 = vld [vmem:[%s5422_s0 + $0xc] sm:$0x1]  ;;  %v103_v35 = vshrl.u32 %v67_v23, 16  ;;  %v106_v36 = vshll.u32 %v67_v23, 16  ;;  %v3512_v50 = vor.u32 %v4179_v32, %v4177_v31 }
  0x11   :  { %54 = vst [vmem:[#allocation2 + $0x6c] sm:$0xf] %v38_v21  ;;  %v112_v37 = vshll.u32 %v68_v24, 16  ;;  %v3873_v38 = vld [vmem:[#allocation2 + $0x20] sm:$0xf0]  ;;  %v117_v39 = vshrl.u32 %v69_v28, 16 }
  0x12   :  { %4025 = vmatpush.bf16.msra.mxu1 %v3944_v16  ;;  %4026 = vmatpush.bf16.msra.mxu2 %v3944_v16  ;;  %v120_v40 = vshll.u32 %v69_v28, 16  ;;  %v126_v41 = vshll.u32 %v70_v34, 16  ;;  %v105_v42 = vrot.slane %v103_v35, 4  ;;  %v108_v43 = vrot.slane %v106_v36, 5  ;;  %v3964_v46 = vld [vmem:[%s5423_s1 + $0xb8] sm:$0xff]  ;;  %v3963_v2 = vld [vmem:[%s5423_s1 + $0xb0] sm:$0xff] }
  0x13   :  { %4027 = vmatpush.bf16.msra.mxu3 %v3944_v16  ;;  %2527 = vmatpush.bf16.msra.mxu0 %v3944_v16  ;;  %v3956_v47 = vld [vmem:[%s5423_s1 + $0x78] sm:$0xff]  ;;  %v119_v48 = vrot.slane %v117_v39, 4  ;;  %v114_v54 = vrot.slane %v112_v37, 5  ;;  %v358_v56 = vld [vmem:[%s5422_s0] sm:$0xe]  ;;  %v3296_v59 = vor.u32 %v3873_v38, %v4181_v33  ;;  %v3955_v7 = vld [vmem:[%s5423_s1 + $0x70] sm:$0xff] }
  0x14   :  { %v122_v49 = vrot.slane %v120_v40, 5  ;;  %v3972_v51 = vld [vmem:[%s5423_s1 + $0xf8] sm:$0xff]  ;;  %v109_v53 = vor.u32 %v108_v43, %v105_v42  ;;  %v128_v55 = vrot.slane %v126_v41, 5  ;;  %v359_v57 = vld [vmem:[%s5422_s0 + $0x4] sm:$0x1]  ;;  %v3085_v0 = vrot.slane %v358_v56, 9 }
  0x15   :  { %v3980_v52 = vld [vmem:[%s5423_s1 + $0x138] sm:$0xff]  ;;  %v360_v62 = vld [vmem:[%s5422_s0 + $0x8] sm:$0xe]  ;;  %v361_v63 = vld [vmem:[%s5422_s0 + $0xc] sm:$0x1]  ;;  %v427_v1 = vrot.slane %v359_v57, 5 }
  0x16   :  { %4028 = vmatpush.bf16.msra.mxu1 %v3943_v19  ;;  %4029 = vmatpush.bf16.msra.mxu2 %v3943_v19  ;;  %v123_v61 = vor.u32 %v122_v49, %v119_v48  ;;  %v110_v3 = vrot.slane %v109_v53, 4  ;;  %v3086_v4 = vrot.slane %v360_v62, 9  ;;  %v431_v5 = vrot.slane %v361_v63, 5  ;;  %v3101_v6 = vld [vmem:[%s5422_s0 + $0x8] sm:$0xf]  ;;  %v3971_v11 = vld [vmem:[%s5423_s1 + $0xf0] sm:$0xff] }
  0x17   :  { %4030 = vmatpush.bf16.msra.mxu3 %v3943_v19  ;;  %2528 = vmatpush.bf16.msra.mxu0 %v3943_v19  ;;  %v428_v9 = vsel %vm4211_vm4, %v3085_v0, %v427_v1  ;;  %v3102_v10 = vld [vmem:[%s5422_s0 + $0x10] sm:$0xf]  ;;  %538 = vst [vmem:[#allocation2 + $0xc] sm:$0xf] %v3101_v6  ;;  %v3117_v15 = vld [vmem:[%s5422_s0 + $0x8] sm:$0xf] }
  0x18   :  { %v124_v8 = vrot.slane %v123_v61, 4  ;;  %v3979_v12 = vld [vmem:[%s5423_s1 + $0x130] sm:$0xff]  ;;  %v115_v13 = vsel %vm4218_vm5, %v110_v3, %v114_v54  ;;  %v432_v14 = vsel %vm4211_vm4, %v3086_v4, %v431_v5  ;;  %505 = vst [vmem:[#allocation2 + $0x8] sm:$0xf] %v428_v9  ;;  %v3118_v16 = vld [vmem:[%s5422_s0 + $0xc] sm:$0x1] }
  0x19   :  { %v3962_v17 = vld [vmem:[%s5423_s1 + $0xa8] sm:$0xff]  ;;  %342 = vst [vmem:[#allocation2 + $0x4] sm:$0xf] %v115_v13  ;;  %v3119_v20 = vld [vmem:[%s5422_s0 + $0x10] sm:$0xf]  ;;  %v587_v21 = vshrl.u32 %v3117_v15, 16 }
  0x1a   :  { %4031 = vmatpush.bf16.msra.mxu1 %v3942_v22  ;;  %4032 = vmatpush.bf16.msra.mxu2 %v3942_v22  ;;  %v3954_v18 = vld [vmem:[%s5423_s1 + $0x68] sm:$0xff]  ;;  %v129_v19 = vsel %vm4218_vm5, %v124_v8, %v128_v55  ;;  %v590_v23 = vshll.u32 %v3117_v15, 16  ;;  %v596_v24 = vshll.u32 %v3118_v16, 16  ;;  %506 = vst [vmem:[#allocation2 + $0x2c] sm:$0xf] %v432_v14  ;;  %v601_v26 = vshrl.u32 %v3119_v20, 16 }
  0x1b   :  { %4033 = vmatpush.bf16.msra.mxu3 %v3942_v22  ;;  %2529 = vmatpush.bf16.msra.mxu0 %v3942_v22  ;;  %343 = vst [vmem:[#allocation2 + $0x28] sm:$0xf] %v129_v19  ;;  %v3120_v22 = vld [vmem:[%s5422_s0 + $0x14] sm:$0x1]  ;;  %v589_v25 = vrot.slane %v587_v21, 4  ;;  %v604_v27 = vshll.u32 %v3119_v20, 16 }
  0x1c   :  { %v610_v28 = vshll.u32 %v3120_v22, 16  ;;  %v3978_v30 = vld [vmem:[%s5423_s1 + $0x128] sm:$0xff]  ;;  %539 = vst [vmem:[#allocation2 + $0x30] sm:$0xf] %v3102_v10  ;;  %v592_v31 = vrot.slane %v590_v23, 5  ;;  %v603_v34 = vrot.slane %v601_v26, 4 }
  0x1d   :  { %v4278_v32 = vld [vmem:[#allocation2 + $0xd8] sm:$0xf]  ;;  %v4280_v33 = vld [vmem:[#allocation2 + $0xf8] sm:$0xf0]  ;;  %v606_v35 = vrot.slane %v604_v27, 5  ;;  %v3961_v37 = vld [vmem:[%s5423_s1 + $0xa0] sm:$0xff] }
  0x1e   :  { %4034 = vmatpush.bf16.msra.mxu1 %v3941_v29  ;;  %4035 = vmatpush.bf16.msra.mxu2 %v3941_v29  ;;  %v71_v36 = vld [vmem:[%s5422_s0 + $0x10] sm:$0xf]  ;;  %v593_v38 = vor.u32 %v592_v31, %v589_v25  ;;  %v598_v39 = vrot.slane %v596_v24, 5  ;;  %v72_v40 = vld [vmem:[%s5422_s0 + $0x14] sm:$0x1]  ;;  %v3953_v42 = vld [vmem:[%s5423_s1 + $0x60] sm:$0xff]  ;;  %v3404_v1 = vor.u32 %v4280_v33, %v4278_v32 }
  0x1f   :  { %4036 = vmatpush.bf16.msra.mxu3 %v3941_v29  ;;  %2530 = vmatpush.bf16.msra.mxu0 %v3941_v29  ;;  %v3970_v29 = vld [vmem:[%s5423_s1 + $0xe8] sm:$0xff]  ;;  %v73_v41 = vld [vmem:[%s5422_s0 + $0x18] sm:$0xf]  ;;  %v612_v48 = vrot.slane %v610_v28, 5  ;;  %v74_v49 = vld [vmem:[%s5422_s0 + $0x1c] sm:$0x1] }
  0x20   :  { %v4297_v43 = vld [vmem:[#allocation2 + $0x168] sm:$0xf]  ;;  %v594_v53 = vrot.slane %v593_v38, 4  ;;  %v140_v54 = vshll.u32 %v72_v40, 16  ;;  %v145_v55 = vshrl.u32 %v73_v41, 16  ;;  %v148_v56 = vshll.u32 %v73_v41, 16 }
  0x21   :  { %2541 = vmatmul.bf16.vlgmr.msra.gmra.mxu1 %v3368_v44  ;;  %2551 = vmatmul.bf16.vlgmr.msra.gmra.mxu2 %v3440_v45  ;;  %v4299_v44 = vld [vmem:[#allocation2 + $0x188] sm:$0xf0]  ;;  %v4301_v45 = vld [vmem:[#allocation2 + $0x1f8] sm:$0xf]  ;;  %v3969_v57 = vld [vmem:[%s5423_s1 + $0xe0] sm:$0xff]  ;;  %v154_v5 = vshll.u32 %v74_v49, 16 }
  0x22   :  { %2621 = vmatpush.bf16.msrb.mxu2 %v3964_v46  ;;  %2572 = vmatpush.bf16.msrb.mxu1 %v3956_v47  ;;  %v4303_v46 = vld [vmem:[#allocation2 + $0x218] sm:$0xf0]  ;;  %v607_v47 = vor.u32 %v606_v35, %v603_v34  ;;  %v3977_v0 = vld [vmem:[%s5423_s1 + $0x120] sm:$0xff]  ;;  %v599_v3 = vsel %vm4218_vm5, %v594_v53, %v598_v39  ;;  %v147_v4 = vrot.slane %v145_v55, 4  ;;  %v362_v6 = vld [vmem:[%s5422_s0 + $0x10] sm:$0xe] }
  0x23   :  { %2561 = vmatmul.bf16.vlgmr.msra.gmra.mxu3 %v3512_v50  ;;  %2531 = vmatmul.bf16.vlgmr.msra.gmra.mxu0 %v3296_v59  ;;  %v131_v50 = vshrl.u32 %v71_v36, 16  ;;  %v3882_v59 = vld [vmem:[#allocation2 + $0x68] sm:$0xf0]  ;;  %826 = vst [vmem:[#allocation2 + $0x10] sm:$0xf] %v599_v3  ;;  %v142_v10 = vrot.slane %v140_v54, 5  ;;  %v3548_v13 = vor.u32 %v4303_v46, %v4301_v45 }
  0x24   :  { %2670 = vmatpush.bf16.msrb.mxu3 %v3972_v51  ;;  %2719 = vmatpush.bf16.msrb.mxu0 %v3980_v52  ;;  %v134_v51 = vshll.u32 %v71_v36, 16  ;;  %v4308_v52 = vld [vmem:[#allocation2 + $0x48] sm:$0xf]  ;;  %v608_v61 = vrot.slane %v607_v47, 4  ;;  %v3968_v14 = vld [vmem:[%s5423_s1 + $0xd8] sm:$0xff]  ;;  %v3087_v21 = vrot.slane %v362_v6, 9 }
  0x25   :  { %v133_v62 = vrot.slane %v131_v50, 4  ;;  %v3332_v15 = vor.u32 %v3882_v59, %v4308_v52  ;;  %v3976_v16 = vld [vmem:[%s5423_s1 + $0x118] sm:$0xff]  ;;  %v3959_v24 = vld [vmem:[%s5423_s1 + $0x90] sm:$0xff]  ;;  %v156_v27 = vrot.slane %v154_v5, 5  ;;  %v3104_v32 = vld [vmem:[%s5422_s0 + $0x20] sm:$0xf] }
  0x26   :  { %2622 = vmatpush.bf16.msrb.mxu2 %v3963_v2  ;;  %2573 = vmatpush.bf16.msrb.mxu1 %v3955_v7  ;;  %v136_v63 = vrot.slane %v134_v51, 5  ;;  %v3960_v2 = vld [vmem:[%s5423_s1 + $0x98] sm:$0xff]  ;;  %v613_v8 = vsel %vm4218_vm5, %v608_v61, %v612_v48  ;;  %v3951_v25 = vld [vmem:[%s5423_s1 + $0x50] sm:$0xff]  ;;  %v3124_v39 = vld [vmem:[%s5422_s0 + $0x24] sm:$0x1] }
  0x27   :  { %v3952_v7 = vld [vmem:[%s5423_s1 + $0x58] sm:$0xff]  ;;  %827 = vst [vmem:[#allocation2 + $0x34] sm:$0xf] %v613_v8  ;;  %v3967_v41 = vld [vmem:[%s5423_s1 + $0xd0] sm:$0xff]  ;;  %v3958_v46 = vld [vmem:[%s5423_s1 + $0x88] sm:$0xff]  ;;  %v638_v53 = vshll.u32 %v3124_v39, 16 }
  0x28   :  { %2671 = vmatpush.bf16.msrb.mxu3 %v3971_v11  ;;  %2720 = vmatpush.bf16.msrb.mxu0 %v3979_v12  ;;  %v137_v9 = vor.u32 %v136_v63, %v133_v62  ;;  %v363_v11 = vld [vmem:[%s5422_s0 + $0x14] sm:$0x1]  ;;  %v3476_v12 = vor.u32 %v4299_v44, %v4297_v43  ;;  %v365_v20 = vld [vmem:[%s5422_s0 + $0x1c] sm:$0x1]  ;;  %v3121_v33 = vld [vmem:[%s5422_s0 + $0x18] sm:$0xf] }
  0x29   :  { %v435_v22 = vrot.slane %v363_v11, 5  ;;  %v439_v28 = vrot.slane %v365_v20, 5  ;;  %v3122_v34 = vld [vmem:[%s5422_s0 + $0x1c] sm:$0x1]  ;;  %v615_v38 = vshrl.u32 %v3121_v33, 16  ;;  %v618_v40 = vshll.u32 %v3121_v33, 16 }
  0x2a   :  { %2623 = vmatpush.bf16.msrb.mxu2 %v3962_v17  ;;  %2574 = vmatpush.bf16.msrb.mxu1 %v3954_v18  ;;  %v150_v17 = vrot.slane %v148_v56, 5  ;;  %v364_v18 = vld [vmem:[%s5422_s0 + $0x18] sm:$0xe]  ;;  %v138_v19 = vrot.slane %v137_v9, 4  ;;  %v624_v45 = vshll.u32 %v3122_v34, 16  ;;  %v3950_v47 = vld [vmem:[%s5423_s1 + $0x48] sm:$0xff] }
  0x2b   :  { %v3088_v23 = vrot.slane %v364_v18, 9  ;;  %v436_v31 = vsel %vm4211_vm4, %v3087_v21, %v435_v22  ;;  %v617_v44 = vrot.slane %v615_v38, 4  ;;  %v620_v48 = vrot.slane %v618_v40, 5  ;;  %v3966_v50 = vld [vmem:[%s5423_s1 + $0xc8] sm:$0xff]  ;;  %541 = vst [vmem:[#allocation2 + $0x78] sm:$0xf] %v3104_v32 }
  0x2c   :  { %2672 = vmatpush.bf16.msrb.mxu3 %v3970_v29  ;;  %2721 = vmatpush.bf16.msrb.mxu0 %v3978_v30  ;;  %v151_v26 = vor.u32 %v150_v17, %v147_v4  ;;  %v3103_v29 = vld [vmem:[%s5422_s0 + $0x18] sm:$0xf]  ;;  %v143_v30 = vsel %vm4218_vm5, %v138_v19, %v142_v10  ;;  %507 = vst [vmem:[#allocation2 + $0x50] sm:$0xf] %v436_v31  ;;  %v3974_v51 = vld [vmem:[%s5423_s1 + $0x108] sm:$0xff]  ;;  %v3957_v54 = vld [vmem:[%s5423_s1 + $0x80] sm:$0xff] }
  0x2d   :  { %540 = vst [vmem:[#allocation2 + $0x54] sm:$0xf] %v3103_v29  ;;  %v440_v36 = vsel %vm4211_vm4, %v3088_v23, %v439_v28  ;;  %v3949_v55 = vld [vmem:[%s5423_s1 + $0x40] sm:$0xff]  ;;  %v621_v56 = vor.u32 %v620_v48, %v617_v44  ;;  %v4412_v63 = vld [vmem:[#allocation2 + $0x24] sm:$0xf0]  ;;  %v4004_v28 = vld [vmem:[%s5423_s1 + $0x1f8] sm:$0xff] }
  0x2e   :  { %2624 = vmatpush.bf16.msrb.mxu2 %v3961_v37  ;;  %2575 = vmatpush.bf16.msrb.mxu1 %v3953_v42  ;;  %v152_v35 = vrot.slane %v151_v26, 4  ;;  %344 = vst [vmem:[#allocation2 + $0x4c] sm:$0xf] %v143_v30  ;;  %v3123_v37 = vld [vmem:[%s5422_s0 + $0x20] sm:$0xf]  ;;  %v3975_v42 = vld [vmem:[%s5423_s1 + $0x110] sm:$0xff] }
  0x2f   :  { %508 = vst [vmem:[#allocation2 + $0x74] sm:$0xf] %v440_v36  ;;  %v629_v49 = vshrl.u32 %v3123_v37, 16  ;;  %v632_v52 = vshll.u32 %v3123_v37, 16  ;;  %v75_v61 = vld [vmem:[%s5422_s0 + $0x20] sm:$0xf] }
  0x30   :  { %2673 = vmatpush.bf16.msrb.mxu3 %v3969_v57  ;;  %2722 = vmatpush.bf16.msrb.mxu0 %v3977_v0  ;;  %v157_v43 = vsel %vm4218_vm5, %v152_v35, %v156_v27  ;;  %v626_v57 = vrot.slane %v624_v45, 5  ;;  %v4410_v62 = vld [vmem:[#allocation2 + $0x4] sm:$0xf]  ;;  %v4414_v0 = vld [vmem:[#allocation2 + $0x8] sm:$0xf]  ;;  %v622_v5 = vrot.slane %v621_v56, 4 }
  0x31   :  { %2546 = vmatmul.bf16.gmra.mxu1 %v3404_v1  ;;  %2556 = vmatmul.bf16.gmra.mxu2 %v3476_v12  ;;  %345 = vst [vmem:[#allocation2 + $0x70] sm:$0xf] %v157_v43  ;;  %v631_v59 = vrot.slane %v629_v49, 4  ;;  %v3996_v1 = vld [vmem:[%s5423_s1 + $0x1b8] sm:$0xff]  ;;  %v76_v3 = vld [vmem:[%s5422_s0 + $0x24] sm:$0x1]  ;;  %v3300_v26 = vor.u32 %v4410_v62, %v4412_v63 }
  0x32   :  { %2625 = vmatpush.bf16.msrb.mxu2 %v3960_v2  ;;  %2576 = vmatpush.bf16.msrb.mxu1 %v3952_v7  ;;  %v634_v2 = vrot.slane %v632_v52, 5  ;;  %v4422_v4 = vld [vmem:[#allocation2 + $0x28] sm:$0xf0]  ;;  %v77_v6 = vld [vmem:[%s5422_s0 + $0x28] sm:$0xf]  ;;  %v159_v7 = vshrl.u32 %v75_v61, 16  ;;  %v627_v18 = vsel %vm4218_vm5, %v622_v5, %v626_v57 }
  0x33   :  { %2566 = vmatmul.bf16.gmra.mxu3 %v3548_v13  ;;  %2536 = vmatmul.bf16.gmra.mxu0 %v3332_v15  ;;  %v3965_v8 = vld [vmem:[%s5423_s1 + $0xc0] sm:$0xff]  ;;  %v4430_v9 = vld [vmem:[#allocation2 + $0xc] sm:$0xf]  ;;  %v4432_v10 = vld [vmem:[#allocation2 + $0x2c] sm:$0xf0]  ;;  %v162_v15 = vshll.u32 %v75_v61, 16  ;;  %v3304_v27 = vor.u32 %v4422_v4, %v4414_v0 }
  0x34   :  { %2674 = vmatpush.bf16.msrb.mxu3 %v3968_v14  ;;  %2723 = vmatpush.bf16.msrb.mxu0 %v3976_v16  ;;  %v4434_v11 = vld [vmem:[#allocation2 + $0x10] sm:$0xf]  ;;  %v3988_v12 = vld [vmem:[%s5423_s1 + $0x178] sm:$0xff]  ;;  %v635_v13 = vor.u32 %v634_v2, %v631_v59  ;;  %v640_v14 = vrot.slane %v638_v53, 5  ;;  %v168_v16 = vshll.u32 %v76_v3, 16  ;;  %v3973_v17 = vld [vmem:[%s5423_s1 + $0x100] sm:$0xff]  ;;  %v3308_v40 = vor.u32 %v4430_v9, %v4432_v10 }
  0x35   :  { %v78_v19 = vld [vmem:[%s5422_s0 + $0x2c] sm:$0x1]  ;;  %v161_v20 = vrot.slane %v159_v7, 4  ;;  %v173_v21 = vshrl.u32 %v77_v6, 16  ;;  %v176_v22 = vshll.u32 %v77_v6, 16  ;;  %v4012_v29 = vld [vmem:[%s5423_s1 + $0x238] sm:$0xff] }
  0x36   :  { %2626 = vmatpush.bf16.msrb.mxu2 %v3959_v24  ;;  %2577 = vmatpush.bf16.msrb.mxu1 %v3951_v25  ;;  %v3875_v23 = vld [vmem:[#allocation2 + $0x30] sm:$0xf0]  ;;  %v636_v24 = vrot.slane %v635_v13, 4  ;;  %828 = vst [vmem:[#allocation2 + $0x58] sm:$0xf] %v627_v18  ;;  %v164_v25 = vrot.slane %v162_v15, 5 }
  0x37   :  { %v175_v30 = vrot.slane %v173_v21, 4  ;;  %v178_v31 = vrot.slane %v176_v22, 5  ;;  %v3995_v32 = vld [vmem:[%s5423_s1 + $0x1b0] sm:$0xff]  ;;  %v170_v36 = vrot.slane %v168_v16, 5  ;;  %v182_v37 = vshll.u32 %v78_v19, 16  ;;  %v3994_v0 = vld [vmem:[%s5423_s1 + $0x1a8] sm:$0xff] }
  0x38   :  { %2675 = vmatpush.bf16.msrb.mxu3 %v3967_v41  ;;  %2724 = vmatpush.bf16.msrb.mxu0 %v3975_v42  ;;  %v641_v33 = vsel %vm4218_vm5, %v636_v24, %v640_v14  ;;  %v3987_v34 = vld [vmem:[%s5423_s1 + $0x170] sm:$0xff]  ;;  %v165_v35 = vor.u32 %v164_v25, %v161_v20  ;;  %v366_v38 = vld [vmem:[%s5422_s0 + $0x20] sm:$0xe]  ;;  %v367_v39 = vld [vmem:[%s5422_s0 + $0x24] sm:$0x1]  ;;  %v3312_v41 = vor.u32 %v3875_v23, %v4434_v11 }
  0x39   :  { %829 = vst [vmem:[#allocation2 + $0x7c] sm:$0xf] %v641_v33  ;;  %v179_v42 = vor.u32 %v178_v31, %v175_v30  ;;  %v368_v43 = vld [vmem:[%s5422_s0 + $0x28] sm:$0xe]  ;;  %v369_v44 = vld [vmem:[%s5422_s0 + $0x2c] sm:$0x1] }
  0x3a   :  { %2627 = vmatpush.bf16.msrb.mxu2 %v3958_v46  ;;  %2578 = vmatpush.bf16.msrb.mxu1 %v3950_v47  ;;  %v166_v45 = vrot.slane %v165_v35, 4  ;;  %v184_v46 = vrot.slane %v182_v37, 5  ;;  %v3089_v47 = vrot.slane %v366_v38, 9  ;;  %v443_v48 = vrot.slane %v367_v39, 5  ;;  %v3105_v49 = vld [vmem:[%s5422_s0 + $0x28] sm:$0xf] }
  0x3b   :  { %v180_v52 = vrot.slane %v179_v42, 4  ;;  %v3090_v53 = vrot.slane %v368_v43, 9  ;;  %542 = vst [vmem:[#allocation2 + $0x9c] sm:$0xf] %v3105_v49  ;;  %v3125_v57 = vld [vmem:[%s5422_s0 + $0x28] sm:$0xf] }
  0x3c   :  { %2676 = vmatpush.bf16.msrb.mxu3 %v3966_v50  ;;  %2725 = vmatpush.bf16.msrb.mxu0 %v3974_v51  ;;  %v4003_v50 = vld [vmem:[%s5423_s1 + $0x1f0] sm:$0xff]  ;;  %v444_v56 = vsel %vm4211_vm4, %v3089_v47, %v443_v48  ;;  %v3126_v59 = vld [vmem:[%s5422_s0 + $0x2c] sm:$0x1]  ;;  %v646_v5 = vshll.u32 %v3125_v57, 16  ;;  %v81_v24 = vld [vmem:[%s5422_s0 + $0x38] sm:$0xf] }
  0x3d   :  { %v4011_v51 = vld [vmem:[%s5423_s1 + $0x230] sm:$0xff]  ;;  %v185_v61 = vsel %vm4218_vm5, %v180_v52, %v184_v46  ;;  %509 = vst [vmem:[#allocation2 + $0x98] sm:$0xf] %v444_v56  ;;  %v652_v6 = vshll.u32 %v3126_v59, 16  ;;  %v4002_v14 = vld [vmem:[%s5423_s1 + $0x1e8] sm:$0xff]  ;;  %v201_v35 = vshrl.u32 %v81_v24, 16 }
  0x3e   :  { %2628 = vmatpush.bf16.msrb.mxu2 %v3957_v54  ;;  %2579 = vmatpush.bf16.msrb.mxu1 %v3949_v55  ;;  %v447_v54 = vrot.slane %v369_v44, 5  ;;  %v171_v55 = vsel %vm4218_vm5, %v166_v45, %v170_v36  ;;  %v3106_v63 = vld [vmem:[%s5422_s0 + $0x30] sm:$0xf]  ;;  %347 = vst [vmem:[#allocation2 + $0xb8] sm:$0xf] %v185_v61  ;;  %v3986_v18 = vld [vmem:[%s5423_s1 + $0x168] sm:$0xff] }
  0x3f   :  { %346 = vst [vmem:[#allocation2 + $0x94] sm:$0xf] %v171_v55  ;;  %v3127_v2 = vld [vmem:[%s5422_s0 + $0x30] sm:$0xf]  ;;  %v3128_v3 = vld [vmem:[%s5422_s0 + $0x34] sm:$0x1] }
  0x40   :  { %2677 = vmatpush.bf16.msrb.mxu3 %v3965_v8  ;;  %2726 = vmatpush.bf16.msrb.mxu0 %v3973_v17  ;;  %v448_v62 = vsel %vm4211_vm4, %v3090_v53, %v447_v54  ;;  %v657_v7 = vshrl.u32 %v3127_v2, 16  ;;  %v660_v8 = vshll.u32 %v3127_v2, 16  ;;  %v666_v9 = vshll.u32 %v3128_v3, 16  ;;  %v3339_v10 = vld [vmem:[#allocation2 + $0x50] sm:$0xf]  ;;  %v4010_v19 = vld [vmem:[%s5423_s1 + $0x228] sm:$0xff] }
  0x41   :  { %2580 = vmatmul.bf16.vlgmr.msrb.gmra.mxu1 %v3300_v26  ;;  %2629 = vmatmul.bf16.vlgmr.msrb.gmra.mxu2 %v3304_v27  ;;  %510 = vst [vmem:[#allocation2 + $0xbc] sm:$0xf] %v448_v62  ;;  %v3883_v11 = vld [vmem:[#allocation2 + $0x70] sm:$0xf0]  ;;  %v3878_v15 = vld [vmem:[#allocation2 + $0x4c] sm:$0xf] }
  0x42   :  { %2817 = vmatpush.bf16.msra.mxu2 %v3996_v1  ;;  %2768 = vmatpush.bf16.msra.mxu1 %v3988_v12  ;;  %v643_v1 = vshrl.u32 %v3125_v57, 16  ;;  %543 = vst [vmem:[#allocation2 + $0xc0] sm:$0xf] %v3106_v63  ;;  %v648_v12 = vrot.slane %v646_v5, 5  ;;  %v659_v13 = vrot.slane %v657_v7, 4  ;;  %v662_v17 = vrot.slane %v660_v8, 5 }
  0x43   :  { %2678 = vmatmul.bf16.vlgmr.msrb.gmra.mxu3 %v3308_v40  ;;  %2727 = vmatmul.bf16.vlgmr.msrb.gmra.mxu0 %v3312_v41  ;;  %v3333_v16 = vld [vmem:[#allocation2 + $0x6c] sm:$0xf0]  ;;  %v654_v22 = vrot.slane %v652_v6, 5  ;;  %v80_v23 = vld [vmem:[%s5422_s0 + $0x34] sm:$0x1]  ;;  %v204_v36 = vshll.u32 %v81_v24, 16  ;;  %v3340_v37 = vor.u32 %v3883_v11, %v3339_v10 }
  0x44   :  { %2866 = vmatpush.bf16.msra.mxu3 %v4004_v28  ;;  %2915 = vmatpush.bf16.msra.mxu0 %v4012_v29  ;;  %v645_v4 = vrot.slane %v643_v1, 4  ;;  %v79_v20 = vld [vmem:[%s5422_s0 + $0x30] sm:$0xf]  ;;  %v3879_v25 = vld [vmem:[#allocation2 + $0x54] sm:$0xf]  ;;  %v663_v28 = vor.u32 %v662_v17, %v659_v13  ;;  %v668_v29 = vrot.slane %v666_v9, 5  ;;  %v3336_v42 = vor.u32 %v3878_v15, %v3333_v16 }
  0x45   :  { %v3341_v26 = vld [vmem:[#allocation2 + $0x74] sm:$0xf0]  ;;  %v187_v30 = vshrl.u32 %v79_v20, 16  ;;  %v190_v31 = vshll.u32 %v79_v20, 16  ;;  %v82_v33 = vld [vmem:[%s5422_s0 + $0x3c] sm:$0x1] }
  0x46   :  { %2818 = vmatpush.bf16.msra.mxu2 %v3995_v32  ;;  %2769 = vmatpush.bf16.msra.mxu1 %v3987_v34  ;;  %v649_v21 = vor.u32 %v648_v12, %v645_v4  ;;  %v3347_v27 = vld [vmem:[#allocation2 + $0x58] sm:$0xf]  ;;  %v196_v34 = vshll.u32 %v80_v23, 16  ;;  %v3884_v38 = vld [vmem:[#allocation2 + $0x78] sm:$0xf0]  ;;  %v664_v39 = vrot.slane %v663_v28, 4 }
  0x47   :  { %v189_v40 = vrot.slane %v187_v30, 4  ;;  %v192_v41 = vrot.slane %v190_v31, 5  ;;  %v203_v44 = vrot.slane %v201_v35, 4  ;;  %v206_v45 = vrot.slane %v204_v36, 5  ;;  %v370_v53 = vld [vmem:[%s5422_s0 + $0x30] sm:$0xe] }
  0x48   :  { %2867 = vmatpush.bf16.msra.mxu3 %v4003_v50  ;;  %2916 = vmatpush.bf16.msra.mxu0 %v4011_v51  ;;  %v650_v32 = vrot.slane %v649_v21, 4  ;;  %v669_v46 = vsel %vm4218_vm5, %v664_v39, %v668_v29  ;;  %v198_v48 = vrot.slane %v196_v34, 5  ;;  %v210_v49 = vshll.u32 %v82_v33, 16  ;;  %v371_v54 = vld [vmem:[%s5422_s0 + $0x34] sm:$0x1]  ;;  %v3993_v7 = vld [vmem:[%s5423_s1 + $0x1a0] sm:$0xff] }
  0x49   :  { %v193_v47 = vor.u32 %v192_v41, %v189_v40  ;;  %v3344_v50 = vor.u32 %v3879_v25, %v3341_v26  ;;  %v3348_v51 = vor.u32 %v3884_v38, %v3347_v27  ;;  %831 = vst [vmem:[#allocation2 + $0xc4] sm:$0xf] %v669_v46  ;;  %v207_v52 = vor.u32 %v206_v45, %v203_v44  ;;  %v372_v57 = vld [vmem:[%s5422_s0 + $0x38] sm:$0xe]  ;;  %v373_v59 = vld [vmem:[%s5422_s0 + $0x3c] sm:$0x1] }
  0x4a   :  { %2819 = vmatpush.bf16.msra.mxu2 %v3994_v0  ;;  %2770 = vmatpush.bf16.msra.mxu1 %v3986_v18  ;;  %v655_v43 = vsel %vm4218_vm5, %v650_v32, %v654_v22  ;;  %v212_v56 = vrot.slane %v210_v49, 5  ;;  %v3091_v62 = vrot.slane %v370_v53, 9  ;;  %v451_v63 = vrot.slane %v371_v54, 5  ;;  %v3107_v1 = vld [vmem:[%s5422_s0 + $0x38] sm:$0xf]  ;;  %v4001_v9 = vld [vmem:[%s5423_s1 + $0x1e0] sm:$0xff] }
  0x4b   :  { %830 = vst [vmem:[#allocation2 + $0xa0] sm:$0xf] %v655_v43  ;;  %v194_v55 = vrot.slane %v193_v47, 4  ;;  %v208_v61 = vrot.slane %v207_v52, 4  ;;  %v3092_v0 = vrot.slane %v372_v57, 9  ;;  %v455_v3 = vrot.slane %v373_v59, 5 }
  0x4c   :  { %2868 = vmatpush.bf16.msra.mxu3 %v4002_v14  ;;  %2917 = vmatpush.bf16.msra.mxu0 %v4010_v19  ;;  %v3108_v4 = vld [vmem:[%s5422_s0 + $0x40] sm:$0xf]  ;;  %544 = vst [vmem:[#allocation2 + $0xe4] sm:$0xf] %v3107_v1  ;;  %v452_v6 = vsel %vm4211_vm4, %v3091_v62, %v451_v63  ;;  %v3129_v8 = vld [vmem:[%s5422_s0 + $0x38] sm:$0xf] }
  0x4d   :  { %v199_v2 = vsel %vm4218_vm5, %v194_v55, %v198_v48  ;;  %v213_v5 = vsel %vm4218_vm5, %v208_v61, %v212_v56  ;;  %v456_v10 = vsel %vm4211_vm4, %v3092_v0, %v455_v3  ;;  %v3130_v11 = vld [vmem:[%s5422_s0 + $0x3c] sm:$0x1]  ;;  %v3131_v12 = vld [vmem:[%s5422_s0 + $0x40] sm:$0xf]  ;;  %511 = vst [vmem:[#allocation2 + $0xe0] sm:$0xf] %v452_v6 }
  0x4e   :  { %348 = vst [vmem:[#allocation2 + $0xdc] sm:$0xf] %v199_v2  ;;  %2820 = vmatpush.bf16.msra.mxu2 %v3993_v7  ;;  %v3132_v13 = vld [vmem:[%s5422_s0 + $0x44] sm:$0x1]  ;;  %v3887_v14 = vld [vmem:[#allocation2 + $0x94] sm:$0xf] }
  0x4f   :  { %349 = vst [vmem:[#allocation2 + $0x100] sm:$0xf] %v213_v5  ;;  %v3369_v15 = vld [vmem:[#allocation2 + $0xb4] sm:$0xf0]  ;;  %v671_v16 = vshrl.u32 %v3129_v8, 16  ;;  %v674_v17 = vshll.u32 %v3129_v8, 16 }
  0x50   :  { %2869 = vmatpush.bf16.msra.mxu3 %v4001_v9  ;;  %512 = vst [vmem:[#allocation2 + $0x104] sm:$0xf] %v456_v10  ;;  %v3375_v18 = vld [vmem:[#allocation2 + $0x98] sm:$0xf]  ;;  %v3892_v19 = vld [vmem:[#allocation2 + $0xb8] sm:$0xf0]  ;;  %v3372_v39 = vor.u32 %v3887_v14, %v3369_v15 }
  0x51   :  { %2585 = vmatmul.bf16.gmra.mxu1 %v3336_v42  ;;  %2634 = vmatmul.bf16.gmra.mxu2 %v3340_v37  ;;  %545 = vst [vmem:[#allocation2 + $0x108] sm:$0xf] %v3108_v4  ;;  %v680_v20 = vshll.u32 %v3130_v11, 16  ;;  %v685_v21 = vshrl.u32 %v3131_v12, 16  ;;  %v688_v22 = vshll.u32 %v3131_v12, 16  ;;  %v3985_v23 = vld [vmem:[%s5423_s1 + $0x160] sm:$0xff]  ;;  %v3376_v44 = vor.u32 %v3892_v19, %v3375_v18 }
  0x52   :  { %v673_v24 = vrot.slane %v671_v16, 4  ;;  %v676_v25 = vrot.slane %v674_v17, 5  ;;  %v694_v26 = vshll.u32 %v3132_v13, 16  ;;  %v4009_v27 = vld [vmem:[%s5423_s1 + $0x220] sm:$0xff]  ;;  %v83_v28 = vld [vmem:[%s5422_s0 + $0x50] sm:$0xf]  ;;  %2771 = vmatpush.bf16.msra.mxu1 %v3985_v23 }
  0x53   :  { %2683 = vmatmul.bf16.gmra.mxu3 %v3344_v50  ;;  %2732 = vmatmul.bf16.gmra.mxu0 %v3348_v51  ;;  %v3888_v29 = vld [vmem:[#allocation2 + $0x9c] sm:$0xf]  ;;  %v3377_v30 = vld [vmem:[#allocation2 + $0xbc] sm:$0xf0]  ;;  %v687_v31 = vrot.slane %v685_v21, 4  ;;  %v690_v32 = vrot.slane %v688_v22, 5 }
  0x54   :  { %v215_v33 = vshrl.u32 %v83_v28, 16  ;;  %v3383_v34 = vld [vmem:[#allocation2 + $0xa0] sm:$0xf]  ;;  %v677_v35 = vor.u32 %v676_v25, %v673_v24  ;;  %v682_v36 = vrot.slane %v680_v20, 5  ;;  %2918 = vmatpush.bf16.msra.mxu0 %v4009_v27  ;;  %v84_v37 = vld [vmem:[%s5422_s0 + $0x54] sm:$0x1]  ;;  %v3380_v53 = vor.u32 %v3888_v29, %v3377_v30 }
  0x55   :  { %v218_v38 = vshll.u32 %v83_v28, 16  ;;  %v691_v40 = vor.u32 %v690_v32, %v687_v31  ;;  %v696_v41 = vrot.slane %v694_v26, 5  ;;  %v85_v42 = vld [vmem:[%s5422_s0 + $0x58] sm:$0xf]  ;;  %v86_v43 = vld [vmem:[%s5422_s0 + $0x5c] sm:$0x1] }
  0x56   :  { %v3893_v45 = vld [vmem:[#allocation2 + $0xc0] sm:$0xf0]  ;;  %v678_v46 = vrot.slane %v677_v35, 4  ;;  %v217_v47 = vrot.slane %v215_v33, 4  ;;  %v224_v50 = vshll.u32 %v84_v37, 16  ;;  %v229_v51 = vshrl.u32 %v85_v42, 16 }
  0x57   :  { %v220_v48 = vrot.slane %v218_v38, 5  ;;  %v692_v49 = vrot.slane %v691_v40, 4  ;;  %v232_v52 = vshll.u32 %v85_v42, 16  ;;  %v238_v56 = vshll.u32 %v86_v43, 16  ;;  %v374_v57 = vld [vmem:[%s5422_s0 + $0x50] sm:$0xe] }
  0x58   :  { %v683_v54 = vsel %vm4218_vm5, %v678_v46, %v682_v36  ;;  %v3384_v59 = vor.u32 %v3893_v45, %v3383_v34  ;;  %v226_v62 = vrot.slane %v224_v50, 5  ;;  %v231_v63 = vrot.slane %v229_v51, 4  ;;  %v375_v0 = vld [vmem:[%s5422_s0 + $0x54] sm:$0x1]  ;;  %v376_v5 = vld [vmem:[%s5422_s0 + $0x58] sm:$0xe] }
  0x59   :  { %v221_v55 = vor.u32 %v220_v48, %v217_v47  ;;  %v697_v61 = vsel %vm4218_vm5, %v692_v49, %v696_v41  ;;  %832 = vst [vmem:[#allocation2 + $0xe8] sm:$0xf] %v683_v54  ;;  %v234_v2 = vrot.slane %v232_v52, 5  ;;  %v3093_v3 = vrot.slane %v374_v57, 9  ;;  %v377_v6 = vld [vmem:[%s5422_s0 + $0x5c] sm:$0x1] }
  0x5a   :  { %833 = vst [vmem:[#allocation2 + $0x10c] sm:$0xf] %v697_v61  ;;  %v240_v4 = vrot.slane %v238_v56, 5  ;;  %v459_v7 = vrot.slane %v375_v0, 5  ;;  %v3094_v10 = vrot.slane %v376_v5, 9  ;;  %v463_v11 = vrot.slane %v377_v6, 5 }
  0x5b   :  { %v222_v1 = vrot.slane %v221_v55, 4  ;;  %v235_v9 = vor.u32 %v234_v2, %v231_v63  ;;  %v3109_v12 = vld [vmem:[%s5422_s0 + $0x58] sm:$0xf]  ;;  %v3110_v14 = vld [vmem:[%s5422_s0 + $0x60] sm:$0xf] }
  0x5c   :  { %v460_v13 = vsel %vm4211_vm4, %v3093_v3, %v459_v7  ;;  %v3992_v15 = vld [vmem:[%s5423_s1 + $0x198] sm:$0xff]  ;;  %v464_v19 = vsel %vm4211_vm4, %v3094_v10, %v463_v11  ;;  %v3135_v22 = vld [vmem:[%s5422_s0 + $0x60] sm:$0xf]  ;;  %v3136_v23 = vld [vmem:[%s5422_s0 + $0x64] sm:$0x1] }
  0x5d   :  { %v227_v8 = vsel %vm4218_vm5, %v222_v1, %v226_v62  ;;  %v3133_v16 = vld [vmem:[%s5422_s0 + $0x58] sm:$0xf]  ;;  %v236_v18 = vrot.slane %v235_v9, 4  ;;  %513 = vst [vmem:[#allocation2 + $0x128] sm:$0xf] %v460_v13  ;;  %2821 = vmatpush.bf16.msra.mxu2 %v3992_v15  ;;  %v713_v30 = vshrl.u32 %v3135_v22, 16 }
  0x5e   :  { %350 = vst [vmem:[#allocation2 + $0x124] sm:$0xf] %v227_v8  ;;  %v4000_v17 = vld [vmem:[%s5423_s1 + $0x1d8] sm:$0xff]  ;;  %v699_v21 = vshrl.u32 %v3133_v16, 16  ;;  %v702_v27 = vshll.u32 %v3133_v16, 16  ;;  %v716_v33 = vshll.u32 %v3135_v22, 16 }
  0x5f   :  { %v3134_v20 = vld [vmem:[%s5422_s0 + $0x5c] sm:$0x1]  ;;  %514 = vst [vmem:[#allocation2 + $0x14c] sm:$0xf] %v464_v19  ;;  %2870 = vmatpush.bf16.msra.mxu3 %v4000_v17  ;;  %v241_v25 = vsel %vm4218_vm5, %v236_v18, %v240_v4  ;;  %v3405_v28 = vld [vmem:[#allocation2 + $0xfc] sm:$0xf0] }
  0x60   :  { %v3896_v24 = vld [vmem:[#allocation2 + $0xdc] sm:$0xf]  ;;  %546 = vst [vmem:[#allocation2 + $0x12c] sm:$0xf] %v3109_v12  ;;  %v701_v26 = vrot.slane %v699_v21, 4  ;;  %v708_v29 = vshll.u32 %v3134_v20, 16 }
  0x61   :  { %2590 = vmatmul.bf16.gmra.mxu1 %v3372_v39  ;;  %2639 = vmatmul.bf16.gmra.mxu2 %v3376_v44  ;;  %351 = vst [vmem:[#allocation2 + $0x148] sm:$0xf] %v241_v25  ;;  %v3411_v31 = vld [vmem:[#allocation2 + $0xe0] sm:$0xf]  ;;  %v704_v32 = vrot.slane %v702_v27, 5  ;;  %v722_v34 = vshll.u32 %v3136_v23, 16  ;;  %v3408_v46 = vor.u32 %v3896_v24, %v3405_v28 }
  0x62   :  { %547 = vst [vmem:[#allocation2 + $0x150] sm:$0xf] %v3110_v14  ;;  %v3984_v35 = vld [vmem:[%s5423_s1 + $0x158] sm:$0xff]  ;;  %v3901_v36 = vld [vmem:[#allocation2 + $0x100] sm:$0xf0]  ;;  %v715_v37 = vrot.slane %v713_v30, 4 }
  0x63   :  { %2688 = vmatmul.bf16.gmra.mxu3 %v3380_v53  ;;  %2737 = vmatmul.bf16.gmra.mxu0 %v3384_v59  ;;  %v4008_v38 = vld [vmem:[%s5423_s1 + $0x218] sm:$0xff]  ;;  %v87_v39 = vld [vmem:[%s5422_s0 + $0x60] sm:$0xf]  ;;  %v3897_v40 = vld [vmem:[#allocation2 + $0xe4] sm:$0xf]  ;;  %v705_v42 = vor.u32 %v704_v32, %v701_v26  ;;  %v710_v43 = vrot.slane %v708_v29, 5  ;;  %v3412_v55 = vor.u32 %v3901_v36, %v3411_v31 }
  0x64   :  { %v3413_v41 = vld [vmem:[#allocation2 + $0x104] sm:$0xf0]  ;;  %v718_v44 = vrot.slane %v716_v33, 5  ;;  %2772 = vmatpush.bf16.msra.mxu1 %v3984_v35  ;;  %v88_v45 = vld [vmem:[%s5422_s0 + $0x64] sm:$0x1]  ;;  %v724_v48 = vrot.slane %v722_v34, 5  ;;  %2919 = vmatpush.bf16.msra.mxu0 %v4008_v38 }
  0x65   :  { %v3419_v47 = vld [vmem:[#allocation2 + $0xe8] sm:$0xf]  ;;  %v3902_v50 = vld [vmem:[#allocation2 + $0x108] sm:$0xf0]  ;;  %v706_v51 = vrot.slane %v705_v42, 4  ;;  %v243_v53 = vshrl.u32 %v87_v39, 16  ;;  %v3416_v2 = vor.u32 %v3897_v40, %v3413_v41 }
  0x66   :  { %v89_v49 = vld [vmem:[%s5422_s0 + $0x68] sm:$0xf]  ;;  %v719_v52 = vor.u32 %v718_v44, %v715_v37  ;;  %v246_v54 = vshll.u32 %v87_v39, 16  ;;  %v252_v56 = vshll.u32 %v88_v45, 16  ;;  %v90_v63 = vld [vmem:[%s5422_s0 + $0x6c] sm:$0x1]  ;;  %v3420_v3 = vor.u32 %v3902_v50, %v3419_v47 }
  0x67   :  { %v257_v57 = vshrl.u32 %v89_v49, 16  ;;  %v260_v59 = vshll.u32 %v89_v49, 16  ;;  %v711_v61 = vsel %vm4218_vm5, %v706_v51, %v710_v43  ;;  %v245_v0 = vrot.slane %v243_v53, 4  ;;  %v378_v9 = vld [vmem:[%s5422_s0 + $0x60] sm:$0xe]  ;;  %v3991_v25 = vld [vmem:[%s5423_s1 + $0x190] sm:$0xff] }
  0x68   :  { %v720_v62 = vrot.slane %v719_v52, 4  ;;  %v248_v1 = vrot.slane %v246_v54, 5  ;;  %834 = vst [vmem:[#allocation2 + $0x130] sm:$0xf] %v711_v61  ;;  %v254_v7 = vrot.slane %v252_v56, 5  ;;  %v266_v11 = vshll.u32 %v90_v63, 16  ;;  %2822 = vmatpush.bf16.msra.mxu2 %v3991_v25 }
  0x69   :  { %v259_v4 = vrot.slane %v257_v57, 4  ;;  %v262_v8 = vrot.slane %v260_v59, 5  ;;  %v379_v10 = vld [vmem:[%s5422_s0 + $0x64] sm:$0x1]  ;;  %v380_v12 = vld [vmem:[%s5422_s0 + $0x68] sm:$0xe] }
  0x6a   :  { %v725_v5 = vsel %vm4218_vm5, %v720_v62, %v724_v48  ;;  %v249_v6 = vor.u32 %v248_v1, %v245_v0  ;;  %v3095_v13 = vrot.slane %v378_v9, 9  ;;  %v381_v16 = vld [vmem:[%s5422_s0 + $0x6c] sm:$0x1]  ;;  %v467_v17 = vrot.slane %v379_v10, 5  ;;  %v3111_v21 = vld [vmem:[%s5422_s0 + $0x68] sm:$0xf] }
  0x6b   :  { %835 = vst [vmem:[#allocation2 + $0x154] sm:$0xf] %v725_v5  ;;  %v263_v15 = vor.u32 %v262_v8, %v259_v4  ;;  %v3096_v18 = vrot.slane %v380_v12, 9  ;;  %v268_v19 = vrot.slane %v266_v11, 5  ;;  %v471_v20 = vrot.slane %v381_v16, 5  ;;  %v3999_v47 = vld [vmem:[%s5423_s1 + $0x1d0] sm:$0xff] }
  0x6c   :  { %v250_v14 = vrot.slane %v249_v6, 4  ;;  %v468_v24 = vsel %vm4211_vm4, %v3095_v13, %v467_v17  ;;  %548 = vst [vmem:[#allocation2 + $0x174] sm:$0xf] %v3111_v21  ;;  %v3137_v26 = vld [vmem:[%s5422_s0 + $0x68] sm:$0xf]  ;;  %v3983_v52 = vld [vmem:[%s5423_s1 + $0x150] sm:$0xff]  ;;  %2871 = vmatpush.bf16.msra.mxu3 %v3999_v47 }
  0x6d   :  { %v264_v23 = vrot.slane %v263_v15, 4  ;;  %v472_v27 = vsel %vm4211_vm4, %v3096_v18, %v471_v20  ;;  %v3138_v28 = vld [vmem:[%s5422_s0 + $0x6c] sm:$0x1]  ;;  %v3139_v29 = vld [vmem:[%s5422_s0 + $0x70] sm:$0xf]  ;;  %v727_v38 = vshrl.u32 %v3137_v26, 16  ;;  %2773 = vmatpush.bf16.msra.mxu1 %v3983_v52 }
  0x6e   :  { %v255_v22 = vsel %vm4218_vm5, %v250_v14, %v254_v7  ;;  %v4705_v30 = vld [vmem:[#allocation2 + $0x128] sm:$0xf]  ;;  %v4707_v31 = vld [vmem:[#allocation2 + $0x148] sm:$0xf0]  ;;  %515 = vst [vmem:[#allocation2 + $0x170] sm:$0xf] %v468_v24 }
  0x6f   :  { %352 = vst [vmem:[#allocation2 + $0x16c] sm:$0xf] %v255_v22  ;;  %v269_v32 = vsel %vm4218_vm5, %v264_v23, %v268_v19  ;;  %v3112_v33 = vld [vmem:[%s5422_s0 + $0x70] sm:$0xf]  ;;  %v3140_v34 = vld [vmem:[%s5422_s0 + $0x74] sm:$0x1]  ;;  %v3448_v54 = vor.u32 %v4707_v31, %v4705_v30 }
  0x70   :  { %v3905_v35 = vld [vmem:[#allocation2 + $0x124] sm:$0xf]  ;;  %v3441_v36 = vld [vmem:[#allocation2 + $0x144] sm:$0xf0]  ;;  %v3906_v37 = vld [vmem:[#allocation2 + $0x12c] sm:$0xf] }
  0x71   :  { %2595 = vmatmul.bf16.gmra.mxu1 %v3408_v46  ;;  %2644 = vmatmul.bf16.gmra.mxu2 %v3412_v55  ;;  %353 = vst [vmem:[#allocation2 + $0x190] sm:$0xf] %v269_v32  ;;  %v730_v39 = vshll.u32 %v3137_v26, 16  ;;  %v736_v40 = vshll.u32 %v3138_v28, 16  ;;  %v741_v41 = vshrl.u32 %v3139_v29, 16  ;;  %v744_v43 = vshll.u32 %v3139_v29, 16 }
  0x72   :  { %v3449_v42 = vld [vmem:[#allocation2 + $0x14c] sm:$0xf0]  ;;  %516 = vst [vmem:[#allocation2 + $0x194] sm:$0xf] %v472_v27  ;;  %v750_v44 = vshll.u32 %v3140_v34, 16  ;;  %v729_v45 = vrot.slane %v727_v38, 4  ;;  %v3444_v61 = vor.u32 %v3905_v35, %v3441_v36 }
  0x73   :  { %2693 = vmatmul.bf16.gmra.mxu3 %v3416_v2  ;;  %2742 = vmatmul.bf16.gmra.mxu0 %v3420_v3  ;;  %549 = vst [vmem:[#allocation2 + $0x198] sm:$0xf] %v3112_v33  ;;  %v732_v46 = vrot.slane %v730_v39, 5  ;;  %v3455_v48 = vld [vmem:[#allocation2 + $0x130] sm:$0xf]  ;;  %v743_v50 = vrot.slane %v741_v41, 4  ;;  %v3452_v62 = vor.u32 %v3906_v37, %v3449_v42 }
  0x74   :  { %v3911_v49 = vld [vmem:[#allocation2 + $0x150] sm:$0xf0]  ;;  %v746_v51 = vrot.slane %v744_v43, 5  ;;  %v738_v56 = vrot.slane %v736_v40, 5  ;;  %v91_v57 = vld [vmem:[%s5422_s0 + $0x70] sm:$0xf] }
  0x75   :  { %v4007_v53 = vld [vmem:[%s5423_s1 + $0x210] sm:$0xff]  ;;  %v733_v55 = vor.u32 %v732_v46, %v729_v45  ;;  %v752_v0 = vrot.slane %v750_v44, 5  ;;  %v93_v1 = vld [vmem:[%s5422_s0 + $0x78] sm:$0xf]  ;;  %v94_v2 = vld [vmem:[%s5422_s0 + $0x7c] sm:$0x1]  ;;  %v3456_v11 = vor.u32 %v3911_v49, %v3455_v48 }
  0x76   :  { %v92_v59 = vld [vmem:[%s5422_s0 + $0x74] sm:$0x1]  ;;  %v747_v63 = vor.u32 %v746_v51, %v743_v50  ;;  %2920 = vmatpush.bf16.msra.mxu0 %v4007_v53  ;;  %v271_v4 = vshrl.u32 %v91_v57, 16  ;;  %v274_v5 = vshll.u32 %v91_v57, 16  ;;  %v285_v8 = vshrl.u32 %v93_v1, 16  ;;  %v3990_v32 = vld [vmem:[%s5423_s1 + $0x188] sm:$0xff] }
  0x77   :  { %v734_v3 = vrot.slane %v733_v55, 4  ;;  %v280_v6 = vshll.u32 %v92_v59, 16  ;;  %v288_v9 = vshll.u32 %v93_v1, 16  ;;  %v294_v10 = vshll.u32 %v94_v2, 16  ;;  %v382_v15 = vld [vmem:[%s5422_s0 + $0x70] sm:$0xe]  ;;  %2823 = vmatpush.bf16.msra.mxu2 %v3990_v32 }
  0x78   :  { %v748_v7 = vrot.slane %v747_v63, 4  ;;  %v273_v13 = vrot.slane %v271_v4, 4  ;;  %v276_v14 = vrot.slane %v274_v5, 5  ;;  %v287_v18 = vrot.slane %v285_v8, 4  ;;  %v383_v22 = vld [vmem:[%s5422_s0 + $0x74] sm:$0x1] }
  0x79   :  { %v739_v12 = vsel %vm4218_vm5, %v734_v3, %v738_v56  ;;  %v282_v17 = vrot.slane %v280_v6, 5  ;;  %v290_v20 = vrot.slane %v288_v9, 5  ;;  %v296_v21 = vrot.slane %v294_v10, 5  ;;  %v384_v23 = vld [vmem:[%s5422_s0 + $0x78] sm:$0xe]  ;;  %v3998_v57 = vld [vmem:[%s5423_s1 + $0x1c8] sm:$0xff] }
  0x7a   :  { %v753_v16 = vsel %vm4218_vm5, %v748_v7, %v752_v0  ;;  %836 = vst [vmem:[#allocation2 + $0x178] sm:$0xf] %v739_v12  ;;  %v277_v19 = vor.u32 %v276_v14, %v273_v13  ;;  %v385_v24 = vld [vmem:[%s5422_s0 + $0x7c] sm:$0x1]  ;;  %v3097_v25 = vrot.slane %v382_v15, 9  ;;  %v475_v26 = vrot.slane %v383_v22, 5  ;;  %2872 = vmatpush.bf16.msra.mxu3 %v3998_v57 }
  0x7b   :  { %837 = vst [vmem:[#allocation2 + $0x19c] sm:$0xf] %v753_v16  ;;  %v291_v28 = vor.u32 %v290_v20, %v287_v18  ;;  %v3098_v29 = vrot.slane %v384_v23, 9  ;;  %v479_v30 = vrot.slane %v385_v24, 5  ;;  %v3113_v31 = vld [vmem:[%s5422_s0 + $0x78] sm:$0xf] }
  0x7c   :  { %v278_v27 = vrot.slane %v277_v19, 4  ;;  %v476_v33 = vsel %vm4211_vm4, %v3097_v25, %v475_v26  ;;  %v3114_v34 = vld [vmem:[%s5422_s0 + $0x80] sm:$0xf]  ;;  %550 = vst [vmem:[#allocation2 + $0x1bc] sm:$0xf] %v3113_v31  ;;  %v4006_v63 = vld [vmem:[%s5423_s1 + $0x208] sm:$0xff] }
  0x7d   :  { %v3141_v35 = vld [vmem:[%s5422_s0 + $0x78] sm:$0xf]  ;;  %v292_v37 = vrot.slane %v291_v28, 4  ;;  %v480_v38 = vsel %vm4211_vm4, %v3098_v29, %v479_v30  ;;  %517 = vst [vmem:[#allocation2 + $0x1b8] sm:$0xf] %v476_v33  ;;  %2921 = vmatpush.bf16.msra.mxu0 %v4006_v63 }
  0x7e   :  { %v283_v36 = vsel %vm4218_vm5, %v278_v27, %v282_v17  ;;  %v3142_v39 = vld [vmem:[%s5422_s0 + $0x7c] sm:$0x1]  ;;  %v755_v40 = vshrl.u32 %v3141_v35, 16  ;;  %v3143_v41 = vld [vmem:[%s5422_s0 + $0x80] sm:$0xf]  ;;  %v758_v50 = vshll.u32 %v3141_v35, 16 }
  0x7f   :  { %354 = vst [vmem:[#allocation2 + $0x1b4] sm:$0xf] %v283_v36  ;;  %v3144_v42 = vld [vmem:[%s5422_s0 + $0x84] sm:$0x1]  ;;  %v3914_v43 = vld [vmem:[#allocation2 + $0x16c] sm:$0xf]  ;;  %v297_v48 = vsel %vm4218_vm5, %v292_v37, %v296_v21 }
  0x80   :  { %v3477_v44 = vld [vmem:[#allocation2 + $0x18c] sm:$0xf0]  ;;  %v3919_v46 = vld [vmem:[#allocation2 + $0x190] sm:$0xf0]  ;;  %518 = vst [vmem:[#allocation2 + $0x1dc] sm:$0xf] %v480_v38 }
  0x81   :  { %2600 = vmatmul.bf16.gmra.mxu1 %v3444_v61  ;;  %2649 = vmatmul.bf16.gmra.mxu2 %v3448_v54  ;;  %v3483_v45 = vld [vmem:[#allocation2 + $0x170] sm:$0xf]  ;;  %v3915_v47 = vld [vmem:[#allocation2 + $0x174] sm:$0xf]  ;;  %v757_v49 = vrot.slane %v755_v40, 4  ;;  %v764_v52 = vshll.u32 %v3142_v39, 16  ;;  %v3480_v6 = vor.u32 %v3914_v43, %v3477_v44 }
  0x82   :  { %v3485_v51 = vld [vmem:[#allocation2 + $0x194] sm:$0xf0]  ;;  %355 = vst [vmem:[#allocation2 + $0x1d8] sm:$0xf] %v297_v48  ;;  %v769_v53 = vshrl.u32 %v3143_v41, 16  ;;  %v760_v54 = vrot.slane %v758_v50, 5  ;;  %v3484_v7 = vor.u32 %v3919_v46, %v3483_v45 }
  0x83   :  { %2698 = vmatmul.bf16.gmra.mxu3 %v3452_v62  ;;  %2747 = vmatmul.bf16.gmra.mxu0 %v3456_v11  ;;  %551 = vst [vmem:[#allocation2 + $0x1e0] sm:$0xf] %v3114_v34  ;;  %v772_v55 = vshll.u32 %v3143_v41, 16  ;;  %v778_v56 = vshll.u32 %v3144_v42, 16  ;;  %v3491_v59 = vld [vmem:[#allocation2 + $0x178] sm:$0xf]  ;;  %v3488_v8 = vor.u32 %v3915_v47, %v3485_v51 }
  0x84   :  { %v771_v61 = vrot.slane %v769_v53, 4  ;;  %v3982_v62 = vld [vmem:[%s5423_s1 + $0x148] sm:$0xff]  ;;  %v95_v0 = vld [vmem:[%s5422_s0 + $0x80] sm:$0xf]  ;;  %v3920_v1 = vld [vmem:[#allocation2 + $0x198] sm:$0xf0]  ;;  %v761_v2 = vor.u32 %v760_v54, %v757_v49 }
  0x85   :  { %v766_v3 = vrot.slane %v764_v52, 5  ;;  %v774_v4 = vrot.slane %v772_v55, 5  ;;  %v96_v5 = vld [vmem:[%s5422_s0 + $0x84] sm:$0x1]  ;;  %v780_v9 = vrot.slane %v778_v56, 5  ;;  %2774 = vmatpush.bf16.msra.mxu1 %v3982_v62  ;;  %v299_v14 = vshrl.u32 %v95_v0, 16 }
  0x86   :  { %v97_v10 = vld [vmem:[%s5422_s0 + $0x88] sm:$0xf]  ;;  %v98_v11 = vld [vmem:[%s5422_s0 + $0x8c] sm:$0x1]  ;;  %v762_v12 = vrot.slane %v761_v2, 4  ;;  %v302_v15 = vshll.u32 %v95_v0, 16  ;;  %v3492_v20 = vor.u32 %v3920_v1, %v3491_v59 }
  0x87   :  { %v775_v13 = vor.u32 %v774_v4, %v771_v61  ;;  %v308_v16 = vshll.u32 %v96_v5, 16  ;;  %v313_v17 = vshrl.u32 %v97_v10, 16  ;;  %v316_v18 = vshll.u32 %v97_v10, 16  ;;  %v386_v24 = vld [vmem:[%s5422_s0 + $0x80] sm:$0xe] }
  0x88   :  { %v322_v19 = vshll.u32 %v98_v11, 16  ;;  %v767_v21 = vsel %vm4218_vm5, %v762_v12, %v766_v3  ;;  %v301_v23 = vrot.slane %v299_v14, 4  ;;  %v304_v25 = vrot.slane %v302_v15, 5  ;;  %v387_v30 = vld [vmem:[%s5422_s0 + $0x84] sm:$0x1] }
  0x89   :  { %v776_v22 = vrot.slane %v775_v13, 4  ;;  %838 = vst [vmem:[#allocation2 + $0x1c0] sm:$0xf] %v767_v21  ;;  %v310_v26 = vrot.slane %v308_v16, 5  ;;  %v315_v28 = vrot.slane %v313_v17, 4  ;;  %v318_v29 = vrot.slane %v316_v18, 5 }
  0x8a   :  { %v388_v31 = vld [vmem:[%s5422_s0 + $0x88] sm:$0xe]  ;;  %v305_v32 = vor.u32 %v304_v25, %v301_v23  ;;  %v324_v33 = vrot.slane %v322_v19, 5  ;;  %v389_v34 = vld [vmem:[%s5422_s0 + $0x8c] sm:$0x1]  ;;  %v3099_v35 = vrot.slane %v386_v24, 9 }
  0x8b   :  { %v781_v27 = vsel %vm4218_vm5, %v776_v22, %v780_v9  ;;  %v319_v36 = vor.u32 %v318_v29, %v315_v28  ;;  %v483_v37 = vrot.slane %v387_v30, 5  ;;  %v3100_v38 = vrot.slane %v388_v31, 9  ;;  %v3115_v40 = vld [vmem:[%s5422_s0 + $0x88] sm:$0xf]  ;;  %v3989_v41 = vld [vmem:[%s5423_s1 + $0x180] sm:$0xff] }
  0x8c   :  { %839 = vst [vmem:[#allocation2 + $0x1e4] sm:$0xf] %v781_v27  ;;  %v487_v39 = vrot.slane %v389_v34, 5  ;;  %v306_v42 = vrot.slane %v305_v32, 4  ;;  %v3116_v43 = vld [vmem:[%s5422_s0 + $0x90] sm:$0xf]  ;;  %2824 = vmatpush.bf16.msra.mxu2 %v3989_v41 }
  0x8d   :  { %552 = vst [vmem:[#allocation2 + $0x204] sm:$0xf] %v3115_v40  ;;  %v3997_v44 = vld [vmem:[%s5423_s1 + $0x1c0] sm:$0xff]  ;;  %v320_v45 = vrot.slane %v319_v36, 4  ;;  %v484_v46 = vsel %vm4211_vm4, %v3099_v35, %v483_v37  ;;  %v3145_v47 = vld [vmem:[%s5422_s0 + $0x88] sm:$0xf] }
  0x8e   :  { %553 = vst [vmem:[#allocation2 + $0x228] sm:$0xf] %v3116_v43  ;;  %v311_v48 = vsel %vm4218_vm5, %v306_v42, %v310_v26  ;;  %v488_v49 = vsel %vm4211_vm4, %v3100_v38, %v487_v39  ;;  %v3146_v50 = vld [vmem:[%s5422_s0 + $0x8c] sm:$0x1]  ;;  %v3147_v51 = vld [vmem:[%s5422_s0 + $0x90] sm:$0xf]  ;;  %2873 = vmatpush.bf16.msra.mxu3 %v3997_v44 }
  0x8f   :  { %519 = vst [vmem:[#allocation2 + $0x200] sm:$0xf] %v484_v46  ;;  %v325_v52 = vsel %vm4218_vm5, %v320_v45, %v324_v33  ;;  %v3148_v53 = vld [vmem:[%s5422_s0 + $0x94] sm:$0x1]  ;;  %v3519_v55 = vld [vmem:[#allocation2 + $0x1b8] sm:$0xf] }
  0x90   :  { %356 = vst [vmem:[#allocation2 + $0x1fc] sm:$0xf] %v311_v48  ;;  %v3923_v54 = vld [vmem:[#allocation2 + $0x1b4] sm:$0xf]  ;;  %v3928_v56 = vld [vmem:[#allocation2 + $0x1d8] sm:$0xf0] }
  0x91   :  { %2605 = vmatmul.bf16.gmra.mxu1 %v3480_v6  ;;  %2654 = vmatmul.bf16.gmra.mxu2 %v3484_v7  ;;  %357 = vst [vmem:[#allocation2 + $0x220] sm:$0xf] %v325_v52  ;;  %v783_v57 = vshrl.u32 %v3145_v47, 16  ;;  %v786_v59 = vshll.u32 %v3145_v47, 16  ;;  %v792_v61 = vshll.u32 %v3146_v50, 16  ;;  %v797_v62 = vshrl.u32 %v3147_v51, 16 }
  0x92   :  { %v3513_v63 = vld [vmem:[#allocation2 + $0x1d4] sm:$0xf0]  ;;  %520 = vst [vmem:[#allocation2 + $0x224] sm:$0xf] %v488_v49  ;;  %v800_v0 = vshll.u32 %v3147_v51, 16  ;;  %v806_v1 = vshll.u32 %v3148_v53, 16  ;;  %v3520_v17 = vor.u32 %v3928_v56, %v3519_v55 }
  0x93   :  { %2703 = vmatmul.bf16.gmra.mxu3 %v3488_v8  ;;  %2752 = vmatmul.bf16.gmra.mxu0 %v3492_v20  ;;  %v3924_v2 = vld [vmem:[#allocation2 + $0x1bc] sm:$0xf]  ;;  %v3521_v3 = vld [vmem:[#allocation2 + $0x1dc] sm:$0xf0]  ;;  %v785_v4 = vrot.slane %v783_v57, 4  ;;  %v788_v5 = vrot.slane %v786_v59, 5  ;;  %v3516_v16 = vor.u32 %v3923_v54, %v3513_v63 }
  0x94   :  { %v3981_v6 = vld [vmem:[%s5423_s1 + $0x140] sm:$0xff]  ;;  %v799_v10 = vrot.slane %v797_v62, 4  ;;  %v802_v11 = vrot.slane %v800_v0, 5  ;;  %v794_v13 = vrot.slane %v792_v61, 5  ;;  %v3149_v14 = vld [vmem:[%s5422_s0 + $0x8] sm:$0xe]  ;;  %v3524_v27 = vor.u32 %v3924_v2, %v3521_v3 }
  0x95   :  { %v4005_v7 = vld [vmem:[%s5423_s1 + $0x200] sm:$0xff]  ;;  %v789_v12 = vor.u32 %v788_v5, %v785_v4  ;;  %2775 = vmatpush.bf16.msra.mxu1 %v3981_v6  ;;  %v3150_v15 = vld [vmem:[%s5422_s0 + $0xc] sm:$0x1]  ;;  %v808_v19 = vrot.slane %v806_v1, 5  ;;  %v3151_v20 = vld [vmem:[%s5422_s0 + $0x10] sm:$0xe] }
  0x96   :  { %v3527_v8 = vld [vmem:[#allocation2 + $0x1c0] sm:$0xf]  ;;  %v3929_v9 = vld [vmem:[#allocation2 + $0x1e0] sm:$0xf0]  ;;  %2922 = vmatpush.bf16.msra.mxu0 %v4005_v7  ;;  %v803_v18 = vor.u32 %v802_v11, %v799_v10  ;;  %v3152_v21 = vld [vmem:[%s5422_s0 + $0x14] sm:$0x1] }
  0x97   :  { %v790_v22 = vrot.slane %v789_v12, 4  ;;  %v3181_v23 = vrot.slane %v3149_v14, 9  ;;  %v908_v24 = vrot.slane %v3150_v15, 5  ;;  %v3182_v25 = vrot.slane %v3151_v20, 9  ;;  %v3197_v31 = vld [vmem:[%s5422_s0 + $0x10] sm:$0xf] }
  0x98   :  { %v3528_v28 = vor.u32 %v3929_v9, %v3527_v8  ;;  %v804_v29 = vrot.slane %v803_v18, 4  ;;  %v912_v30 = vrot.slane %v3152_v21, 5  ;;  %v3198_v35 = vld [vmem:[%s5422_s0 + $0x18] sm:$0xf]  ;;  %1019 = vst [vmem:[#allocation2 + $0x18] sm:$0xf] %v3197_v31 }
  0x99   :  { %v795_v33 = vsel %vm4218_vm5, %v790_v22, %v794_v13  ;;  %v909_v34 = vsel %vm4211_vm4, %v3181_v23, %v908_v24  ;;  %v3213_v38 = vld [vmem:[%s5422_s0 + $0x10] sm:$0xf]  ;;  %v3214_v39 = vld [vmem:[%s5422_s0 + $0x14] sm:$0x1]  ;;  %v3215_v40 = vld [vmem:[%s5422_s0 + $0x18] sm:$0xf] }
  0x9a   :  { %v809_v36 = vsel %vm4218_vm5, %v804_v29, %v808_v19  ;;  %840 = vst [vmem:[#allocation2 + $0x208] sm:$0xf] %v795_v33  ;;  %v913_v37 = vsel %vm4211_vm4, %v3182_v25, %v912_v30  ;;  %v3216_v41 = vld [vmem:[%s5422_s0 + $0x1c] sm:$0x1]  ;;  %v1068_v42 = vshrl.u32 %v3213_v38, 16  ;;  %v1071_v43 = vshll.u32 %v3213_v38, 16 }
  0x9b   :  { %841 = vst [vmem:[#allocation2 + $0x22c] sm:$0xf] %v809_v36  ;;  %v1077_v44 = vshll.u32 %v3214_v39, 16  ;;  %v1082_v45 = vshrl.u32 %v3215_v40, 16  ;;  %v1085_v46 = vshll.u32 %v3215_v40, 16  ;;  %v1091_v47 = vshll.u32 %v3216_v41, 16 }
  0x9c   :  { %986 = vst [vmem:[#allocation2 + $0x14] sm:$0xf] %v909_v34  ;;  %v3245_v48 = vld [vmem:[%s5422_s0 + $0x10] sm:$0xe]  ;;  %v1070_v50 = vrot.slane %v1068_v42, 4  ;;  %v1073_v51 = vrot.slane %v1071_v43, 5 }
  0x9d   :  { %987 = vst [vmem:[#allocation2 + $0x38] sm:$0xf] %v913_v37  ;;  %v1084_v52 = vrot.slane %v1082_v45, 4  ;;  %v1087_v54 = vrot.slane %v1085_v46, 5  ;;  %v3246_v55 = vld [vmem:[%s5422_s0 + $0x14] sm:$0x1] }
  0x9e   :  { %v4872_v26 = vpop.f32.mrf.mxu1  ;;  %1020 = vst [vmem:[#allocation2 + $0x3c] sm:$0xf] %v3198_v35  ;;  %v3247_v56 = vld [vmem:[%s5422_s0 + $0x18] sm:$0xe]  ;;  %v1074_v59 = vor.u32 %v1073_v51, %v1070_v50  ;;  %v1079_v61 = vrot.slane %v1077_v44, 5  ;;  %v3277_v63 = vrot.slane %v3245_v48, 9 }
  0x9f   :  { %v3248_v62 = vld [vmem:[%s5422_s0 + $0x1c] sm:$0x1]  ;;  %v1389_v0 = vrot.slane %v3246_v55, 5  ;;  %v1088_v2 = vor.u32 %v1087_v54, %v1084_v52  ;;  %v1093_v3 = vrot.slane %v1091_v47, 5  ;;  %v3278_v4 = vrot.slane %v3247_v56, 9 }
  0xa0   :  { %v4877_v32 = vpop.f32.mrf.mxu0  ;;  %v1393_v5 = vrot.slane %v3248_v62, 5  ;;  %v3153_v6 = vld [vmem:[%s5422_s0 + $0x18] sm:$0xe]  ;;  %v3932_v7 = vld [vmem:[#allocation2 + $0x1fc] sm:$0xf]  ;;  %v1075_v10 = vrot.slane %v1074_v59, 4 }
  0xa1   :  { %2610 = vmatmul.bf16.gmra.mxu1 %v3516_v16  ;;  %2659 = vmatmul.bf16.gmra.mxu2 %v3520_v17  ;;  %v3549_v8 = vld [vmem:[#allocation2 + $0x21c] sm:$0xf0]  ;;  %v1390_v11 = vsel %vm4211_vm4, %v3277_v63, %v1389_v0  ;;  %v3154_v12 = vld [vmem:[%s5422_s0 + $0x1c] sm:$0x1]  ;;  %v3183_v13 = vrot.slane %v3153_v6, 9  ;;  %v1089_v17 = vrot.slane %v1088_v2, 4 }
  0xa2   :  { %v3555_v9 = vld [vmem:[#allocation2 + $0x200] sm:$0xf]  ;;  %v3937_v14 = vld [vmem:[#allocation2 + $0x220] sm:$0xf0]  ;;  %v3557_v16 = vld [vmem:[#allocation2 + $0x224] sm:$0xf0]  ;;  %v1394_v18 = vsel %vm4211_vm4, %v3278_v4, %v1393_v5  ;;  %v1080_v21 = vsel %vm4218_vm5, %v1075_v10, %v1079_v61  ;;  %v3552_v34 = vor.u32 %v3932_v7, %v3549_v8 }
  0xa3   :  { %2708 = vmatmul.bf16.gmra.mxu3 %v3524_v27  ;;  %2757 = vmatmul.bf16.gmra.mxu0 %v3528_v28  ;;  %v3933_v15 = vld [vmem:[#allocation2 + $0x204] sm:$0xf]  ;;  %1467 = vst [vmem:[#allocation2 + $0x20] sm:$0xf] %v1390_v11  ;;  %v916_v19 = vrot.slane %v3154_v12, 5  ;;  %v1094_v24 = vsel %vm4218_vm5, %v1089_v17, %v1093_v3  ;;  %v3556_v35 = vor.u32 %v3937_v14, %v3555_v9 }
  0xa4   :  { %v4905_v49 = vpop.f32.mrf.mxu2  ;;  %v3563_v20 = vld [vmem:[#allocation2 + $0x208] sm:$0xf]  ;;  %1468 = vst [vmem:[#allocation2 + $0x44] sm:$0xf] %v1394_v18  ;;  %v3155_v22 = vld [vmem:[%s5422_s0 + $0x20] sm:$0xe]  ;;  %v3560_v39 = vor.u32 %v3933_v15, %v3557_v16 }
  0xa5   :  { %v3938_v23 = vld [vmem:[#allocation2 + $0x228] sm:$0xf0]  ;;  %1307 = vst [vmem:[#allocation2 + $0x1c] sm:$0xf] %v1080_v21  ;;  %v3156_v25 = vld [vmem:[%s5422_s0 + $0x24] sm:$0x1]  ;;  %v917_v27 = vsel %vm4211_vm4, %v3183_v13, %v916_v19 }
  0xa6   :  { %v4907_v53 = vpop.f32.mrf.mxu3  ;;  %v4915_v57 = vpop.f32.mrf.mxu1  ;;  %1308 = vst [vmem:[#allocation2 + $0x40] sm:$0xf] %v1094_v24  ;;  %v3184_v29 = vrot.slane %v3155_v22, 9  ;;  %v920_v30 = vrot.slane %v3156_v25, 5  ;;  %v3199_v31 = vld [vmem:[%s5422_s0 + $0x20] sm:$0xf]  ;;  %v3564_v40 = vor.u32 %v3938_v23, %v3563_v20 }
  0xa7   :  { %988 = vst [vmem:[#allocation2 + $0x5c] sm:$0xf] %v917_v27  ;;  %v3200_v36 = vld [vmem:[%s5422_s0 + $0x28] sm:$0xf]  ;;  %v3217_v37 = vld [vmem:[%s5422_s0 + $0x20] sm:$0xf] }
  0xa8   :  { %v4920_v1 = vpop.f32.mrf.mxu0  ;;  %v921_v41 = vsel %vm4211_vm4, %v3184_v29, %v920_v30  ;;  %1021 = vst [vmem:[#allocation2 + $0x60] sm:$0xf] %v3199_v31  ;;  %v3218_v42 = vld [vmem:[%s5422_s0 + $0x24] sm:$0x1]  ;;  %v3219_v43 = vld [vmem:[%s5422_s0 + $0x28] sm:$0xf] }
  0xa9   :  { %989 = vst [vmem:[#allocation2 + $0x80] sm:$0xf] %v921_v41  ;;  %v3220_v45 = vld [vmem:[%s5422_s0 + $0x2c] sm:$0x1]  ;;  %v1096_v46 = vshrl.u32 %v3217_v37, 16  ;;  %v1099_v47 = vshll.u32 %v3217_v37, 16 }
  0xaa   :  { %1022 = vst [vmem:[#allocation2 + $0x84] sm:$0xf] %v3200_v36  ;;  %v1105_v48 = vshll.u32 %v3218_v42, 16  ;;  %v1110_v50 = vshrl.u32 %v3219_v43, 16  ;;  %v1113_v54 = vshll.u32 %v3219_v43, 16  ;;  %v1119_v55 = vshll.u32 %v3220_v45, 16 }
  0xab   :  { %v1098_v51 = vrot.slane %v1096_v46, 4  ;;  %v1101_v52 = vrot.slane %v1099_v47, 5  ;;  %v3249_v59 = vld [vmem:[%s5422_s0 + $0x20] sm:$0xe]  ;;  %v3250_v0 = vld [vmem:[%s5422_s0 + $0x24] sm:$0x1] }
  0xac   :  { %v4944_v28 = vpop.f32.mrf.mxu2  ;;  %v1112_v56 = vrot.slane %v1110_v50, 4  ;;  %v1107_v62 = vrot.slane %v1105_v48, 5  ;;  %v1115_v63 = vrot.slane %v1113_v54, 5  ;;  %v1121_v3 = vrot.slane %v1119_v55, 5  ;;  %v3251_v4 = vld [vmem:[%s5422_s0 + $0x28] sm:$0xe] }
  0xad   :  { %v1102_v61 = vor.u32 %v1101_v52, %v1098_v51  ;;  %v3252_v5 = vld [vmem:[%s5422_s0 + $0x2c] sm:$0x1]  ;;  %v3279_v9 = vrot.slane %v3249_v59, 9  ;;  %v1397_v10 = vrot.slane %v3250_v0, 5  ;;  %v3280_v12 = vrot.slane %v3251_v4, 9 }
  0xae   :  { %v4949_v33 = vpop.f32.mrf.mxu3  ;;  %v4957_v38 = vpop.f32.mrf.mxu1  ;;  %v1116_v8 = vor.u32 %v1115_v63, %v1112_v56  ;;  %v1401_v13 = vrot.slane %v3252_v5, 5  ;;  %v3157_v14 = vld [vmem:[%s5422_s0 + $0x28] sm:$0xe]  ;;  %v3871_v16 = vld [vmem:[#allocation2 + $0x14] sm:$0xf] }
  0xaf   :  { %v1103_v7 = vrot.slane %v1102_v61, 4  ;;  %v3313_v17 = vld [vmem:[#allocation2 + $0x34] sm:$0xf0]  ;;  %v3876_v19 = vld [vmem:[#allocation2 + $0x38] sm:$0xf0]  ;;  %v1398_v22 = vsel %vm4211_vm4, %v3279_v9, %v1397_v10  ;;  %v3185_v36 = vrot.slane %v3157_v14, 9 }
  0xb0   :  { %v4967_v44 = vpop.f32.mrf.mxu0  ;;  %v3319_v18 = vld [vmem:[#allocation2 + $0x18] sm:$0xf]  ;;  %v1117_v21 = vrot.slane %v1116_v8, 4  ;;  %v3158_v23 = vld [vmem:[%s5422_s0 + $0x2c] sm:$0x1]  ;;  %v1402_v30 = vsel %vm4211_vm4, %v3280_v12, %v1401_v13  ;;  %v3316_v47 = vor.u32 %v3871_v16, %v3313_v17 }
  0xb1   :  { %2615 = vmatmul.bf16.gmra.mxu1 %v3552_v34  ;;  %2664 = vmatmul.bf16.gmra.mxu2 %v3556_v35  ;;  %v1108_v20 = vsel %vm4218_vm5, %v1103_v7, %v1107_v62  ;;  %v3872_v24 = vld [vmem:[#allocation2 + $0x1c] sm:$0xf]  ;;  %v3321_v25 = vld [vmem:[#allocation2 + $0x3c] sm:$0xf0]  ;;  %v3877_v29 = vld [vmem:[#allocation2 + $0x40] sm:$0xf0]  ;;  %v3320_v48 = vor.u32 %v3876_v19, %v3319_v18 }
  0xb2   :  { %v3327_v27 = vld [vmem:[#allocation2 + $0x20] sm:$0xf]  ;;  %1309 = vst [vmem:[#allocation2 + $0x64] sm:$0xf] %v1108_v20  ;;  %v3159_v31 = vld [vmem:[%s5422_s0 + $0x30] sm:$0xe]  ;;  %v1122_v35 = vsel %vm4218_vm5, %v1117_v21, %v1121_v3  ;;  %v3324_v55 = vor.u32 %v3872_v24, %v3321_v25 }
  0xb3   :  { %2713 = vmatmul.bf16.gmra.mxu3 %v3560_v39  ;;  %2762 = vmatmul.bf16.gmra.mxu0 %v3564_v40  ;;  %v3160_v34 = vld [vmem:[%s5422_s0 + $0x34] sm:$0x1]  ;;  %1469 = vst [vmem:[#allocation2 + $0x68] sm:$0xf] %v1398_v22  ;;  %v924_v37 = vrot.slane %v3158_v23, 5  ;;  %v3186_v39 = vrot.slane %v3159_v31, 9  ;;  %v3328_v56 = vor.u32 %v3877_v29, %v3327_v27 }
  0xb4   :  { %v4978_v2 = vpop.f32.mrf.mxu2  ;;  %1310 = vst [vmem:[#allocation2 + $0x88] sm:$0xf] %v1122_v35  ;;  %v928_v40 = vrot.slane %v3160_v34, 5  ;;  %v3201_v41 = vld [vmem:[%s5422_s0 + $0x30] sm:$0xf] }
  0xb5   :  { %1470 = vst [vmem:[#allocation2 + $0x8c] sm:$0xf] %v1402_v30  ;;  %v925_v42 = vsel %vm4211_vm4, %v3185_v36, %v924_v37  ;;  %v3202_v43 = vld [vmem:[%s5422_s0 + $0x38] sm:$0xf]  ;;  %v3221_v45 = vld [vmem:[%s5422_s0 + $0x30] sm:$0xf] }
  0xb6   :  { %v4986_v6 = vpop.f32.mrf.mxu3  ;;  %v4988_v11 = vpop.f32.mrf.mxu1  ;;  %v929_v50 = vsel %vm4211_vm4, %v3186_v39, %v928_v40  ;;  %990 = vst [vmem:[#allocation2 + $0xa4] sm:$0xf] %v925_v42  ;;  %v3222_v51 = vld [vmem:[%s5422_s0 + $0x34] sm:$0x1]  ;;  %v3223_v52 = vld [vmem:[%s5422_s0 + $0x38] sm:$0xf] }
  0xb7   :  { %991 = vst [vmem:[#allocation2 + $0xc8] sm:$0xf] %v929_v50  ;;  %v3224_v59 = vld [vmem:[%s5422_s0 + $0x3c] sm:$0x1]  ;;  %v1124_v61 = vshrl.u32 %v3221_v45, 16  ;;  %v1127_v62 = vshll.u32 %v3221_v45, 16 }
  0xb8   :  { %v4993_v15 = vpop.f32.mrf.mxu0  ;;  %1023 = vst [vmem:[#allocation2 + $0xa8] sm:$0xf] %v3201_v41  ;;  %v1133_v0 = vshll.u32 %v3222_v51, 16  ;;  %v1138_v3 = vshrl.u32 %v3223_v52, 16  ;;  %v1141_v4 = vshll.u32 %v3223_v52, 16  ;;  %v1147_v5 = vshll.u32 %v3224_v59, 16 }
  0xb9   :  { %1024 = vst [vmem:[#allocation2 + $0xcc] sm:$0xf] %v3202_v43  ;;  %v1126_v9 = vrot.slane %v1124_v61, 4  ;;  %v1129_v10 = vrot.slane %v1127_v62, 5  ;;  %v3253_v17 = vld [vmem:[%s5422_s0 + $0x30] sm:$0xe] }
  0xba   :  { %v1140_v12 = vrot.slane %v1138_v3, 4  ;;  %v1143_v13 = vrot.slane %v1141_v4, 5  ;;  %v1135_v16 = vrot.slane %v1133_v0, 5  ;;  %v3254_v18 = vld [vmem:[%s5422_s0 + $0x34] sm:$0x1]  ;;  %v1149_v19 = vrot.slane %v1147_v5, 5 }
  0xbb   :  { %v1130_v14 = vor.u32 %v1129_v10, %v1126_v9  ;;  %v3255_v20 = vld [vmem:[%s5422_s0 + $0x38] sm:$0xe]  ;;  %v3256_v21 = vld [vmem:[%s5422_s0 + $0x3c] sm:$0x1]  ;;  %v3281_v23 = vrot.slane %v3253_v17, 9  ;;  %v1405_v24 = vrot.slane %v3254_v18, 5 }
  0xbc   :  { %v5023_v46 = vpop.f32.mrf.mxu2  ;;  %v3282_v29 = vrot.slane %v3255_v20, 9  ;;  %v1409_v30 = vrot.slane %v3256_v21, 5  ;;  %v3161_v37 = vld [vmem:[%s5422_s0 + $0x38] sm:$0xe]  ;;  %v3162_v39 = vld [vmem:[%s5422_s0 + $0x3c] sm:$0x1] }
  0xbd   :  { %v1131_v22 = vrot.slane %v1130_v14, 4  ;;  %v1406_v36 = vsel %vm4211_vm4, %v3281_v23, %v1405_v24  ;;  %v3880_v41 = vld [vmem:[#allocation2 + $0x5c] sm:$0xf]  ;;  %v3349_v42 = vld [vmem:[#allocation2 + $0x7c] sm:$0xf0]  ;;  %v3187_v59 = vrot.slane %v3161_v37, 9 }
  0xbe   :  { %v5033_v54 = vpop.f32.mrf.mxu3  ;;  %v2581_v63 = vpop.f32.mrf.mxu1  ;;  %v3355_v43 = vld [vmem:[#allocation2 + $0x60] sm:$0xf]  ;;  %v3885_v45 = vld [vmem:[#allocation2 + $0x80] sm:$0xf0]  ;;  %v3357_v62 = vld [vmem:[#allocation2 + $0x84] sm:$0xf0] }
  0xbf   :  { %v2582_v7 = vadd.f32 %v2581_v63, %v4877_v32  ;;  %v1144_v32 = vor.u32 %v1143_v13, %v1140_v12  ;;  %v1136_v35 = vsel %vm4218_vm5, %v1131_v22, %v1135_v16  ;;  %v3163_v50 = vld [vmem:[%s5422_s0 + $0x40] sm:$0xe]  ;;  %v3881_v61 = vld [vmem:[#allocation2 + $0x64] sm:$0xf]  ;;  %1471 = vst [vmem:[#allocation2 + $0xb0] sm:$0xf] %v1406_v36  ;;  %v3352_v16 = vor.u32 %v3880_v41, %v3349_v42 }
  0xc0   :  { %v2728_v8 = vpop.f32.mrf.mxu0  ;;  %1311 = vst [vmem:[#allocation2 + $0xac] sm:$0xf] %v1136_v35  ;;  %v932_v63 = vrot.slane %v3162_v39, 5  ;;  %v3188_v0 = vrot.slane %v3163_v50, 9  ;;  %v3363_v4 = vld [vmem:[#allocation2 + $0x68] sm:$0xf]  ;;  %v3356_v17 = vor.u32 %v3885_v45, %v3355_v43 }
  0xc1   :  { %2776 = vmatmul.bf16.vlgmr.msra.gmra.mxu1 %v3316_v47  ;;  %2825 = vmatmul.bf16.vlgmr.msra.gmra.mxu2 %v3320_v48  ;;  %v1145_v27 = vrot.slane %v1144_v32, 4  ;;  %v1410_v48 = vsel %vm4211_vm4, %v3282_v29, %v1409_v30  ;;  %v3886_v5 = vld [vmem:[#allocation2 + $0x88] sm:$0xf0]  ;;  %v3225_v13 = vld [vmem:[%s5422_s0 + $0x40] sm:$0xf] }
  0xc2   :  { %1472 = vst [vmem:[#allocation2 + $0xd4] sm:$0xf] %v1410_v48  ;;  %v933_v10 = vsel %vm4211_vm4, %v3187_v59, %v932_v63  ;;  %v3226_v14 = vld [vmem:[%s5422_s0 + $0x44] sm:$0x1]  ;;  %v3228_v18 = vld [vmem:[%s5422_s0 + $0x4c] sm:$0x1] }
  0xc3   :  { %2874 = vmatmul.bf16.vlgmr.msra.gmra.mxu3 %v3324_v55  ;;  %2923 = vmatmul.bf16.vlgmr.msra.gmra.mxu0 %v3328_v56  ;;  %v1150_v47 = vsel %vm4218_vm5, %v1145_v27, %v1149_v19  ;;  %v3164_v56 = vld [vmem:[%s5422_s0 + $0x44] sm:$0x1]  ;;  %992 = vst [vmem:[#allocation2 + $0xec] sm:$0xf] %v933_v10  ;;  %v1152_v19 = vshrl.u32 %v3225_v13, 16  ;;  %v1155_v20 = vshll.u32 %v3225_v13, 16 }
  0xc4   :  { %v2630_v25 = vpop.f32.mrf.mxu2  ;;  %1312 = vst [vmem:[#allocation2 + $0xd0] sm:$0xf] %v1150_v47  ;;  %v936_v3 = vrot.slane %v3164_v56, 5  ;;  %v1161_v21 = vshll.u32 %v3226_v14, 16  ;;  %v1175_v29 = vshll.u32 %v3228_v18, 16 }
  0xc5   :  { %v2631_v31 = vadd.f32 %v2630_v25, %v2582_v7  ;;  %v3204_v7 = vld [vmem:[%s5422_s0 + $0x48] sm:$0xf]  ;;  %v3360_v25 = vor.u32 %v3881_v61, %v3357_v62  ;;  %v1157_v35 = vrot.slane %v1155_v20, 5  ;;  %v3257_v42 = vld [vmem:[%s5422_s0 + $0x40] sm:$0xe] }
  0xc6   :  { %v2679_v34 = vpop.f32.mrf.mxu3  ;;  %v2583_v40 = vpop.f32.mrf.mxu1  ;;  %v937_v12 = vsel %vm4211_vm4, %v3188_v0, %v936_v3  ;;  %1026 = vst [vmem:[#allocation2 + $0x114] sm:$0xf] %v3204_v7  ;;  %v1163_v45 = vrot.slane %v1161_v21, 5  ;;  %v3258_v47 = vld [vmem:[%s5422_s0 + $0x44] sm:$0x1]  ;;  %v3283_v48 = vrot.slane %v3257_v42, 9 }
  0xc7   :  { %v2680_v51 = vadd.f32 %v2679_v34, %v2631_v31  ;;  %v2584_v52 = vadd.f32 %v2583_v40, %v4920_v1  ;;  %v3203_v1 = vld [vmem:[%s5422_s0 + $0x40] sm:$0xf]  ;;  %993 = vst [vmem:[#allocation2 + $0x110] sm:$0xf] %v937_v12  ;;  %v3364_v31 = vor.u32 %v3886_v5, %v3363_v4  ;;  %v1154_v34 = vrot.slane %v1152_v19, 4 }
  0xc8   :  { %v2730_v55 = vpop.f32.mrf.mxu0  ;;  %1025 = vst [vmem:[#allocation2 + $0xf0] sm:$0xf] %v3203_v1  ;;  %v1413_v61 = vrot.slane %v3258_v47, 5  ;;  %v3165_v1 = vld [vmem:[%s5422_s0 + $0x58] sm:$0xe] }
  0xc9   :  { %v5078_v9 = vadd.f32 %v2728_v8, %v2680_v51  ;;  %v3227_v8 = vld [vmem:[%s5422_s0 + $0x48] sm:$0xf]  ;;  %v1158_v43 = vor.u32 %v1157_v35, %v1154_v34  ;;  %v1177_v51 = vrot.slane %v1175_v29, 5  ;;  %v3229_v7 = vld [vmem:[%s5422_s0 + $0x60] sm:$0xf]  ;;  %v3189_v18 = vrot.slane %v3165_v1, 9 }
  0xca   :  { %v1166_v22 = vshrl.u32 %v3227_v8, 16  ;;  %v1169_v27 = vshll.u32 %v3227_v8, 16  ;;  %v1414_v5 = vsel %vm4211_vm4, %v3283_v48, %v1413_v61  ;;  %v3894_v29 = vld [vmem:[#allocation2 + $0xc8] sm:$0xf0]  ;;  %v3230_v35 = vld [vmem:[%s5422_s0 + $0x64] sm:$0x1] }
  0xcb   :  { %v1159_v59 = vrot.slane %v1158_v43, 4  ;;  %1473 = vst [vmem:[#allocation2 + $0xf8] sm:$0xf] %v1414_v5  ;;  %v3232_v42 = vld [vmem:[%s5422_s0 + $0x6c] sm:$0x1]  ;;  %v1180_v43 = vshrl.u32 %v3229_v7, 16 }
  0xcc   :  { %v2632_v32 = vpop.f32.mrf.mxu2  ;;  %v1168_v36 = vrot.slane %v1166_v22, 4  ;;  %v1171_v41 = vrot.slane %v1169_v27, 5  ;;  %v3391_v27 = vld [vmem:[#allocation2 + $0xa8] sm:$0xf]  ;;  %v1189_v48 = vshll.u32 %v3230_v35, 16 }
  0xcd   :  { %v2633_v23 = vadd.f32 %v2632_v32, %v2584_v52  ;;  %v3260_v52 = vld [vmem:[%s5422_s0 + $0x4c] sm:$0x1]  ;;  %v1164_v4 = vsel %vm4218_vm5, %v1159_v59, %v1163_v45  ;;  %v1183_v45 = vshll.u32 %v3229_v7, 16  ;;  %v1182_v59 = vrot.slane %v1180_v43, 4  ;;  %v3261_v7 = vld [vmem:[%s5422_s0 + $0x60] sm:$0xe] }
  0xce   :  { %v2681_v24 = vpop.f32.mrf.mxu3  ;;  %v2586_v30 = vpop.f32.mrf.mxu1  ;;  %v1172_v50 = vor.u32 %v1171_v41, %v1168_v36  ;;  %v1417_v63 = vrot.slane %v3260_v52, 5  ;;  %1313 = vst [vmem:[#allocation2 + $0xf4] sm:$0xf] %v1164_v4  ;;  %v3231_v36 = vld [vmem:[%s5422_s0 + $0x68] sm:$0xf] }
  0xcf   :  { %v2682_v37 = vadd.f32 %v2681_v24, %v2633_v23  ;;  %v2587_v39 = vadd.f32 %v2586_v30, %v4967_v44  ;;  %v3259_v44 = vld [vmem:[%s5422_s0 + $0x48] sm:$0xe]  ;;  %v3889_v24 = vld [vmem:[#allocation2 + $0xa4] sm:$0xf]  ;;  %v3205_v30 = vld [vmem:[%s5422_s0 + $0x60] sm:$0xf] }
  0xd0   :  { %v2733_v40 = vpop.f32.mrf.mxu0  ;;  %v3284_v62 = vrot.slane %v3259_v44, 9  ;;  %v1173_v0 = vrot.slane %v1172_v50, 4  ;;  %v3399_v41 = vld [vmem:[#allocation2 + $0xb0] sm:$0xf]  ;;  %v1194_v50 = vshrl.u32 %v3231_v36, 16  ;;  %v1203_v44 = vshll.u32 %v3232_v42, 16 }
  0xd1   :  { %2781 = vmatmul.bf16.gmra.mxu1 %v3352_v16  ;;  %2830 = vmatmul.bf16.gmra.mxu2 %v3356_v17  ;;  %v5109_v56 = vadd.f32 %v2730_v55, %v2682_v37  ;;  %v3166_v55 = vld [vmem:[%s5422_s0 + $0x5c] sm:$0x1]  ;;  %v3167_v16 = vld [vmem:[%s5422_s0 + $0x60] sm:$0xe]  ;;  %v3168_v17 = vld [vmem:[%s5422_s0 + $0x64] sm:$0x1] }
  0xd2   :  { %v1178_v13 = vsel %vm4218_vm5, %v1173_v0, %v1177_v51  ;;  %v1418_v14 = vsel %vm4211_vm4, %v3284_v62, %v1417_v63  ;;  %v940_v32 = vrot.slane %v3166_v55, 5  ;;  %v3190_v19 = vrot.slane %v3167_v16, 9  ;;  %v3890_v37 = vld [vmem:[#allocation2 + $0xac] sm:$0xf]  ;;  %v3895_v52 = vld [vmem:[#allocation2 + $0xd0] sm:$0xf0] }
  0xd3   :  { %2879 = vmatmul.bf16.gmra.mxu3 %v3360_v25  ;;  %2928 = vmatmul.bf16.gmra.mxu0 %v3364_v31  ;;  %1314 = vst [vmem:[#allocation2 + $0x118] sm:$0xf] %v1178_v13  ;;  %v944_v20 = vrot.slane %v3168_v17, 5  ;;  %v3385_v25 = vld [vmem:[#allocation2 + $0xc4] sm:$0xf0]  ;;  %v1197_v51 = vshll.u32 %v3231_v36, 16  ;;  %v3392_v0 = vor.u32 %v3894_v29, %v3391_v27 }
  0xd4   :  { %v2635_v3 = vpop.f32.mrf.mxu2  ;;  %v3206_v31 = vld [vmem:[%s5422_s0 + $0x68] sm:$0xf]  ;;  %1474 = vst [vmem:[#allocation2 + $0x11c] sm:$0xf] %v1418_v14  ;;  %v941_v34 = vsel %vm4211_vm4, %v3189_v18, %v940_v32  ;;  %v1185_v61 = vrot.slane %v1183_v45, 5  ;;  %v3388_v63 = vor.u32 %v3889_v24, %v3385_v25  ;;  %v1191_v55 = vrot.slane %v1189_v48, 5 }
  0xd5   :  { %v2636_v10 = vadd.f32 %v2635_v3, %v2587_v39  ;;  %v3393_v39 = vld [vmem:[#allocation2 + $0xcc] sm:$0xf0]  ;;  %994 = vst [vmem:[#allocation2 + $0x134] sm:$0xf] %v941_v34  ;;  %v1196_v3 = vrot.slane %v1194_v50, 4  ;;  %v3400_v14 = vor.u32 %v3895_v52, %v3399_v41  ;;  %v1205_v16 = vrot.slane %v1203_v44, 5 }
  0xd6   :  { %v2684_v12 = vpop.f32.mrf.mxu3  ;;  %v2588_v8 = vpop.f32.mrf.mxu1  ;;  %1027 = vst [vmem:[#allocation2 + $0x138] sm:$0xf] %v3205_v30  ;;  %v1186_v1 = vor.u32 %v1185_v61, %v1182_v59  ;;  %v3396_v13 = vor.u32 %v3890_v37, %v3393_v39  ;;  %v3263_v17 = vld [vmem:[%s5422_s0 + $0x68] sm:$0xe]  ;;  %v3233_v34 = vld [vmem:[%s5422_s0 + $0x70] sm:$0xf] }
  0xd7   :  { %v2685_v21 = vadd.f32 %v2684_v12, %v2636_v10  ;;  %v2589_v22 = vadd.f32 %v2588_v8, %v4993_v15  ;;  %v945_v15 = vsel %vm4211_vm4, %v3190_v19, %v944_v20  ;;  %1028 = vst [vmem:[#allocation2 + $0x15c] sm:$0xf] %v3206_v31  ;;  %v3262_v10 = vld [vmem:[%s5422_s0 + $0x64] sm:$0x1]  ;;  %v3264_v8 = vld [vmem:[%s5422_s0 + $0x6c] sm:$0x1] }
  0xd8   :  { %v2735_v23 = vpop.f32.mrf.mxu0  ;;  %995 = vst [vmem:[#allocation2 + $0x158] sm:$0xf] %v945_v15  ;;  %v1187_v20 = vrot.slane %v1186_v1, 4  ;;  %v1421_v24 = vrot.slane %v3262_v10, 5  ;;  %v3286_v25 = vrot.slane %v3263_v17, 9  ;;  %v1425_v30 = vrot.slane %v3264_v8, 5 }
  0xd9   :  { %v5154_v47 = vadd.f32 %v2733_v40, %v2685_v21  ;;  %v1199_v40 = vrot.slane %v1197_v51, 5  ;;  %v3235_v36 = vld [vmem:[%s5422_s0 + $0x78] sm:$0xf]  ;;  %v3169_v39 = vld [vmem:[%s5422_s0 + $0x68] sm:$0xe]  ;;  %v1208_v10 = vshrl.u32 %v3233_v34, 16 }
  0xda   :  { %v1192_v27 = vsel %vm4218_vm5, %v1187_v20, %v1191_v55  ;;  %v1426_v35 = vsel %vm4211_vm4, %v3286_v25, %v1425_v30  ;;  %v3170_v41 = vld [vmem:[%s5422_s0 + $0x6c] sm:$0x1]  ;;  %v3171_v45 = vld [vmem:[%s5422_s0 + $0x70] sm:$0xe]  ;;  %v3172_v48 = vld [vmem:[%s5422_s0 + $0x74] sm:$0x1] }
  0xdb   :  { %v1200_v21 = vor.u32 %v1199_v40, %v1196_v3  ;;  %1315 = vst [vmem:[#allocation2 + $0x13c] sm:$0xf] %v1192_v27  ;;  %v3191_v51 = vrot.slane %v3169_v39, 9  ;;  %v948_v44 = vrot.slane %v3170_v41, 5  ;;  %v3192_v52 = vrot.slane %v3171_v45, 9 }
  0xdc   :  { %v2637_v62 = vpop.f32.mrf.mxu2  ;;  %1476 = vst [vmem:[#allocation2 + $0x164] sm:$0xf] %v1426_v35  ;;  %v952_v59 = vrot.slane %v3172_v48, 5  ;;  %v3421_v3 = vld [vmem:[#allocation2 + $0x10c] sm:$0xf0]  ;;  %v1225_v30 = vshll.u32 %v3235_v36, 16 }
  0xdd   :  { %v2638_v4 = vadd.f32 %v2637_v62, %v2589_v22  ;;  %v3285_v22 = vrot.slane %v3261_v7, 9  ;;  %v1201_v29 = vrot.slane %v1200_v21, 4  ;;  %v3899_v1 = vld [vmem:[#allocation2 + $0xf4] sm:$0xf]  ;;  %v3429_v55 = vld [vmem:[#allocation2 + $0x114] sm:$0xf0] }
  0xde   :  { %v2686_v5 = vpop.f32.mrf.mxu3  ;;  %v2591_v12 = vpop.f32.mrf.mxu1  ;;  %v3207_v40 = vld [vmem:[%s5422_s0 + $0x70] sm:$0xf]  ;;  %v3236_v7 = vld [vmem:[%s5422_s0 + $0x7c] sm:$0x1]  ;;  %v3208_v17 = vld [vmem:[%s5422_s0 + $0x78] sm:$0xf] }
  0xdf   :  { %v2687_v18 = vadd.f32 %v2686_v5, %v2638_v4  ;;  %v2592_v32 = vadd.f32 %v2591_v12, %v4872_v26  ;;  %v1422_v26 = vsel %vm4211_vm4, %v3285_v22, %v1421_v24  ;;  %v1206_v15 = vsel %vm4218_vm5, %v1201_v29, %v1205_v16  ;;  %v3427_v4 = vld [vmem:[#allocation2 + $0xf0] sm:$0xf]  ;;  %v3903_v5 = vld [vmem:[#allocation2 + $0x110] sm:$0xf0]  ;;  %1029 = vst [vmem:[#allocation2 + $0x180] sm:$0xf] %v3207_v40 }
  0xe0   :  { %v2738_v19 = vpop.f32.mrf.mxu0  ;;  %1475 = vst [vmem:[#allocation2 + $0x140] sm:$0xf] %v1422_v26  ;;  %v1211_v12 = vshll.u32 %v3233_v34, 16  ;;  %v953_v16 = vsel %vm4211_vm4, %v3192_v52, %v952_v59  ;;  %v3265_v21 = vld [vmem:[%s5422_s0 + $0x70] sm:$0xe]  ;;  %v1231_v26 = vshll.u32 %v3236_v7, 16  ;;  %v3428_v35 = vor.u32 %v3903_v5, %v3427_v4 }
  0xe1   :  { %2786 = vmatmul.bf16.gmra.mxu1 %v3388_v63  ;;  %2835 = vmatmul.bf16.gmra.mxu2 %v3392_v0  ;;  %v5171_v31 = vadd.f32 %v2735_v23, %v2687_v18  ;;  %v3234_v23 = vld [vmem:[%s5422_s0 + $0x74] sm:$0x1]  ;;  %1316 = vst [vmem:[#allocation2 + $0x160] sm:$0xf] %v1206_v15  ;;  %v3898_v0 = vld [vmem:[#allocation2 + $0xec] sm:$0xf] }
  0xe2   :  { %v1217_v8 = vshll.u32 %v3234_v23, 16  ;;  %v1222_v18 = vshrl.u32 %v3235_v36, 16  ;;  %v1213_v20 = vrot.slane %v1211_v12, 5  ;;  %997 = vst [vmem:[#allocation2 + $0x1a0] sm:$0xf] %v953_v16  ;;  %v3424_v15 = vor.u32 %v3898_v0, %v3421_v3 }
  0xe3   :  { %2884 = vmatmul.bf16.gmra.mxu3 %v3396_v13  ;;  %2933 = vmatmul.bf16.gmra.mxu0 %v3400_v14  ;;  %v3435_v13 = vld [vmem:[#allocation2 + $0xf8] sm:$0xf]  ;;  %v949_v14 = vsel %vm4211_vm4, %v3191_v51, %v948_v44  ;;  %v3266_v25 = vld [vmem:[%s5422_s0 + $0x74] sm:$0x1]  ;;  %1030 = vst [vmem:[#allocation2 + $0x1a4] sm:$0xf] %v3208_v17  ;;  %v3432_v23 = vor.u32 %v3899_v1, %v3429_v55 }
  0xe4   :  { %v2640_v37 = vpop.f32.mrf.mxu2  ;;  %996 = vst [vmem:[#allocation2 + $0x17c] sm:$0xf] %v949_v14  ;;  %v1219_v24 = vrot.slane %v1217_v8, 5  ;;  %v1224_v29 = vrot.slane %v1222_v18, 4  ;;  %v1227_v45 = vrot.slane %v1225_v30, 5 }
  0xe5   :  { %v2641_v42 = vadd.f32 %v2640_v37, %v2592_v32  ;;  %v1210_v32 = vrot.slane %v1208_v10, 4  ;;  %v3268_v37 = vld [vmem:[%s5422_s0 + $0x7c] sm:$0x1] }
  0xe6   :  { %v2689_v43 = vpop.f32.mrf.mxu3  ;;  %v2593_v50 = vpop.f32.mrf.mxu1 }
  0xe7   :  { %v2690_v61 = vadd.f32 %v2689_v43, %v2641_v42  ;;  %v2594_v62 = vadd.f32 %v2593_v50, %v4915_v57  ;;  %v3904_v57 = vld [vmem:[#allocation2 + $0x118] sm:$0xf0]  ;;  %v1214_v27 = vor.u32 %v1213_v20, %v1210_v32 }
  0xe8   :  { %v5201_v63 = vpop.f32.mrf.mxu0  ;;  %v3436_v42 = vor.u32 %v3904_v57, %v3435_v13 }
  0xe9   :  { %v5219_v22 = vadd.f32 %v2738_v19, %v2690_v61  ;;  %v3267_v19 = vld [vmem:[%s5422_s0 + $0x78] sm:$0xe]  ;;  %v1215_v43 = vrot.slane %v1214_v27, 4 }
  0xec   :  { %v2642_v34 = vpop.f32.mrf.mxu2 }
  0xed   :  { %v2643_v39 = vadd.f32 %v2642_v34, %v2594_v62 }
  0xee   :  { %v2691_v41 = vpop.f32.mrf.mxu3 }
  0xef   :  { %8 = vsyncpa [#allocation5], 0  ;;  %v2596_v36 = vpop.f32.mrf.mxu1  ;;  %v1233_v48 = vrot.slane %v1231_v26, 5  ;;  %v3287_v50 = vrot.slane %v3265_v21, 9  ;;  %v1429_v51 = vrot.slane %v3266_v25, 5  ;;  %v3288_v44 = vrot.slane %v3267_v19, 9 }
  0xf0   :  { %v3237_v52 = vld [vmem:[%s5422_s0 + $0x80] sm:$0xf]  ;;  %v2692_v59 = vadd.f32 %v2691_v41, %v2643_v39  ;;  %v2597_v61 = vadd.f32 %v2596_v36, %v4957_v38  ;;  %v5234_v0 = vpop.f32.mrf.mxu0  ;;  %v1220_v62 = vsel %vm4218_vm5, %v1215_v43, %v1219_v24  ;;  %v1228_v3 = vor.u32 %v1227_v45, %v1224_v29  ;;  %v3239_v10 = vld [vmem:[%s5422_s0 + $0x88] sm:$0xf]  ;;  %v3238_v13 = vld [vmem:[%s5422_s0 + $0x84] sm:$0x1] }
  0xf1   :  { %1317 = vst [vmem:[#allocation2 + $0x184] sm:$0xf] %v1220_v62  ;;  %v1430_v4 = vsel %vm4211_vm4, %v3287_v50, %v1429_v51  ;;  %v1433_v5 = vrot.slane %v3268_v37, 5  ;;  %v1236_v1 = vshrl.u32 %v3237_v52, 16  ;;  %2791 = vmatmul.bf16.gmra.mxu1 %v3424_v15  ;;  %2840 = vmatmul.bf16.gmra.mxu2 %v3428_v35  ;;  %v1239_v40 = vshll.u32 %v3237_v52, 16  ;;  %s3073_s1 = sshll.u32 %s5425_s3, 4  ;;  %s3074_s1 = int_to_ptr.hbm [resolvable:$true] %s3073_s1 }
  0xf2   :  { %v1229_v55 = vrot.slane %v1228_v3, 4  ;;  %1477 = vst [vmem:[#allocation2 + $0x188] sm:$0xf] %v1430_v4  ;;  %v5241_v7 = vadd.f32 %v5201_v63, %v2692_v59  ;;  %v3173_v16 = vld [vmem:[%s5422_s0 + $0x78] sm:$0xe]  ;;  %v1245_v34 = vshll.u32 %v3238_v13, 16 }
  0xf3   :  { %2889 = vmatmul.bf16.gmra.mxu3 %v3432_v23  ;;  %2938 = vmatmul.bf16.gmra.mxu0 %v3436_v42  ;;  %v1434_v38 = vsel %vm4211_vm4, %v3288_v44, %v1433_v5  ;;  %v1238_v57 = vrot.slane %v1236_v1, 4  ;;  %v1241_v63 = vrot.slane %v1239_v40, 5  ;;  %v3174_v17 = vld [vmem:[%s5422_s0 + $0x7c] sm:$0x1]  ;;  %v3175_v32 = vld [vmem:[%s5422_s0 + $0x80] sm:$0xe] }
  0xf4   :  { %v1234_v12 = vsel %vm4218_vm5, %v1229_v55, %v1233_v48  ;;  %1478 = vst [vmem:[#allocation2 + $0x1ac] sm:$0xf] %v1434_v38  ;;  %v2645_v14 = vpop.f32.mrf.mxu2  ;;  %v3176_v20 = vld [vmem:[%s5422_s0 + $0x84] sm:$0x1]  ;;  %v3193_v21 = vrot.slane %v3173_v16, 9  ;;  %v956_v24 = vrot.slane %v3174_v17, 5 }
  0xf5   :  { %1318 = vst [vmem:[#allocation2 + $0x1a8] sm:$0xf] %v1234_v12  ;;  %v2646_v8 = vadd.f32 %v2645_v14, %v2597_v61  ;;  %v1242_v25 = vor.u32 %v1241_v63, %v1238_v57  ;;  %v3194_v29 = vrot.slane %v3175_v32, 9  ;;  %v960_v30 = vrot.slane %v3176_v20, 5  ;;  %v3240_v26 = vld [vmem:[%s5422_s0 + $0x8c] sm:$0x1] }
  0xf6   :  { %v2694_v18 = vpop.f32.mrf.mxu3  ;;  %v1250_v15 = vshrl.u32 %v3239_v10, 16  ;;  %v3907_v37 = vld [vmem:[#allocation2 + $0x134] sm:$0xf]  ;;  %v3457_v39 = vld [vmem:[#allocation2 + $0x154] sm:$0xf0]  ;;  %v957_v43 = vsel %vm4211_vm4, %v3193_v21, %v956_v24  ;;  %v1247_v51 = vrot.slane %v1245_v34, 5 }
  0xf7   :  { %v2598_v27 = vpop.f32.mrf.mxu1  ;;  %v2695_v35 = vadd.f32 %v2694_v18, %v2646_v8  ;;  %v3463_v41 = vld [vmem:[#allocation2 + $0x138] sm:$0xf]  ;;  %v3912_v42 = vld [vmem:[#allocation2 + $0x158] sm:$0xf0]  ;;  %v3209_v45 = vld [vmem:[%s5422_s0 + $0x80] sm:$0xf]  ;;  %v961_v48 = vsel %vm4211_vm4, %v3194_v29, %v960_v30  ;;  %v3460_v57 = vor.u32 %v3907_v37, %v3457_v39 }
  0xf8   :  { %v2599_v23 = vadd.f32 %v2598_v27, %v4988_v11  ;;  %v2745_v19 = vpop.f32.mrf.mxu0  ;;  %v3269_v36 = vld [vmem:[%s5422_s0 + $0x80] sm:$0xe]  ;;  %998 = vst [vmem:[#allocation2 + $0x1c4] sm:$0xf] %v957_v43  ;;  %v3210_v11 = vld [vmem:[%s5422_s0 + $0x88] sm:$0xf] }
  0xf9   :  { %v1243_v50 = vrot.slane %v1242_v25, 4  ;;  %v3908_v44 = vld [vmem:[#allocation2 + $0x13c] sm:$0xf]  ;;  %v3465_v52 = vld [vmem:[#allocation2 + $0x15c] sm:$0xf0]  ;;  %v1252_v61 = vrot.slane %v1250_v15, 4  ;;  %v5288_v55 = vadd.f32 %v5234_v0, %v2695_v35 }
  0xfa   :  { %v3471_v59 = vld [vmem:[#allocation2 + $0x140] sm:$0xf]  ;;  %999 = vst [vmem:[#allocation2 + $0x1e8] sm:$0xf] %v961_v48  ;;  %v1253_v62 = vshll.u32 %v3239_v10, 16  ;;  %v1259_v3 = vshll.u32 %v3240_v26, 16  ;;  %v3464_v10 = vor.u32 %v3912_v42, %v3463_v41  ;;  %v3468_v20 = vor.u32 %v3908_v44, %v3465_v52 }
  0xfb   :  { %v3913_v4 = vld [vmem:[#allocation2 + $0x160] sm:$0xf0]  ;;  %1031 = vst [vmem:[#allocation2 + $0x1c8] sm:$0xf] %v3209_v45  ;;  %v1248_v5 = vsel %vm4218_vm5, %v1243_v50, %v1247_v51  ;;  %v3289_v12 = vrot.slane %v3269_v36, 9  ;;  %s4068_s11 = smov 128  }
  0xfc   :  { %v3270_v1 = vld [vmem:[%s5422_s0 + $0x84] sm:$0x1]  ;;  %1032 = vst [vmem:[#allocation2 + $0x1ec] sm:$0xf] %v3210_v11  ;;  %v1255_v40 = vrot.slane %v1253_v62, 5  ;;  %v1261_v38 = vrot.slane %v1259_v3, 5  ;;  %v2647_v13 = vpop.f32.mrf.mxu2  ;;  %v3472_v21 = vor.u32 %v3913_v4, %v3471_v59 }
  0xfd   :  { %1319 = vst [vmem:[#allocation2 + $0x1cc] sm:$0xf] %v1248_v5  ;;  %v3271_v63 = vld [vmem:[%s5422_s0 + $0x88] sm:$0xe]  ;;  %v3272_v14 = vld [vmem:[%s5422_s0 + $0x8c] sm:$0x1]  ;;  %v2648_v16 = vadd.f32 %v2647_v13, %v2599_v23 }
  0xfe   :  { %v2696_v17 = vpop.f32.mrf.mxu3  ;;  %v1256_v0 = vor.u32 %v1255_v40, %v1252_v61  ;;  %v1437_v8 = vrot.slane %v3270_v1, 5  ;;  %v3290_v18 = vrot.slane %v3271_v63, 9  ;;  %v1441_v24 = vrot.slane %v3272_v14, 5  ;;  %v3241_v25 = vld [vmem:[%s5422_s0 + $0x90] sm:$0xf]  ;;  %s4069_s12 = smov 8  }
  0xff   :  { %v2601_v32 = vpop.f32.mrf.mxu1  ;;  %v2697_v27 = vadd.f32 %v2696_v17, %v2648_v16  ;;  %v3243_v15 = vld [vmem:[%s5422_s0 + $0x98] sm:$0xf]  ;;  %v1264_v35 = vshrl.u32 %v3241_v25, 16  ;;  %v1267_v23 = vshll.u32 %v3241_v25, 16  ;;  %v3242_v42 = vld [vmem:[%s5422_s0 + $0x94] sm:$0x1] }
 0x100   :  { %v2748_v29 = vpop.f32.mrf.mxu0  ;;  %v1257_v30 = vrot.slane %v1256_v0, 4  ;;  %v1438_v26 = vsel %vm4211_vm4, %v3289_v12, %v1437_v8  ;;  %v1442_v34 = vsel %vm4211_vm4, %v3290_v18, %v1441_v24  ;;  %v2602_v39 = vadd.f32 %v2601_v32, %v4905_v49  ;;  %v3177_v50 = vld [vmem:[%s5422_s0 + $0x88] sm:$0xe]  ;;  %v3178_v49 = vld [vmem:[%s5422_s0 + $0x8c] sm:$0x1] }
 0x101   :  { %1479 = vst [vmem:[#allocation2 + $0x1d0] sm:$0xf] %v1438_v26  ;;  %2796 = vmatmul.bf16.gmra.mxu1 %v3460_v57  ;;  %2845 = vmatmul.bf16.gmra.mxu2 %v3464_v10  ;;  %v5309_v41 = vadd.f32 %v2745_v19, %v2697_v27  ;;  %v1266_v43 = vrot.slane %v1264_v35, 4  ;;  %v1269_v45 = vrot.slane %v1267_v23, 5  ;;  %v1278_v36 = vshrl.u32 %v3243_v15, 16 }
 0x102   :  { %v1262_v37 = vsel %vm4218_vm5, %v1257_v30, %v1261_v38  ;;  %1480 = vst [vmem:[#allocation2 + $0x1f4] sm:$0xf] %v1442_v34  ;;  %v1281_v48 = vshll.u32 %v3243_v15, 16  ;;  %v3179_v19 = vld [vmem:[%s5422_s0 + $0x90] sm:$0xe]  ;;  %v3195_v59 = vrot.slane %v3177_v50, 9 }
 0x103   :  { %2894 = vmatmul.bf16.gmra.mxu3 %v3468_v20  ;;  %2943 = vmatmul.bf16.gmra.mxu0 %v3472_v21  ;;  %1320 = vst [vmem:[#allocation2 + $0x1f0] sm:$0xf] %v1262_v37  ;;  %v3180_v52 = vld [vmem:[%s5422_s0 + $0x94] sm:$0x1]  ;;  %v964_v61 = vrot.slane %v3178_v49, 5  ;;  %v3196_v62 = vrot.slane %v3179_v19, 9  ;;  %v1270_v1 = vor.u32 %v1269_v45, %v1266_v43 }
 0x104   :  { %v2650_v11 = vpop.f32.mrf.mxu2  ;;  %v968_v4 = vrot.slane %v3180_v52, 5  ;;  %v3244_v5 = vld [vmem:[%s5422_s0 + $0x9c] sm:$0x1]  ;;  %v1273_v40 = vshll.u32 %v3242_v42, 16  ;;  %v3211_v57 = vld [vmem:[%s5422_s0 + $0x90] sm:$0xf] }
 0x105   :  { %v2651_v51 = vadd.f32 %v2650_v11, %v2602_v39  ;;  %v965_v13 = vsel %vm4211_vm4, %v3195_v59, %v964_v61  ;;  %v1280_v10 = vrot.slane %v1278_v36, 4  ;;  %v3273_v63 = vld [vmem:[%s5422_s0 + $0x90] sm:$0xe]  ;;  %v3916_v14 = vld [vmem:[#allocation2 + $0x17c] sm:$0xf]  ;;  %v1271_v32 = vrot.slane %v1270_v1, 4 }
 0x106   :  { %v2699_v44 = vpop.f32.mrf.mxu3  ;;  %v3493_v16 = vld [vmem:[#allocation2 + $0x19c] sm:$0xf0]  ;;  %v3921_v0 = vld [vmem:[#allocation2 + $0x1a0] sm:$0xf0]  ;;  %v969_v8 = vsel %vm4211_vm4, %v3196_v62, %v968_v4  ;;  %1000 = vst [vmem:[#allocation2 + $0x20c] sm:$0xf] %v965_v13 }
 0x107   :  { %v2603_v3 = vpop.f32.mrf.mxu1  ;;  %v2700_v38 = vadd.f32 %v2699_v44, %v2651_v51  ;;  %v3499_v17 = vld [vmem:[#allocation2 + $0x180] sm:$0xf]  ;;  %v3212_v18 = vld [vmem:[%s5422_s0 + $0x98] sm:$0xf]  ;;  %v1275_v20 = vrot.slane %v1273_v40, 5  ;;  %v1283_v30 = vrot.slane %v1281_v48, 5  ;;  %v3496_v19 = vor.u32 %v3916_v14, %v3493_v16 }
 0x108   :  { %v2750_v12 = vpop.f32.mrf.mxu0  ;;  %v3917_v21 = vld [vmem:[#allocation2 + $0x184] sm:$0xf]  ;;  %v3501_v24 = vld [vmem:[#allocation2 + $0x1a4] sm:$0xf0]  ;;  %v3922_v27 = vld [vmem:[#allocation2 + $0x1a8] sm:$0xf0]  ;;  %v2604_v37 = vadd.f32 %v2603_v3, %v4944_v28  ;;  %v3500_v51 = vor.u32 %v3921_v0, %v3499_v17 }
 0x109   :  { %v3507_v25 = vld [vmem:[#allocation2 + $0x188] sm:$0xf]  ;;  %1001 = vst [vmem:[#allocation2 + $0x230] sm:$0xf] %v969_v8  ;;  %v1287_v26 = vshll.u32 %v3244_v5, 16  ;;  %v5342_v34 = vadd.f32 %v2748_v29, %v2700_v38  ;;  %v1276_v15 = vsel %vm4218_vm5, %v1271_v32, %v1275_v20  ;;  %v1284_v39 = vor.u32 %v1283_v30, %v1280_v10 }
 0x10a   :  { %1033 = vst [vmem:[#allocation2 + $0x210] sm:$0xf] %v3211_v57  ;;  %v3274_v35 = vld [vmem:[%s5422_s0 + $0x94] sm:$0x1]  ;;  %v3275_v23 = vld [vmem:[%s5422_s0 + $0x98] sm:$0xe]  ;;  %v3504_v28 = vor.u32 %v3917_v21, %v3501_v24  ;;  %v3508_v59 = vor.u32 %v3922_v27, %v3507_v25 }
 0x10b   :  { %1034 = vst [vmem:[#allocation2 + $0x234] sm:$0xf] %v3212_v18  ;;  %v1289_v42 = vrot.slane %v1287_v26, 5  ;;  %v3276_v29 = vld [vmem:[%s5422_s0 + $0x9c] sm:$0x1]  ;;  %v3291_v43 = vrot.slane %v3273_v63, 9 }
 0x10c   :  { %v2652_v45 = vpop.f32.mrf.mxu2  ;;  %1321 = vst [vmem:[#allocation2 + $0x214] sm:$0xf] %v1276_v15  ;;  %v1445_v36 = vrot.slane %v3274_v35, 5  ;;  %v3292_v48 = vrot.slane %v3275_v23, 9  ;;  %v1449_v11 = vrot.slane %v3276_v29, 5  ;;  %v1285_v44 = vrot.slane %v1284_v39, 4 }
 0x10d   :  { %v2653_v50 = vadd.f32 %v2652_v45, %v2604_v37  ;;  %v3925_v14 = vld [vmem:[#allocation2 + $0x1c4] sm:$0xf]  ;;  %v3529_v60 = vld [vmem:[#allocation2 + $0x1e4] sm:$0xf0]  ;;  %v3930_v0 = vld [vmem:[#allocation2 + $0x1e8] sm:$0xf0] }
 0x10e   :  { %v2701_v49 = vpop.f32.mrf.mxu3  ;;  %v1446_v61 = vsel %vm4211_vm4, %v3291_v43, %v1445_v36  ;;  %v1450_v62 = vsel %vm4211_vm4, %v3292_v48, %v1449_v11  ;;  %v1290_v5 = vsel %vm4218_vm5, %v1285_v44, %v1289_v42  ;;  %v3535_v17 = vld [vmem:[#allocation2 + $0x1c8] sm:$0xf]  ;;  %v3926_v8 = vld [vmem:[#allocation2 + $0x1cc] sm:$0xf]  ;;  %v3537_v18 = vld [vmem:[#allocation2 + $0x1ec] sm:$0xf0]  ;;  %v3532_v25 = vor.u32 %v3925_v14, %v3529_v60 }
 0x10f   :  { %v2606_v52 = vpop.f32.mrf.mxu1  ;;  %v2702_v3 = vadd.f32 %v2701_v49, %v2653_v50  ;;  %1481 = vst [vmem:[#allocation2 + $0x218] sm:$0xf] %v1446_v61  ;;  %v3543_v32 = vld [vmem:[#allocation2 + $0x1d0] sm:$0xf]  ;;  %v3931_v20 = vld [vmem:[#allocation2 + $0x1f0] sm:$0xf0]  ;;  %v3536_v27 = vor.u32 %v3930_v0, %v3535_v17  ;;  %v3540_v26 = vor.u32 %v3926_v8, %v3537_v18 }
 0x110   :  { %v2753_v4 = vpop.f32.mrf.mxu0  ;;  %1322 = vst [vmem:[#allocation2 + $0x238] sm:$0xf] %v1290_v5  ;;  %v2607_v40 = vadd.f32 %v2606_v52, %v4978_v2  ;;  %v3544_v15 = vor.u32 %v3931_v20, %v3543_v32  ;;  %v3934_v48 = vld [vmem:[#allocation2 + $0x20c] sm:$0xf]  ;;  %v3565_v11 = vld [vmem:[#allocation2 + $0x22c] sm:$0xf0] }
 0x111   :  { %2801 = vmatmul.bf16.gmra.mxu1 %v3496_v19  ;;  %2850 = vmatmul.bf16.gmra.mxu2 %v3500_v51  ;;  %1482 = vst [vmem:[#allocation2 + $0x23c] sm:$0xf] %v1450_v62  ;;  %v5362_v1 = vadd.f32 %v2750_v12, %v2702_v3  ;;  %v3571_v49 = vld [vmem:[#allocation2 + $0x210] sm:$0xf]  ;;  %v3568_v3 = vor.u32 %v3934_v48, %v3565_v11 }
 0x112   :  { %v3939_v19 = vld [vmem:[#allocation2 + $0x230] sm:$0xf0] }
 0x113   :  { %2899 = vmatmul.bf16.gmra.mxu3 %v3504_v28  ;;  %2948 = vmatmul.bf16.gmra.mxu0 %v3508_v59  ;;  %v3935_v51 = vld [vmem:[#allocation2 + $0x214] sm:$0xf] }
 0x114   :  { %v2655_v38 = vpop.f32.mrf.mxu2 }
 0x115   :  { %v2656_v13 = vadd.f32 %v2655_v38, %v2607_v40 }
 0x116   :  { %v2704_v58 = vpop.f32.mrf.mxu3  ;;  %v3579_v28 = vld [vmem:[#allocation2 + $0x218] sm:$0xf] }
 0x117   :  { %v2608_v57 = vpop.f32.mrf.mxu1  ;;  %v2705_v10 = vadd.f32 %v2704_v58, %v2656_v13  ;;  %v3573_v52 = vld [vmem:[#allocation2 + $0x234] sm:$0xf0] }
 0x118   :  { %v2755_v63 = vpop.f32.mrf.mxu0  ;;  %v2609_v12 = vadd.f32 %v2608_v57, %v5023_v46  ;;  %v3940_v59 = vld [vmem:[#allocation2 + $0x238] sm:$0xf0]  ;;  %v3576_v40 = vor.u32 %v3935_v51, %v3573_v52 }
 0x119   :  { %v5365_v16 = vadd.f32 %v2753_v4, %v2705_v10  ;;  %v3572_v4 = vor.u32 %v3939_v19, %v3571_v49  ;;  %v3580_v38 = vor.u32 %v3940_v59, %v3579_v28 }
 0x11c   :  { %v2657_v21 = vpop.f32.mrf.mxu2 }
 0x11d   :  { %v2658_v2 = vadd.f32 %v2657_v21, %v2609_v12 }
 0x11e   :  { %v2706_v24 = vpop.f32.mrf.mxu3 }
 0x11f   :  { %v2611_v30 = vpop.f32.mrf.mxu1  ;;  %v2707_v35 = vadd.f32 %v2706_v24, %v2658_v2 }
 0x120   :  { %v2758_v23 = vpop.f32.mrf.mxu0  ;;  %v2612_v46 = vadd.f32 %v2611_v30, %v4907_v53 }
 0x121   :  { %2806 = vmatmul.bf16.gmra.mxu1 %v3532_v25  ;;  %2855 = vmatmul.bf16.gmra.mxu2 %v3536_v27  ;;  %v5368_v37 = vadd.f32 %v2755_v63, %v2707_v35 }
 0x123   :  { %2904 = vmatmul.bf16.gmra.mxu3 %v3540_v26  ;;  %2953 = vmatmul.bf16.gmra.mxu0 %v3544_v15 }
 0x124   :  { %v2660_v39 = vpop.f32.mrf.mxu2 }
 0x125   :  { %v2661_v42 = vadd.f32 %v2660_v39, %v2612_v46 }
 0x126   :  { %v2709_v29 = vpop.f32.mrf.mxu3 }
 0x127   :  { %v2613_v43 = vpop.f32.mrf.mxu1  ;;  %v2710_v45 = vadd.f32 %v2709_v29, %v2661_v42 }
 0x128   :  { %v2760_v36 = vpop.f32.mrf.mxu0  ;;  %v2614_v44 = vadd.f32 %v2613_v43, %v4949_v33 }
 0x129   :  { %v5371_v50 = vadd.f32 %v2758_v23, %v2710_v45  ;;  %v5386_v23 = vld [vmem:[%s5424_s2] ss:$0 sm:$0xff]  ;;  %s4067_s2 = smov [#allocation4]  }
 0x12a   :  { %s3071_s8 = sshll.u32 %s4067_s2, 4  ;;  %s3072_s8 = int_to_ptr.vmem [resolvable:$true] %s3071_s8 }
 0x12c   :  { %v2662_v61 = vpop.f32.mrf.mxu2 }
 0x12d   :  { %v2663_v53 = vadd.f32 %v2662_v61, %v2614_v44 }
 0x12e   :  { %v2711_v62 = vpop.f32.mrf.mxu3 }
 0x12f   :  { %v2616_v5 = vpop.f32.mrf.mxu1  ;;  %v2712_v13 = vadd.f32 %v2711_v62, %v2663_v53 }
 0x130   :  { %v2763_v58 = vpop.f32.mrf.mxu0  ;;  %v2617_v33 = vadd.f32 %v2616_v5, %v4986_v6 }
 0x131   :  { %2811 = vmatmul.bf16.gmra.mxu1 %v3568_v3  ;;  %2860 = vmatmul.bf16.gmra.mxu2 %v3572_v4  ;;  %v5374_v57 = vadd.f32 %v2760_v36, %v2712_v13 }
 0x133   :  { %2909 = vmatmul.bf16.gmra.mxu3 %v3576_v40  ;;  %2958 = vmatmul.bf16.gmra.mxu0 %v3580_v38 }
 0x134   :  { %v2665_v10 = vpop.f32.mrf.mxu2 }
 0x135   :  { %v2666_v63 = vadd.f32 %v2665_v10, %v2617_v33 }
 0x136   :  { %v2714_v14 = vpop.f32.mrf.mxu3 }
 0x137   :  { %v2618_v60 = vpop.f32.mrf.mxu1  ;;  %v2715_v17 = vadd.f32 %v2714_v14, %v2666_v63 }
 0x138   :  { %v2765_v0 = vpop.f32.mrf.mxu0  ;;  %v2619_v12 = vadd.f32 %v2618_v60, %v5033_v54 }
 0x139   :  { %v5377_v8 = vadd.f32 %v2763_v58, %v2715_v17 }
 0x13c   :  { %v2667_v18 = vpop.f32.mrf.mxu2 }
 0x13d   :  { %v2668_v32 = vadd.f32 %v2667_v18, %v2619_v12 }
 0x13e   :  { %v2716_v20 = vpop.f32.mrf.mxu3 }
 0x13f   :  { %v2777_v21 = vpop.f32.mrf.mxu1  ;;  %v2717_v2 = vadd.f32 %v2716_v20, %v2668_v32 }
 0x140   :  { %v2924_v24 = vpop.f32.mrf.mxu0  ;;  %v2778_v6 = vadd.f32 %v2777_v21, %v5078_v9 }
 0x141   :  { %v5380_v25 = vadd.f32 %v2765_v0, %v2717_v2 }
 0x144   :  { %v2826_v27 = vpop.f32.mrf.mxu2 }
 0x145   :  { %v2827_v30 = vadd.f32 %v2826_v27, %v2778_v6 }
 0x146   :  { %v2875_v26 = vpop.f32.mrf.mxu3 }
 0x147   :  { %v2779_v15 = vpop.f32.mrf.mxu1  ;;  %v2876_v35 = vadd.f32 %v2875_v26, %v2827_v30 }
 0x148   :  { %v2926_v54 = vpop.f32.mrf.mxu0  ;;  %v2780_v42 = vadd.f32 %v2779_v15, %v5109_v56 }
 0x149   :  { %v2925_v46 = vadd.f32 %v2924_v24, %v2876_v35 }
 0x14b   :  { %v3019_v39 = vadd.f32 %v5386_v23, %v2925_v46 }
 0x14c   :  { %v2828_v29 = vpop.f32.mrf.mxu2 }
 0x14d   :  { %v3035_v43 = vmax.f32 %v3019_v39, 0.0  ;;  %v2829_v45 = vadd.f32 %v2828_v29, %v2780_v42 }
 0x14e   :  { %v2877_v9 = vpop.f32.mrf.mxu3 }
 0x14f   :  { %v2782_v36 = vpop.f32.mrf.mxu1  ;;  %3051 = vst [vmem:[#allocation4] sm:$0xff] %v3035_v43  ;;  %v2878_v48 = vadd.f32 %v2877_v9, %v2829_v45 }
 0x150   :  { %v2929_v11 = vpop.f32.mrf.mxu0  ;;  %v2783_v51 = vadd.f32 %v2782_v36, %v5154_v47 }
 0x151   :  { %v2927_v49 = vadd.f32 %v2926_v54, %v2878_v48 }
 0x153   :  { %v3020_v19 = vadd.f32 %v5386_v23, %v2927_v49 }
 0x154   :  { %v2831_v44 = vpop.f32.mrf.mxu2 }
 0x155   :  { %v3036_v52 = vmax.f32 %v3020_v19, 0.0  ;;  %v2832_v28 = vadd.f32 %v2831_v44, %v2783_v51 }
 0x156   :  { %v2880_v59 = vpop.f32.mrf.mxu3 }
 0x157   :  { %v2784_v61 = vpop.f32.mrf.mxu1  ;;  %3052 = vst [vmem:[#allocation4 + $0x8] sm:$0xff] %v3036_v52  ;;  %v2881_v56 = vadd.f32 %v2880_v59, %v2832_v28 }
 0x158   :  { %v2931_v53 = vpop.f32.mrf.mxu0  ;;  %v2785_v4 = vadd.f32 %v2784_v61, %v5171_v31 }
 0x159   :  { %v2930_v62 = vadd.f32 %v2929_v11, %v2881_v56 }
 0x15b   :  { %v3021_v3 = vadd.f32 %v5386_v23, %v2930_v62 }
 0x15c   :  { %v2833_v5 = vpop.f32.mrf.mxu2 }
 0x15d   :  { %v3037_v40 = vmax.f32 %v3021_v3, 0.0  ;;  %v2834_v38 = vadd.f32 %v2833_v5, %v2785_v4 }
 0x15e   :  { %v2882_v13 = vpop.f32.mrf.mxu3 }
 0x15f   :  { %v2787_v58 = vpop.f32.mrf.mxu1  ;;  %3053 = vst [vmem:[#allocation4 + $0x10] sm:$0xff] %v3037_v40  ;;  %v2883_v47 = vadd.f32 %v2882_v13, %v2834_v38 }
 0x160   :  { %v2934_v33 = vpop.f32.mrf.mxu0  ;;  %v2788_v14 = vadd.f32 %v2787_v58, %v5219_v22 }
 0x161   :  { %v2932_v10 = vadd.f32 %v2931_v53, %v2883_v47 }
 0x163   :  { %v3022_v63 = vadd.f32 %v5386_v23, %v2932_v10 }
 0x164   :  { %v2836_v60 = vpop.f32.mrf.mxu2 }
 0x165   :  { %v3038_v17 = vmax.f32 %v3022_v63, 0.0  ;;  %v2837_v0 = vadd.f32 %v2836_v60, %v2788_v14 }
 0x166   :  { %v2885_v12 = vpop.f32.mrf.mxu3 }
 0x167   :  { %v2789_v18 = vpop.f32.mrf.mxu1  ;;  %3054 = vst [vmem:[#allocation4 + $0x18] sm:$0xff] %v3038_v17  ;;  %v2886_v31 = vadd.f32 %v2885_v12, %v2837_v0 }
 0x168   :  { %v2936_v32 = vpop.f32.mrf.mxu0  ;;  %v2790_v2 = vadd.f32 %v2789_v18, %v5241_v7 }
 0x169   :  { %v2935_v20 = vadd.f32 %v2934_v33, %v2886_v31 }
 0x16b   :  { %v3023_v21 = vadd.f32 %v5386_v23, %v2935_v20 }
 0x16c   :  { %v2838_v24 = vpop.f32.mrf.mxu2 }
 0x16d   :  { %v3039_v6 = vmax.f32 %v3023_v21, 0.0  ;;  %v2839_v27 = vadd.f32 %v2838_v24, %v2790_v2 }
 0x16e   :  { %v2887_v30 = vpop.f32.mrf.mxu3 }
 0x16f   :  { %v2792_v26 = vpop.f32.mrf.mxu1  ;;  %3055 = vst [vmem:[#allocation4 + $0x20] sm:$0xff] %v3039_v6  ;;  %v2888_v22 = vadd.f32 %v2887_v30, %v2839_v27 }
 0x170   :  { %v2939_v15 = vpop.f32.mrf.mxu0  ;;  %v2793_v46 = vadd.f32 %v2792_v26, %v5288_v55 }
 0x171   :  { %v2937_v35 = vadd.f32 %v2936_v32, %v2888_v22 }
 0x173   :  { %v3024_v54 = vadd.f32 %v5386_v23, %v2937_v35 }
 0x174   :  { %v2841_v39 = vpop.f32.mrf.mxu2 }
 0x175   :  { %v3040_v42 = vmax.f32 %v3024_v54, 0.0  ;;  %v2842_v29 = vadd.f32 %v2841_v39, %v2793_v46 }
 0x176   :  { %v2890_v43 = vpop.f32.mrf.mxu3 }
 0x177   :  { %v2794_v45 = vpop.f32.mrf.mxu1  ;;  %3056 = vst [vmem:[#allocation4 + $0x28] sm:$0xff] %v3040_v42  ;;  %v2891_v7 = vadd.f32 %v2890_v43, %v2842_v29 }
 0x178   :  { %v2941_v9 = vpop.f32.mrf.mxu0  ;;  %v2795_v11 = vadd.f32 %v2794_v45, %v5309_v41 }
 0x179   :  { %v2940_v36 = vadd.f32 %v2939_v15, %v2891_v7 }
 0x17b   :  { %v3025_v48 = vadd.f32 %v5386_v23, %v2940_v36 }
 0x17c   :  { %v2843_v49 = vpop.f32.mrf.mxu2 }
 0x17d   :  { %v3041_v19 = vmax.f32 %v3025_v48, 0.0  ;;  %v2844_v51 = vadd.f32 %v2843_v49, %v2795_v11 }
 0x17e   :  { %v2892_v44 = vpop.f32.mrf.mxu3 }
 0x17f   :  { %v2797_v52 = vpop.f32.mrf.mxu1  ;;  %3057 = vst [vmem:[#allocation4 + $0x30] sm:$0xff] %v3041_v19  ;;  %v2893_v55 = vadd.f32 %v2892_v44, %v2844_v51 }
 0x180   :  { %v2944_v28 = vpop.f32.mrf.mxu0  ;;  %v2798_v56 = vadd.f32 %v2797_v52, %v5342_v34 }
 0x181   :  { %v2942_v59 = vadd.f32 %v2941_v9, %v2893_v55 }
 0x183   :  { %v3026_v61 = vadd.f32 %v5386_v23, %v2942_v59 }
 0x184   :  { %v2846_v53 = vpop.f32.mrf.mxu2 }
 0x185   :  { %v3042_v62 = vmax.f32 %v3026_v61, 0.0  ;;  %v2847_v3 = vadd.f32 %v2846_v53, %v2798_v56 }
 0x186   :  { %v2895_v4 = vpop.f32.mrf.mxu3 }
 0x187   :  { %v2799_v5 = vpop.f32.mrf.mxu1  ;;  %3058 = vst [vmem:[#allocation4 + $0x38] sm:$0xff] %v3042_v62  ;;  %v2896_v41 = vadd.f32 %v2895_v4, %v2847_v3 }
 0x188   :  { %v2946_v40 = vpop.f32.mrf.mxu0  ;;  %v2800_v58 = vadd.f32 %v2799_v5, %v5362_v1 }
 0x189   :  { %v2945_v38 = vadd.f32 %v2944_v28, %v2896_v41 }
 0x18b   :  { %v3027_v13 = vadd.f32 %v5386_v23, %v2945_v38 }
 0x18c   :  { %v2848_v47 = vpop.f32.mrf.mxu2 }
 0x18d   :  { %v3043_v33 = vmax.f32 %v3027_v13, 0.0  ;;  %v2849_v10 = vadd.f32 %v2848_v47, %v2800_v58 }
 0x18e   :  { %v2897_v63 = vpop.f32.mrf.mxu3 }
 0x18f   :  { %v2802_v14 = vpop.f32.mrf.mxu1  ;;  %3059 = vst [vmem:[#allocation4 + $0x40] sm:$0xff] %v3043_v33  ;;  %v2898_v34 = vadd.f32 %v2897_v63, %v2849_v10 }
 0x190   :  { %v2949_v60 = vpop.f32.mrf.mxu0  ;;  %v2803_v12 = vadd.f32 %v2802_v14, %v5365_v16 }
 0x191   :  { %v2947_v17 = vadd.f32 %v2946_v40, %v2898_v34 }
 0x193   :  { %v3028_v0 = vadd.f32 %v5386_v23, %v2947_v17 }
 0x194   :  { %v2851_v18 = vpop.f32.mrf.mxu2 }
 0x195   :  { %v3044_v31 = vmax.f32 %v3028_v0, 0.0  ;;  %v2852_v32 = vadd.f32 %v2851_v18, %v2803_v12 }
 0x196   :  { %v2900_v20 = vpop.f32.mrf.mxu3 }
 0x197   :  { %v2804_v21 = vpop.f32.mrf.mxu1  ;;  %3060 = vst [vmem:[#allocation4 + $0x48] sm:$0xff] %v3044_v31  ;;  %v2901_v1 = vadd.f32 %v2900_v20, %v2852_v32 }
 0x198   :  { %v2951_v2 = vpop.f32.mrf.mxu0  ;;  %v2805_v27 = vadd.f32 %v2804_v21, %v5368_v37 }
 0x199   :  { %v2950_v24 = vadd.f32 %v2949_v60, %v2901_v1 }
 0x19b   :  { %v3029_v6 = vadd.f32 %v5386_v23, %v2950_v24 }
 0x19c   :  { %v2853_v30 = vpop.f32.mrf.mxu2 }
 0x19d   :  { %v3045_v26 = vmax.f32 %v3029_v6, 0.0  ;;  %v2854_v22 = vadd.f32 %v2853_v30, %v2805_v27 }
 0x19e   :  { %v2902_v15 = vpop.f32.mrf.mxu3 }
 0x19f   :  { %v2807_v35 = vpop.f32.mrf.mxu1  ;;  %3061 = vst [vmem:[#allocation4 + $0x50] sm:$0xff] %v3045_v26  ;;  %v2903_v16 = vadd.f32 %v2902_v15, %v2854_v22 }
 0x1a0   :  { %v2954_v46 = vpop.f32.mrf.mxu0  ;;  %v2808_v42 = vadd.f32 %v2807_v35, %v5371_v50 }
 0x1a1   :  { %v2952_v54 = vadd.f32 %v2951_v2, %v2903_v16 }
 0x1a3   :  { %v3030_v39 = vadd.f32 %v5386_v23, %v2952_v54 }
 0x1a4   :  { %v2856_v29 = vpop.f32.mrf.mxu2 }
 0x1a5   :  { %v3046_v43 = vmax.f32 %v3030_v39, 0.0  ;;  %v2857_v45 = vadd.f32 %v2856_v29, %v2808_v42 }
 0x1a6   :  { %v2905_v7 = vpop.f32.mrf.mxu3 }
 0x1a7   :  { %v2809_v9 = vpop.f32.mrf.mxu1  ;;  %3062 = vst [vmem:[#allocation4 + $0x58] sm:$0xff] %v3046_v43  ;;  %v2906_v37 = vadd.f32 %v2905_v7, %v2857_v45 }
 0x1a8   :  { %v2810_v11 = vadd.f32 %v2809_v9, %v5374_v57  ;;  %v2956_v49 = vpop.f32.mrf.mxu0 }
 0x1a9   :  { %v2955_v36 = vadd.f32 %v2954_v46, %v2906_v37 }
 0x1ab   :  { %v3031_v48 = vadd.f32 %v5386_v23, %v2955_v36 }
 0x1ac   :  { %v2858_v19 = vpop.f32.mrf.mxu2 }
 0x1ad   :  { %v3047_v51 = vmax.f32 %v3031_v48, 0.0  ;;  %v2859_v44 = vadd.f32 %v2858_v19, %v2810_v11 }
 0x1ae   :  { %v2907_v52 = vpop.f32.mrf.mxu3 }
 0x1af   :  { %v2812_v55 = vpop.f32.mrf.mxu1  ;;  %3063 = vst [vmem:[#allocation4 + $0x60] sm:$0xff] %v3047_v51  ;;  %v2908_v50 = vadd.f32 %v2907_v52, %v2859_v44 }
 0x1b0   :  { %v2813_v61 = vadd.f32 %v2812_v55, %v5377_v8  ;;  %v2959_v4 = vpop.f32.mrf.mxu0 }
 0x1b1   :  { %v2957_v28 = vadd.f32 %v2956_v49, %v2908_v50 }
 0x1b3   :  { %v3032_v59 = vadd.f32 %v5386_v23, %v2957_v28 }
 0x1b4   :  { %v2861_v56 = vpop.f32.mrf.mxu2 }
 0x1b5   :  { %v3048_v53 = vmax.f32 %v3032_v59, 0.0  ;;  %v2862_v62 = vadd.f32 %v2861_v56, %v2813_v61 }
 0x1b6   :  { %v2910_v3 = vpop.f32.mrf.mxu3 }
 0x1b7   :  { %3064 = vst [vmem:[#allocation4 + $0x68] sm:$0xff] %v3048_v53  ;;  %v2911_v57 = vadd.f32 %v2910_v3, %v2862_v62  ;;  %v2814_v5 = vpop.f32.mrf.mxu1 }
 0x1b8   :  { %v2815_v38 = vadd.f32 %v2814_v5, %v5380_v25  ;;  %v2961_v8 = vpop.f32.mrf.mxu0 }
 0x1b9   :  { %v2960_v41 = vadd.f32 %v2959_v4, %v2911_v57 }
 0x1bb   :  { %v3033_v40 = vadd.f32 %v5386_v23, %v2960_v41 }
 0x1bc   :  { %v2863_v13 = vpop.f32.mrf.mxu2 }
 0x1bd   :  { %v3049_v58 = vmax.f32 %v3033_v40, 0.0  ;;  %v2864_v47 = vadd.f32 %v2863_v13, %v2815_v38 }
 0x1be   :  { %v2912_v33 = vpop.f32.mrf.mxu3 }
 0x1bf   :  { %3065 = vst [vmem:[#allocation4 + $0x70] sm:$0xff] %v3049_v58  ;;  %v2913_v10 = vadd.f32 %v2912_v33, %v2864_v47 }
 0x1c1   :  { %v2962_v63 = vadd.f32 %v2961_v8, %v2913_v10 }
 0x1c3   :  { %v3034_v14 = vadd.f32 %v5386_v23, %v2962_v63 }
 0x1c5   :  { %v3050_v34 = vmax.f32 %v3034_v14, 0.0 }
 0x1c7   :  { %3066 = vst [vmem:[#allocation4 + $0x78] sm:$0xff] %v3050_v34 }
 0x1c8   :  { %3079 = dma.vmem_to_hbm [thread:$0]  %s3072_s8, 2048, %s3074_s1, [#allocation5], %s4068_s11, %s4068_s11, %s4069_s12  }
 0x1c9   :  { %4065 = dma.done.wait [#allocation5], 2048  }
 0x1ca   :  { %4066 = vsyncadd [#allocation5], 4294965248 }
 0x1cb   :  { %3084 = vsyncpa [#allocation5], 1 }

</bundles_post_ra>
